<compile_context>
chip_gen: v7x
topology: tpu7x:2x2x1
jax: 0.10.0
libtpu: 0.0.40
codegen_flags: <defaults>
</compile_context>

<pallas_src>
import functools

import numpy as np
import jax
import jax.numpy as jnp
from jax.experimental import pallas as pl
from jax.experimental.pallas import tpu as pltpu

BN_EPS = 1e-3  # matches nn.BatchNorm2d(eps=0.001)


# ---------------------------------------------------------------------------
# Kernel
# ---------------------------------------------------------------------------
def _block_a_kernel(M, W, act_scale,
                    x_ref, mask_ref,
                    w1_ref, t1_ref,
                    w2_ref, t2_ref,
                    w3_ref, t3_ref,
                    w4_ref, t4_ref,
                    w5_ref, t5_ref,
                    w6_ref, t6_ref,
                    w7a_ref, w7b_ref, w7c_ref, b7_ref,
                    o_ref):
    # x: (M, 256) f32, M = B_tile * H * W (row-major spatial, images stacked).
    x = x_ref[...]
    x_bf = x.astype(jnp.bfloat16)

    def cbr_1x1(inp_bf, w_ref, t_ref):
        # 1x1 conv == channel matmul (bf16 MXU, f32 acc), folded BN + ReLU.
        y = jnp.dot(inp_bf, w_ref[...], preferred_element_type=jnp.float32)
        return jnp.maximum(y + t_ref[...], 0.0)

    def cbr_3x3(inp_f32, w_ref, t_ref):
        # 3x3 conv, padding=1: 9 taps.  Each tap = sublane roll of the
        # flattened spatial axis + border mask, then a (M,32)@(32,32) matmul.
        acc = jnp.zeros((M, 32), dtype=jnp.float32)
        for kh in range(3):
            for kw in range(3):
                t = kh * 3 + kw
                s = (kh - 1) * W + (kw - 1)   # source row offset
                if s == 0:
                    shifted = inp_f32
                else:
                    # out[r] = inp[r + s]  (wrapped rows are masked to 0)
                    shifted = pltpu.roll(inp_f32, shift=(-s) % M, axis=0)
                tap = (mask_ref[t] * shifted).astype(jnp.bfloat16)
                acc = acc + jnp.dot(tap, w_ref[t],
                                    preferred_element_type=jnp.float32)
        return jnp.maximum(acc + t_ref[...], 0.0)

    # branch 1: conv1 (1x1)
    bx = cbr_1x1(x_bf, w1_ref, t1_ref)
    # branch 2: conv2 (1x1) -> conv3 (3x3)
    by = cbr_1x1(x_bf, w2_ref, t2_ref)
    by = cbr_3x3(by, w3_ref, t3_ref)
    # branch 3: conv4 (1x1) -> conv5 (3x3) -> conv6 (3x3)
    bz = cbr_1x1(x_bf, w4_ref, t4_ref)
    bz = cbr_3x3(bz, w5_ref, t5_ref)
    bz = cbr_3x3(bz, w6_ref, t6_ref)

    # conv7: 1x1, 96 -> 256 with bias.  Concat([bx,by,bz]) @ W7 computed as
    # three 32->256 matmuls summed (mathematically identical to the concat).
    w = (jnp.dot(bx.astype(jnp.bfloat16), w7a_ref[...],
                 preferred_element_type=jnp.float32)
         + jnp.dot(by.astype(jnp.bfloat16), w7b_ref[...],
                   preferred_element_type=jnp.float32)
         + jnp.dot(bz.astype(jnp.bfloat16), w7c_ref[...],
                   preferred_element_type=jnp.float32)
         + b7_ref[...])

    # residual + scale + final ReLU, all in f32.
    o_ref[...] = jnp.maximum(x + act_scale * w, 0.0)


# ---------------------------------------------------------------------------
# Parameter construction / folding (glue, plain JAX)
# ---------------------------------------------------------------------------
def init_torch_params(key):
    """Deterministic parameters in PyTorch layouts (OIHW conv weights)."""
    ks = iter(jax.random.split(key, 64))

    def convw(out_c, in_c, k):
        return 0.05 * jax.random.normal(next(ks), (out_c, in_c, k, k),
                                        jnp.float32)

    def bnp(c):
        g = 1.0 + 0.1 * jax.random.normal(next(ks), (c,), jnp.float32)
        b = 0.1 * jax.random.normal(next(ks), (c,), jnp.float32)
        m = 0.1 * jax.random.normal(next(ks), (c,), jnp.float32)
        v = jax.random.uniform(next(ks), (c,), jnp.float32,
                               minval=0.5, maxval=1.5)
        return (g, b, m, v)

    p = {}
    p['w1'], p['bn1'] = convw(32, 256, 1), bnp(32)
    p['w2'], p['bn2'] = convw(32, 256, 1), bnp(32)
    p['w3'], p['bn3'] = convw(32, 32, 3), bnp(32)
    p['w4'], p['bn4'] = convw(32, 256, 1), bnp(32)
    p['w5'], p['bn5'] = convw(32, 32, 3), bnp(32)
    p['w6'], p['bn6'] = convw(32, 32, 3), bnp(32)
    p['w7'] = convw(256, 96, 1)
    p['b7'] = 0.1 * jax.random.normal(next(ks), (256,), jnp.float32)
    return p


def _fold_bn(bn):
    g, b, m, v = bn
    s = g / jnp.sqrt(v + BN_EPS)
    t = b - m * s
    return s, t


def _kernel_params(p):
    """Torch layouts -> kernel layouts, BN scale folded into weights, bf16."""
    kp = {}
    for i in (1, 2, 4):  # 1x1 convs: (O, I, 1, 1) -> (I, O), scale folded
        w = p[f'w{i}'][:, :, 0, 0]                       # (32, 256)
        s, t = _fold_bn(p[f'bn{i}'])
        kp[f'w{i}'] = (jnp.transpose(w, (1, 0)) * s[None, :]).astype(jnp.bfloat16)
        kp[f't{i}'] = t.reshape(1, -1).astype(jnp.float32)
    for i in (3, 5, 6):  # 3x3 convs: (O, I, 3, 3) -> (9, I, O), scale folded
        w = p[f'w{i}']
        s, t = _fold_bn(p[f'bn{i}'])
        w = jnp.transpose(w, (2, 3, 1, 0)) * s[None, None, None, :]  # (3,3,I,O)
        kp[f'w{i}'] = w.reshape(9, w.shape[2], w.shape[3]).astype(jnp.bfloat16)
        kp[f't{i}'] = t.reshape(1, -1).astype(jnp.float32)
    w7 = jnp.transpose(p['w7'][:, :, 0, 0], (1, 0))      # (96, 256)
    kp['w7a'] = w7[0:32].astype(jnp.bfloat16)
    kp['w7b'] = w7[32:64].astype(jnp.bfloat16)
    kp['w7c'] = w7[64:96].astype(jnp.bfloat16)
    kp['b7'] = p['b7'].reshape(1, -1).astype(jnp.float32)
    return kp


def _make_tap_masks(H, W, B_tile):
    """(9, B_tile*H*W, 1) f32 border masks for the 9 taps of a 3x3/pad-1 conv."""
    HW = H * W
    m = np.zeros((9, HW, 1), np.float32)
    for kh in range(3):
        for kw in range(3):
            t = kh * 3 + kw
            dh, dw = kh - 1, kw - 1
            for i in range(H):
                for j in range(W):
                    if 0 <= i + dh < H and 0 <= j + dw < W:
                        m[t, i * W + j, 0] = 1.0
    m = np.tile(m, (1, B_tile, 1))   # periodic per image within the batch tile
    return jnp.asarray(m)


# ---------------------------------------------------------------------------
# Pallas wrapper
# ---------------------------------------------------------------------------
def block_a_pallas(x_nchw, params, activation_scale=1.0):
    N, C, H, W = x_nchw.shape
    assert C == 256, "BlockA expects 256 input channels"
    HW = H * W

    # Batch tile: largest divisor of N with M = B_tile*HW big enough to keep
    # the MXU rows busy, small enough for VMEM, and (8,128)-legal.
    B_tile = 1
    for bt in range(1, N + 1):
        if N % bt == 0 and bt * HW <= 4096 and ((bt * HW) % 8 == 0 or bt == N):
            B_tile = bt
    M = B_tile * HW

    # NCHW -> (N*H*W, C) row-major spatial, f32 (residual stays exact in f32).
    x = jnp.transpose(x_nchw, (0, 2, 3, 1)).reshape(N * HW, C).astype(jnp.float32)

    kp = _kernel_params(params)
    masks = _make_tap_masks(H, W, B_tile)

    ins = [x, masks,
           kp['w1'], kp['t1'], kp['w2'], kp['t2'],
           kp['w3'], kp['t3'], kp['w4'], kp['t4'],
           kp['w5'], kp['t5'], kp['w6'], kp['t6'],
           kp['w7a'], kp['w7b'], kp['w7c'], kp['b7']]

    def const_spec(a):
        nd = a.ndim
        return pl.BlockSpec(a.shape, lambda b, _nd=nd: (0,) * _nd)

    in_specs = [pl.BlockSpec((M, C), lambda b: (b, 0))]
    in_specs += [const_spec(a) for a in ins[1:]]

    out = pl.pallas_call(
        functools.partial(_block_a_kernel, M, W, float(activation_scale)),
        out_shape=jax.ShapeDtypeStruct((N * HW, C), jnp.float32),
        grid=(N // B_tile,),
        in_specs=in_specs,
        out_specs=pl.BlockSpec((M, C), lambda b: (b, 0)),
        compiler_params=pltpu.CompilerParams(
            dimension_semantics=("parallel",)),
    )(*ins)

    # (N*H*W, C) -> NCHW
    return jnp.transpose(out.reshape(N, H, W, C), (0, 3, 1, 2))


# ---------------------------------------------------------------------------
# Pure-JAX reference (eval-mode BN), for verification
# ---------------------------------------------------------------------------
def block_a_reference(x_nchw, p, activation_scale=1.0):
    x = jnp.transpose(x_nchw, (0, 2, 3, 1))  # NHWC

    def conv(x, w_oihw, pad):
        w_hwio = jnp.transpose(w_oihw, (2, 3, 1, 0))
        return jax.lax.conv_general_dilated(
            x, w_hwio, window_strides=(1, 1),
            padding=[(pad, pad), (pad, pad)],
            dimension_numbers=('NHWC', 'HWIO', 'NHWC'),
            precision=jax.lax.Precision.HIGHEST)

    def cbr(x, w, bn, pad):
        g, b, m, v = bn
        y = conv(x, w, pad)
        y = (y - m) * (g / jnp.sqrt(v + BN_EPS)) + b
        return jnp.maximum(y, 0.0)

    bx = cbr(x, p['w1'], p['bn1'], 0)
    by = cbr(x, p['w2'], p['bn2'], 0)
    by = cbr(by, p['w3'], p['bn3'], 1)
    bz = cbr(x, p['w4'], p['bn4'], 0)
    bz = cbr(bz, p['w5'], p['bn5'], 1)
    bz = cbr(bz, p['w6'], p['bn6'], 1)
    w = jnp.concatenate([bx, by, bz], axis=-1)
    w = conv(w, p['w7'], 0) + p['b7']
    ret = jnp.maximum(x + activation_scale * w, 0.0)
    return jnp.transpose(ret, (0, 3, 1, 2))


# ---------------------------------------------------------------------------
if __name__ == "__main__":
    key = jax.random.PRNGKey(0)
    kx, kparam = jax.random.split(key)

    N, C, H, W = 2, 256, 8, 8          # small shapes; C=256 fixed by module
    x = jax.random.normal(kx, (N, C, H, W), jnp.float32)
    params = init_torch_params(kparam)

    out = block_a_pallas(x, params, activation_scale=1.0)
    out = jax.block_until_ready(out)
    assert out.shape == (N, C, H, W)

    ref = jax.block_until_ready(block_a_reference(x, params, 1.0))
    if not np.allclose(np.asarray(out), np.asarray(ref),
                       atol=1e-2, rtol=1e-2):
        max_err = float(jnp.max(jnp.abs(out - ref)))
        raise AssertionError(f"mismatch vs reference, max abs err={max_err}")

    print("KERNEL_OK")
</pallas_src>

<mosaic_0001>
module attributes {stable_mosaic.version = 11 : i64} {
  func.func @_block_a_kernel(%arg0: i32, %arg1: memref<128x256xf32, #tpu.memory_space<vmem>>, %arg2: memref<9x128x1xf32, #tpu.memory_space<vmem>>, %arg3: memref<256x32xbf16, #tpu.memory_space<vmem>>, %arg4: memref<1x32xf32, #tpu.memory_space<vmem>>, %arg5: memref<256x32xbf16, #tpu.memory_space<vmem>>, %arg6: memref<1x32xf32, #tpu.memory_space<vmem>>, %arg7: memref<9x32x32xbf16, #tpu.memory_space<vmem>>, %arg8: memref<1x32xf32, #tpu.memory_space<vmem>>, %arg9: memref<256x32xbf16, #tpu.memory_space<vmem>>, %arg10: memref<1x32xf32, #tpu.memory_space<vmem>>, %arg11: memref<9x32x32xbf16, #tpu.memory_space<vmem>>, %arg12: memref<1x32xf32, #tpu.memory_space<vmem>>, %arg13: memref<9x32x32xbf16, #tpu.memory_space<vmem>>, %arg14: memref<1x32xf32, #tpu.memory_space<vmem>>, %arg15: memref<32x256xbf16, #tpu.memory_space<vmem>>, %arg16: memref<32x256xbf16, #tpu.memory_space<vmem>>, %arg17: memref<32x256xbf16, #tpu.memory_space<vmem>>, %arg18: memref<1x256xf32, #tpu.memory_space<vmem>>, %arg19: memref<128x256xf32, #tpu.memory_space<vmem>>) attributes {dimension_semantics = [#tpu.dimension_semantics<parallel>], iteration_bounds = array<i64: 1>, scalar_prefetch = 0 : i64, scratch_operands = 0 : i64, tpu.core_type = #tpu.core_type<tc>, window_params = [{transform_indices = @transform_0, window_bounds = array<i64: 128, 256>}, {pipeline_mode = #tpu.pipeline_mode<synchronous>, transform_indices = @transform_1, window_bounds = array<i64: 9, 128, 1>}, {pipeline_mode = #tpu.pipeline_mode<synchronous>, transform_indices = @transform_2, window_bounds = array<i64: 256, 32>}, {pipeline_mode = #tpu.pipeline_mode<synchronous>, transform_indices = @transform_3, window_bounds = array<i64: 1, 32>}, {pipeline_mode = #tpu.pipeline_mode<synchronous>, transform_indices = @transform_4, window_bounds = array<i64: 256, 32>}, {pipeline_mode = #tpu.pipeline_mode<synchronous>, transform_indices = @transform_5, window_bounds = array<i64: 1, 32>}, {pipeline_mode = #tpu.pipeline_mode<synchronous>, transform_indices = @transform_6, window_bounds = array<i64: 9, 32, 32>}, {pipeline_mode = #tpu.pipeline_mode<synchronous>, transform_indices = @transform_7, window_bounds = array<i64: 1, 32>}, {pipeline_mode = #tpu.pipeline_mode<synchronous>, transform_indices = @transform_8, window_bounds = array<i64: 256, 32>}, {pipeline_mode = #tpu.pipeline_mode<synchronous>, transform_indices = @transform_9, window_bounds = array<i64: 1, 32>}, {pipeline_mode = #tpu.pipeline_mode<synchronous>, transform_indices = @transform_10, window_bounds = array<i64: 9, 32, 32>}, {pipeline_mode = #tpu.pipeline_mode<synchronous>, transform_indices = @transform_11, window_bounds = array<i64: 1, 32>}, {pipeline_mode = #tpu.pipeline_mode<synchronous>, transform_indices = @transform_12, window_bounds = array<i64: 9, 32, 32>}, {pipeline_mode = #tpu.pipeline_mode<synchronous>, transform_indices = @transform_13, window_bounds = array<i64: 1, 32>}, {pipeline_mode = #tpu.pipeline_mode<synchronous>, transform_indices = @transform_14, window_bounds = array<i64: 32, 256>}, {pipeline_mode = #tpu.pipeline_mode<synchronous>, transform_indices = @transform_15, window_bounds = array<i64: 32, 256>}, {pipeline_mode = #tpu.pipeline_mode<synchronous>, transform_indices = @transform_16, window_bounds = array<i64: 32, 256>}, {pipeline_mode = #tpu.pipeline_mode<synchronous>, transform_indices = @transform_17, window_bounds = array<i64: 1, 256>}, {transform_indices = @transform_18, window_bounds = array<i64: 128, 256>}]} {
    %c0 = arith.constant 0 : index
    %c0_0 = arith.constant 0 : index
    %0 = vector.load %arg1[%c0, %c0_0] : memref<128x256xf32, #tpu.memory_space<vmem>>, vector<128x256xf32>
    %1 = arith.truncf %0 : vector<128x256xf32> to vector<128x256xbf16>
    %c0_1 = arith.constant 0 : index
    %c0_2 = arith.constant 0 : index
    %2 = vector.load %arg3[%c0_1, %c0_2] : memref<256x32xbf16, #tpu.memory_space<vmem>>, vector<256x32xbf16>
    %cst = arith.constant dense<0.000000e+00> : vector<128x32xf32>
    %3 = tpu.matmul %1, %2, %cst {dimension_numbers = #tpu.dot_dimension_numbers<[1], [0], [0], [1], [0, 0, 1, 1], [], []>} : vector<128x256xbf16>, vector<256x32xbf16>, vector<128x32xf32> -> vector<128x32xf32>
    %c0_3 = arith.constant 0 : index
    %c0_4 = arith.constant 0 : index
    %4 = vector.load %arg4[%c0_3, %c0_4] : memref<1x32xf32, #tpu.memory_space<vmem>>, vector<1x32xf32>
    %5 = vector.broadcast %4 : vector<1x32xf32> to vector<128x32xf32>
    %6 = arith.addf %3, %5 : vector<128x32xf32>
    %cst_5 = arith.constant 0.000000e+00 : f32
    %7 = vector.broadcast %cst_5 : f32 to vector<128x32xf32>
    %8 = arith.maximumf %6, %7 : vector<128x32xf32>
    %c0_6 = arith.constant 0 : index
    %c0_7 = arith.constant 0 : index
    %9 = vector.load %arg5[%c0_6, %c0_7] : memref<256x32xbf16, #tpu.memory_space<vmem>>, vector<256x32xbf16>
    %cst_8 = arith.constant dense<0.000000e+00> : vector<128x32xf32>
    %10 = tpu.matmul %1, %9, %cst_8 {dimension_numbers = #tpu.dot_dimension_numbers<[1], [0], [0], [1], [0, 0, 1, 1], [], []>} : vector<128x256xbf16>, vector<256x32xbf16>, vector<128x32xf32> -> vector<128x32xf32>
    %c0_9 = arith.constant 0 : index
    %c0_10 = arith.constant 0 : index
    %11 = vector.load %arg6[%c0_9, %c0_10] : memref<1x32xf32, #tpu.memory_space<vmem>>, vector<1x32xf32>
    %12 = vector.broadcast %11 : vector<1x32xf32> to vector<128x32xf32>
    %13 = arith.addf %10, %12 : vector<128x32xf32>
    %cst_11 = arith.constant 0.000000e+00 : f32
    %14 = vector.broadcast %cst_11 : f32 to vector<128x32xf32>
    %15 = arith.maximumf %13, %14 : vector<128x32xf32>
    %cst_12 = arith.constant 0.000000e+00 : f32
    %16 = vector.broadcast %cst_12 : f32 to vector<128x32xf32>
    %c9_i32 = arith.constant 9 : i32
    %17 = tpu.dynamic_rotate %15 by %c9_i32 dim 0 : vector<128x32xf32>, i32 -> vector<128x32xf32>
    %c0_13 = arith.constant 0 : index
    %c0_14 = arith.constant 0 : index
    %c0_15 = arith.constant 0 : index
    %18 = vector.load %arg2[%c0_13, %c0_14, %c0_15] : memref<9x128x1xf32, #tpu.memory_space<vmem>>, vector<1x128x1xf32>
    %19 = vector.shape_cast %18 : vector<1x128x1xf32> to vector<128x1xf32>
    %20 = vector.broadcast %19 : vector<128x1xf32> to vector<128x32xf32>
    %21 = arith.mulf %20, %17 : vector<128x32xf32>
    %22 = arith.truncf %21 : vector<128x32xf32> to vector<128x32xbf16>
    %c0_16 = arith.constant 0 : index
    %c0_17 = arith.constant 0 : index
    %c0_18 = arith.constant 0 : index
    %23 = vector.load %arg7[%c0_16, %c0_17, %c0_18] : memref<9x32x32xbf16, #tpu.memory_space<vmem>>, vector<1x32x32xbf16>
    %24 = vector.shape_cast %23 : vector<1x32x32xbf16> to vector<32x32xbf16>
    %cst_19 = arith.constant dense<0.000000e+00> : vector<128x32xf32>
    %25 = tpu.matmul %22, %24, %cst_19 {dimension_numbers = #tpu.dot_dimension_numbers<[1], [0], [0], [1], [0, 0, 1, 1], [], []>} : vector<128x32xbf16>, vector<32x32xbf16>, vector<128x32xf32> -> vector<128x32xf32>
    %26 = arith.addf %16, %25 : vector<128x32xf32>
    %c8_i32 = arith.constant 8 : i32
    %27 = tpu.dynamic_rotate %15 by %c8_i32 dim 0 : vector<128x32xf32>, i32 -> vector<128x32xf32>
    %c1 = arith.constant 1 : index
    %c0_20 = arith.constant 0 : index
    %c0_21 = arith.constant 0 : index
    %28 = vector.load %arg2[%c1, %c0_20, %c0_21] : memref<9x128x1xf32, #tpu.memory_space<vmem>>, vector<1x128x1xf32>
    %29 = vector.shape_cast %28 : vector<1x128x1xf32> to vector<128x1xf32>
    %30 = vector.broadcast %29 : vector<128x1xf32> to vector<128x32xf32>
    %31 = arith.mulf %30, %27 : vector<128x32xf32>
    %32 = arith.truncf %31 : vector<128x32xf32> to vector<128x32xbf16>
    %c1_22 = arith.constant 1 : index
    %c0_23 = arith.constant 0 : index
    %c0_24 = arith.constant 0 : index
    %33 = vector.load %arg7[%c1_22, %c0_23, %c0_24] : memref<9x32x32xbf16, #tpu.memory_space<vmem>>, vector<1x32x32xbf16>
    %34 = vector.shape_cast %33 : vector<1x32x32xbf16> to vector<32x32xbf16>
    %cst_25 = arith.constant dense<0.000000e+00> : vector<128x32xf32>
    %35 = tpu.matmul %32, %34, %cst_25 {dimension_numbers = #tpu.dot_dimension_numbers<[1], [0], [0], [1], [0, 0, 1, 1], [], []>} : vector<128x32xbf16>, vector<32x32xbf16>, vector<128x32xf32> -> vector<128x32xf32>
    %36 = arith.addf %26, %35 : vector<128x32xf32>
    %c7_i32 = arith.constant 7 : i32
    %37 = tpu.dynamic_rotate %15 by %c7_i32 dim 0 : vector<128x32xf32>, i32 -> vector<128x32xf32>
    %c2 = arith.constant 2 : index
    %c0_26 = arith.constant 0 : index
    %c0_27 = arith.constant 0 : index
    %38 = vector.load %arg2[%c2, %c0_26, %c0_27] : memref<9x128x1xf32, #tpu.memory_space<vmem>>, vector<1x128x1xf32>
    %39 = vector.shape_cast %38 : vector<1x128x1xf32> to vector<128x1xf32>
    %40 = vector.broadcast %39 : vector<128x1xf32> to vector<128x32xf32>
    %41 = arith.mulf %40, %37 : vector<128x32xf32>
    %42 = arith.truncf %41 : vector<128x32xf32> to vector<128x32xbf16>
    %c2_28 = arith.constant 2 : index
    %c0_29 = arith.constant 0 : index
    %c0_30 = arith.constant 0 : index
    %43 = vector.load %arg7[%c2_28, %c0_29, %c0_30] : memref<9x32x32xbf16, #tpu.memory_space<vmem>>, vector<1x32x32xbf16>
    %44 = vector.shape_cast %43 : vector<1x32x32xbf16> to vector<32x32xbf16>
    %cst_31 = arith.constant dense<0.000000e+00> : vector<128x32xf32>
    %45 = tpu.matmul %42, %44, %cst_31 {dimension_numbers = #tpu.dot_dimension_numbers<[1], [0], [0], [1], [0, 0, 1, 1], [], []>} : vector<128x32xbf16>, vector<32x32xbf16>, vector<128x32xf32> -> vector<128x32xf32>
    %46 = arith.addf %36, %45 : vector<128x32xf32>
    %c1_i32 = arith.constant 1 : i32
    %47 = tpu.dynamic_rotate %15 by %c1_i32 dim 0 : vector<128x32xf32>, i32 -> vector<128x32xf32>
    %c3 = arith.constant 3 : index
    %c0_32 = arith.constant 0 : index
    %c0_33 = arith.constant 0 : index
    %48 = vector.load %arg2[%c3, %c0_32, %c0_33] : memref<9x128x1xf32, #tpu.memory_space<vmem>>, vector<1x128x1xf32>
    %49 = vector.shape_cast %48 : vector<1x128x1xf32> to vector<128x1xf32>
    %50 = vector.broadcast %49 : vector<128x1xf32> to vector<128x32xf32>
    %51 = arith.mulf %50, %47 : vector<128x32xf32>
    %52 = arith.truncf %51 : vector<128x32xf32> to vector<128x32xbf16>
    %c3_34 = arith.constant 3 : index
    %c0_35 = arith.constant 0 : index
    %c0_36 = arith.constant 0 : index
    %53 = vector.load %arg7[%c3_34, %c0_35, %c0_36] : memref<9x32x32xbf16, #tpu.memory_space<vmem>>, vector<1x32x32xbf16>
    %54 = vector.shape_cast %53 : vector<1x32x32xbf16> to vector<32x32xbf16>
    %cst_37 = arith.constant dense<0.000000e+00> : vector<128x32xf32>
    %55 = tpu.matmul %52, %54, %cst_37 {dimension_numbers = #tpu.dot_dimension_numbers<[1], [0], [0], [1], [0, 0, 1, 1], [], []>} : vector<128x32xbf16>, vector<32x32xbf16>, vector<128x32xf32> -> vector<128x32xf32>
    %56 = arith.addf %46, %55 : vector<128x32xf32>
    %c4 = arith.constant 4 : index
    %c0_38 = arith.constant 0 : index
    %c0_39 = arith.constant 0 : index
    %57 = vector.load %arg2[%c4, %c0_38, %c0_39] : memref<9x128x1xf32, #tpu.memory_space<vmem>>, vector<1x128x1xf32>
    %58 = vector.shape_cast %57 : vector<1x128x1xf32> to vector<128x1xf32>
    %59 = vector.broadcast %58 : vector<128x1xf32> to vector<128x32xf32>
    %60 = arith.mulf %59, %15 : vector<128x32xf32>
    %61 = arith.truncf %60 : vector<128x32xf32> to vector<128x32xbf16>
    %c4_40 = arith.constant 4 : index
    %c0_41 = arith.constant 0 : index
    %c0_42 = arith.constant 0 : index
    %62 = vector.load %arg7[%c4_40, %c0_41, %c0_42] : memref<9x32x32xbf16, #tpu.memory_space<vmem>>, vector<1x32x32xbf16>
    %63 = vector.shape_cast %62 : vector<1x32x32xbf16> to vector<32x32xbf16>
    %cst_43 = arith.constant dense<0.000000e+00> : vector<128x32xf32>
    %64 = tpu.matmul %61, %63, %cst_43 {dimension_numbers = #tpu.dot_dimension_numbers<[1], [0], [0], [1], [0, 0, 1, 1], [], []>} : vector<128x32xbf16>, vector<32x32xbf16>, vector<128x32xf32> -> vector<128x32xf32>
    %65 = arith.addf %56, %64 : vector<128x32xf32>
    %c127_i32 = arith.constant 127 : i32
    %66 = tpu.dynamic_rotate %15 by %c127_i32 dim 0 : vector<128x32xf32>, i32 -> vector<128x32xf32>
    %c5 = arith.constant 5 : index
    %c0_44 = arith.constant 0 : index
    %c0_45 = arith.constant 0 : index
    %67 = vector.load %arg2[%c5, %c0_44, %c0_45] : memref<9x128x1xf32, #tpu.memory_space<vmem>>, vector<1x128x1xf32>
    %68 = vector.shape_cast %67 : vector<1x128x1xf32> to vector<128x1xf32>
    %69 = vector.broadcast %68 : vector<128x1xf32> to vector<128x32xf32>
    %70 = arith.mulf %69, %66 : vector<128x32xf32>
    %71 = arith.truncf %70 : vector<128x32xf32> to vector<128x32xbf16>
    %c5_46 = arith.constant 5 : index
    %c0_47 = arith.constant 0 : index
    %c0_48 = arith.constant 0 : index
    %72 = vector.load %arg7[%c5_46, %c0_47, %c0_48] : memref<9x32x32xbf16, #tpu.memory_space<vmem>>, vector<1x32x32xbf16>
    %73 = vector.shape_cast %72 : vector<1x32x32xbf16> to vector<32x32xbf16>
    %cst_49 = arith.constant dense<0.000000e+00> : vector<128x32xf32>
    %74 = tpu.matmul %71, %73, %cst_49 {dimension_numbers = #tpu.dot_dimension_numbers<[1], [0], [0], [1], [0, 0, 1, 1], [], []>} : vector<128x32xbf16>, vector<32x32xbf16>, vector<128x32xf32> -> vector<128x32xf32>
    %75 = arith.addf %65, %74 : vector<128x32xf32>
    %c121_i32 = arith.constant 121 : i32
    %76 = tpu.dynamic_rotate %15 by %c121_i32 dim 0 : vector<128x32xf32>, i32 -> vector<128x32xf32>
    %c6 = arith.constant 6 : index
    %c0_50 = arith.constant 0 : index
    %c0_51 = arith.constant 0 : index
    %77 = vector.load %arg2[%c6, %c0_50, %c0_51] : memref<9x128x1xf32, #tpu.memory_space<vmem>>, vector<1x128x1xf32>
    %78 = vector.shape_cast %77 : vector<1x128x1xf32> to vector<128x1xf32>
    %79 = vector.broadcast %78 : vector<128x1xf32> to vector<128x32xf32>
    %80 = arith.mulf %79, %76 : vector<128x32xf32>
    %81 = arith.truncf %80 : vector<128x32xf32> to vector<128x32xbf16>
    %c6_52 = arith.constant 6 : index
    %c0_53 = arith.constant 0 : index
    %c0_54 = arith.constant 0 : index
    %82 = vector.load %arg7[%c6_52, %c0_53, %c0_54] : memref<9x32x32xbf16, #tpu.memory_space<vmem>>, vector<1x32x32xbf16>
    %83 = vector.shape_cast %82 : vector<1x32x32xbf16> to vector<32x32xbf16>
    %cst_55 = arith.constant dense<0.000000e+00> : vector<128x32xf32>
    %84 = tpu.matmul %81, %83, %cst_55 {dimension_numbers = #tpu.dot_dimension_numbers<[1], [0], [0], [1], [0, 0, 1, 1], [], []>} : vector<128x32xbf16>, vector<32x32xbf16>, vector<128x32xf32> -> vector<128x32xf32>
    %85 = arith.addf %75, %84 : vector<128x32xf32>
    %c120_i32 = arith.constant 120 : i32
    %86 = tpu.dynamic_rotate %15 by %c120_i32 dim 0 : vector<128x32xf32>, i32 -> vector<128x32xf32>
    %c7 = arith.constant 7 : index
    %c0_56 = arith.constant 0 : index
    %c0_57 = arith.constant 0 : index
    %87 = vector.load %arg2[%c7, %c0_56, %c0_57] : memref<9x128x1xf32, #tpu.memory_space<vmem>>, vector<1x128x1xf32>
    %88 = vector.shape_cast %87 : vector<1x128x1xf32> to vector<128x1xf32>
    %89 = vector.broadcast %88 : vector<128x1xf32> to vector<128x32xf32>
    %90 = arith.mulf %89, %86 : vector<128x32xf32>
    %91 = arith.truncf %90 : vector<128x32xf32> to vector<128x32xbf16>
    %c7_58 = arith.constant 7 : index
    %c0_59 = arith.constant 0 : index
    %c0_60 = arith.constant 0 : index
    %92 = vector.load %arg7[%c7_58, %c0_59, %c0_60] : memref<9x32x32xbf16, #tpu.memory_space<vmem>>, vector<1x32x32xbf16>
    %93 = vector.shape_cast %92 : vector<1x32x32xbf16> to vector<32x32xbf16>
    %cst_61 = arith.constant dense<0.000000e+00> : vector<128x32xf32>
    %94 = tpu.matmul %91, %93, %cst_61 {dimension_numbers = #tpu.dot_dimension_numbers<[1], [0], [0], [1], [0, 0, 1, 1], [], []>} : vector<128x32xbf16>, vector<32x32xbf16>, vector<128x32xf32> -> vector<128x32xf32>
    %95 = arith.addf %85, %94 : vector<128x32xf32>
    %c119_i32 = arith.constant 119 : i32
    %96 = tpu.dynamic_rotate %15 by %c119_i32 dim 0 : vector<128x32xf32>, i32 -> vector<128x32xf32>
    %c8 = arith.constant 8 : index
    %c0_62 = arith.constant 0 : index
    %c0_63 = arith.constant 0 : index
    %97 = vector.load %arg2[%c8, %c0_62, %c0_63] : memref<9x128x1xf32, #tpu.memory_space<vmem>>, vector<1x128x1xf32>
    %98 = vector.shape_cast %97 : vector<1x128x1xf32> to vector<128x1xf32>
    %99 = vector.broadcast %98 : vector<128x1xf32> to vector<128x32xf32>
    %100 = arith.mulf %99, %96 : vector<128x32xf32>
    %101 = arith.truncf %100 : vector<128x32xf32> to vector<128x32xbf16>
    %c8_64 = arith.constant 8 : index
    %c0_65 = arith.constant 0 : index
    %c0_66 = arith.constant 0 : index
    %102 = vector.load %arg7[%c8_64, %c0_65, %c0_66] : memref<9x32x32xbf16, #tpu.memory_space<vmem>>, vector<1x32x32xbf16>
    %103 = vector.shape_cast %102 : vector<1x32x32xbf16> to vector<32x32xbf16>
    %cst_67 = arith.constant dense<0.000000e+00> : vector<128x32xf32>
    %104 = tpu.matmul %101, %103, %cst_67 {dimension_numbers = #tpu.dot_dimension_numbers<[1], [0], [0], [1], [0, 0, 1, 1], [], []>} : vector<128x32xbf16>, vector<32x32xbf16>, vector<128x32xf32> -> vector<128x32xf32>
    %105 = arith.addf %95, %104 : vector<128x32xf32>
    %c0_68 = arith.constant 0 : index
    %c0_69 = arith.constant 0 : index
    %106 = vector.load %arg8[%c0_68, %c0_69] : memref<1x32xf32, #tpu.memory_space<vmem>>, vector<1x32xf32>
    %107 = vector.broadcast %106 : vector<1x32xf32> to vector<128x32xf32>
    %108 = arith.addf %105, %107 : vector<128x32xf32>
    %cst_70 = arith.constant 0.000000e+00 : f32
    %109 = vector.broadcast %cst_70 : f32 to vector<128x32xf32>
    %110 = arith.maximumf %108, %109 : vector<128x32xf32>
    %c0_71 = arith.constant 0 : index
    %c0_72 = arith.constant 0 : index
    %111 = vector.load %arg9[%c0_71, %c0_72] : memref<256x32xbf16, #tpu.memory_space<vmem>>, vector<256x32xbf16>
    %cst_73 = arith.constant dense<0.000000e+00> : vector<128x32xf32>
    %112 = tpu.matmul %1, %111, %cst_73 {dimension_numbers = #tpu.dot_dimension_numbers<[1], [0], [0], [1], [0, 0, 1, 1], [], []>} : vector<128x256xbf16>, vector<256x32xbf16>, vector<128x32xf32> -> vector<128x32xf32>
    %c0_74 = arith.constant 0 : index
    %c0_75 = arith.constant 0 : index
    %113 = vector.load %arg10[%c0_74, %c0_75] : memref<1x32xf32, #tpu.memory_space<vmem>>, vector<1x32xf32>
    %114 = vector.broadcast %113 : vector<1x32xf32> to vector<128x32xf32>
    %115 = arith.addf %112, %114 : vector<128x32xf32>
    %cst_76 = arith.constant 0.000000e+00 : f32
    %116 = vector.broadcast %cst_76 : f32 to vector<128x32xf32>
    %117 = arith.maximumf %115, %116 : vector<128x32xf32>
    %cst_77 = arith.constant 0.000000e+00 : f32
    %118 = vector.broadcast %cst_77 : f32 to vector<128x32xf32>
    %c9_i32_78 = arith.constant 9 : i32
    %119 = tpu.dynamic_rotate %117 by %c9_i32_78 dim 0 : vector<128x32xf32>, i32 -> vector<128x32xf32>
    %c0_79 = arith.constant 0 : index
    %c0_80 = arith.constant 0 : index
    %c0_81 = arith.constant 0 : index
    %120 = vector.load %arg2[%c0_79, %c0_80, %c0_81] : memref<9x128x1xf32, #tpu.memory_space<vmem>>, vector<1x128x1xf32>
    %121 = vector.shape_cast %120 : vector<1x128x1xf32> to vector<128x1xf32>
    %122 = vector.broadcast %121 : vector<128x1xf32> to vector<128x32xf32>
    %123 = arith.mulf %122, %119 : vector<128x32xf32>
    %124 = arith.truncf %123 : vector<128x32xf32> to vector<128x32xbf16>
    %c0_82 = arith.constant 0 : index
    %c0_83 = arith.constant 0 : index
    %c0_84 = arith.constant 0 : index
    %125 = vector.load %arg11[%c0_82, %c0_83, %c0_84] : memref<9x32x32xbf16, #tpu.memory_space<vmem>>, vector<1x32x32xbf16>
    %126 = vector.shape_cast %125 : vector<1x32x32xbf16> to vector<32x32xbf16>
    %cst_85 = arith.constant dense<0.000000e+00> : vector<128x32xf32>
    %127 = tpu.matmul %124, %126, %cst_85 {dimension_numbers = #tpu.dot_dimension_numbers<[1], [0], [0], [1], [0, 0, 1, 1], [], []>} : vector<128x32xbf16>, vector<32x32xbf16>, vector<128x32xf32> -> vector<128x32xf32>
    %128 = arith.addf %118, %127 : vector<128x32xf32>
    %c8_i32_86 = arith.constant 8 : i32
    %129 = tpu.dynamic_rotate %117 by %c8_i32_86 dim 0 : vector<128x32xf32>, i32 -> vector<128x32xf32>
    %c1_87 = arith.constant 1 : index
    %c0_88 = arith.constant 0 : index
    %c0_89 = arith.constant 0 : index
    %130 = vector.load %arg2[%c1_87, %c0_88, %c0_89] : memref<9x128x1xf32, #tpu.memory_space<vmem>>, vector<1x128x1xf32>
    %131 = vector.shape_cast %130 : vector<1x128x1xf32> to vector<128x1xf32>
    %132 = vector.broadcast %131 : vector<128x1xf32> to vector<128x32xf32>
    %133 = arith.mulf %132, %129 : vector<128x32xf32>
    %134 = arith.truncf %133 : vector<128x32xf32> to vector<128x32xbf16>
    %c1_90 = arith.constant 1 : index
    %c0_91 = arith.constant 0 : index
    %c0_92 = arith.constant 0 : index
    %135 = vector.load %arg11[%c1_90, %c0_91, %c0_92] : memref<9x32x32xbf16, #tpu.memory_space<vmem>>, vector<1x32x32xbf16>
    %136 = vector.shape_cast %135 : vector<1x32x32xbf16> to vector<32x32xbf16>
    %cst_93 = arith.constant dense<0.000000e+00> : vector<128x32xf32>
    %137 = tpu.matmul %134, %136, %cst_93 {dimension_numbers = #tpu.dot_dimension_numbers<[1], [0], [0], [1], [0, 0, 1, 1], [], []>} : vector<128x32xbf16>, vector<32x32xbf16>, vector<128x32xf32> -> vector<128x32xf32>
    %138 = arith.addf %128, %137 : vector<128x32xf32>
    %c7_i32_94 = arith.constant 7 : i32
    %139 = tpu.dynamic_rotate %117 by %c7_i32_94 dim 0 : vector<128x32xf32>, i32 -> vector<128x32xf32>
    %c2_95 = arith.constant 2 : index
    %c0_96 = arith.constant 0 : index
    %c0_97 = arith.constant 0 : index
    %140 = vector.load %arg2[%c2_95, %c0_96, %c0_97] : memref<9x128x1xf32, #tpu.memory_space<vmem>>, vector<1x128x1xf32>
    %141 = vector.shape_cast %140 : vector<1x128x1xf32> to vector<128x1xf32>
    %142 = vector.broadcast %141 : vector<128x1xf32> to vector<128x32xf32>
    %143 = arith.mulf %142, %139 : vector<128x32xf32>
    %144 = arith.truncf %143 : vector<128x32xf32> to vector<128x32xbf16>
    %c2_98 = arith.constant 2 : index
    %c0_99 = arith.constant 0 : index
    %c0_100 = arith.constant 0 : index
    %145 = vector.load %arg11[%c2_98, %c0_99, %c0_100] : memref<9x32x32xbf16, #tpu.memory_space<vmem>>, vector<1x32x32xbf16>
    %146 = vector.shape_cast %145 : vector<1x32x32xbf16> to vector<32x32xbf16>
    %cst_101 = arith.constant dense<0.000000e+00> : vector<128x32xf32>
    %147 = tpu.matmul %144, %146, %cst_101 {dimension_numbers = #tpu.dot_dimension_numbers<[1], [0], [0], [1], [0, 0, 1, 1], [], []>} : vector<128x32xbf16>, vector<32x32xbf16>, vector<128x32xf32> -> vector<128x32xf32>
    %148 = arith.addf %138, %147 : vector<128x32xf32>
    %c1_i32_102 = arith.constant 1 : i32
    %149 = tpu.dynamic_rotate %117 by %c1_i32_102 dim 0 : vector<128x32xf32>, i32 -> vector<128x32xf32>
    %c3_103 = arith.constant 3 : index
    %c0_104 = arith.constant 0 : index
    %c0_105 = arith.constant 0 : index
    %150 = vector.load %arg2[%c3_103, %c0_104, %c0_105] : memref<9x128x1xf32, #tpu.memory_space<vmem>>, vector<1x128x1xf32>
    %151 = vector.shape_cast %150 : vector<1x128x1xf32> to vector<128x1xf32>
    %152 = vector.broadcast %151 : vector<128x1xf32> to vector<128x32xf32>
    %153 = arith.mulf %152, %149 : vector<128x32xf32>
    %154 = arith.truncf %153 : vector<128x32xf32> to vector<128x32xbf16>
    %c3_106 = arith.constant 3 : index
    %c0_107 = arith.constant 0 : index
    %c0_108 = arith.constant 0 : index
    %155 = vector.load %arg11[%c3_106, %c0_107, %c0_108] : memref<9x32x32xbf16, #tpu.memory_space<vmem>>, vector<1x32x32xbf16>
    %156 = vector.shape_cast %155 : vector<1x32x32xbf16> to vector<32x32xbf16>
    %cst_109 = arith.constant dense<0.000000e+00> : vector<128x32xf32>
    %157 = tpu.matmul %154, %156, %cst_109 {dimension_numbers = #tpu.dot_dimension_numbers<[1], [0], [0], [1], [0, 0, 1, 1], [], []>} : vector<128x32xbf16>, vector<32x32xbf16>, vector<128x32xf32> -> vector<128x32xf32>
    %158 = arith.addf %148, %157 : vector<128x32xf32>
    %c4_110 = arith.constant 4 : index
    %c0_111 = arith.constant 0 : index
    %c0_112 = arith.constant 0 : index
    %159 = vector.load %arg2[%c4_110, %c0_111, %c0_112] : memref<9x128x1xf32, #tpu.memory_space<vmem>>, vector<1x128x1xf32>
    %160 = vector.shape_cast %159 : vector<1x128x1xf32> to vector<128x1xf32>
    %161 = vector.broadcast %160 : vector<128x1xf32> to vector<128x32xf32>
    %162 = arith.mulf %161, %117 : vector<128x32xf32>
    %163 = arith.truncf %162 : vector<128x32xf32> to vector<128x32xbf16>
    %c4_113 = arith.constant 4 : index
    %c0_114 = arith.constant 0 : index
    %c0_115 = arith.constant 0 : index
    %164 = vector.load %arg11[%c4_113, %c0_114, %c0_115] : memref<9x32x32xbf16, #tpu.memory_space<vmem>>, vector<1x32x32xbf16>
    %165 = vector.shape_cast %164 : vector<1x32x32xbf16> to vector<32x32xbf16>
    %cst_116 = arith.constant dense<0.000000e+00> : vector<128x32xf32>
    %166 = tpu.matmul %163, %165, %cst_116 {dimension_numbers = #tpu.dot_dimension_numbers<[1], [0], [0], [1], [0, 0, 1, 1], [], []>} : vector<128x32xbf16>, vector<32x32xbf16>, vector<128x32xf32> -> vector<128x32xf32>
    %167 = arith.addf %158, %166 : vector<128x32xf32>
    %c127_i32_117 = arith.constant 127 : i32
    %168 = tpu.dynamic_rotate %117 by %c127_i32_117 dim 0 : vector<128x32xf32>, i32 -> vector<128x32xf32>
    %c5_118 = arith.constant 5 : index
    %c0_119 = arith.constant 0 : index
    %c0_120 = arith.constant 0 : index
    %169 = vector.load %arg2[%c5_118, %c0_119, %c0_120] : memref<9x128x1xf32, #tpu.memory_space<vmem>>, vector<1x128x1xf32>
    %170 = vector.shape_cast %169 : vector<1x128x1xf32> to vector<128x1xf32>
    %171 = vector.broadcast %170 : vector<128x1xf32> to vector<128x32xf32>
    %172 = arith.mulf %171, %168 : vector<128x32xf32>
    %173 = arith.truncf %172 : vector<128x32xf32> to vector<128x32xbf16>
    %c5_121 = arith.constant 5 : index
    %c0_122 = arith.constant 0 : index
    %c0_123 = arith.constant 0 : index
    %174 = vector.load %arg11[%c5_121, %c0_122, %c0_123] : memref<9x32x32xbf16, #tpu.memory_space<vmem>>, vector<1x32x32xbf16>
    %175 = vector.shape_cast %174 : vector<1x32x32xbf16> to vector<32x32xbf16>
    %cst_124 = arith.constant dense<0.000000e+00> : vector<128x32xf32>
    %176 = tpu.matmul %173, %175, %cst_124 {dimension_numbers = #tpu.dot_dimension_numbers<[1], [0], [0], [1], [0, 0, 1, 1], [], []>} : vector<128x32xbf16>, vector<32x32xbf16>, vector<128x32xf32> -> vector<128x32xf32>
    %177 = arith.addf %167, %176 : vector<128x32xf32>
    %c121_i32_125 = arith.constant 121 : i32
    %178 = tpu.dynamic_rotate %117 by %c121_i32_125 dim 0 : vector<128x32xf32>, i32 -> vector<128x32xf32>
    %c6_126 = arith.constant 6 : index
    %c0_127 = arith.constant 0 : index
    %c0_128 = arith.constant 0 : index
    %179 = vector.load %arg2[%c6_126, %c0_127, %c0_128] : memref<9x128x1xf32, #tpu.memory_space<vmem>>, vector<1x128x1xf32>
    %180 = vector.shape_cast %179 : vector<1x128x1xf32> to vector<128x1xf32>
    %181 = vector.broadcast %180 : vector<128x1xf32> to vector<128x32xf32>
    %182 = arith.mulf %181, %178 : vector<128x32xf32>
    %183 = arith.truncf %182 : vector<128x32xf32> to vector<128x32xbf16>
    %c6_129 = arith.constant 6 : index
    %c0_130 = arith.constant 0 : index
    %c0_131 = arith.constant 0 : index
    %184 = vector.load %arg11[%c6_129, %c0_130, %c0_131] : memref<9x32x32xbf16, #tpu.memory_space<vmem>>, vector<1x32x32xbf16>
    %185 = vector.shape_cast %184 : vector<1x32x32xbf16> to vector<32x32xbf16>
    %cst_132 = arith.constant dense<0.000000e+00> : vector<128x32xf32>
    %186 = tpu.matmul %183, %185, %cst_132 {dimension_numbers = #tpu.dot_dimension_numbers<[1], [0], [0], [1], [0, 0, 1, 1], [], []>} : vector<128x32xbf16>, vector<32x32xbf16>, vector<128x32xf32> -> vector<128x32xf32>
    %187 = arith.addf %177, %186 : vector<128x32xf32>
    %c120_i32_133 = arith.constant 120 : i32
    %188 = tpu.dynamic_rotate %117 by %c120_i32_133 dim 0 : vector<128x32xf32>, i32 -> vector<128x32xf32>
    %c7_134 = arith.constant 7 : index
    %c0_135 = arith.constant 0 : index
    %c0_136 = arith.constant 0 : index
    %189 = vector.load %arg2[%c7_134, %c0_135, %c0_136] : memref<9x128x1xf32, #tpu.memory_space<vmem>>, vector<1x128x1xf32>
    %190 = vector.shape_cast %189 : vector<1x128x1xf32> to vector<128x1xf32>
    %191 = vector.broadcast %190 : vector<128x1xf32> to vector<128x32xf32>
    %192 = arith.mulf %191, %188 : vector<128x32xf32>
    %193 = arith.truncf %192 : vector<128x32xf32> to vector<128x32xbf16>
    %c7_137 = arith.constant 7 : index
    %c0_138 = arith.constant 0 : index
    %c0_139 = arith.constant 0 : index
    %194 = vector.load %arg11[%c7_137, %c0_138, %c0_139] : memref<9x32x32xbf16, #tpu.memory_space<vmem>>, vector<1x32x32xbf16>
    %195 = vector.shape_cast %194 : vector<1x32x32xbf16> to vector<32x32xbf16>
    %cst_140 = arith.constant dense<0.000000e+00> : vector<128x32xf32>
    %196 = tpu.matmul %193, %195, %cst_140 {dimension_numbers = #tpu.dot_dimension_numbers<[1], [0], [0], [1], [0, 0, 1, 1], [], []>} : vector<128x32xbf16>, vector<32x32xbf16>, vector<128x32xf32> -> vector<128x32xf32>
    %197 = arith.addf %187, %196 : vector<128x32xf32>
    %c119_i32_141 = arith.constant 119 : i32
    %198 = tpu.dynamic_rotate %117 by %c119_i32_141 dim 0 : vector<128x32xf32>, i32 -> vector<128x32xf32>
    %c8_142 = arith.constant 8 : index
    %c0_143 = arith.constant 0 : index
    %c0_144 = arith.constant 0 : index
    %199 = vector.load %arg2[%c8_142, %c0_143, %c0_144] : memref<9x128x1xf32, #tpu.memory_space<vmem>>, vector<1x128x1xf32>
    %200 = vector.shape_cast %199 : vector<1x128x1xf32> to vector<128x1xf32>
    %201 = vector.broadcast %200 : vector<128x1xf32> to vector<128x32xf32>
    %202 = arith.mulf %201, %198 : vector<128x32xf32>
    %203 = arith.truncf %202 : vector<128x32xf32> to vector<128x32xbf16>
    %c8_145 = arith.constant 8 : index
    %c0_146 = arith.constant 0 : index
    %c0_147 = arith.constant 0 : index
    %204 = vector.load %arg11[%c8_145, %c0_146, %c0_147] : memref<9x32x32xbf16, #tpu.memory_space<vmem>>, vector<1x32x32xbf16>
    %205 = vector.shape_cast %204 : vector<1x32x32xbf16> to vector<32x32xbf16>
    %cst_148 = arith.constant dense<0.000000e+00> : vector<128x32xf32>
    %206 = tpu.matmul %203, %205, %cst_148 {dimension_numbers = #tpu.dot_dimension_numbers<[1], [0], [0], [1], [0, 0, 1, 1], [], []>} : vector<128x32xbf16>, vector<32x32xbf16>, vector<128x32xf32> -> vector<128x32xf32>
    %207 = arith.addf %197, %206 : vector<128x32xf32>
    %c0_149 = arith.constant 0 : index
    %c0_150 = arith.constant 0 : index
    %208 = vector.load %arg12[%c0_149, %c0_150] : memref<1x32xf32, #tpu.memory_space<vmem>>, vector<1x32xf32>
    %209 = vector.broadcast %208 : vector<1x32xf32> to vector<128x32xf32>
    %210 = arith.addf %207, %209 : vector<128x32xf32>
    %cst_151 = arith.constant 0.000000e+00 : f32
    %211 = vector.broadcast %cst_151 : f32 to vector<128x32xf32>
    %212 = arith.maximumf %210, %211 : vector<128x32xf32>
    %cst_152 = arith.constant 0.000000e+00 : f32
    %213 = vector.broadcast %cst_152 : f32 to vector<128x32xf32>
    %c9_i32_153 = arith.constant 9 : i32
    %214 = tpu.dynamic_rotate %212 by %c9_i32_153 dim 0 : vector<128x32xf32>, i32 -> vector<128x32xf32>
    %c0_154 = arith.constant 0 : index
    %c0_155 = arith.constant 0 : index
    %c0_156 = arith.constant 0 : index
    %215 = vector.load %arg2[%c0_154, %c0_155, %c0_156] : memref<9x128x1xf32, #tpu.memory_space<vmem>>, vector<1x128x1xf32>
    %216 = vector.shape_cast %215 : vector<1x128x1xf32> to vector<128x1xf32>
    %217 = vector.broadcast %216 : vector<128x1xf32> to vector<128x32xf32>
    %218 = arith.mulf %217, %214 : vector<128x32xf32>
    %219 = arith.truncf %218 : vector<128x32xf32> to vector<128x32xbf16>
    %c0_157 = arith.constant 0 : index
    %c0_158 = arith.constant 0 : index
    %c0_159 = arith.constant 0 : index
    %220 = vector.load %arg13[%c0_157, %c0_158, %c0_159] : memref<9x32x32xbf16, #tpu.memory_space<vmem>>, vector<1x32x32xbf16>
    %221 = vector.shape_cast %220 : vector<1x32x32xbf16> to vector<32x32xbf16>
    %cst_160 = arith.constant dense<0.000000e+00> : vector<128x32xf32>
    %222 = tpu.matmul %219, %221, %cst_160 {dimension_numbers = #tpu.dot_dimension_numbers<[1], [0], [0], [1], [0, 0, 1, 1], [], []>} : vector<128x32xbf16>, vector<32x32xbf16>, vector<128x32xf32> -> vector<128x32xf32>
    %223 = arith.addf %213, %222 : vector<128x32xf32>
    %c8_i32_161 = arith.constant 8 : i32
    %224 = tpu.dynamic_rotate %212 by %c8_i32_161 dim 0 : vector<128x32xf32>, i32 -> vector<128x32xf32>
    %c1_162 = arith.constant 1 : index
    %c0_163 = arith.constant 0 : index
    %c0_164 = arith.constant 0 : index
    %225 = vector.load %arg2[%c1_162, %c0_163, %c0_164] : memref<9x128x1xf32, #tpu.memory_space<vmem>>, vector<1x128x1xf32>
    %226 = vector.shape_cast %225 : vector<1x128x1xf32> to vector<128x1xf32>
    %227 = vector.broadcast %226 : vector<128x1xf32> to vector<128x32xf32>
    %228 = arith.mulf %227, %224 : vector<128x32xf32>
    %229 = arith.truncf %228 : vector<128x32xf32> to vector<128x32xbf16>
    %c1_165 = arith.constant 1 : index
    %c0_166 = arith.constant 0 : index
    %c0_167 = arith.constant 0 : index
    %230 = vector.load %arg13[%c1_165, %c0_166, %c0_167] : memref<9x32x32xbf16, #tpu.memory_space<vmem>>, vector<1x32x32xbf16>
    %231 = vector.shape_cast %230 : vector<1x32x32xbf16> to vector<32x32xbf16>
    %cst_168 = arith.constant dense<0.000000e+00> : vector<128x32xf32>
    %232 = tpu.matmul %229, %231, %cst_168 {dimension_numbers = #tpu.dot_dimension_numbers<[1], [0], [0], [1], [0, 0, 1, 1], [], []>} : vector<128x32xbf16>, vector<32x32xbf16>, vector<128x32xf32> -> vector<128x32xf32>
    %233 = arith.addf %223, %232 : vector<128x32xf32>
    %c7_i32_169 = arith.constant 7 : i32
    %234 = tpu.dynamic_rotate %212 by %c7_i32_169 dim 0 : vector<128x32xf32>, i32 -> vector<128x32xf32>
    %c2_170 = arith.constant 2 : index
    %c0_171 = arith.constant 0 : index
    %c0_172 = arith.constant 0 : index
    %235 = vector.load %arg2[%c2_170, %c0_171, %c0_172] : memref<9x128x1xf32, #tpu.memory_space<vmem>>, vector<1x128x1xf32>
    %236 = vector.shape_cast %235 : vector<1x128x1xf32> to vector<128x1xf32>
    %237 = vector.broadcast %236 : vector<128x1xf32> to vector<128x32xf32>
    %238 = arith.mulf %237, %234 : vector<128x32xf32>
    %239 = arith.truncf %238 : vector<128x32xf32> to vector<128x32xbf16>
    %c2_173 = arith.constant 2 : index
    %c0_174 = arith.constant 0 : index
    %c0_175 = arith.constant 0 : index
    %240 = vector.load %arg13[%c2_173, %c0_174, %c0_175] : memref<9x32x32xbf16, #tpu.memory_space<vmem>>, vector<1x32x32xbf16>
    %241 = vector.shape_cast %240 : vector<1x32x32xbf16> to vector<32x32xbf16>
    %cst_176 = arith.constant dense<0.000000e+00> : vector<128x32xf32>
    %242 = tpu.matmul %239, %241, %cst_176 {dimension_numbers = #tpu.dot_dimension_numbers<[1], [0], [0], [1], [0, 0, 1, 1], [], []>} : vector<128x32xbf16>, vector<32x32xbf16>, vector<128x32xf32> -> vector<128x32xf32>
    %243 = arith.addf %233, %242 : vector<128x32xf32>
    %c1_i32_177 = arith.constant 1 : i32
    %244 = tpu.dynamic_rotate %212 by %c1_i32_177 dim 0 : vector<128x32xf32>, i32 -> vector<128x32xf32>
    %c3_178 = arith.constant 3 : index
    %c0_179 = arith.constant 0 : index
    %c0_180 = arith.constant 0 : index
    %245 = vector.load %arg2[%c3_178, %c0_179, %c0_180] : memref<9x128x1xf32, #tpu.memory_space<vmem>>, vector<1x128x1xf32>
    %246 = vector.shape_cast %245 : vector<1x128x1xf32> to vector<128x1xf32>
    %247 = vector.broadcast %246 : vector<128x1xf32> to vector<128x32xf32>
    %248 = arith.mulf %247, %244 : vector<128x32xf32>
    %249 = arith.truncf %248 : vector<128x32xf32> to vector<128x32xbf16>
    %c3_181 = arith.constant 3 : index
    %c0_182 = arith.constant 0 : index
    %c0_183 = arith.constant 0 : index
    %250 = vector.load %arg13[%c3_181, %c0_182, %c0_183] : memref<9x32x32xbf16, #tpu.memory_space<vmem>>, vector<1x32x32xbf16>
    %251 = vector.shape_cast %250 : vector<1x32x32xbf16> to vector<32x32xbf16>
    %cst_184 = arith.constant dense<0.000000e+00> : vector<128x32xf32>
    %252 = tpu.matmul %249, %251, %cst_184 {dimension_numbers = #tpu.dot_dimension_numbers<[1], [0], [0], [1], [0, 0, 1, 1], [], []>} : vector<128x32xbf16>, vector<32x32xbf16>, vector<128x32xf32> -> vector<128x32xf32>
    %253 = arith.addf %243, %252 : vector<128x32xf32>
    %c4_185 = arith.constant 4 : index
    %c0_186 = arith.constant 0 : index
    %c0_187 = arith.constant 0 : index
    %254 = vector.load %arg2[%c4_185, %c0_186, %c0_187] : memref<9x128x1xf32, #tpu.memory_space<vmem>>, vector<1x128x1xf32>
    %255 = vector.shape_cast %254 : vector<1x128x1xf32> to vector<128x1xf32>
    %256 = vector.broadcast %255 : vector<128x1xf32> to vector<128x32xf32>
    %257 = arith.mulf %256, %212 : vector<128x32xf32>
    %258 = arith.truncf %257 : vector<128x32xf32> to vector<128x32xbf16>
    %c4_188 = arith.constant 4 : index
    %c0_189 = arith.constant 0 : index
    %c0_190 = arith.constant 0 : index
    %259 = vector.load %arg13[%c4_188, %c0_189, %c0_190] : memref<9x32x32xbf16, #tpu.memory_space<vmem>>, vector<1x32x32xbf16>
    %260 = vector.shape_cast %259 : vector<1x32x32xbf16> to vector<32x32xbf16>
    %cst_191 = arith.constant dense<0.000000e+00> : vector<128x32xf32>
    %261 = tpu.matmul %258, %260, %cst_191 {dimension_numbers = #tpu.dot_dimension_numbers<[1], [0], [0], [1], [0, 0, 1, 1], [], []>} : vector<128x32xbf16>, vector<32x32xbf16>, vector<128x32xf32> -> vector<128x32xf32>
    %262 = arith.addf %253, %261 : vector<128x32xf32>
    %c127_i32_192 = arith.constant 127 : i32
    %263 = tpu.dynamic_rotate %212 by %c127_i32_192 dim 0 : vector<128x32xf32>, i32 -> vector<128x32xf32>
    %c5_193 = arith.constant 5 : index
    %c0_194 = arith.constant 0 : index
    %c0_195 = arith.constant 0 : index
    %264 = vector.load %arg2[%c5_193, %c0_194, %c0_195] : memref<9x128x1xf32, #tpu.memory_space<vmem>>, vector<1x128x1xf32>
    %265 = vector.shape_cast %264 : vector<1x128x1xf32> to vector<128x1xf32>
    %266 = vector.broadcast %265 : vector<128x1xf32> to vector<128x32xf32>
    %267 = arith.mulf %266, %263 : vector<128x32xf32>
    %268 = arith.truncf %267 : vector<128x32xf32> to vector<128x32xbf16>
    %c5_196 = arith.constant 5 : index
    %c0_197 = arith.constant 0 : index
    %c0_198 = arith.constant 0 : index
    %269 = vector.load %arg13[%c5_196, %c0_197, %c0_198] : memref<9x32x32xbf16, #tpu.memory_space<vmem>>, vector<1x32x32xbf16>
    %270 = vector.shape_cast %269 : vector<1x32x32xbf16> to vector<32x32xbf16>
    %cst_199 = arith.constant dense<0.000000e+00> : vector<128x32xf32>
    %271 = tpu.matmul %268, %270, %cst_199 {dimension_numbers = #tpu.dot_dimension_numbers<[1], [0], [0], [1], [0, 0, 1, 1], [], []>} : vector<128x32xbf16>, vector<32x32xbf16>, vector<128x32xf32> -> vector<128x32xf32>
    %272 = arith.addf %262, %271 : vector<128x32xf32>
    %c121_i32_200 = arith.constant 121 : i32
    %273 = tpu.dynamic_rotate %212 by %c121_i32_200 dim 0 : vector<128x32xf32>, i32 -> vector<128x32xf32>
    %c6_201 = arith.constant 6 : index
    %c0_202 = arith.constant 0 : index
    %c0_203 = arith.constant 0 : index
    %274 = vector.load %arg2[%c6_201, %c0_202, %c0_203] : memref<9x128x1xf32, #tpu.memory_space<vmem>>, vector<1x128x1xf32>
    %275 = vector.shape_cast %274 : vector<1x128x1xf32> to vector<128x1xf32>
    %276 = vector.broadcast %275 : vector<128x1xf32> to vector<128x32xf32>
    %277 = arith.mulf %276, %273 : vector<128x32xf32>
    %278 = arith.truncf %277 : vector<128x32xf32> to vector<128x32xbf16>
    %c6_204 = arith.constant 6 : index
    %c0_205 = arith.constant 0 : index
    %c0_206 = arith.constant 0 : index
    %279 = vector.load %arg13[%c6_204, %c0_205, %c0_206] : memref<9x32x32xbf16, #tpu.memory_space<vmem>>, vector<1x32x32xbf16>
    %280 = vector.shape_cast %279 : vector<1x32x32xbf16> to vector<32x32xbf16>
    %cst_207 = arith.constant dense<0.000000e+00> : vector<128x32xf32>
    %281 = tpu.matmul %278, %280, %cst_207 {dimension_numbers = #tpu.dot_dimension_numbers<[1], [0], [0], [1], [0, 0, 1, 1], [], []>} : vector<128x32xbf16>, vector<32x32xbf16>, vector<128x32xf32> -> vector<128x32xf32>
    %282 = arith.addf %272, %281 : vector<128x32xf32>
    %c120_i32_208 = arith.constant 120 : i32
    %283 = tpu.dynamic_rotate %212 by %c120_i32_208 dim 0 : vector<128x32xf32>, i32 -> vector<128x32xf32>
    %c7_209 = arith.constant 7 : index
    %c0_210 = arith.constant 0 : index
    %c0_211 = arith.constant 0 : index
    %284 = vector.load %arg2[%c7_209, %c0_210, %c0_211] : memref<9x128x1xf32, #tpu.memory_space<vmem>>, vector<1x128x1xf32>
    %285 = vector.shape_cast %284 : vector<1x128x1xf32> to vector<128x1xf32>
    %286 = vector.broadcast %285 : vector<128x1xf32> to vector<128x32xf32>
    %287 = arith.mulf %286, %283 : vector<128x32xf32>
    %288 = arith.truncf %287 : vector<128x32xf32> to vector<128x32xbf16>
    %c7_212 = arith.constant 7 : index
    %c0_213 = arith.constant 0 : index
    %c0_214 = arith.constant 0 : index
    %289 = vector.load %arg13[%c7_212, %c0_213, %c0_214] : memref<9x32x32xbf16, #tpu.memory_space<vmem>>, vector<1x32x32xbf16>
    %290 = vector.shape_cast %289 : vector<1x32x32xbf16> to vector<32x32xbf16>
    %cst_215 = arith.constant dense<0.000000e+00> : vector<128x32xf32>
    %291 = tpu.matmul %288, %290, %cst_215 {dimension_numbers = #tpu.dot_dimension_numbers<[1], [0], [0], [1], [0, 0, 1, 1], [], []>} : vector<128x32xbf16>, vector<32x32xbf16>, vector<128x32xf32> -> vector<128x32xf32>
    %292 = arith.addf %282, %291 : vector<128x32xf32>
    %c119_i32_216 = arith.constant 119 : i32
    %293 = tpu.dynamic_rotate %212 by %c119_i32_216 dim 0 : vector<128x32xf32>, i32 -> vector<128x32xf32>
    %c8_217 = arith.constant 8 : index
    %c0_218 = arith.constant 0 : index
    %c0_219 = arith.constant 0 : index
    %294 = vector.load %arg2[%c8_217, %c0_218, %c0_219] : memref<9x128x1xf32, #tpu.memory_space<vmem>>, vector<1x128x1xf32>
    %295 = vector.shape_cast %294 : vector<1x128x1xf32> to vector<128x1xf32>
    %296 = vector.broadcast %295 : vector<128x1xf32> to vector<128x32xf32>
    %297 = arith.mulf %296, %293 : vector<128x32xf32>
    %298 = arith.truncf %297 : vector<128x32xf32> to vector<128x32xbf16>
    %c8_220 = arith.constant 8 : index
    %c0_221 = arith.constant 0 : index
    %c0_222 = arith.constant 0 : index
    %299 = vector.load %arg13[%c8_220, %c0_221, %c0_222] : memref<9x32x32xbf16, #tpu.memory_space<vmem>>, vector<1x32x32xbf16>
    %300 = vector.shape_cast %299 : vector<1x32x32xbf16> to vector<32x32xbf16>
    %cst_223 = arith.constant dense<0.000000e+00> : vector<128x32xf32>
    %301 = tpu.matmul %298, %300, %cst_223 {dimension_numbers = #tpu.dot_dimension_numbers<[1], [0], [0], [1], [0, 0, 1, 1], [], []>} : vector<128x32xbf16>, vector<32x32xbf16>, vector<128x32xf32> -> vector<128x32xf32>
    %302 = arith.addf %292, %301 : vector<128x32xf32>
    %c0_224 = arith.constant 0 : index
    %c0_225 = arith.constant 0 : index
    %303 = vector.load %arg14[%c0_224, %c0_225] : memref<1x32xf32, #tpu.memory_space<vmem>>, vector<1x32xf32>
    %304 = vector.broadcast %303 : vector<1x32xf32> to vector<128x32xf32>
    %305 = arith.addf %302, %304 : vector<128x32xf32>
    %cst_226 = arith.constant 0.000000e+00 : f32
    %306 = vector.broadcast %cst_226 : f32 to vector<128x32xf32>
    %307 = arith.maximumf %305, %306 : vector<128x32xf32>
    %308 = arith.truncf %8 : vector<128x32xf32> to vector<128x32xbf16>
    %c0_227 = arith.constant 0 : index
    %c0_228 = arith.constant 0 : index
    %309 = vector.load %arg15[%c0_227, %c0_228] : memref<32x256xbf16, #tpu.memory_space<vmem>>, vector<32x256xbf16>
    %cst_229 = arith.constant dense<0.000000e+00> : vector<128x256xf32>
    %310 = tpu.matmul %308, %309, %cst_229 {dimension_numbers = #tpu.dot_dimension_numbers<[1], [0], [0], [1], [0, 0, 1, 1], [], []>} : vector<128x32xbf16>, vector<32x256xbf16>, vector<128x256xf32> -> vector<128x256xf32>
    %311 = arith.truncf %110 : vector<128x32xf32> to vector<128x32xbf16>
    %c0_230 = arith.constant 0 : index
    %c0_231 = arith.constant 0 : index
    %312 = vector.load %arg16[%c0_230, %c0_231] : memref<32x256xbf16, #tpu.memory_space<vmem>>, vector<32x256xbf16>
    %cst_232 = arith.constant dense<0.000000e+00> : vector<128x256xf32>
    %313 = tpu.matmul %311, %312, %cst_232 {dimension_numbers = #tpu.dot_dimension_numbers<[1], [0], [0], [1], [0, 0, 1, 1], [], []>} : vector<128x32xbf16>, vector<32x256xbf16>, vector<128x256xf32> -> vector<128x256xf32>
    %314 = arith.addf %310, %313 : vector<128x256xf32>
    %315 = arith.truncf %307 : vector<128x32xf32> to vector<128x32xbf16>
    %c0_233 = arith.constant 0 : index
    %c0_234 = arith.constant 0 : index
    %316 = vector.load %arg17[%c0_233, %c0_234] : memref<32x256xbf16, #tpu.memory_space<vmem>>, vector<32x256xbf16>
    %cst_235 = arith.constant dense<0.000000e+00> : vector<128x256xf32>
    %317 = tpu.matmul %315, %316, %cst_235 {dimension_numbers = #tpu.dot_dimension_numbers<[1], [0], [0], [1], [0, 0, 1, 1], [], []>} : vector<128x32xbf16>, vector<32x256xbf16>, vector<128x256xf32> -> vector<128x256xf32>
    %318 = arith.addf %314, %317 : vector<128x256xf32>
    %c0_236 = arith.constant 0 : index
    %c0_237 = arith.constant 0 : index
    %319 = vector.load %arg18[%c0_236, %c0_237] : memref<1x256xf32, #tpu.memory_space<vmem>>, vector<1x256xf32>
    %320 = vector.broadcast %319 : vector<1x256xf32> to vector<128x256xf32>
    %321 = arith.addf %318, %320 : vector<128x256xf32>
    %cst_238 = arith.constant 1.000000e+00 : f32
    %322 = vector.broadcast %cst_238 : f32 to vector<128x256xf32>
    %323 = arith.mulf %322, %321 : vector<128x256xf32>
    %324 = arith.addf %0, %323 : vector<128x256xf32>
    %cst_239 = arith.constant 0.000000e+00 : f32
    %325 = vector.broadcast %cst_239 : f32 to vector<128x256xf32>
    %326 = arith.maximumf %324, %325 : vector<128x256xf32>
    %c0_240 = arith.constant 0 : index
    %c0_241 = arith.constant 0 : index
    %327 = vector.load %arg19[%c0_240, %c0_241] : memref<128x256xf32, #tpu.memory_space<vmem>>, vector<128x256xf32>
    tpu.vector_store %arg19[%c0_240, %c0_241], %326 {strides = array<i32>} : memref<128x256xf32, #tpu.memory_space<vmem>>, vector<128x256xf32>,
    return
  }
  func.func @transform_0(%arg0: i32) -> (i32, i32) {
    %c0_i32 = arith.constant 0 : i32
    %c0_i32_0 = arith.constant 0 : i32
    return %arg0, %c0_i32 : i32, i32
  }
  func.func @transform_1(%arg0: i32) -> (i32, i32, i32) {
    %c0_i32 = arith.constant 0 : i32
    %c0_i32_0 = arith.constant 0 : i32
    %c0_i32_1 = arith.constant 0 : i32
    %c0_i32_2 = arith.constant 0 : i32
    return %c0_i32, %c0_i32_0, %c0_i32_1 : i32, i32, i32
  }
  func.func @transform_2(%arg0: i32) -> (i32, i32) {
    %c0_i32 = arith.constant 0 : i32
    %c0_i32_0 = arith.constant 0 : i32
    %c0_i32_1 = arith.constant 0 : i32
    return %c0_i32, %c0_i32_0 : i32, i32
  }
  func.func @transform_3(%arg0: i32) -> (i32, i32) {
    %c0_i32 = arith.constant 0 : i32
    %c0_i32_0 = arith.constant 0 : i32
    %c0_i32_1 = arith.constant 0 : i32
    return %c0_i32, %c0_i32_0 : i32, i32
  }
  func.func @transform_4(%arg0: i32) -> (i32, i32) {
    %c0_i32 = arith.constant 0 : i32
    %c0_i32_0 = arith.constant 0 : i32
    %c0_i32_1 = arith.constant 0 : i32
    return %c0_i32, %c0_i32_0 : i32, i32
  }
  func.func @transform_5(%arg0: i32) -> (i32, i32) {
    %c0_i32 = arith.constant 0 : i32
    %c0_i32_0 = arith.constant 0 : i32
    %c0_i32_1 = arith.constant 0 : i32
    return %c0_i32, %c0_i32_0 : i32, i32
  }
  func.func @transform_6(%arg0: i32) -> (i32, i32, i32) {
    %c0_i32 = arith.constant 0 : i32
    %c0_i32_0 = arith.constant 0 : i32
    %c0_i32_1 = arith.constant 0 : i32
    %c0_i32_2 = arith.constant 0 : i32
    return %c0_i32, %c0_i32_0, %c0_i32_1 : i32, i32, i32
  }
  func.func @transform_7(%arg0: i32) -> (i32, i32) {
    %c0_i32 = arith.constant 0 : i32
    %c0_i32_0 = arith.constant 0 : i32
    %c0_i32_1 = arith.constant 0 : i32
    return %c0_i32, %c0_i32_0 : i32, i32
  }
  func.func @transform_8(%arg0: i32) -> (i32, i32) {
    %c0_i32 = arith.constant 0 : i32
    %c0_i32_0 = arith.constant 0 : i32
    %c0_i32_1 = arith.constant 0 : i32
    return %c0_i32, %c0_i32_0 : i32, i32
  }
  func.func @transform_9(%arg0: i32) -> (i32, i32) {
    %c0_i32 = arith.constant 0 : i32
    %c0_i32_0 = arith.constant 0 : i32
    %c0_i32_1 = arith.constant 0 : i32
    return %c0_i32, %c0_i32_0 : i32, i32
  }
  func.func @transform_10(%arg0: i32) -> (i32, i32, i32) {
    %c0_i32 = arith.constant 0 : i32
    %c0_i32_0 = arith.constant 0 : i32
    %c0_i32_1 = arith.constant 0 : i32
    %c0_i32_2 = arith.constant 0 : i32
    return %c0_i32, %c0_i32_0, %c0_i32_1 : i32, i32, i32
  }
  func.func @transform_11(%arg0: i32) -> (i32, i32) {
    %c0_i32 = arith.constant 0 : i32
    %c0_i32_0 = arith.constant 0 : i32
    %c0_i32_1 = arith.constant 0 : i32
    return %c0_i32, %c0_i32_0 : i32, i32
  }
  func.func @transform_12(%arg0: i32) -> (i32, i32, i32) {
    %c0_i32 = arith.constant 0 : i32
    %c0_i32_0 = arith.constant 0 : i32
    %c0_i32_1 = arith.constant 0 : i32
    %c0_i32_2 = arith.constant 0 : i32
    return %c0_i32, %c0_i32_0, %c0_i32_1 : i32, i32, i32
  }
  func.func @transform_13(%arg0: i32) -> (i32, i32) {
    %c0_i32 = arith.constant 0 : i32
    %c0_i32_0 = arith.constant 0 : i32
    %c0_i32_1 = arith.constant 0 : i32
    return %c0_i32, %c0_i32_0 : i32, i32
  }
  func.func @transform_14(%arg0: i32) -> (i32, i32) {
    %c0_i32 = arith.constant 0 : i32
    %c0_i32_0 = arith.constant 0 : i32
    %c0_i32_1 = arith.constant 0 : i32
    return %c0_i32, %c0_i32_0 : i32, i32
  }
  func.func @transform_15(%arg0: i32) -> (i32, i32) {
    %c0_i32 = arith.constant 0 : i32
    %c0_i32_0 = arith.constant 0 : i32
    %c0_i32_1 = arith.constant 0 : i32
    return %c0_i32, %c0_i32_0 : i32, i32
  }
  func.func @transform_16(%arg0: i32) -> (i32, i32) {
    %c0_i32 = arith.constant 0 : i32
    %c0_i32_0 = arith.constant 0 : i32
    %c0_i32_1 = arith.constant 0 : i32
    return %c0_i32, %c0_i32_0 : i32, i32
  }
  func.func @transform_17(%arg0: i32) -> (i32, i32) {
    %c0_i32 = arith.constant 0 : i32
    %c0_i32_0 = arith.constant 0 : i32
    %c0_i32_1 = arith.constant 0 : i32
    return %c0_i32, %c0_i32_0 : i32, i32
  }
  func.func @transform_18(%arg0: i32) -> (i32, i32) {
    %c0_i32 = arith.constant 0 : i32
    %c0_i32_0 = arith.constant 0 : i32
    return %arg0, %c0_i32 : i32, i32
  }
}

</mosaic_0001>

<bundles_post_ra>
// kernel: tpu_custom_call.1
= control target key start
LH: loop header
LB: loop body
LE: loop exit
PB: predicated region body
PF: predicated region fallthrough
CT: control target
= control target key end

     0   :  { %s14472_s0 = inlined_call_operand.vmem [shape: f32[128,256], index: 0, kind: input, shape index: {}]   ;;  %s14473_s1 = inlined_call_operand.vmem [shape: f32[9,128,1], index: 1, kind: input, shape index: {}]   ;;  %s14474_s2 = inlined_call_operand.vmem [shape: bf16[256,32], index: 2, kind: input, shape index: {}]   ;;  %s14475_s3 = inlined_call_operand.vmem [shape: f32[1,32], index: 3, kind: input, shape index: {}]   ;;  %s14476_s4 = inlined_call_operand.vmem [shape: bf16[256,32], index: 4, kind: input, shape index: {}]   ;;  %s14477_s5 = inlined_call_operand.vmem [shape: f32[1,32], index: 5, kind: input, shape index: {}]   ;;  %s14478_s6 = inlined_call_operand.vmem [shape: bf16[9,32,32], index: 6, kind: input, shape index: {}]   ;;  %s14479_s7 = inlined_call_operand.vmem [shape: f32[1,32], index: 7, kind: input, shape index: {}]   ;;  %s14480_s8 = inlined_call_operand.vmem [shape: bf16[256,32], index: 8, kind: input, shape index: {}]   ;;  %s14481_s9 = inlined_call_operand.vmem [shape: f32[1,32], index: 9, kind: input, shape index: {}]   ;;  %s14482_s10 = inlined_call_operand.vmem [shape: bf16[9,32,32], index: 10, kind: input, shape index: {}]   ;;  %s14483_s11 = inlined_call_operand.vmem [shape: f32[1,32], index: 11, kind: input, shape index: {}]   ;;  %s14484_s12 = inlined_call_operand.vmem [shape: bf16[9,32,32], index: 12, kind: input, shape index: {}]   ;;  %s14485_s13 = inlined_call_operand.vmem [shape: f32[1,32], index: 13, kind: input, shape index: {}]   ;;  %s14486_s14 = inlined_call_operand.vmem [shape: bf16[32,256], index: 14, kind: input, shape index: {}]   ;;  %s14487_s15 = inlined_call_operand.vmem [shape: bf16[32,256], index: 15, kind: input, shape index: {}]   ;;  %s14488_s16 = inlined_call_operand.vmem [shape: bf16[32,256], index: 16, kind: input, shape index: {}]   ;;  %s14489_s17 = inlined_call_operand.vmem [shape: f32[1,256], index: 17, kind: input, shape index: {}]   ;;  %s14490_s18 = inlined_call_operand.hbm [shape: f32[128,256], index: 18, kind: output, shape index: {}]  }
   0x1   :  { %15020 = sst [smem:[#allocation287_spill]] %s14472_s0 }
   0x2   :  { %15021 = sst [smem:[#allocation288_spill]] %s14473_s1 }
   0x3   :  { %15022 = sst [smem:[#allocation289_spill]] %s14474_s2 }
   0x4   :  { %s15023_s29 = sld [smem:[#allocation288_spill]]  ;;  %v14494_v2 = vmov 0   ;;  %v9485_v3 = vld [vmem:[%s14476_s4 + $0x40] sm:$0xff]   ;;  %v9487_v7 = vld [vmem:[%s14476_s4 + $0x48] sm:$0xff]   ;;  %v9489_v10 = vld [vmem:[%s14476_s4 + $0x50] sm:$0xff]   ;;  %s15024_s25 = sld [smem:[#allocation287_spill]] }
   0x5   :  { %9484 = vset.pattern.permute.xlu1 %v14494_v2  ;;  %9483 = vset.pattern.permute.xlu0 %v14494_v2  ;;  %v9486_v4 = vld [vmem:[%s14476_s4] sm:$0xff]   ;;  %v9488_v8 = vld [vmem:[%s14476_s4 + $0x8] sm:$0xff]   ;;  %v9490_v12 = vld [vmem:[%s14476_s4 + $0x10] sm:$0xff]   ;;  %s15025_s27 = sld [smem:[#allocation289_spill]] }
   0x6   :  { %8089 = vmatprep.subr.bf16.mxu1 %v9485_v3  ;;  %v9491_v13 = vld [vmem:[%s14476_s4 + $0x58] sm:$0xff]   ;;  %v9493_v17 = vld [vmem:[%s14476_s4 + $0x60] sm:$0xff]   ;;  %v9495_v21 = vld [vmem:[%s14476_s4 + $0x68] sm:$0xff]  }
   0x7   :  { %8090 = vmatpush3.bf16.msra.mxu1 %v9486_v4  ;;  %v9492_v16 = vld [vmem:[%s14476_s4 + $0x18] sm:$0xff]   ;;  %v9494_v20 = vld [vmem:[%s14476_s4 + $0x20] sm:$0xff]   ;;  %v9496_v24 = vld [vmem:[%s14476_s4 + $0x28] sm:$0xff]  }
   0x8   :  { %8091 = vmatprep.subr.bf16.mxu1 %v9487_v7  ;;  %v9497_v25 = vld [vmem:[%s14476_s4 + $0x70] sm:$0xff]   ;;  %v9499_v32 = vld [vmem:[%s14476_s4 + $0x78] sm:$0xff]   ;;  %v9501_v38 = vld [vmem:[%s14480_s8 + $0x40] sm:$0xff]  }
   0x9   :  { %v9498_v31 = vld [vmem:[%s14476_s4 + $0x30] sm:$0xff]   ;;  %v9500_v35 = vld [vmem:[%s14476_s4 + $0x38] sm:$0xff]   ;;  %v9502_v44 = vld [vmem:[%s14480_s8] sm:$0xff]  }
   0xa   :  { %v7477_v0 = vld [vmem:[%s15023_s29 + $0x90] sm:$0xff]  ;;  %v7475_v1 = vld [vmem:[%s15023_s29 + $0x80] sm:$0xff]  ;;  %v7478_v5 = vld [vmem:[%s15023_s29 + $0x98] sm:$0xff] }
   0xb   :  { %793 = vperm.xlu1 %9484, %v7477_v0   ;;  %783 = vperm.xlu0 %9483, %v7475_v1   ;;  %v7476_v6 = vld [vmem:[%s15023_s29 + $0x88] sm:$0xff]  ;;  %v7479_v11 = vld [vmem:[%s15023_s29 + $0xa0] sm:$0xff]  ;;  %v7482_v14 = vld [vmem:[%s15023_s29 + $0xb8] sm:$0xff] }
   0xc   :  { %v7480_v9 = vld [vmem:[%s15023_s29 + $0xa8] sm:$0xff]  ;;  %8092 = vmatpush3.bf16.msra.mxu1 %v9488_v8  ;;  %v7481_v15 = vld [vmem:[%s15023_s29 + $0xb0] sm:$0xff]  ;;  %v7483_v19 = vld [vmem:[%s15023_s29 + $0xc0] sm:$0xff] }
   0xd   :  { %8093 = vmatprep.subr.bf16.mxu1 %v9489_v10  ;;  %v7484_v18 = vld [vmem:[%s15023_s29 + $0xc8] sm:$0xff]  ;;  %v7486_v22 = vld [vmem:[%s15023_s29 + $0xd8] sm:$0xff]  ;;  %v7485_v23 = vld [vmem:[%s15023_s29 + $0xd0] sm:$0xff] }
   0xe   :  { %v7488_v26 = vld [vmem:[%s15023_s29 + $0xe8] sm:$0xff]  ;;  %v64_v28 = vld [vmem:[%s15024_s25 + $0x18] sm:$0xff]  ;;  %v7487_v29 = vld [vmem:[%s15023_s29 + $0xe0] sm:$0xff] }
   0xf   :  { %798 = vperm.xlu1 %9484, %v7478_v5   ;;  %788 = vperm.xlu0 %9483, %v7476_v6   ;;  %v62_v27 = vld [vmem:[%s15024_s25 + $0x8] sm:$0xff]  ;;  %v7490_v33 = vld [vmem:[%s15023_s29 + $0xf8] sm:$0xff]  ;;  %v7489_v34 = vld [vmem:[%s15023_s29 + $0xf0] sm:$0xff] }
  0x10   :  { %8094 = vmatpush3.bf16.msra.mxu1 %v9490_v12  ;;  %v9850_v30 = vpack.c.bf16 %v64_v28, %v62_v27  ;;  %v61_v36 = vld [vmem:[%s15024_s25] sm:$0xff]  ;;  %v63_v37 = vld [vmem:[%s15024_s25 + $0x10] sm:$0xff]  ;;  %v66_v39 = vld [vmem:[%s15024_s25 + $0x28] sm:$0xff] }
  0x11   :  { %8095 = vmatprep.subr.bf16.mxu1 %v9491_v13  ;;  %v68_v40 = vld [vmem:[%s15024_s25 + $0x38] sm:$0xff]  ;;  %v641_v41 = vld [vmem:[%s15023_s29 + $0x8] sm:$0xff]  ;;  %v640_v42 = vld [vmem:[%s15023_s29] sm:$0xff]  ;;  %v9890_v43 = vpack.c.bf16 %v63_v37, %v61_v36 }
  0x12   :  { %524 = vmatprep.mubr.bf16.mxu1 %v9850_v30  ;;  %276 = vmatprep.mubr.bf16.mxu0 %v9850_v30  ;;  %v9895_v45 = vpack.c.bf16 %v68_v40, %v66_v39  ;;  %v9503_v46 = vld [vmem:[%s14480_s8 + $0x48] sm:$0xff]   ;;  %v643_v47 = vld [vmem:[%s15023_s29 + $0x18] sm:$0xff]  ;;  %v642_v48 = vld [vmem:[%s15023_s29 + $0x10] sm:$0xff] }
  0x13   :  { %808 = vperm.xlu1 %9484, %v7480_v9   ;;  %803 = vperm.xlu0 %9483, %v7479_v11   ;;  %v65_v49 = vld [vmem:[%s15024_s25 + $0x20] sm:$0xff]  ;;  %v67_v50 = vld [vmem:[%s15024_s25 + $0x30] sm:$0xff]  ;;  %v9504_v51 = vld [vmem:[%s14480_s8 + $0x8] sm:$0xff]  }
  0x14   :  { %8096 = vmatpush3.bf16.msra.mxu1 %v9492_v16  ;;  %v70_v52 = vld [vmem:[%s15024_s25 + $0x48] sm:$0xff]  ;;  %v72_v53 = vld [vmem:[%s15024_s25 + $0x58] sm:$0xff]  ;;  %v9505_v54 = vld [vmem:[%s14480_s8 + $0x50] sm:$0xff]   ;;  %v9932_v57 = vpack.c.bf16 %v67_v50, %v65_v49 }
  0x15   :  { %8097 = vmatprep.subr.bf16.mxu1 %v9493_v17  ;;  %v645_v55 = vld [vmem:[%s15023_s29 + $0x28] sm:$0xff]  ;;  %v644_v56 = vld [vmem:[%s15023_s29 + $0x20] sm:$0xff]  ;;  %v9934_v58 = vpack.c.bf16 %v72_v53, %v70_v52  ;;  %v9506_v59 = vld [vmem:[%s14480_s8 + $0x10] sm:$0xff]  }
  0x16   :  { %v9507_v60 = vld [vmem:[%s14480_s8 + $0x58] sm:$0xff]   ;;  %v646_v62 = vld [vmem:[%s15023_s29 + $0x30] sm:$0xff]  ;;  %v69_v63 = vld [vmem:[%s15024_s25 + $0x40] sm:$0xff] }
  0x17   :  { %818 = vperm.xlu1 %9484, %v7482_v14   ;;  %813 = vperm.xlu0 %9483, %v7481_v15   ;;  %v647_v61 = vld [vmem:[%s15023_s29 + $0x38] sm:$0xff]  ;;  %v71_v0 = vld [vmem:[%s15024_s25 + $0x50] sm:$0xff]  ;;  %v74_v3 = vld [vmem:[%s15024_s25 + $0x68] sm:$0xff] }
  0x18   :  { %8098 = vmatpush3.bf16.msra.mxu1 %v9494_v20  ;;  %v9508_v1 = vld [vmem:[%s14480_s8 + $0x18] sm:$0xff]   ;;  %v9509_v5 = vld [vmem:[%s14480_s8 + $0x60] sm:$0xff]   ;;  %v649_v6 = vld [vmem:[%s15023_s29 + $0x48] sm:$0xff]  ;;  %v9974_v8 = vpack.c.bf16 %v71_v0, %v69_v63 }
  0x19   :  { %8099 = vmatprep.subr.bf16.mxu1 %v9495_v21  ;;  %v76_v4 = vld [vmem:[%s15024_s25 + $0x78] sm:$0xff]  ;;  %v648_v7 = vld [vmem:[%s15023_s29 + $0x40] sm:$0xff]  ;;  %v9511_v11 = vld [vmem:[%s14480_s8 + $0x68] sm:$0xff]  }
  0x1a   :  { %v9976_v9 = vpack.c.bf16 %v76_v4, %v74_v3  ;;  %v9510_v10 = vld [vmem:[%s14480_s8 + $0x20] sm:$0xff]   ;;  %v651_v12 = vld [vmem:[%s15023_s29 + $0x58] sm:$0xff]  ;;  %v650_v13 = vld [vmem:[%s15023_s29 + $0x50] sm:$0xff] }
  0x1b   :  { %828 = vperm.xlu1 %9484, %v7484_v18   ;;  %823 = vperm.xlu0 %9483, %v7483_v19   ;;  %v73_v14 = vld [vmem:[%s15024_s25 + $0x60] sm:$0xff]  ;;  %v75_v15 = vld [vmem:[%s15024_s25 + $0x70] sm:$0xff]  ;;  %v9512_v16 = vld [vmem:[%s14480_s8 + $0x28] sm:$0xff]  }
  0x1c   :  { %8100 = vmatpush3.bf16.msra.mxu1 %v9496_v24  ;;  %v78_v17 = vld [vmem:[%s15024_s25 + $0x88] sm:$0xff]  ;;  %v80_v18 = vld [vmem:[%s15024_s25 + $0x98] sm:$0xff]  ;;  %v9513_v19 = vld [vmem:[%s14480_s8 + $0x70] sm:$0xff]  }
  0x1d   :  { %8101 = vmatprep.subr.bf16.mxu1 %v9497_v25  ;;  %v653_v20 = vld [vmem:[%s15023_s29 + $0x68] sm:$0xff]  ;;  %v652_v21 = vld [vmem:[%s15023_s29 + $0x60] sm:$0xff]  ;;  %v9514_v24 = vld [vmem:[%s14480_s8 + $0x30] sm:$0xff]  }
  0x1e   :  { %v9515_v25 = vld [vmem:[%s14480_s8 + $0x78] sm:$0xff]   ;;  %v654_v27 = vld [vmem:[%s15023_s29 + $0x70] sm:$0xff]  ;;  %v77_v28 = vld [vmem:[%s15024_s25 + $0x80] sm:$0xff] }
  0x1f   :  { %838 = vperm.xlu1 %9484, %v7486_v22   ;;  %833 = vperm.xlu0 %9483, %v7485_v23   ;;  %v10016_v22 = vpack.c.bf16 %v75_v15, %v73_v14  ;;  %v10018_v23 = vpack.c.bf16 %v80_v18, %v78_v17  ;;  %v7517_v39 = vld [vmem:[%s15023_s29 + $0x110] sm:$0xff]  ;;  %v81_v40 = vld [vmem:[%s15024_s25 + $0xa0] sm:$0xff]  ;;  %v7522_v50 = vld [vmem:[%s15023_s29 + $0x138] sm:$0xff] }
  0x20   :  { %8102 = vmatpush3.bf16.msra.mxu1 %v9498_v31  ;;  %v9516_v31 = vld [vmem:[%s14480_s8 + $0x38] sm:$0xff]   ;;  %v85_v52 = vld [vmem:[%s15024_s25 + $0xc0] sm:$0xff]  ;;  %v87_v53 = vld [vmem:[%s15024_s25 + $0xd0] sm:$0xff] }
  0x21   :  { %8103 = vmatprep.subr.bf16.mxu1 %v9499_v32  ;;  %v82_v32 = vld [vmem:[%s15024_s25 + $0xa8] sm:$0xff]  ;;  %v7525_v63 = vld [vmem:[%s15023_s29 + $0x150] sm:$0xff]  ;;  %v89_v0 = vld [vmem:[%s15024_s25 + $0xe0] sm:$0xff] }
  0x22   :  { %v7528_v3 = vld [vmem:[%s15023_s29 + $0x168] sm:$0xff]  ;;  %v7527_v4 = vld [vmem:[%s15023_s29 + $0x160] sm:$0xff]  ;;  %v7548_v15 = vld [vmem:[%s15023_s29 + $0x198] sm:$0xff] }
  0x23   :  { %848 = vperm.xlu1 %9484, %v7488_v26   ;;  %843 = vperm.xlu0 %9483, %v7487_v29   ;;  %v655_v26 = vld [vmem:[%s15023_s29 + $0x78] sm:$0xff]  ;;  %v79_v29 = vld [vmem:[%s15024_s25 + $0x90] sm:$0xff]  ;;  %v9520_v14 = vld [vmem:[%s15025_s27 + $0x8] sm:$0xff]  }
  0x24   :  { %8104 = vmatpush3.bf16.msra.mxu1 %v9500_v35  ;;  %v7515_v35 = vld [vmem:[%s15023_s29 + $0x100] sm:$0xff]  ;;  %v10055_v36 = vpack.c.bf16 %v79_v29, %v77_v28  ;;  %v9521_v17 = vld [vmem:[%s15025_s27 + $0x50] sm:$0xff]   ;;  %v7554_v29 = vld [vmem:[%s15023_s29 + $0x1c8] sm:$0xff] }
  0x25   :  { %8243 = vmatprep.subr.bf16.mxu1 %v9501_v38  ;;  %v7518_v38 = vld [vmem:[%s15023_s29 + $0x118] sm:$0xff]  ;;  %v9522_v18 = vld [vmem:[%s15025_s27 + $0x10] sm:$0xff]   ;;  %v9526_v28 = vld [vmem:[%s15025_s27 + $0x20] sm:$0xff]  }
  0x27   :  { %858 = vperm.xlu1 %9484, %v7490_v33   ;;  %853 = vperm.xlu0 %9483, %v7489_v34   ;;  %v84_v33 = vld [vmem:[%s15024_s25 + $0xb8] sm:$0xff]  ;;  %v7516_v34 = vld [vmem:[%s15023_s29 + $0x108] sm:$0xff] }
  0x28   :  { %525 = vmatmul.mubr.bf16.vlgmr.msra.gmra.mrb[0].mxu1 %v9890_v43  ;;  %v10057_v37 = vpack.c.bf16 %v84_v33, %v82_v32  ;;  %v9527_v32 = vld [vmem:[%s15025_s27 + $0x68] sm:$0xff]  }
  0x29   :  { %8244 = vmatpush3.bf16.msra.mxu1 %v9502_v44  ;;  %532 = vmatprep.mubr.bf16.mxu1 %v9895_v45  ;;  %v88_v44 = vld [vmem:[%s15024_s25 + $0xd8] sm:$0xff]  ;;  %v9528_v33 = vld [vmem:[%s15025_s27 + $0x28] sm:$0xff]  }
  0x2a   :  { %8245 = vmatprep.subr.bf16.mxu1 %v9503_v46  ;;  %v7520_v46 = vld [vmem:[%s15023_s29 + $0x128] sm:$0xff] }
  0x2b   :  { %663 = vperm.xlu1 %9484, %v641_v41   ;;  %658 = vperm.xlu0 %9483, %v640_v42   ;;  %v83_v41 = vld [vmem:[%s15024_s25 + $0xb0] sm:$0xff]  ;;  %v86_v42 = vld [vmem:[%s15024_s25 + $0xc8] sm:$0xff] }
  0x2c   :  { %v10087_v49 = vpack.c.bf16 %v88_v44, %v86_v42  ;;  %v9531_v42 = vld [vmem:[%s15025_s27 + $0x78] sm:$0xff]  }
  0x2d   :  { %8246 = vmatpush3.bf16.msra.mxu1 %v9504_v51  ;;  %v7521_v51 = vld [vmem:[%s15023_s29 + $0x130] sm:$0xff]  ;;  %v9532_v44 = vld [vmem:[%s15025_s27 + $0x38] sm:$0xff]  }
  0x2e   :  { %8247 = vmatprep.subr.bf16.mxu1 %v9505_v54  ;;  %v90_v54 = vld [vmem:[%s15024_s25 + $0xe8] sm:$0xff] }
  0x2f   :  { %673 = vperm.xlu1 %9484, %v643_v47   ;;  %668 = vperm.xlu0 %9483, %v642_v48   ;;  %v7519_v47 = vld [vmem:[%s15023_s29 + $0x120] sm:$0xff]  ;;  %v10085_v48 = vpack.c.bf16 %v83_v41, %v81_v40  ;;  %v7558_v40 = vld [vmem:[%s15023_s29 + $0x1e8] sm:$0xff] }
  0x30   :  { %533 = vmatmul.mubr.bf16.gmra.mrb[4].mxu1 %v9932_v57  ;;  %v7557_v41 = vld [vmem:[%s15023_s29 + $0x1e0] sm:$0xff] }
  0x31   :  { %540 = vmatprep.mubr.bf16.mxu1 %v9934_v58  ;;  %8248 = vmatpush3.bf16.msra.mxu1 %v9506_v59  ;;  %v7523_v59 = vld [vmem:[%s15023_s29 + $0x140] sm:$0xff] }
  0x32   :  { %8249 = vmatprep.subr.bf16.mxu1 %v9507_v60  ;;  %v10115_v60 = vpack.c.bf16 %v87_v53, %v85_v52 }
  0x33   :  { %683 = vperm.xlu1 %9484, %v645_v55   ;;  %678 = vperm.xlu0 %9483, %v644_v56   ;;  %v7524_v55 = vld [vmem:[%s15023_s29 + $0x148] sm:$0xff]  ;;  %v92_v56 = vld [vmem:[%s15024_s25 + $0xf8] sm:$0xff] }
  0x35   :  { %8250 = vmatpush3.bf16.msra.mxu1 %v9508_v1  ;;  %v91_v1 = vld [vmem:[%s15024_s25 + $0xf0] sm:$0xff] }
  0x36   :  { %8251 = vmatprep.subr.bf16.mxu1 %v9509_v5  ;;  %v10139_v5 = vpack.c.bf16 %v91_v1, %v89_v0  ;;  %v7582_v0 = vld [vmem:[%s15023_s29 + $0x238] sm:$0xff]  ;;  %v7581_v1 = vld [vmem:[%s15023_s29 + $0x230] sm:$0xff] }
  0x37   :  { %693 = vperm.xlu1 %9484, %v647_v61   ;;  %688 = vperm.xlu0 %9483, %v646_v62   ;;  %v10117_v61 = vpack.c.bf16 %v92_v56, %v90_v54  ;;  %v7526_v62 = vld [vmem:[%s15023_s29 + $0x158] sm:$0xff]  ;;  %v7580_v56 = vld [vmem:[%s15023_s29 + $0x228] sm:$0xff] }
  0x38   :  { %541 = vmatmul.mubr.bf16.gmra.mrb[8].mxu1 %v9974_v8  ;;  %v7578_v54 = vld [vmem:[%s15023_s29 + $0x218] sm:$0xff] }
  0x39   :  { %548 = vmatprep.mubr.bf16.mxu1 %v9976_v9  ;;  %8252 = vmatpush3.bf16.msra.mxu1 %v9510_v10  ;;  %v9517_v10 = vld [vmem:[%s15025_s27 + $0x40] sm:$0xff]  }
  0x3a   :  { %8253 = vmatprep.subr.bf16.mxu1 %v9511_v11  ;;  %v9518_v11 = vld [vmem:[%s15025_s27] sm:$0xff]   ;;  %8025 = vmatprep.subr.bf16.mxu0 %v9517_v10 }
  0x3b   :  { %703 = vperm.xlu1 %9484, %v649_v6   ;;  %698 = vperm.xlu0 %9483, %v648_v7   ;;  %v7530_v6 = vld [vmem:[%s15023_s29 + $0x178] sm:$0xff]  ;;  %v7529_v7 = vld [vmem:[%s15023_s29 + $0x170] sm:$0xff] }
  0x3c   :  { %8026 = vmatpush3.bf16.msra.mxu0 %v9518_v11 }
  0x3d   :  { %8254 = vmatpush3.bf16.msra.mxu1 %v9512_v16  ;;  %v7547_v16 = vld [vmem:[%s15023_s29 + $0x190] sm:$0xff] }
  0x3e   :  { %8255 = vmatprep.subr.bf16.mxu1 %v9513_v19  ;;  %v7550_v19 = vld [vmem:[%s15023_s29 + $0x1a8] sm:$0xff] }
  0x3f   :  { %713 = vperm.xlu1 %9484, %v651_v12   ;;  %708 = vperm.xlu0 %9483, %v650_v13   ;;  %v7546_v12 = vld [vmem:[%s15023_s29 + $0x188] sm:$0xff]  ;;  %v7545_v13 = vld [vmem:[%s15023_s29 + $0x180] sm:$0xff] }
  0x40   :  { %549 = vmatmul.mubr.bf16.gmra.mrb[12].mxu1 %v10016_v22 }
  0x41   :  { %556 = vmatprep.mubr.bf16.mxu1 %v10018_v23  ;;  %8256 = vmatpush3.bf16.msra.mxu1 %v9514_v24  ;;  %v9524_v24 = vld [vmem:[%s15025_s27 + $0x18] sm:$0xff]  }
  0x42   :  { %8257 = vmatprep.subr.bf16.mxu1 %v9515_v25  ;;  %v7552_v25 = vld [vmem:[%s15023_s29 + $0x1b8] sm:$0xff] }
  0x43   :  { %723 = vperm.xlu1 %9484, %v653_v20   ;;  %718 = vperm.xlu0 %9483, %v652_v21   ;;  %v7549_v20 = vld [vmem:[%s15023_s29 + $0x1a0] sm:$0xff]  ;;  %v9523_v21 = vld [vmem:[%s15025_s27 + $0x58] sm:$0xff]  }
  0x45   :  { %8258 = vmatpush3.bf16.msra.mxu1 %v9516_v31  ;;  %v7553_v31 = vld [vmem:[%s15023_s29 + $0x1c0] sm:$0xff] }
  0x47   :  { %733 = vperm.xlu1 %9484, %v655_v26   ;;  %728 = vperm.xlu0 %9483, %v654_v27   ;;  %v7551_v26 = vld [vmem:[%s15023_s29 + $0x1b0] sm:$0xff]  ;;  %v9525_v27 = vld [vmem:[%s15025_s27 + $0x60] sm:$0xff]  }
  0x48   :  { %557 = vmatmul.mubr.bf16.gmra.mrb[16].mxu1 %v10055_v36 }
  0x49   :  { %564 = vmatprep.mubr.bf16.mxu1 %v10057_v37 }
  0x4b   :  { %1214 = vperm.xlu1 %9484, %v7516_v34   ;;  %1209 = vperm.xlu0 %9483, %v7515_v35   ;;  %v7556_v34 = vld [vmem:[%s15023_s29 + $0x1d8] sm:$0xff]  ;;  %v7555_v35 = vld [vmem:[%s15023_s29 + $0x1d0] sm:$0xff] }
  0x4f   :  { %1224 = vperm.xlu1 %9484, %v7518_v38   ;;  %1219 = vperm.xlu0 %9483, %v7517_v39   ;;  %v9529_v38 = vld [vmem:[%s15025_s27 + $0x70] sm:$0xff]  }
  0x50   :  { %565 = vmatmul.mubr.bf16.gmra.mrb[20].mxu1 %v10085_v48  ;;  %v9530_v39 = vld [vmem:[%s15025_s27 + $0x30] sm:$0xff]  }
  0x51   :  { %572 = vmatprep.mubr.bf16.mxu1 %v10087_v49 }
  0x53   :  { %1234 = vperm.xlu1 %9484, %v7520_v46   ;;  %1229 = vperm.xlu0 %9483, %v7519_v47   ;;  %v7560_v46 = vld [vmem:[%s15023_s29 + $0x1f8] sm:$0xff]  ;;  %v7559_v47 = vld [vmem:[%s15023_s29 + $0x1f0] sm:$0xff] }
  0x57   :  { %1244 = vperm.xlu1 %9484, %v7522_v50   ;;  %1239 = vperm.xlu0 %9483, %v7521_v51   ;;  %v7576_v50 = vld [vmem:[%s15023_s29 + $0x208] sm:$0xff]  ;;  %v7575_v51 = vld [vmem:[%s15023_s29 + $0x200] sm:$0xff] }
  0x58   :  { %573 = vmatmul.mubr.bf16.gmra.mrb[24].mxu1 %v10115_v60 }
  0x59   :  { %580 = vmatprep.mubr.bf16.mxu1 %v10117_v61 }
  0x5b   :  { %1254 = vperm.xlu1 %9484, %v7524_v55   ;;  %1249 = vperm.xlu0 %9483, %v7523_v59   ;;  %v7577_v55 = vld [vmem:[%s15023_s29 + $0x210] sm:$0xff]  ;;  %v7579_v59 = vld [vmem:[%s15023_s29 + $0x220] sm:$0xff] }
  0x5f   :  { %1264 = vperm.xlu1 %9484, %v7526_v62   ;;  %1259 = vperm.xlu0 %9483, %v7525_v63  }
  0x60   :  { %581 = vmatmul.mubr.bf16.gmra.mrb[28].mxu1 %v10139_v5 }
  0x61   :  { %3321 = vmatprep.mubr.bf16.mxu1 %v9850_v30  ;;  %v9519_v30 = vld [vmem:[%s15025_s27 + $0x48] sm:$0xff]  }
  0x62   :  { %8027 = vmatprep.subr.bf16.mxu0 %v9519_v30 }
  0x63   :  { %1274 = vperm.xlu1 %9484, %v7528_v3   ;;  %1269 = vperm.xlu0 %9483, %v7527_v4   ;;  %v7584_v3 = vld [vmem:[%s15023_s29 + $0x248] sm:$0xff]  ;;  %v7583_v4 = vld [vmem:[%s15023_s29 + $0x240] sm:$0xff] }
  0x64   :  { %8028 = vmatpush3.bf16.msra.mxu0 %v9520_v14 }
  0x65   :  { %8029 = vmatprep.subr.bf16.mxu0 %v9521_v17 }
  0x67   :  { %1284 = vperm.xlu1 %9484, %v7530_v6   ;;  %1279 = vperm.xlu0 %9483, %v7529_v7  }
  0x68   :  { %3322 = vmatmul.mubr.bf16.vlgmr.msra.gmra.mrb[32].mxu1 %v9890_v43  ;;  %8030 = vmatpush3.bf16.msra.mxu0 %v9522_v18 }
  0x69   :  { %3329 = vmatprep.mubr.bf16.mxu1 %v9895_v45  ;;  %8031 = vmatprep.subr.bf16.mxu0 %v9523_v21 }
  0x6b   :  { %1489 = vperm.xlu1 %9484, %v7546_v12   ;;  %1484 = vperm.xlu0 %9483, %v7545_v13  }
  0x6c   :  { %8032 = vmatpush3.bf16.msra.mxu0 %v9524_v24 }
  0x6d   :  { %8033 = vmatprep.subr.bf16.mxu0 %v9525_v27 }
  0x6f   :  { %1499 = vperm.xlu1 %9484, %v7548_v15   ;;  %1494 = vperm.xlu0 %9483, %v7547_v16  }
  0x70   :  { %3330 = vmatmul.mubr.bf16.gmra.mrb[36].mxu1 %v9932_v57  ;;  %8034 = vmatpush3.bf16.msra.mxu0 %v9526_v28 }
  0x71   :  { %3337 = vmatprep.mubr.bf16.mxu1 %v9934_v58  ;;  %8035 = vmatprep.subr.bf16.mxu0 %v9527_v32 }
  0x73   :  { %1509 = vperm.xlu1 %9484, %v7550_v19   ;;  %1504 = vperm.xlu0 %9483, %v7549_v20  }
  0x74   :  { %8036 = vmatpush3.bf16.msra.mxu0 %v9528_v33 }
  0x75   :  { %8037 = vmatprep.subr.bf16.mxu0 %v9529_v38 }
  0x77   :  { %1519 = vperm.xlu1 %9484, %v7552_v25   ;;  %1514 = vperm.xlu0 %9483, %v7551_v26  }
  0x78   :  { %3338 = vmatmul.mubr.bf16.gmra.mrb[40].mxu1 %v9974_v8  ;;  %8038 = vmatpush3.bf16.msra.mxu0 %v9530_v39 }
  0x79   :  { %3345 = vmatprep.mubr.bf16.mxu1 %v9976_v9  ;;  %8039 = vmatprep.subr.bf16.mxu0 %v9531_v42 }
  0x7b   :  { %1529 = vperm.xlu1 %9484, %v7554_v29   ;;  %1524 = vperm.xlu0 %9483, %v7553_v31  }
  0x7c   :  { %8040 = vmatpush3.bf16.msra.mxu0 %v9532_v44 }
  0x7f   :  { %1539 = vperm.xlu1 %9484, %v7556_v34   ;;  %1534 = vperm.xlu0 %9483, %v7555_v35  }
  0x80   :  { %3346 = vmatmul.mubr.bf16.gmra.mrb[44].mxu1 %v10016_v22  ;;  %277 = vmatmul.mubr.bf16.vlgmr.msra.gmra.mrb[0].mxu0 %v9890_v43 }
  0x81   :  { %3353 = vmatprep.mubr.bf16.mxu1 %v10018_v23  ;;  %284 = vmatprep.mubr.bf16.mxu0 %v9895_v45 }
  0x83   :  { %1549 = vperm.xlu1 %9484, %v7558_v40   ;;  %1544 = vperm.xlu0 %9483, %v7557_v41  }
  0x87   :  { %1559 = vperm.xlu1 %9484, %v7560_v46   ;;  %1554 = vperm.xlu0 %9483, %v7559_v47  }
  0x88   :  { %3354 = vmatmul.mubr.bf16.gmra.mrb[48].mxu1 %v10055_v36  ;;  %285 = vmatmul.mubr.bf16.gmra.mrb[4].mxu0 %v9932_v57 }
  0x89   :  { %3361 = vmatprep.mubr.bf16.mxu1 %v10057_v37  ;;  %292 = vmatprep.mubr.bf16.mxu0 %v9934_v58 }
  0x8a   :  { %v10261_v52 = vpop.permute.xlu1 %793  ;;  %v10263_v53 = vpop.permute.xlu0 %783 }
  0x8b   :  { %15026 = vst [vmem:[#allocation5_spill] sm:$0xff] %v10261_v52  ;;  %15027 = vst [vmem:[#allocation6_spill] sm:$0xff] %v10263_v53  ;;  %1764 = vperm.xlu1 %9484, %v7576_v50   ;;  %1759 = vperm.xlu0 %9483, %v7575_v51  }
  0x8e   :  { %v10273_v43 = vpop.permute.xlu1 %798  ;;  %v10275_v45 = vpop.permute.xlu0 %788 }
  0x8f   :  { %15028 = vst [vmem:[#allocation7_spill] sm:$0xff] %v10273_v43  ;;  %15029 = vst [vmem:[#allocation8_spill] sm:$0xff] %v10275_v45  ;;  %1774 = vperm.xlu1 %9484, %v7578_v54   ;;  %1769 = vperm.xlu0 %9483, %v7577_v55  }
  0x90   :  { %3362 = vmatmul.mubr.bf16.gmra.mrb[52].mxu1 %v10085_v48  ;;  %293 = vmatmul.mubr.bf16.gmra.mrb[8].mxu0 %v9974_v8 }
  0x91   :  { %3369 = vmatprep.mubr.bf16.mxu1 %v10087_v49  ;;  %300 = vmatprep.mubr.bf16.mxu0 %v9976_v9 }
  0x92   :  { %v10285_v62 = vpop.permute.xlu1 %808  ;;  %v10287_v63 = vpop.permute.xlu0 %803 }
  0x93   :  { %15030 = vst [vmem:[#allocation9_spill] sm:$0xff] %v10285_v62  ;;  %15031 = vst [vmem:[#allocation10_spill] sm:$0xff] %v10287_v63  ;;  %1784 = vperm.xlu1 %9484, %v7580_v56   ;;  %1779 = vperm.xlu0 %9483, %v7579_v59  }
  0x96   :  { %v10297_v57 = vpop.permute.xlu1 %818  ;;  %v10299_v58 = vpop.permute.xlu0 %813 }
  0x97   :  { %15032 = vst [vmem:[#allocation11_spill] sm:$0xff] %v10297_v57  ;;  %15033 = vst [vmem:[#allocation12_spill] sm:$0xff] %v10299_v58  ;;  %1794 = vperm.xlu1 %9484, %v7582_v0   ;;  %1789 = vperm.xlu0 %9483, %v7581_v1  }
  0x98   :  { %23 = vsyncpa [#allocation3], 0  ;;  %3370 = vmatmul.mubr.bf16.gmra.mrb[56].mxu1 %v10115_v60  ;;  %v7586_v10 = vld [vmem:[%s15023_s29 + $0x258] sm:$0xff]  ;;  %v7585_v11 = vld [vmem:[%s15023_s29 + $0x250] sm:$0xff]  ;;  %301 = vmatmul.mubr.bf16.gmra.mrb[12].mxu0 %v10016_v22  ;;  %vm902_vm2 = vcmask 261120  }
  0x99   :  { %3377 = vmatprep.mubr.bf16.mxu1 %v10117_v61  ;;  %v7588_v12 = vld [vmem:[%s15023_s29 + $0x268] sm:$0xff]  ;;  %v7587_v13 = vld [vmem:[%s15023_s29 + $0x260] sm:$0xff]  ;;  %308 = vmatprep.mubr.bf16.mxu0 %v10018_v23  ;;  %v7590_v15 = vld [vmem:[%s15023_s29 + $0x278] sm:$0xff] }
  0x9a   :  { %v10309_v6 = vpop.permute.xlu1 %828  ;;  %v10311_v7 = vpop.permute.xlu0 %823  ;;  %v7589_v16 = vld [vmem:[%s15023_s29 + $0x270] sm:$0xff]  ;;  %v7606_v23 = vld [vmem:[%s15023_s29 + $0x288] sm:$0xff]  ;;  %v7605_v18 = vld [vmem:[%s15023_s29 + $0x280] sm:$0xff] }
  0x9b   :  { %15034 = vst [vmem:[#allocation13_spill] sm:$0xff] %v10309_v6  ;;  %15035 = vst [vmem:[#allocation14_spill] sm:$0xff] %v10311_v7  ;;  %1804 = vperm.xlu1 %9484, %v7584_v3   ;;  %1799 = vperm.xlu0 %9483, %v7583_v4   ;;  %v7608_v21 = vld [vmem:[%s15023_s29 + $0x298] sm:$0xff]  ;;  %v7607_v24 = vld [vmem:[%s15023_s29 + $0x290] sm:$0xff] }
  0x9c   :  { %v7612_v29 = vld [vmem:[%s15023_s29 + $0x2b8] sm:$0xff]  ;;  %v7611_v31 = vld [vmem:[%s15023_s29 + $0x2b0] sm:$0xff]  ;;  %v7618_v41 = vld [vmem:[%s15023_s29 + $0x2e8] sm:$0xff] }
  0x9d   :  { %v7616_v38 = vld [vmem:[%s15023_s29 + $0x2d8] sm:$0xff]  ;;  %v7615_v39 = vld [vmem:[%s15023_s29 + $0x2d0] sm:$0xff]  ;;  %v7617_v42 = vld [vmem:[%s15023_s29 + $0x2e0] sm:$0xff] }
  0x9e   :  { %v10321_v8 = vpop.permute.xlu1 %838  ;;  %v10323_v9 = vpop.permute.xlu0 %833  ;;  %v9534_v44 = vld [vmem:[%s14478_s6 + $0x18] sm:$0xff]   ;;  %v7636_v55 = vld [vmem:[%s15023_s29 + $0x308] sm:$0xff]  ;;  %v7635_v56 = vld [vmem:[%s15023_s29 + $0x300] sm:$0xff] }
  0x9f   :  { %15036 = vst [vmem:[#allocation15_spill] sm:$0xff] %v10321_v8  ;;  %15037 = vst [vmem:[#allocation16_spill] sm:$0xff] %v10323_v9  ;;  %1814 = vperm.xlu1 %9484, %v7586_v10   ;;  %1809 = vperm.xlu0 %9483, %v7585_v11   ;;  %v7620_v50 = vld [vmem:[%s15023_s29 + $0x2f8] sm:$0xff]  ;;  %v9535_v1 = vld [vmem:[%s14482_s10 + $0x10] sm:$0xff]  }
  0xa0   :  { %3378 = vmatmul.mubr.bf16.gmra.mrb[60].mxu1 %v10139_v5  ;;  %309 = vmatmul.mubr.bf16.gmra.mrb[16].mxu0 %v10055_v36  ;;  %v7610_v36 = vld [vmem:[%s15023_s29 + $0x2a8] sm:$0xff]  ;;  %v7638_v3 = vld [vmem:[%s15023_s29 + $0x318] sm:$0xff]  ;;  %v7637_v4 = vld [vmem:[%s15023_s29 + $0x310] sm:$0xff] }
  0xa1   :  { %316 = vmatprep.mubr.bf16.mxu0 %v10057_v37  ;;  %v7609_v37 = vld [vmem:[%s15023_s29 + $0x2a0] sm:$0xff]  ;;  %8667 = vmatprep.subr.bf16.mxu1 %v9535_v1  ;;  %v7676_v2 = vld [vmem:[%s15023_s29 + $0x3d8] sm:$0xff] }
  0xa2   :  { %v10333_v30 = vpop.permute.xlu1 %848  ;;  %v10335_v14 = vpop.permute.xlu0 %843  ;;  %8668 = vmatpush3.bf16.msra.mxu1 %v9535_v1 }
  0xa3   :  { %15038 = vst [vmem:[#allocation17_spill] sm:$0xff] %v10333_v30  ;;  %15039 = vst [vmem:[#allocation18_spill] sm:$0xff] %v10335_v14  ;;  %1824 = vperm.xlu1 %9484, %v7588_v12   ;;  %1819 = vperm.xlu0 %9483, %v7587_v13   ;;  %v7640_v12 = vld [vmem:[%s15023_s29 + $0x328] sm:$0xff]  ;;  %v7639_v13 = vld [vmem:[%s15023_s29 + $0x320] sm:$0xff] }
  0xa6   :  { %v10344_v17 = vpop.permute.xlu1 %858  ;;  %v10346_v22 = vpop.permute.xlu0 %853 }
  0xa7   :  { %15040 = vst [vmem:[#allocation19_spill] sm:$0xff] %v10344_v17  ;;  %15041 = vst [vmem:[#allocation20_spill] sm:$0xff] %v10346_v22  ;;  %1834 = vperm.xlu1 %9484, %v7590_v15   ;;  %1829 = vperm.xlu0 %9483, %v7589_v16  }
  0xa8   :  { %317 = vmatmul.mubr.bf16.gmra.mrb[20].mxu0 %v10085_v48  ;;  %v7614_v48 = vld [vmem:[%s15023_s29 + $0x2c8] sm:$0xff] }
  0xa9   :  { %324 = vmatprep.mubr.bf16.mxu0 %v10087_v49  ;;  %v7613_v49 = vld [vmem:[%s15023_s29 + $0x2c0] sm:$0xff] }
  0xaa   :  { %v10356_v19 = vpop.permute.xlu1 %663  ;;  %v10358_v20 = vpop.permute.xlu0 %658 }
  0xab   :  { %15042 = vst [vmem:[#allocation21_spill] sm:$0xff] %v10356_v19  ;;  %15043 = vst [vmem:[#allocation22_spill] sm:$0xff] %v10358_v20  ;;  %2039 = vperm.xlu1 %9484, %v7606_v23   ;;  %2034 = vperm.xlu0 %9483, %v7605_v18   ;;  %v7642_v23 = vld [vmem:[%s15023_s29 + $0x338] sm:$0xff]  ;;  %v7641_v18 = vld [vmem:[%s15023_s29 + $0x330] sm:$0xff] }
  0xae   :  { %v10366_v25 = vpop.permute.xlu1 %673  ;;  %v10368_v26 = vpop.permute.xlu0 %668 }
  0xaf   :  { %15044 = vst [vmem:[#allocation23_spill] sm:$0xff] %v10366_v25  ;;  %15045 = vst [vmem:[#allocation24_spill] sm:$0xff] %v10368_v26  ;;  %2049 = vperm.xlu1 %9484, %v7608_v21   ;;  %2044 = vperm.xlu0 %9483, %v7607_v24  }
  0xb0   :  { %325 = vmatmul.mubr.bf16.gmra.mrb[24].mxu0 %v10115_v60  ;;  %v9533_v60 = vld [vmem:[%s14478_s6 + $0x10] sm:$0xff]  }
  0xb1   :  { %332 = vmatprep.mubr.bf16.mxu0 %v10117_v61  ;;  %8487 = vmatprep.subr.bf16.mxu0 %v9533_v60 }
  0xb2   :  { %v10378_v27 = vpop.permute.xlu1 %683  ;;  %v10380_v28 = vpop.permute.xlu0 %678  ;;  %8488 = vmatpush3.bf16.msra.mxu0 %v9533_v60  ;;  %v7648_v60 = vld [vmem:[%s15023_s29 + $0x368] sm:$0xff] }
  0xb3   :  { %15046 = vst [vmem:[#allocation25_spill] sm:$0xff] %v10378_v27  ;;  %15047 = vst [vmem:[#allocation26_spill] sm:$0xff] %v10380_v28  ;;  %2059 = vperm.xlu1 %9484, %v7610_v36   ;;  %2054 = vperm.xlu0 %9483, %v7609_v37   ;;  %v7644_v36 = vld [vmem:[%s15023_s29 + $0x348] sm:$0xff]  ;;  %v7643_v37 = vld [vmem:[%s15023_s29 + $0x340] sm:$0xff] }
  0xb4   :  { %8489 = vmatprep.subr.bf16.mxu0 %v9534_v44 }
  0xb6   :  { %v10388_v32 = vpop.permute.xlu1 %693  ;;  %v10390_v33 = vpop.permute.xlu0 %688  ;;  %8490 = vmatpush3.bf16.msra.mxu0 %v9534_v44 }
  0xb7   :  { %15048 = vst [vmem:[#allocation27_spill] sm:$0xff] %v10388_v32  ;;  %15049 = vst [vmem:[#allocation28_spill] sm:$0xff] %v10390_v33  ;;  %2069 = vperm.xlu1 %9484, %v7612_v29   ;;  %2064 = vperm.xlu0 %9483, %v7611_v31  }
  0xb8   :  { %333 = vmatmul.mubr.bf16.gmra.mrb[28].mxu0 %v10139_v5  ;;  %v7619_v5 = vld [vmem:[%s15023_s29 + $0x2f0] sm:$0xff] }
  0xba   :  { %v10400_v34 = vpop.permute.xlu1 %703  ;;  %v10402_v35 = vpop.permute.xlu0 %698 }
  0xbb   :  { %15050 = vst [vmem:[#allocation29_spill] sm:$0xff] %v10400_v34  ;;  %15051 = vst [vmem:[#allocation30_spill] sm:$0xff] %v10402_v35  ;;  %2079 = vperm.xlu1 %9484, %v7614_v48   ;;  %2074 = vperm.xlu0 %9483, %v7613_v49   ;;  %v7646_v48 = vld [vmem:[%s15023_s29 + $0x358] sm:$0xff]  ;;  %v7645_v49 = vld [vmem:[%s15023_s29 + $0x350] sm:$0xff] }
  0xbe   :  { %v10413_v40 = vpop.permute.xlu1 %713  ;;  %v10415_v61 = vpop.permute.xlu0 %708 }
  0xbf   :  { %15052 = vst [vmem:[#allocation31_spill] sm:$0xff] %v10413_v40  ;;  %15053 = vst [vmem:[#allocation32_spill] sm:$0xff] %v10415_v61  ;;  %2089 = vperm.xlu1 %9484, %v7616_v38   ;;  %2084 = vperm.xlu0 %9483, %v7615_v39  }
  0xc2   :  { %v10427_v46 = vpop.permute.xlu1 %723  ;;  %v10429_v47 = vpop.permute.xlu0 %718 }
  0xc3   :  { %15054 = vst [vmem:[#allocation33_spill] sm:$0xff] %v10427_v46  ;;  %15055 = vst [vmem:[#allocation34_spill] sm:$0xff] %v10429_v47  ;;  %2099 = vperm.xlu1 %9484, %v7618_v41   ;;  %2094 = vperm.xlu0 %9483, %v7617_v42   ;;  %v7647_v41 = vld [vmem:[%s15023_s29 + $0x360] sm:$0xff] }
  0xc4   :  { %v10513_v42 = vld [vmem:[%s14478_s6] sm:$0xff]  }
  0xc5   :  { %8507 = vmatprep.subr.bf16.mxu0 %v10513_v42 }
  0xc6   :  { %v10437_v51 = vpop.permute.xlu1 %733  ;;  %v10439_v54 = vpop.permute.xlu0 %728 }
  0xc7   :  { %15056 = vst [vmem:[#allocation35_spill] sm:$0xff] %v10437_v51  ;;  %15057 = vst [vmem:[#allocation36_spill] sm:$0xff] %v10439_v54  ;;  %2109 = vperm.xlu1 %9484, %v7620_v50   ;;  %2104 = vperm.xlu0 %9483, %v7619_v5   ;;  %v7650_v5 = vld [vmem:[%s15023_s29 + $0x378] sm:$0xff]  ;;  %v7701_v51 = vld [vmem:[%s15023_s29 + $0x430] sm:$0xff] }
  0xca   :  { %v10447_v59 = vpop.permute.xlu1 %1214  ;;  %v10449_v0 = vpop.permute.xlu0 %1209 }
  0xcb   :  { %15058 = vst [vmem:[#allocation37_spill] sm:$0xff] %v10447_v59  ;;  %15059 = vst [vmem:[#allocation38_spill] sm:$0xff] %v10449_v0  ;;  %2314 = vperm.xlu1 %9484, %v7636_v55   ;;  %2309 = vperm.xlu0 %9483, %v7635_v56   ;;  %v7649_v55 = vld [vmem:[%s15023_s29 + $0x370] sm:$0xff] }
  0xce   :  { %v10460_v10 = vpop.permute.xlu1 %1224  ;;  %v10462_v11 = vpop.permute.xlu0 %1219 }
  0xcf   :  { %15060 = vst [vmem:[#allocation39_spill] sm:$0xff] %v10460_v10  ;;  %15061 = vst [vmem:[#allocation40_spill] sm:$0xff] %v10462_v11  ;;  %2324 = vperm.xlu1 %9484, %v7638_v3   ;;  %2319 = vperm.xlu0 %9483, %v7637_v4   ;;  %v7666_v3 = vld [vmem:[%s15023_s29 + $0x388] sm:$0xff]  ;;  %v7665_v4 = vld [vmem:[%s15023_s29 + $0x380] sm:$0xff] }
  0xd2   :  { %v10470_v15 = vpop.permute.xlu1 %1234  ;;  %v10472_v16 = vpop.permute.xlu0 %1229 }
  0xd3   :  { %15062 = vst [vmem:[#allocation41_spill] sm:$0xff] %v10470_v15  ;;  %15063 = vst [vmem:[#allocation42_spill] sm:$0xff] %v10472_v16  ;;  %2334 = vperm.xlu1 %9484, %v7640_v12   ;;  %2329 = vperm.xlu0 %9483, %v7639_v13  }
  0xd6   :  { %v10480_v21 = vpop.permute.xlu1 %1244  ;;  %v10482_v24 = vpop.permute.xlu0 %1239 }
  0xd7   :  { %15064 = vst [vmem:[#allocation43_spill] sm:$0xff] %v10480_v21  ;;  %15065 = vst [vmem:[#allocation44_spill] sm:$0xff] %v10482_v24  ;;  %2344 = vperm.xlu1 %9484, %v7642_v23   ;;  %2339 = vperm.xlu0 %9483, %v7641_v18   ;;  %v9538_v23 = vld [vmem:[%s14482_s10 + $0x18] sm:$0xff]  }
  0xd8   :  { %v7668_v18 = vld [vmem:[%s15023_s29 + $0x398] sm:$0xff]  ;;  %8669 = vmatprep.subr.bf16.mxu1 %v9538_v23 }
  0xd9   :  { %8670 = vmatpush3.bf16.msra.mxu1 %v9538_v23 }
  0xda   :  { %v10490_v29 = vpop.permute.xlu1 %1254  ;;  %v10492_v31 = vpop.permute.xlu0 %1249 }
  0xdb   :  { %15066 = vst [vmem:[#allocation45_spill] sm:$0xff] %v10490_v29  ;;  %15067 = vst [vmem:[#allocation46_spill] sm:$0xff] %v10492_v31  ;;  %2354 = vperm.xlu1 %9484, %v7644_v36   ;;  %2349 = vperm.xlu0 %9483, %v7643_v37   ;;  %v7667_v36 = vld [vmem:[%s15023_s29 + $0x390] sm:$0xff] }
  0xdc   :  { %v7709_v29 = vld [vmem:[%s15023_s29 + $0x470] sm:$0xff] }
  0xde   :  { %v10500_v38 = vpop.permute.xlu1 %1264  ;;  %v10502_v39 = vpop.permute.xlu0 %1259 }
  0xdf   :  { %15068 = vst [vmem:[#allocation47_spill] sm:$0xff] %v10500_v38  ;;  %15069 = vst [vmem:[#allocation48_spill] sm:$0xff] %v10502_v39  ;;  %2364 = vperm.xlu1 %9484, %v7646_v48   ;;  %2359 = vperm.xlu0 %9483, %v7645_v49   ;;  %v7670_v49 = vld [vmem:[%s15023_s29 + $0x3a8] sm:$0xff]  ;;  %v7698_v38 = vld [vmem:[%s15023_s29 + $0x418] sm:$0xff] }
  0xe0   :  { %v7705_v39 = vld [vmem:[%s15023_s29 + $0x450] sm:$0xff] }
  0xe2   :  { %v10515_v44 = vpop.permute.xlu1 %1274  ;;  %v10517_v50 = vpop.permute.xlu0 %1269 }
  0xe3   :  { %15070 = vst [vmem:[#allocation49_spill] sm:$0xff] %v10515_v44  ;;  %15071 = vst [vmem:[#allocation50_spill] sm:$0xff] %v10517_v50  ;;  %2374 = vperm.xlu1 %9484, %v7648_v60   ;;  %2369 = vperm.xlu0 %9483, %v7647_v41   ;;  %v7669_v60 = vld [vmem:[%s15023_s29 + $0x3a0] sm:$0xff]  ;;  %v7679_v50 = vld [vmem:[%s15023_s29 + $0x3f0] sm:$0xff] }
  0xe6   :  { %v10526_v56 = vpop.permute.xlu1 %1284  ;;  %v10528_v1 = vpop.permute.xlu0 %1279 }
  0xe7   :  { %15072 = vst [vmem:[#allocation51_spill] sm:$0xff] %v10526_v56  ;;  %15073 = vst [vmem:[#allocation52_spill] sm:$0xff] %v10528_v1  ;;  %2384 = vperm.xlu1 %9484, %v7650_v5   ;;  %2379 = vperm.xlu0 %9483, %v7649_v55   ;;  %v7672_v55 = vld [vmem:[%s15023_s29 + $0x3b8] sm:$0xff] }
  0xea   :  { %v10536_v12 = vpop.permute.xlu1 %1489  ;;  %v10538_v13 = vpop.permute.xlu0 %1484 }
  0xeb   :  { %15074 = vst [vmem:[#allocation53_spill] sm:$0xff] %v10536_v12  ;;  %15075 = vst [vmem:[#allocation54_spill] sm:$0xff] %v10538_v13  ;;  %2589 = vperm.xlu1 %9484, %v7666_v3   ;;  %2584 = vperm.xlu0 %9483, %v7665_v4   ;;  %v7671_v3 = vld [vmem:[%s15023_s29 + $0x3b0] sm:$0xff] }
  0xee   :  { %v10549_v37 = vpop.permute.xlu1 %1499  ;;  %v10551_v48 = vpop.permute.xlu0 %1494 }
  0xef   :  { %15076 = vst [vmem:[#allocation55_spill] sm:$0xff] %v10549_v37  ;;  %15077 = vst [vmem:[#allocation56_spill] sm:$0xff] %v10551_v48  ;;  %2599 = vperm.xlu1 %9484, %v7668_v18   ;;  %2594 = vperm.xlu0 %9483, %v7667_v36   ;;  %v7674_v18 = vld [vmem:[%s15023_s29 + $0x3c8] sm:$0xff]  ;;  %v7673_v36 = vld [vmem:[%s15023_s29 + $0x3c0] sm:$0xff] }
  0xf2   :  { %v10559_v41 = vpop.permute.xlu1 %1509  ;;  %v10561_v5 = vpop.permute.xlu0 %1504 }
  0xf3   :  { %15078 = vst [vmem:[#allocation57_spill] sm:$0xff] %v10559_v41  ;;  %15079 = vst [vmem:[#allocation58_spill] sm:$0xff] %v10561_v5  ;;  %2609 = vperm.xlu1 %9484, %v7670_v49   ;;  %2604 = vperm.xlu0 %9483, %v7669_v60  }
  0xf6   :  { %v10569_v4 = vpop.permute.xlu1 %1519  ;;  %v10571_v23 = vpop.permute.xlu0 %1514 }
  0xf7   :  { %15080 = vst [vmem:[#allocation59_spill] sm:$0xff] %v10569_v4  ;;  %15081 = vst [vmem:[#allocation60_spill] sm:$0xff] %v10571_v23  ;;  %2619 = vperm.xlu1 %9484, %v7672_v55   ;;  %2614 = vperm.xlu0 %9483, %v7671_v3   ;;  %v7675_v55 = vld [vmem:[%s15023_s29 + $0x3d0] sm:$0xff] }
  0xfa   :  { %v10579_v49 = vpop.permute.xlu1 %1529  ;;  %v10581_v60 = vpop.permute.xlu0 %1524 }
  0xfb   :  { %15082 = vst [vmem:[#allocation61_spill] sm:$0xff] %v10579_v49  ;;  %15083 = vst [vmem:[#allocation62_spill] sm:$0xff] %v10581_v60  ;;  %2629 = vperm.xlu1 %9484, %v7674_v18   ;;  %2624 = vperm.xlu0 %9483, %v7673_v36   ;;  %v8105_v23 = vpop.f32.mrb[0].mxu1  ;;  %v7678_v18 = vld [vmem:[%s15023_s29 + $0x3e8] sm:$0xff]  ;;  %v7677_v36 = vld [vmem:[%s15023_s29 + $0x3e0] sm:$0xff] }
  0xfc   :  { %v8106_v1 = vpop.f32.mrb[1].mxu1 }
  0xfd   :  { %v10599_v60 = vadd.f32 %v8106_v1, %v8105_v23  ;;  %v8108_v49 = vpop.f32.mrb[2].mxu1 }
  0xfe   :  { %v10589_v3 = vpop.permute.xlu1 %1539  ;;  %v10591_v13 = vpop.permute.xlu0 %1534 }
  0xff   :  { %15084 = vst [vmem:[#allocation63_spill] sm:$0xff] %v10589_v3  ;;  %15085 = vst [vmem:[#allocation64_spill] sm:$0xff] %v10591_v13  ;;  %2639 = vperm.xlu1 %9484, %v7676_v2   ;;  %2634 = vperm.xlu0 %9483, %v7675_v55   ;;  %v8109_v13 = vpop.f32.mrb[3].mxu1  ;;  %v7680_v55 = vld [vmem:[%s15023_s29 + $0x3f8] sm:$0xff] }
 0x100   :  { %v10605_v2 = vadd.f32 %v8109_v13, %v8108_v49  ;;  %v7696_v13 = vld [vmem:[%s15023_s29 + $0x408] sm:$0xff]  ;;  %v7695_v49 = vld [vmem:[%s15023_s29 + $0x400] sm:$0xff] }
 0x102   :  { %v10601_v56 = vpop.permute.xlu1 %1549  ;;  %v10603_v3 = vpop.permute.xlu0 %1544 }
 0x103   :  { %15086 = vst [vmem:[#allocation65_spill] sm:$0xff] %v10601_v56  ;;  %15087 = vst [vmem:[#allocation66_spill] sm:$0xff] %v10603_v3  ;;  %2649 = vperm.xlu1 %9484, %v7678_v18   ;;  %2644 = vperm.xlu0 %9483, %v7677_v36   ;;  %v8111_v3 = vpop.f32.mrb[4].mxu1 }
 0x104   :  { %v8112_v56 = vpop.f32.mrb[5].mxu1 }
 0x105   :  { %v10623_v18 = vadd.f32 %v8112_v56, %v8111_v3  ;;  %v8114_v36 = vpop.f32.mrb[6].mxu1  ;;  %v7697_v56 = vld [vmem:[%s15023_s29 + $0x410] sm:$0xff] }
 0x106   :  { %v10613_v1 = vpop.permute.xlu1 %1559  ;;  %v10615_v23 = vpop.permute.xlu0 %1554 }
 0x107   :  { %15088 = vst [vmem:[#allocation67_spill] sm:$0xff] %v10613_v1  ;;  %15089 = vst [vmem:[#allocation68_spill] sm:$0xff] %v10615_v23  ;;  %2659 = vperm.xlu1 %9484, %v7680_v55   ;;  %2654 = vperm.xlu0 %9483, %v7679_v50   ;;  %v9541_v1 = vld [vmem:[%s14482_s10] sm:$0xff]   ;;  %v8115_v55 = vpop.f32.mrb[7].mxu1 }
 0x108   :  { %v10632_v44 = vadd.f32 %v8115_v55, %v8114_v36  ;;  %8687 = vmatprep.subr.bf16.mxu1 %v9541_v1  ;;  %v7699_v36 = vld [vmem:[%s15023_s29 + $0x420] sm:$0xff] }
 0x10a   :  { %v10628_v23 = vpop.permute.xlu1 %1764  ;;  %v10630_v50 = vpop.permute.xlu0 %1759 }
 0x10b   :  { %15090 = vst [vmem:[#allocation69_spill] sm:$0xff] %v10628_v23  ;;  %15091 = vst [vmem:[#allocation70_spill] sm:$0xff] %v10630_v50  ;;  %2864 = vperm.xlu1 %9484, %v7696_v13   ;;  %2859 = vperm.xlu0 %9483, %v7695_v49   ;;  %v8117_v50 = vpop.f32.mrb[8].mxu1  ;;  %v7700_v49 = vld [vmem:[%s15023_s29 + $0x428] sm:$0xff] }
 0x10c   :  { %v8118_v13 = vpop.f32.mrb[9].mxu1 }
 0x10d   :  { %v10650_v55 = vadd.f32 %v8118_v13, %v8117_v50  ;;  %v8120_v23 = vpop.f32.mrb[10].mxu1 }
 0x10e   :  { %v10640_v3 = vpop.permute.xlu1 %1774  ;;  %v10642_v54 = vpop.permute.xlu0 %1769 }
 0x10f   :  { %15092 = vst [vmem:[#allocation71_spill] sm:$0xff] %v10640_v3  ;;  %15093 = vst [vmem:[#allocation72_spill] sm:$0xff] %v10642_v54  ;;  %2874 = vperm.xlu1 %9484, %v7698_v38   ;;  %2869 = vperm.xlu0 %9483, %v7697_v56   ;;  %v8121_v54 = vpop.f32.mrb[11].mxu1  ;;  %v7702_v56 = vld [vmem:[%s15023_s29 + $0x438] sm:$0xff] }
 0x110   :  { %v10656_v38 = vadd.f32 %v8121_v54, %v8120_v23  ;;  %v7704_v54 = vld [vmem:[%s15023_s29 + $0x448] sm:$0xff]  ;;  %v7703_v23 = vld [vmem:[%s15023_s29 + $0x440] sm:$0xff] }
 0x112   :  { %v10652_v1 = vpop.permute.xlu1 %1784  ;;  %v10654_v3 = vpop.permute.xlu0 %1779 }
 0x113   :  { %15094 = vst [vmem:[#allocation73_spill] sm:$0xff] %v10652_v1  ;;  %15095 = vst [vmem:[#allocation74_spill] sm:$0xff] %v10654_v3  ;;  %2884 = vperm.xlu1 %9484, %v7700_v49   ;;  %2879 = vperm.xlu0 %9483, %v7699_v36   ;;  %v8123_v3 = vpop.f32.mrb[12].mxu1 }
 0x114   :  { %v8124_v1 = vpop.f32.mrb[13].mxu1 }
 0x115   :  { %v10674_v49 = vadd.f32 %v8124_v1, %v8123_v3  ;;  %v8126_v36 = vpop.f32.mrb[14].mxu1 }
 0x116   :  { %v10664_v50 = vpop.permute.xlu1 %1794  ;;  %v10666_v13 = vpop.permute.xlu0 %1789 }
 0x117   :  { %15096 = vst [vmem:[#allocation75_spill] sm:$0xff] %v10664_v50  ;;  %15097 = vst [vmem:[#allocation76_spill] sm:$0xff] %v10666_v13  ;;  %2894 = vperm.xlu1 %9484, %v7702_v56   ;;  %2889 = vperm.xlu0 %9483, %v7701_v51   ;;  %v8127_v13 = vpop.f32.mrb[15].mxu1  ;;  %v7706_v56 = vld [vmem:[%s15023_s29 + $0x458] sm:$0xff] }
 0x118   :  { %v10680_v51 = vadd.f32 %v8127_v13, %v8126_v36  ;;  %v7708_v13 = vld [vmem:[%s15023_s29 + $0x468] sm:$0xff] }
 0x11a   :  { %v10676_v0 = vpop.permute.xlu1 %1804  ;;  %v10678_v50 = vpop.permute.xlu0 %1799 }
 0x11b   :  { %15098 = vst [vmem:[#allocation77_spill] sm:$0xff] %v10676_v0  ;;  %15099 = vst [vmem:[#allocation78_spill] sm:$0xff] %v10678_v50  ;;  %2904 = vperm.xlu1 %9484, %v7704_v54   ;;  %2899 = vperm.xlu0 %9483, %v7703_v23   ;;  %v8129_v50 = vpop.f32.mrb[16].mxu1  ;;  %v7707_v54 = vld [vmem:[%s15023_s29 + $0x460] sm:$0xff] }
 0x11c   :  { %v8130_v0 = vpop.f32.mrb[17].mxu1 }
 0x11d   :  { %v10698_v23 = vadd.f32 %v8130_v0, %v8129_v50  ;;  %v8132_v36 = vpop.f32.mrb[18].mxu1 }
 0x11e   :  { %v10688_v3 = vpop.permute.xlu1 %1814  ;;  %v10690_v1 = vpop.permute.xlu0 %1809 }
 0x11f   :  { %15100 = vst [vmem:[#allocation79_spill] sm:$0xff] %v10688_v3  ;;  %15101 = vst [vmem:[#allocation80_spill] sm:$0xff] %v10690_v1  ;;  %2914 = vperm.xlu1 %9484, %v7706_v56   ;;  %2909 = vperm.xlu0 %9483, %v7705_v39   ;;  %v8133_v1 = vpop.f32.mrb[19].mxu1  ;;  %v7710_v56 = vld [vmem:[%s15023_s29 + $0x478] sm:$0xff] }
 0x120   :  { %v10704_v39 = vadd.f32 %v8133_v1, %v8132_v36 }
 0x122   :  { %v10700_v4 = vpop.permute.xlu1 %1824  ;;  %v10702_v3 = vpop.permute.xlu0 %1819 }
 0x123   :  { %15102 = vst [vmem:[#allocation81_spill] sm:$0xff] %v10700_v4  ;;  %15103 = vst [vmem:[#allocation82_spill] sm:$0xff] %v10702_v3  ;;  %2924 = vperm.xlu1 %9484, %v7708_v13   ;;  %2919 = vperm.xlu0 %9483, %v7707_v54   ;;  %v8135_v4 = vpop.f32.mrb[20].mxu1 }
 0x124   :  { %v8136_v3 = vpop.f32.mrb[21].mxu1 }
 0x125   :  { %v10716_v13 = vadd.f32 %v8136_v3, %v8135_v4  ;;  %v8138_v1 = vpop.f32.mrb[22].mxu1 }
 0x126   :  { %v10712_v0 = vpop.permute.xlu1 %1834  ;;  %v10714_v50 = vpop.permute.xlu0 %1829 }
 0x127   :  { %15104 = vst [vmem:[#allocation83_spill] sm:$0xff] %v10712_v0  ;;  %15105 = vst [vmem:[#allocation84_spill] sm:$0xff] %v10714_v50  ;;  %2934 = vperm.xlu1 %9484, %v7710_v56   ;;  %2929 = vperm.xlu0 %9483, %v7709_v29   ;;  %v8139_v31 = vpop.f32.mrb[23].mxu1  ;;  %v10731_v29 = vld [vmem:[%s14477_s5] ss:$0 sm:$0xff] }
 0x128   :  { %v10722_v47 = vadd.f32 %v8139_v31, %v8138_v1  ;;  %v530_v50 = vadd.f32 %v10605_v2, %v10731_v29  ;;  %v535_v21 = vadd.f32 %v10623_v18, %v10731_v29 }
 0x12a   :  { %v10718_v54 = vpop.permute.xlu1 %2039  ;;  %v10720_v36 = vpop.permute.xlu0 %2034  ;;  %v10759_v35 = vmax.f32 %v535_v21, 0.0  ;;  %v546_v21 = vadd.f32 %v10656_v38, %v10731_v29  ;;  %v559_v38 = vadd.f32 %v10698_v23, %v10731_v29 }
 0x12b   :  { %15106 = vst [vmem:[#allocation85_spill] sm:$0xff] %v10718_v54  ;;  %15107 = vst [vmem:[#allocation86_spill] sm:$0xff] %v10720_v36  ;;  %v8141_v56 = vpop.f32.mrb[24].mxu1  ;;  %v527_v36 = vadd.f32 %v10599_v60, %v10731_v29  ;;  %v621_v54 = vlaneseq }
 0x12c   :  { %v8142_v4 = vpop.f32.mrb[25].mxu1  ;;  %15117 = vst [vmem:[#allocation96_spill] sm:$0xff] %v10759_v35  ;;  %v10827_v32 = vmax.f32 %v559_v38, 0.0 }
 0x12d   :  { %v10733_v3 = vadd.f32 %v8142_v4, %v8141_v56  ;;  %v8144_v0 = vpop.f32.mrb[26].mxu1  ;;  %v10747_v56 = vmax.f32 %v527_v36, 0.0  ;;  %v10749_v4 = vshrl.u32 %v621_v54, 7  ;;  %v551_v54 = vadd.f32 %v10674_v49, %v10731_v29 }
 0x12e   :  { %v10724_v61 = vpop.permute.xlu1 %2049  ;;  %v10726_v46 = vpop.permute.xlu0 %2044  ;;  %15132 = vst [vmem:[#allocation108_spill] sm:$0xff] %v10827_v32 }
 0x12f   :  { %15108 = vst [vmem:[#allocation87_spill] sm:$0xff] %v10724_v61  ;;  %15109 = vst [vmem:[#allocation88_spill] sm:$0xff] %v10726_v46  ;;  %v8145_v40 = vpop.f32.mrb[27].mxu1  ;;  %vm1173_vm0 = vcmp.lt.s32.totalorder %v10749_v4, 7  ;;  %vm623_vm1 = vcmp.lt.s32.totalorder %v10749_v4, 1  ;;  %v15126_v23 = vrot.slane %v10747_v56, 1 }
 0x130   :  { %v10745_v24 = vadd.f32 %v8145_v40, %v8144_v0  ;;  %15112 = vst [vmem:[#allocation91_spill] sm:$0xff] %v10747_v56  ;;  %15113 = vst [vmem:[#allocation92_spill] sm:$0xff] %v10749_v4  ;;  %v538_v40 = vadd.f32 %v10632_v44, %v10731_v29 }
 0x132   :  { %v10737_v31 = vpop.permute.xlu1 %2059  ;;  %v10739_v1 = vpop.permute.xlu0 %2054 }
 0x133   :  { %15110 = vst [vmem:[#allocation89_spill] sm:$0xff] %v10737_v31  ;;  %15111 = vst [vmem:[#allocation90_spill] sm:$0xff] %v10739_v1  ;;  %v10755_v31 = vmax.f32 %v530_v50, 0.0  ;;  %v543_v1 = vadd.f32 %v10650_v55, %v10731_v29  ;;  %v8147_v2 = vpop.f32.mrb[28].mxu1 }
 0x134   :  { %v8148_v41 = vpop.f32.mrb[29].mxu1 }
 0x135   :  { %15116 = vst [vmem:[#allocation95_spill] sm:$0xff] %v10755_v31  ;;  %v10763_v18 = vadd.f32 %v8148_v41, %v8147_v2  ;;  %v8150_v0 = vpop.f32.mrb[30].mxu1  ;;  %v10772_v55 = vmax.f32 %v543_v1, 0.0  ;;  %v606_v2 = vrot.slane %v10755_v31, 7  ;;  %v554_v1 = vadd.f32 %v10680_v51, %v10731_v29 }
 0x136   :  { %v10751_v5 = vpop.permute.xlu1 %2069  ;;  %v10753_v60 = vpop.permute.xlu0 %2064  ;;  %v863_v33 = vmul.f32 %v10261_v52, %v10755_v31  ;;  %v15125_v51 = vrot.slane %v10755_v31, 1 }
 0x137   :  { %15114 = vst [vmem:[#allocation93_spill] sm:$0xff] %v10751_v5  ;;  %15115 = vst [vmem:[#allocation94_spill] sm:$0xff] %v10753_v60  ;;  %v8151_v41 = vpop.f32.mrb[31].mxu1  ;;  %v864_v5 = vmul.f32 %v10273_v43, %v10759_v35  ;;  %v10783_v60 = vmax.f32 %v538_v40, 0.0  ;;  %v862_v40 = vmul.f32 %v10275_v45, %v10747_v56 }
 0x138   :  { %15120 = vst [vmem:[#allocation99_spill] sm:$0xff] %v10772_v55 }
 0x139   :  { %15121 = vst [vmem:[#allocation100_spill] sm:$0xff] %v10783_v60  ;;  %v878_v16 = vpack.c.bf16 %v864_v5, %v863_v33  ;;  %v10838_v33 = vld [vmem:[%s14481_s9] ss:$0 sm:$0xff] }
 0x13a   :  { %v10767_v36 = vpop.permute.xlu1 %2079  ;;  %v10769_v50 = vpop.permute.xlu0 %2074 }
 0x13b   :  { %15118 = vst [vmem:[#allocation97_spill] sm:$0xff] %v10767_v36  ;;  %15119 = vst [vmem:[#allocation98_spill] sm:$0xff] %v10769_v50  ;;  %v8152_v36 = vadd.f32 %v8151_v41, %v8150_v0  ;;  %v607_v50 = vrot.slane %v10759_v35, 7  ;;  %v10799_v0 = vmax.f32 %v546_v21, 0.0  ;;  %v10807_v41 = vsel %vm1173_vm0, %v15126_v23, %v15125_v51  ;;  %v8259_v44 = vpop.f32.mrb[32].mxu1 }
 0x13c   :  { %15127 = vst [vmem:[#allocation104_spill] sm:$0xff] %v10807_v41  ;;  %v10817_v21 = vmax.f32 %v551_v54, 0.0  ;;  %v8260_v45 = vpop.f32.mrb[33].mxu1  ;;  %v10825_v23 = vmax.f32 %v554_v1, 0.0  ;;  %v562_v54 = vadd.f32 %v10704_v39, %v10731_v29  ;;  %v609_v39 = vrot.slane %v10772_v55, 7 }
 0x13d   :  { %v586_v43 = vadd.f32 %v8152_v36, %v10731_v29  ;;  %15124 = vst [vmem:[#allocation103_spill] sm:$0xff] %v10799_v0  ;;  %v866_v36 = vmul.f32 %v10285_v62, %v10772_v55  ;;  %v10823_v51 = vsel %vm623_vm1, %v606_v2, %v607_v50  ;;  %v8261_v62 = vadd.f32 %v8260_v45, %v8259_v44  ;;  %v8262_v15 = vpop.f32.mrb[34].mxu1 }
 0x13e   :  { %v10793_v34 = vpop.permute.xlu1 %2089  ;;  %v10795_v49 = vpop.permute.xlu0 %2084  ;;  %15129 = vst [vmem:[#allocation105_spill] sm:$0xff] %v10817_v21  ;;  %15131 = vst [vmem:[#allocation107_spill] sm:$0xff] %v10825_v23  ;;  %v608_v44 = vrot.slane %v10783_v60, 7 }
 0x13f   :  { %15122 = vst [vmem:[#allocation101_spill] sm:$0xff] %v10793_v34  ;;  %15123 = vst [vmem:[#allocation102_spill] sm:$0xff] %v10795_v49  ;;  %v15128_v34 = vrot.slane %v10747_v56, 7  ;;  %v10819_v52 = vmax.f32 %v586_v43, 0.0  ;;  %v567_v43 = vadd.f32 %v10716_v13, %v10731_v29  ;;  %v8263_v1 = vpop.f32.mrb[35].mxu1  ;;  %v10850_v13 = vmul.f32 %v10299_v58, %v10799_v0 }
 0x140   :  { %v8264_v12 = vadd.f32 %v8263_v1, %v8262_v15  ;;  %v613_v58 = vrot.slane %v10827_v32, 7  ;;  %v9537_v15 = vld [vmem:[%s14478_s6 + $0x8] sm:$0xff]   ;;  %v570_v1 = vadd.f32 %v10722_v47, %v10731_v29  ;;  %v869_v47 = vmul.f32 %v10311_v7, %v10825_v23 }
 0x141   :  { %v10815_v49 = vsel %vm623_vm1, %v15128_v34, %v606_v2  ;;  %15130 = vst [vmem:[#allocation106_spill] sm:$0xff] %v10819_v52  ;;  %v865_v34 = vmul.f32 %v10287_v63, %v10783_v60  ;;  %v861_v45 = vmul.f32 %v10263_v53, %v10819_v52  ;;  %v610_v63 = vrot.slane %v10799_v0, 7 }
 0x142   :  { %v10840_v5 = vpop.permute.xlu1 %2099  ;;  %v10842_v2 = vpop.permute.xlu0 %2094  ;;  %v3324_v53 = vadd.f32 %v8261_v62, %v10838_v33  ;;  %v3327_v62 = vadd.f32 %v8264_v12, %v10838_v33  ;;  %v575_v12 = vadd.f32 %v10733_v3, %v10731_v29 }
 0x143   :  { %15133 = vst [vmem:[#allocation109_spill] sm:$0xff] %v10840_v5  ;;  %15134 = vst [vmem:[#allocation110_spill] sm:$0xff] %v10842_v2  ;;  %v879_v38 = vpack.c.bf16 %v866_v36, %v865_v34  ;;  %v877_v59 = vpack.c.bf16 %v862_v40, %v861_v45  ;;  %v10855_v5 = vmul.f32 %v10297_v57, %v10817_v21  ;;  %v611_v2 = vrot.slane %v10817_v21, 7 }
 0x144   :  { %v10861_v36 = vmul.f32 %v10309_v6, %v10827_v32  ;;  %v612_v34 = vrot.slane %v10825_v23, 7  ;;  %v10868_v40 = vmax.f32 %v562_v54, 0.0  ;;  %v10870_v45 = vmax.f32 %v567_v43, 0.0  ;;  %v8265_v32 = vpop.f32.mrb[36].mxu1 }
 0x145   :  { %8491 = vmatprep.mubr.msk.bf16.mxu0 %vm902_vm2, %v877_v59  ;;  %v10883_v54 = vsel %vm623_vm1, %v608_v44, %v609_v39  ;;  %v10887_v43 = vsel %vm623_vm1, %v607_v50, %v608_v44  ;;  %v10893_v59 = vsel %vm623_vm1, %v609_v39, %v610_v63  ;;  %v10904_v50 = vsel %vm623_vm1, %v610_v63, %v611_v2 }
 0x146   :  { %15135 = vst [vmem:[#allocation111_spill] sm:$0xff] %v10868_v40  ;;  %15136 = vst [vmem:[#allocation112_spill] sm:$0xff] %v10870_v45  ;;  %v10876_v6 = vpop.permute.xlu1 %2109  ;;  %v10878_v57 = vpop.permute.xlu0 %2104  ;;  %8492 = vmatmul.mubr.msk.bf16.vlgmr.msra.gmra.mrb[32].mxu0 %vm902_vm2, %v878_v16  ;;  %v10897_v16 = vmax.f32 %v3327_v62, 0.0  ;;  %v10907_v44 = vmax.f32 %v3324_v53, 0.0  ;;  %v881_v3 = vpack.c.bf16 %v10861_v36, %v869_v47  ;;  %v10912_v62 = vsel %vm623_vm1, %v611_v2, %v612_v34 }
 0x147   :  { %15137 = vst [vmem:[#allocation113_spill] sm:$0xff] %v10876_v6  ;;  %15138 = vst [vmem:[#allocation114_spill] sm:$0xff] %v10878_v57  ;;  %8495 = vmatprep.mubr.msk.bf16.mxu0 %vm902_vm2, %v879_v38  ;;  %v8266_v6 = vpop.f32.mrb[37].mxu1  ;;  %v880_v57 = vpack.c.bf16 %v10855_v5, %v10850_v13  ;;  %8508 = vmatpush3.bf16.msra.mxu0 %v10513_v42  ;;  %v10917_v5 = vld [vmem:[%s14478_s6 + $0x20] sm:$0xff]   ;;  %v10919_v63 = vmax.f32 %v570_v1, 0.0  ;;  %v614_v42 = vrot.slane %v10868_v40, 7 }
 0x148   :  { %15139 = vst [vmem:[#allocation115_spill] sm:$0xff] %v10897_v16  ;;  %15140 = vst [vmem:[#allocation116_spill] sm:$0xff] %v10904_v50  ;;  %v8267_v39 = vadd.f32 %v8266_v6, %v8265_v32  ;;  %v8268_v7 = vpop.f32.mrb[38].mxu1  ;;  %8509 = vmatprep.subr.bf16.mxu0 %v9537_v15  ;;  %v10927_v6 = vsel %vm623_vm1, %v612_v34, %v613_v58  ;;  %v10931_v32 = vmul.f32 %v10321_v8, %v10870_v45 }
 0x149   :  { %15141 = vst [vmem:[#allocation117_spill] sm:$0xff] %v10907_v44  ;;  %15142 = vst [vmem:[#allocation118_spill] sm:$0xff] %v10919_v63  ;;  %v3403_v36 = vrot.slane %v10897_v16, 7  ;;  %v8269_v34 = vpop.f32.mrb[39].mxu1  ;;  %v10944_v47 = vmax.f32 %v575_v12, 0.0  ;;  %v871_v8 = vmul.f32 %v10323_v9, %v10868_v40  ;;  %v14596_v55 = vrot.slane %v10907_v44, 7 }
 0x14a   :  { %v10921_v38 = vpop.permute.xlu1 %2314  ;;  %v10923_v53 = vpop.permute.xlu0 %2309  ;;  %15145 = vst [vmem:[#allocation121_spill] sm:$0xff] %v10927_v6  ;;  %v3332_v2 = vadd.f32 %v8267_v39, %v10838_v33  ;;  %v8270_v23 = vadd.f32 %v8269_v34, %v8268_v7  ;;  %v583_v39 = vadd.f32 %v10763_v18, %v10731_v29  ;;  %v578_v7 = vadd.f32 %v10745_v24, %v10731_v29 }
 0x14b   :  { %15143 = vst [vmem:[#allocation119_spill] sm:$0xff] %v10921_v38  ;;  %15144 = vst [vmem:[#allocation120_spill] sm:$0xff] %v10923_v53  ;;  %v10937_v13 = vmul.f32 %v10921_v38, %v10823_v51  ;;  %v10942_v1 = vmul.f32 %v10923_v53, %v10815_v49  ;;  %8510 = vmatpush3.bf16.msra.mxu0 %v9537_v15  ;;  %v882_v18 = vpack.c.bf16 %v10931_v32, %v871_v8  ;;  %v8271_v29 = vpop.f32.mrb[40].mxu1 }
 0x14c   :  { %15148 = vst [vmem:[#allocation124_spill] sm:$0xff] %v10944_v47  ;;  %v10951_v41 = vmax.f32 %v3332_v2, 0.0  ;;  %8527 = vmatprep.subr.bf16.mxu0 %v10917_v5  ;;  %v3335_v12 = vadd.f32 %v8270_v23, %v10838_v33  ;;  %v10967_v2 = vsel %vm623_vm1, %v613_v58, %v614_v42  ;;  %v10974_v21 = vsel %vm623_vm1, %v14596_v55, %v3403_v36  ;;  %v8272_v32 = vpop.f32.mrb[41].mxu1 }
 0x14d   :  { %15146 = vst [vmem:[#allocation122_spill] sm:$0xff] %v10937_v13  ;;  %15147 = vst [vmem:[#allocation123_spill] sm:$0xff] %v10942_v1  ;;  %v873_v8 = vmul.f32 %v10335_v14, %v10919_v63  ;;  %v15157_v55 = vrot.slane %v10870_v45, 7  ;;  %v10997_v13 = vmax.f32 %v583_v39, 0.0  ;;  %v8273_v44 = vadd.f32 %v8272_v32, %v8271_v29  ;;  %v8274_v14 = vpop.f32.mrb[42].mxu1 }
 0x14e   :  { %15149 = vst [vmem:[#allocation125_spill] sm:$0xff] %v10951_v41  ;;  %v10960_v34 = vpop.permute.xlu1 %2324  ;;  %v10962_v15 = vpop.permute.xlu0 %2319  ;;  %15152 = vst [vmem:[#allocation128_spill] sm:$0xff] %v10967_v2  ;;  %v3404_v28 = vrot.slane %v10951_v41, 7  ;;  %8496 = vmatmul.mubr.msk.bf16.gmra.mrb[36].mxu0 %vm902_vm2, %v880_v57  ;;  %v10983_v58 = vmax.f32 %v3335_v12, 0.0  ;;  %v11005_v9 = vmax.f32 %v578_v7, 0.0  ;;  %v620_v40 = vrot.slane %v10819_v52, 7 }
 0x14f   :  { %15150 = vst [vmem:[#allocation126_spill] sm:$0xff] %v10960_v34  ;;  %15151 = vst [vmem:[#allocation127_spill] sm:$0xff] %v10962_v15  ;;  %v10978_v24 = vmul.f32 %v10960_v34, %v10883_v54  ;;  %v10987_v23 = vmul.f32 %v10962_v15, %v10887_v43  ;;  %8499 = vmatprep.mubr.msk.bf16.mxu0 %vm902_vm2, %v881_v3  ;;  %v10994_v1 = vsel %vm623_vm1, %v614_v42, %v15157_v55  ;;  %v8275_v57 = vpop.f32.mrb[43].mxu1 }
 0x150   :  { %15153 = vst [vmem:[#allocation129_spill] sm:$0xff] %v10974_v21  ;;  %15155 = vst [vmem:[#allocation131_spill] sm:$0xff] %v10983_v58  ;;  %v11001_v12 = vsel %vm623_vm1, %v3403_v36, %v3404_v28  ;;  %v874_v3 = vmul.f32 %v10333_v30, %v10944_v47  ;;  %v11014_v42 = vmul.f32 %v10974_v21, %v10923_v53  ;;  %v14619_v7 = vrot.slane %v10983_v58, 7 }
 0x151   :  { %15154 = vst [vmem:[#allocation130_spill] sm:$0xff] %v10978_v24  ;;  %15156 = vst [vmem:[#allocation132_spill] sm:$0xff] %v10987_v23  ;;  %v11010_v55 = vmul.f32 %v11001_v12, %v10921_v38  ;;  %v3759_v38 = vrot.slane %v10951_v41, 1  ;;  %v3340_v21 = vadd.f32 %v8273_v44, %v10838_v33  ;;  %v11035_v52 = vadd.f32 %v8275_v57, %v8274_v14 }
 0x152   :  { %15158 = vst [vmem:[#allocation133_spill] sm:$0xff] %v10994_v1  ;;  %15159 = vst [vmem:[#allocation134_spill] sm:$0xff] %v10997_v13  ;;  %v11016_v39 = vpop.permute.xlu1 %2334  ;;  %v11018_v36 = vpop.permute.xlu0 %2329  ;;  %v11042_v23 = vsel %vm623_vm1, %v3404_v28, %v14619_v7  ;;  %v883_v24 = vpack.c.bf16 %v874_v3, %v873_v8  ;;  %v11047_v44 = vmul.f32 %v11001_v12, %v10551_v48 }
 0x153   :  { %15160 = vst [vmem:[#allocation135_spill] sm:$0xff] %v11001_v12  ;;  %15161 = vst [vmem:[#allocation136_spill] sm:$0xff] %v11005_v9  ;;  %v11025_v32 = vmul.f32 %v11016_v39, %v10904_v50  ;;  %v11033_v30 = vmul.f32 %v11018_v36, %v10893_v59  ;;  %v11051_v53 = vmul.f32 %v11042_v23, %v10549_v37  ;;  %v8277_v7 = vpop.f32.mrb[44].mxu1  ;;  %v1160_v12 = vrot.slane %v10783_v60, 1 }
 0x154   :  { %15162 = vst [vmem:[#allocation137_spill] sm:$0xff] %v11010_v55  ;;  %15163 = vst [vmem:[#allocation138_spill] sm:$0xff] %v11014_v42  ;;  %v15174_v42 = vrot.slane %v10997_v13, 7  ;;  %v15176_v55 = vrot.slane %v10747_v56, 7 }
 0x155   :  { %15164 = vst [vmem:[#allocation139_spill] sm:$0xff] %v11016_v39  ;;  %15165 = vst [vmem:[#allocation140_spill] sm:$0xff] %v11018_v36  ;;  %v3760_v39 = vrot.slane %v10983_v58, 1 }
 0x156   :  { %15166 = vst [vmem:[#allocation141_spill] sm:$0xff] %v11025_v32  ;;  %15167 = vst [vmem:[#allocation142_spill] sm:$0xff] %v11033_v30  ;;  %v11055_v57 = vpop.permute.xlu1 %2344  ;;  %v11057_v29 = vpop.permute.xlu0 %2339  ;;  %8500 = vmatmul.mubr.msk.bf16.gmra.mrb[40].mxu0 %vm902_vm2, %v882_v18  ;;  %v11073_v14 = vsel %vm623_vm1, %v15174_v42, %v620_v40  ;;  %v11079_v28 = vsel %vm623_vm1, %v620_v40, %v15176_v55  ;;  %v11083_v32 = vmax.f32 %v3340_v21, 0.0  ;;  %v15179_v42 = vrot.slane %v10897_v16, 1 }
 0x157   :  { %15168 = vst [vmem:[#allocation143_spill] sm:$0xff] %v11047_v44  ;;  %15169 = vst [vmem:[#allocation144_spill] sm:$0xff] %v11051_v53  ;;  %v11062_v8 = vmul.f32 %v11055_v57, %v10927_v6  ;;  %v11066_v3 = vmul.f32 %v11057_v29, %v10912_v62  ;;  %8503 = vmatprep.mubr.msk.bf16.mxu0 %vm902_vm2, %v883_v24  ;;  %v8278_v18 = vpop.f32.mrb[45].mxu1  ;;  %v876_v24 = vmul.f32 %v10344_v17, %v10997_v13 }
 0x158   :  { %15170 = vst [vmem:[#allocation145_spill] sm:$0xff] %v11055_v57  ;;  %15171 = vst [vmem:[#allocation146_spill] sm:$0xff] %v11057_v29  ;;  %v11088_v57 = vsel %vm1173_vm0, %v3759_v38, %v3760_v39  ;;  %v11094_v29 = vsel %vm1173_vm0, %v15179_v42, %v3759_v38  ;;  %v11098_v55 = vadd.f32 %v8278_v18, %v8277_v7  ;;  %v8280_v21 = vpop.f32.mrb[46].mxu1  ;;  %v617_v38 = vrot.slane %v10944_v47, 7 }
 0x159   :  { %15172 = vst [vmem:[#allocation147_spill] sm:$0xff] %v11062_v8  ;;  %15173 = vst [vmem:[#allocation148_spill] sm:$0xff] %v11066_v3  ;;  %v11104_v30 = vmul.f32 %v11088_v57, %v10460_v10  ;;  %v736_v42 = vmul.f32 %v10358_v20, %v11073_v14  ;;  %v737_v7 = vmul.f32 %v10356_v19, %v11079_v28  ;;  %v1159_v40 = vrot.slane %v10759_v35, 1  ;;  %v8281_v36 = vpop.f32.mrb[47].mxu1 }
 0x15a   :  { %15175 = vst [vmem:[#allocation149_spill] sm:$0xff] %v11073_v14  ;;  %15177 = vst [vmem:[#allocation150_spill] sm:$0xff] %v11079_v28  ;;  %v11106_v44 = vpop.permute.xlu1 %2354  ;;  %v11108_v53 = vpop.permute.xlu0 %2349  ;;  %v11117_v18 = vmul.f32 %v11094_v29, %v10462_v11  ;;  %v875_v14 = vmul.f32 %v10346_v22, %v11005_v9  ;;  %v11131_v28 = vadd.f32 %v8281_v36, %v8280_v21  ;;  %v15189_v20 = vrot.slane %v10870_v45, 7 }
 0x15b   :  { %15178 = vst [vmem:[#allocation151_spill] sm:$0xff] %v11083_v32  ;;  %15180 = vst [vmem:[#allocation152_spill] sm:$0xff] %v11094_v29  ;;  %v11122_v3 = vmul.f32 %v11106_v44, %v10994_v1  ;;  %v11126_v8 = vmul.f32 %v11108_v53, %v10967_v2  ;;  %v752_v19 = vpack.c.bf16 %v737_v7, %v736_v42 }
 0x15c   :  { %15181 = vst [vmem:[#allocation153_spill] sm:$0xff] %v11098_v55  ;;  %15182 = vst [vmem:[#allocation154_spill] sm:$0xff] %v11104_v30  ;;  %v884_v36 = vpack.c.bf16 %v876_v24, %v875_v14  ;;  %v739_v7 = vmul.f32 %v10366_v25, %v10823_v51 }
 0x15d   :  { %15183 = vst [vmem:[#allocation155_spill] sm:$0xff] %v11106_v44  ;;  %15184 = vst [vmem:[#allocation156_spill] sm:$0xff] %v11108_v53  ;;  %v15188_v53 = vrot.slane %v10919_v63, 7 }
 0x15e   :  { %15185 = vst [vmem:[#allocation157_spill] sm:$0xff] %v11117_v18  ;;  %15186 = vst [vmem:[#allocation158_spill] sm:$0xff] %v11122_v3  ;;  %v11147_v21 = vpop.permute.xlu1 %2364  ;;  %v11155_v44 = vpop.permute.xlu0 %2359  ;;  %v15195_v3 = vrot.slane %v11083_v32, 1  ;;  %8504 = vmatmul.mubr.msk.bf16.gmra.mrb[44].mxu0 %vm902_vm2, %v884_v36  ;;  %v11190_v18 = vmul.f32 %v11088_v57, %v10726_v46  ;;  %v1162_v36 = vrot.slane %v10799_v0, 1  ;;  %v15208_v0 = vrot.slane %v10997_v13, 7 }
 0x15f   :  { %15187 = vst [vmem:[#allocation159_spill] sm:$0xff] %v11126_v8  ;;  %v11145_v55 = vsel %vm623_vm1, %v15189_v20, %v15188_v53  ;;  %15191 = vst [vmem:[#allocation161_spill] sm:$0xff] %v11147_v21  ;;  %v15192_v29 = vmov %v15188_v53  ;;  %v618_v8 = vrot.slane %v11005_v9, 7  ;;  %v15197_v53 = vrot.slane %v10755_v31, 1  ;;  %8511 = vmatprep.mubr.msk.bf16.mxu0 %vm902_vm2, %v752_v19 }
 0x160   :  { %15190 = vst [vmem:[#allocation160_spill] sm:$0xff] %v11145_v55  ;;  %v11153_v35 = vsel %vm623_vm1, %v15192_v29, %v617_v38  ;;  %15194 = vst [vmem:[#allocation163_spill] sm:$0xff] %v11155_v44  ;;  %v11162_v20 = vsel %vm1173_vm0, %v3760_v39, %v15195_v3  ;;  %v738_v29 = vmul.f32 %v10368_v26, %v10815_v49  ;;  %v8283_v39 = vpop.f32.mrb[48].mxu1  ;;  %v15205_v19 = vrot.slane %v10983_v58, 7 }
 0x161   :  { %15193 = vst [vmem:[#allocation162_spill] sm:$0xff] %v11153_v35  ;;  %15196 = vst [vmem:[#allocation164_spill] sm:$0xff] %v11162_v20  ;;  %v11168_v14 = vsel %vm1173_vm0, %v15197_v53, %v1159_v40  ;;  %v11174_v24 = vmul.f32 %v11147_v21, %v11153_v35  ;;  %v11178_v42 = vmul.f32 %v11155_v44, %v11145_v55  ;;  %v8284_v53 = vpop.f32.mrb[49].mxu1  ;;  %v15204_v21 = vrot.slane %v11083_v32, 7 }
 0x162   :  { %15198 = vst [vmem:[#allocation165_spill] sm:$0xff] %v11168_v14  ;;  %v11183_v3 = vsel %vm1173_vm0, %v1159_v40, %v1160_v12  ;;  %15202 = vst [vmem:[#allocation169_spill] sm:$0xff] %v11190_v18  ;;  %v11194_v30 = vmul.f32 %v11162_v20, %v10724_v61  ;;  %v11199_v60 = vadd.f32 %v8284_v53, %v8283_v39  ;;  %v8286_v31 = vpop.f32.mrb[50].mxu1  ;;  %v11211_v44 = vpop.permute.xlu1 %2374 }
 0x163   :  { %15199 = vst [vmem:[#allocation166_spill] sm:$0xff] %v11174_v24  ;;  %15200 = vst [vmem:[#allocation167_spill] sm:$0xff] %v11178_v42  ;;  %v11207_v46 = vsel %vm623_vm1, %v15205_v19, %v15204_v21  ;;  %v741_v61 = vmul.f32 %v10378_v27, %v10883_v54  ;;  %v11217_v39 = vsel %vm623_vm1, %v618_v8, %v15208_v0  ;;  %v11219_v53 = vpop.permute.xlu0 %2369  ;;  %v15212_v19 = vld [vmem:[#allocation99_spill] sm:$0xff]  ;;  %v8287_v26 = vpop.f32.mrb[51].mxu1 }
 0x164   :  { %15201 = vst [vmem:[#allocation168_spill] sm:$0xff] %v11183_v3  ;;  %15203 = vst [vmem:[#allocation170_spill] sm:$0xff] %v11194_v30  ;;  %v11223_v40 = vsel %vm623_vm1, %v617_v38, %v618_v8  ;;  %v1161_v42 = vrot.slane %v15212_v19, 1  ;;  %v11230_v24 = vmul.f32 %v10460_v10, %v11183_v3  ;;  %v11234_v25 = vmul.f32 %v11211_v44, %v11217_v39  ;;  %v15215_v8 = vld [vmem:[#allocation26_spill] sm:$0xff]  ;;  %v15222_v19 = vld [vmem:[#allocation104_spill] sm:$0xff] }
 0x165   :  { %15206 = vst [vmem:[#allocation171_spill] sm:$0xff] %v11207_v46  ;;  %15207 = vst [vmem:[#allocation172_spill] sm:$0xff] %v11211_v44  ;;  %v11238_v0 = vmul.f32 %v11219_v53, %v11223_v40  ;;  %v740_v38 = vmul.f32 %v15215_v8, %v10887_v43  ;;  %v11244_v21 = vmul.f32 %v11042_v23, %v15215_v8  ;;  %v9540_v44 = vld [vmem:[%s14478_s6 + $0x28] sm:$0xff]  }
 0x166   :  { %15209 = vst [vmem:[#allocation173_spill] sm:$0xff] %v11217_v39  ;;  %15210 = vst [vmem:[#allocation174_spill] sm:$0xff] %v11219_v53  ;;  %v8288_v18 = vadd.f32 %v8287_v26, %v8286_v31  ;;  %v11248_v10 = vmul.f32 %v11207_v46, %v10378_v27  ;;  %v753_v30 = vpack.c.bf16 %v739_v7, %v738_v29  ;;  %v11267_v31 = vpop.permute.xlu1 %2384  ;;  %v15227_v7 = vld [vmem:[#allocation53_spill] sm:$0xff] }
 0x167   :  { %15211 = vst [vmem:[#allocation175_spill] sm:$0xff] %v11223_v40  ;;  %15213 = vst [vmem:[#allocation176_spill] sm:$0xff] %v11234_v25  ;;  %v11252_v3 = vmul.f32 %v10549_v37, %v10887_v43  ;;  %v11261_v8 = vmul.f32 %v10462_v11, %v11168_v14  ;;  %v11265_v26 = vsel %vm1173_vm0, %v1161_v42, %v1162_v36  ;;  %v11269_v29 = vpop.permute.xlu0 %2379  ;;  %v15223_v37 = vld [vmem:[#allocation37_spill] sm:$0xff] }
 0x168   :  { %15214 = vst [vmem:[#allocation177_spill] sm:$0xff] %v11238_v0  ;;  %15216 = vst [vmem:[#allocation178_spill] sm:$0xff] %v11244_v21  ;;  %v754_v43 = vpack.c.bf16 %v741_v61, %v740_v38  ;;  %v11275_v27 = vmul.f32 %v15223_v37, %v15222_v19  ;;  %v11279_v11 = vsel %vm1173_vm0, %v1160_v12, %v1161_v42  ;;  %v15225_v0 = vld [vmem:[#allocation105_spill] sm:$0xff]  ;;  %8512 = vmatmul.mubr.msk.bf16.vlgmr.msra.gmra.mrb[32].mxu0 %vm902_vm2, %v753_v30  ;;  %v8289_v61 = vpop.f32.mrb[52].mxu1  ;;  %v15230_v38 = vld [vmem:[#allocation27_spill] sm:$0xff] }
 0x169   :  { %15217 = vst [vmem:[#allocation179_spill] sm:$0xff] %v11248_v10  ;;  %15218 = vst [vmem:[#allocation180_spill] sm:$0xff] %v11252_v3  ;;  %v1163_v25 = vrot.slane %v15225_v0, 1  ;;  %v11284_v14 = vmul.f32 %v10551_v48, %v10823_v51  ;;  %v11291_v19 = vmul.f32 %v15227_v7, %v10815_v49  ;;  %v3359_v37 = vadd.f32 %v8288_v18, %v10838_v33  ;;  %v8290_v12 = vpop.f32.mrb[53].mxu1  ;;  %v15229_v51 = vld [vmem:[#allocation41_spill] sm:$0xff]  ;;  %v11307_v18 = vld [vmem:[%s14478_s6 + $0x30] sm:$0xff]  }
 0x16a   :  { %15219 = vst [vmem:[#allocation181_spill] sm:$0xff] %v11265_v26  ;;  %15220 = vst [vmem:[#allocation182_spill] sm:$0xff] %v11267_v31  ;;  %8515 = vmatprep.mubr.msk.bf16.mxu0 %vm902_vm2, %v754_v43  ;;  %8528 = vmatpush3.bf16.msra.mxu0 %v10917_v5  ;;  %v11298_v42 = vmul.f32 %v15229_v51, %v11265_v26  ;;  %v743_v48 = vmul.f32 %v15230_v38, %v10904_v50  ;;  %v8292_v49 = vpop.f32.mrb[54].mxu1  ;;  %v15231_v5 = vld [vmem:[#allocation42_spill] sm:$0xff]  ;;  %v15232_v26 = vld [vmem:[#allocation107_spill] sm:$0xff]  ;;  %v11316_v31 = vpop.permute.xlu1 %2589  ;;  %v15287_v50 = vrot.slane %v10919_v63, 1 }
 0x16b   :  { %15221 = vst [vmem:[#allocation183_spill] sm:$0xff] %v11269_v29  ;;  %15224 = vst [vmem:[#allocation184_spill] sm:$0xff] %v11279_v11  ;;  %v8291_v0 = vadd.f32 %v8290_v12, %v8289_v61  ;;  %8529 = vmatprep.subr.bf16.mxu0 %v9540_v44  ;;  %v11311_v43 = vmul.f32 %v15231_v5, %v11279_v11  ;;  %v1164_v7 = vrot.slane %v15232_v26, 1  ;;  %v15233_v51 = vld [vmem:[#allocation29_spill] sm:$0xff]  ;;  %v11318_v29 = vpop.permute.xlu0 %2584  ;;  %v15238_v11 = vld [vmem:[#allocation28_spill] sm:$0xff]  ;;  %v11341_v10 = vmax.f32 %v3359_v37, 0.0 }
 0x16c   :  { %15226 = vst [vmem:[#allocation185_spill] sm:$0xff] %v11284_v14  ;;  %15228 = vst [vmem:[#allocation186_spill] sm:$0xff] %v11291_v19  ;;  %v745_v30 = vmul.f32 %v15233_v51, %v10927_v6  ;;  %v11322_v61 = vmul.f32 %v11207_v46, %v10960_v34  ;;  %v11326_v12 = vsel %vm1173_vm0, %v1162_v36, %v1163_v25  ;;  %v15239_v26 = vld [vmem:[#allocation57_spill] sm:$0xff]  ;;  %v15242_v34 = vld [vmem:[#allocation30_spill] sm:$0xff]  ;;  %v15271_v19 = vrot.slane %v10747_v56, 1 }
 0x16d   :  { %15234 = vst [vmem:[#allocation187_spill] sm:$0xff] %v11316_v31  ;;  %15235 = vst [vmem:[#allocation188_spill] sm:$0xff] %v11318_v29  ;;  %v742_v5 = vmul.f32 %v15238_v11, %v10893_v59  ;;  %v11332_v53 = vmul.f32 %v15239_v26, %v10893_v59  ;;  %v3364_v21 = vadd.f32 %v8291_v0, %v10838_v33  ;;  %v8293_v31 = vpop.f32.mrb[55].mxu1  ;;  %v15244_v51 = vld [vmem:[#allocation58_spill] sm:$0xff]  ;;  %v15277_v11 = vld [vmem:[#allocation45_spill] sm:$0xff] }
 0x16e   :  { %15236 = vst [vmem:[#allocation189_spill] sm:$0xff] %v11322_v61  ;;  %15237 = vst [vmem:[#allocation190_spill] sm:$0xff] %v11326_v12  ;;  %v11337_v29 = vmul.f32 %v11042_v23, %v10962_v15  ;;  %v744_v46 = vmul.f32 %v15242_v34, %v10912_v62  ;;  %v8294_v36 = vadd.f32 %v8293_v31, %v8292_v49  ;;  %8530 = vmatpush3.bf16.msra.mxu0 %v9540_v44  ;;  %v11357_v31 = vpop.permute.xlu1 %2599  ;;  %v15251_v15 = vld [vmem:[#allocation111_spill] sm:$0xff]  ;;  %v15260_v34 = vld [vmem:[#allocation33_spill] sm:$0xff] }
 0x16f   :  { %15240 = vst [vmem:[#allocation191_spill] sm:$0xff] %v11332_v53  ;;  %15243 = vst [vmem:[#allocation193_spill] sm:$0xff] %v11341_v10  ;;  %v11345_v14 = vmul.f32 %v15244_v51, %v10883_v54  ;;  %v11347_v59 = vmax.f32 %v3364_v21, 0.0  ;;  %v755_v26 = vpack.c.bf16 %v743_v48, %v742_v5  ;;  %8547 = vmatprep.subr.bf16.mxu0 %v11307_v18  ;;  %v11359_v44 = vpop.permute.xlu0 %2594  ;;  %v15249_v48 = vld [vmem:[#allocation44_spill] sm:$0xff]  ;;  %v1166_v51 = vrot.slane %v15251_v15, 1  ;;  %v15259_v15 = vld [vmem:[#allocation106_spill] sm:$0xff] }
 0x170   :  { %15241 = vst [vmem:[#allocation192_spill] sm:$0xff] %v11337_v29  ;;  %v11354_v23 = vsel %vm1173_vm0, %v1163_v25, %v1164_v7  ;;  %v3367_v37 = vadd.f32 %v8294_v36, %v10838_v33  ;;  %15247 = vst [vmem:[#allocation196_spill] sm:$0xff] %v11357_v31  ;;  %v756_v54 = vpack.c.bf16 %v745_v30, %v744_v46  ;;  %v15250_v5 = vld [vmem:[#allocation108_spill] sm:$0xff]  ;;  %v8295_v25 = vpop.f32.mrb[56].mxu1  ;;  %v15255_v29 = vld [vmem:[#allocation15_spill] sm:$0xff] }
 0x171   :  { %15245 = vst [vmem:[#allocation194_spill] sm:$0xff] %v11345_v14  ;;  %15246 = vst [vmem:[#allocation195_spill] sm:$0xff] %v11354_v23  ;;  %v11365_v49 = vmul.f32 %v15249_v48, %v11326_v12  ;;  %v1165_v0 = vrot.slane %v15250_v5, 1  ;;  %8516 = vmatmul.mubr.msk.bf16.gmra.mrb[36].mxu0 %vm902_vm2, %v755_v26  ;;  %v8296_v46 = vpop.f32.mrb[57].mxu1  ;;  %v15253_v30 = vld [vmem:[#allocation16_spill] sm:$0xff]  ;;  %v11381_v61 = vmul.f32 %v11347_v59, %v15255_v29  ;;  %v15257_v26 = vld [vmem:[#allocation43_spill] sm:$0xff] }
 0x172   :  { %15248 = vst [vmem:[#allocation197_spill] sm:$0xff] %v11359_v44  ;;  %v11372_v31 = vmax.f32 %v3367_v37, 0.0  ;;  %8519 = vmatprep.mubr.msk.bf16.mxu0 %vm902_vm2, %v756_v54  ;;  %v11377_v21 = vmul.f32 %v11341_v10, %v15253_v30  ;;  %v3767_v44 = vrot.slane %v11347_v59, 1  ;;  %v11386_v12 = vmul.f32 %v15257_v26, %v11354_v23  ;;  %v15258_v36 = vld [vmem:[#allocation31_spill] sm:$0xff]  ;;  %v8298_v48 = vpop.f32.mrb[58].mxu1  ;;  %v11394_v29 = vpop.permute.xlu1 %2609 }
 0x173   :  { %15256 = vst [vmem:[#allocation200_spill] sm:$0xff] %v11381_v61  ;;  %v1167_v37 = vrot.slane %v10870_v45, 1  ;;  %v747_v54 = vmul.f32 %v15258_v36, %v10994_v1  ;;  %v8297_v5 = vadd.f32 %v8296_v46, %v8295_v25  ;;  %v749_v14 = vmul.f32 %v15260_v34, %v11153_v35  ;;  %15261 = vst [vmem:[#allocation201_spill] sm:$0xff] %v11394_v29  ;;  %v11396_v53 = vpop.permute.xlu0 %2604  ;;  %v15265_v46 = vld [vmem:[#allocation32_spill] sm:$0xff]  ;;  %v8299_v26 = vpop.f32.mrb[59].mxu1 }
 0x174   :  { %15252 = vst [vmem:[#allocation198_spill] sm:$0xff] %v11372_v31  ;;  %15254 = vst [vmem:[#allocation199_spill] sm:$0xff] %v11377_v21  ;;  %v11403_v45 = vsel %vm1173_vm0, %v1164_v7, %v1165_v0  ;;  %v11407_v25 = vsel %vm1173_vm0, %v1165_v0, %v1166_v51  ;;  %v746_v30 = vmul.f32 %v15265_v46, %v10967_v2  ;;  %v3768_v23 = vrot.slane %v11372_v31, 1 }
 0x175   :  { %15262 = vst [vmem:[#allocation202_spill] sm:$0xff] %v11396_v53  ;;  %15263 = vst [vmem:[#allocation203_spill] sm:$0xff] %v11403_v45  ;;  %v3372_v29 = vadd.f32 %v8297_v5, %v10838_v33  ;;  %v15266_v53 = vld [vmem:[#allocation34_spill] sm:$0xff]  ;;  %v8300_v35 = vadd.f32 %v8299_v26, %v8298_v48  ;;  %v15267_v1 = vrot.slane %v11341_v10, 1  ;;  %v11423_v0 = vsel %vm1173_vm0, %v1166_v51, %v1167_v37 }
 0x176   :  { %15264 = vst [vmem:[#allocation204_spill] sm:$0xff] %v11407_v25  ;;  %v748_v3 = vmul.f32 %v15266_v53, %v11145_v55  ;;  %15269 = vst [vmem:[#allocation206_spill] sm:$0xff] %v11423_v0  ;;  %v757_v38 = vpack.c.bf16 %v747_v54, %v746_v30  ;;  %v15272_v48 = vrot.slane %v15259_v15, 1  ;;  %v11437_v55 = vpop.permute.xlu1 %2619  ;;  %v15276_v30 = vld [vmem:[#allocation46_spill] sm:$0xff]  ;;  %v11451_v56 = vmul.f32 %v15277_v11, %v11407_v25 }
 0x177   :  { %v11419_v7 = vsel %vm1173_vm0, %v15267_v1, %v3767_v44  ;;  %v11426_v5 = vmax.f32 %v3372_v29, 0.0  ;;  %v3375_v1 = vadd.f32 %v8300_v35, %v10838_v33  ;;  %15274 = vst [vmem:[#allocation209_spill] sm:$0xff] %v11437_v55  ;;  %v11439_v6 = vpop.permute.xlu0 %2614  ;;  %v11443_v29 = vsel %vm1173_vm0, %v3767_v44, %v3768_v23  ;;  %v15281_v25 = vld [vmem:[#allocation18_spill] sm:$0xff] }
 0x178   :  { %15268 = vst [vmem:[#allocation205_spill] sm:$0xff] %v11419_v7  ;;  %v11434_v26 = vsel %vm1173_vm0, %v15272_v48, %v15271_v19  ;;  %15275 = vst [vmem:[#allocation210_spill] sm:$0xff] %v11439_v6  ;;  %v758_v51 = vpack.c.bf16 %v749_v14, %v748_v3  ;;  %v11447_v54 = vmul.f32 %v15276_v30, %v11403_v45  ;;  %v15278_v19 = vld [vmem:[#allocation59_spill] sm:$0xff]  ;;  %v8301_v48 = vpop.f32.mrb[60].mxu1  ;;  %v15280_v3 = vld [vmem:[#allocation48_spill] sm:$0xff] }
 0x179   :  { %15270 = vst [vmem:[#allocation207_spill] sm:$0xff] %v11426_v5  ;;  %15273 = vst [vmem:[#allocation208_spill] sm:$0xff] %v11434_v26  ;;  %v11455_v35 = vmul.f32 %v15278_v19, %v10912_v62  ;;  %8520 = vmatmul.mubr.msk.bf16.gmra.mrb[40].mxu0 %vm902_vm2, %v757_v38  ;;  %v11462_v44 = vmul.f32 %v15280_v3, %v11423_v0  ;;  %v11464_v6 = vmax.f32 %v3375_v1, 0.0  ;;  %v8302_v55 = vpop.f32.mrb[61].mxu1  ;;  %v15283_v62 = vld [vmem:[#allocation17_spill] sm:$0xff]  ;;  %v15285_v19 = vld [vmem:[#allocation38_spill] sm:$0xff] }
 0x17a   :  { %8523 = vmatprep.mubr.msk.bf16.mxu0 %vm902_vm2, %v758_v51  ;;  %v11469_v45 = vmul.f32 %v11372_v31, %v15281_v25  ;;  %v11473_v38 = vmul.f32 %v11426_v5, %v15283_v62  ;;  %v1287_v14 = vmul.f32 %v15285_v19, %v11434_v26  ;;  %v15286_v30 = vld [vmem:[#allocation35_spill] sm:$0xff]  ;;  %v8303_v11 = vadd.f32 %v8302_v55, %v8301_v48  ;;  %v8304_v1 = vpop.f32.mrb[62].mxu1  ;;  %v11487_v62 = vpop.permute.xlu1 %2629  ;;  %v15291_v19 = vld [vmem:[#allocation36_spill] sm:$0xff]  ;;  %v15297_v3 = vld [vmem:[#allocation5_spill] sm:$0xff] }
 0x17b   :  { %15279 = vst [vmem:[#allocation211_spill] sm:$0xff] %v11455_v35  ;;  %v751_v0 = vmul.f32 %v15286_v30, %v11217_v39  ;;  %v3769_v35 = vrot.slane %v11426_v5, 1  ;;  %v11485_v25 = vsel %vm1173_vm0, %v1167_v37, %v15287_v50  ;;  %15289 = vst [vmem:[#allocation215_spill] sm:$0xff] %v11487_v62  ;;  %v11489_v21 = vpop.permute.xlu0 %2624  ;;  %v3770_v55 = vrot.slane %v11464_v6, 1  ;;  %v8305_v37 = vpop.f32.mrb[63].mxu1 }
 0x17c   :  { %15282 = vst [vmem:[#allocation212_spill] sm:$0xff] %v11469_v45  ;;  %15284 = vst [vmem:[#allocation213_spill] sm:$0xff] %v11473_v38  ;;  %v750_v51 = vmul.f32 %v15291_v19, %v11223_v40  ;;  %v3380_v39 = vadd.f32 %v8303_v11, %v10838_v33  ;;  %v11500_v50 = vmul.f32 %v11347_v59, %v11487_v62  ;;  %v15295_v45 = vld [vmem:[#allocation8_spill] sm:$0xff]  ;;  %v15296_v38 = vld [vmem:[#allocation117_spill] sm:$0xff] }
 0x17d   :  { %15288 = vst [vmem:[#allocation214_spill] sm:$0xff] %v11485_v25  ;;  %15290 = vst [vmem:[#allocation216_spill] sm:$0xff] %v11489_v21  ;;  %v11504_v61 = vmul.f32 %v11341_v10, %v11489_v21  ;;  %v8306_v2 = vadd.f32 %v8305_v37, %v8304_v1  ;;  %v11508_v26 = vsel %vm1173_vm0, %v3769_v35, %v3770_v55  ;;  %v15298_v1 = vld [vmem:[#allocation7_spill] sm:$0xff] }
 0x17e   :  { %15292 = vst [vmem:[#allocation217_spill] sm:$0xff] %v11500_v50  ;;  %15294 = vst [vmem:[#allocation219_spill] sm:$0xff] %v11508_v26  ;;  %v11512_v48 = vsel %vm1173_vm0, %v3768_v23, %v3769_v35  ;;  %v11514_v40 = vmax.f32 %v3380_v39, 0.0  ;;  %v759_v11 = vpack.c.bf16 %v751_v0, %v750_v51  ;;  %v1303_v62 = vpack.c.bf16 %v11275_v27, %v1287_v14  ;;  %v11526_v35 = vpop.permute.xlu1 %2639  ;;  %v15302_v14 = vld [vmem:[#allocation10_spill] sm:$0xff] }
 0x17f   :  { %15293 = vst [vmem:[#allocation218_spill] sm:$0xff] %v11504_v61  ;;  %v3463_v7 = vmul.f32 %v15296_v38, %v15295_v45  ;;  %v3464_v21 = vmul.f32 %v10897_v16, %v15297_v3  ;;  %v3465_v37 = vmul.f32 %v10951_v41, %v15298_v1  ;;  %v3383_v23 = vadd.f32 %v8306_v2, %v10838_v33  ;;  %v11528_v39 = vpop.permute.xlu0 %2634  ;;  %v15303_v3 = vld [vmem:[#allocation9_spill] sm:$0xff] }
 0x180   :  { %15299 = vst [vmem:[#allocation220_spill] sm:$0xff] %v11526_v35  ;;  %15300 = vst [vmem:[#allocation221_spill] sm:$0xff] %v11528_v39  ;;  %v3343_v27 = vadd.f32 %v11035_v52, %v10838_v33  ;;  %v11534_v0 = vmul.f32 %v11426_v5, %v11526_v35  ;;  %v3466_v51 = vmul.f32 %v10983_v58, %v15302_v14  ;;  %v15306_v14 = vld [vmem:[#allocation153_spill] sm:$0xff]  ;;  %v3771_v61 = vrot.slane %v11514_v40, 1 }
 0x181   :  { %8524 = vmatmul.mubr.msk.bf16.gmra.mrb[44].mxu0 %vm902_vm2, %v759_v11  ;;  %v3467_v26 = vmul.f32 %v11083_v32, %v15303_v3  ;;  %v11541_v2 = vmax.f32 %v3383_v23, 0.0  ;;  %v11545_v45 = vmul.f32 %v11372_v31, %v11528_v39  ;;  %v11550_v52 = vmul.f32 %v11464_v6, %v10346_v22 }
 0x182   :  { %15301 = vst [vmem:[#allocation222_spill] sm:$0xff] %v11534_v0  ;;  %8531 = vmatprep.mubr.msk.bf16.mxu0 %vm902_vm2, %v1303_v62  ;;  %v11554_v11 = vmul.f32 %v11514_v40, %v10344_v17  ;;  %v3348_v1 = vadd.f32 %v15306_v14, %v10838_v33  ;;  %v3356_v23 = vadd.f32 %v11199_v60, %v10838_v33  ;;  %v11565_v50 = vpop.permute.xlu1 %2649  ;;  %v15309_v17 = vld [vmem:[#allocation6_spill] sm:$0xff]  ;;  %v11573_v60 = vmax.f32 %v3343_v27, 0.0 }
 0x183   :  { %15304 = vst [vmem:[#allocation223_spill] sm:$0xff] %v11541_v2  ;;  %15305 = vst [vmem:[#allocation224_spill] sm:$0xff] %v11545_v45  ;;  %v3417_v62 = vrot.slane %v11541_v2, 7  ;;  %v11567_v39 = vpop.permute.xlu0 %2644  ;;  %v3462_v35 = vmul.f32 %v11541_v2, %v15309_v17  ;;  %v3351_v3 = vadd.f32 %v11131_v28, %v10838_v33  ;;  %v11579_v16 = vmul.f32 %v11514_v40, %v11565_v50 }
 0x184   :  { %15307 = vst [vmem:[#allocation153_spill] sm:$0xff] %v11565_v50  ;;  %15308 = vst [vmem:[#allocation225_spill] sm:$0xff] %v11567_v39  ;;  %v11583_v22 = vmul.f32 %v11464_v6, %v11567_v39  ;;  %v15313_v0 = vrot.slane %v11514_v40, 7  ;;  %v15314_v27 = vrot.slane %v15296_v38, 7  ;;  %v14771_v28 = vrot.slane %v11541_v2, 1  ;;  %v15318_v50 = vld [vmem:[#allocation21_spill] sm:$0xff] }
 0x185   :  { %15310 = vst [vmem:[#allocation226_spill] sm:$0xff] %v11573_v60  ;;  %15311 = vst [vmem:[#allocation227_spill] sm:$0xff] %v11579_v16  ;;  %v3478_v45 = vpack.c.bf16 %v3463_v7, %v3462_v35  ;;  %v11598_v14 = vmax.f32 %v3348_v1, 0.0  ;;  %v15317_v7 = vld [vmem:[#allocation22_spill] sm:$0xff]  ;;  %v11610_v38 = vmax.f32 %v3356_v23, 0.0  ;;  %v3479_v1 = vpack.c.bf16 %v3465_v37, %v3464_v21 }
 0x186   :  { %15312 = vst [vmem:[#allocation228_spill] sm:$0xff] %v11583_v22  ;;  %v11589_v17 = vsel %vm623_vm1, %v15313_v0, %v3417_v62  ;;  %v11595_v33 = vsel %vm623_vm1, %v3417_v62, %v15314_v27  ;;  %v11613_v62 = vpop.permute.xlu1 %2659  ;;  %v9542_v39 = vld [vmem:[%s14482_s10 + $0x8] sm:$0xff]   ;;  %v11628_v23 = vsel %vm1173_vm0, %v3770_v55, %v3771_v61  ;;  %v15323_v21 = vpack.c.bf16 %v11230_v24, %v11261_v8  ;;  %v15337_v22 = vld [vmem:[#allocation152_spill] sm:$0xff] }
 0x187   :  { %15315 = vst [vmem:[#allocation229_spill] sm:$0xff] %v11595_v33  ;;  %15316 = vst [vmem:[#allocation230_spill] sm:$0xff] %v11598_v14  ;;  %v11604_v35 = vmul.f32 %v11589_v17, %v15317_v7  ;;  %v11608_v0 = vmul.f32 %v11595_v33, %v15318_v50  ;;  %8671 = vmatprep.mubr.msk.bf16.mxu1 %vm902_vm2, %v3478_v45  ;;  %v11615_v27 = vpop.permute.xlu0 %2654  ;;  %v11624_v7 = vsel %vm1173_vm0, %v3771_v61, %v14771_v28  ;;  %v15322_v45 = vld [vmem:[#allocation47_spill] sm:$0xff]  ;;  %v9544_v61 = vld [vmem:[%s14478_s6 + $0x38] sm:$0xff]  }
 0x188   :  { %15319 = vst [vmem:[#allocation231_spill] sm:$0xff] %v11610_v38  ;;  %15320 = vst [vmem:[#allocation232_spill] sm:$0xff] %v11613_v62  ;;  %v11632_v50 = vmul.f32 %v15322_v45, %v11485_v25  ;;  %v3480_v37 = vpack.c.bf16 %v3467_v26, %v3466_v51  ;;  %v1307_v28 = vpack.c.bf16 %v11451_v56, %v11447_v54  ;;  %v11644_v55 = vmax.f32 %v3351_v3, 0.0  ;;  %v15342_v25 = vld [vmem:[#allocation13_spill] sm:$0xff] }
 0x189   :  { %15321 = vst [vmem:[#allocation233_spill] sm:$0xff] %v11615_v27  ;;  %8532 = vmatmul.mubr.msk.bf16.vlgmr.msra.gmra.mrb[32].mxu0 %vm902_vm2, %v15323_v21  ;;  %v3411_v16 = vrot.slane %v11341_v10, 7  ;;  %v3412_v27 = vrot.slane %v11347_v59, 7  ;;  %8672 = vmatmul.mubr.msk.bf16.vlgmr.msra.gmra.mrb[64].mxu1 %vm902_vm2, %v3479_v1  ;;  %v15325_v24 = vpack.c.bf16 %v11298_v42, %v11311_v43  ;;  %v15326_v8 = vrot.slane %v10944_v47, 1  ;;  %v9605_v43 = vld [vmem:[%s14482_s10] sm:$0xff]   ;;  %v15332_v1 = vld [vmem:[#allocation11_spill] sm:$0xff] }
 0x18a   :  { %15324 = vst [vmem:[#allocation234_spill] sm:$0xff] %v11644_v55  ;;  %v15327_v26 = vrot.slane %v10919_v63, 1  ;;  %v15329_v3 = vrot.slane %v11005_v9, 1  ;;  %8675 = vmatprep.mubr.msk.bf16.mxu1 %vm902_vm2, %v3480_v37  ;;  %8688 = vmatpush3.bf16.msra.mxu1 %v9605_v43  ;;  %v3469_v21 = vmul.f32 %v11598_v14, %v15332_v1  ;;  %v11680_v56 = vpop.permute.xlu1 %2864  ;;  %v11690_v43 = vld [vmem:[%s14482_s10 + $0x20] sm:$0xff]   ;;  %v15339_v62 = vrot.slane %v11573_v60, 1  ;;  %v15343_v63 = vld [vmem:[#allocation14_spill] sm:$0xff] }
 0x18b   :  { %8535 = vmatprep.mubr.msk.bf16.mxu0 %vm902_vm2, %v15325_v24  ;;  %v15330_v51 = vmov %v15326_v8  ;;  %15333 = vst [vmem:[#allocation237_spill] sm:$0xff] %v11680_v56  ;;  %8689 = vmatprep.subr.bf16.mxu1 %v9542_v39  ;;  %v11694_v24 = vmul.f32 %v11088_v57, %v11680_v56  ;;  %v3471_v47 = vmul.f32 %v11610_v38, %v15342_v25  ;;  %v3763_v56 = vrot.slane %v11598_v14, 1 }
 0x18c   :  { %v11661_v54 = vsel %vm1173_vm0, %v15327_v26, %v15326_v8  ;;  %v11669_v42 = vsel %vm1173_vm0, %v15330_v51, %v15329_v3  ;;  %v3413_v8 = vrot.slane %v11372_v31, 7  ;;  %v3414_v26 = vrot.slane %v11426_v5, 7  ;;  %v11682_v3 = vpop.permute.xlu0 %2859  ;;  %v15335_v51 = vld [vmem:[#allocation12_spill] sm:$0xff]  ;;  %8548 = vmatpush3.bf16.msra.mxu0 %v11307_v18  ;;  %v11733_v5 = vld [vmem:[%s14478_s6 + $0x40] sm:$0xff]  }
 0x18d   :  { %15328 = vst [vmem:[#allocation235_spill] sm:$0xff] %v11661_v54  ;;  %15331 = vst [vmem:[#allocation236_spill] sm:$0xff] %v11669_v42  ;;  %v3468_v37 = vmul.f32 %v11573_v60, %v15335_v51  ;;  %v11698_v1 = vmul.f32 %v15337_v22, %v11682_v3  ;;  %v15340_v51 = vrot.slane %v11083_v32, 1  ;;  %8549 = vmatprep.subr.bf16.mxu0 %v9544_v61  ;;  %v15344_v22 = vrot.slane %v11610_v38, 7 }
 0x18e   :  { %15334 = vst [vmem:[#allocation238_spill] sm:$0xff] %v11682_v3  ;;  %15336 = vst [vmem:[#allocation239_spill] sm:$0xff] %v11694_v24  ;;  %v3470_v57 = vmul.f32 %v11644_v55, %v15343_v63  ;;  %v11715_v3 = vsel %vm623_vm1, %v3411_v16, %v3412_v27  ;;  %v3764_v25 = vrot.slane %v11644_v55, 1  ;;  %8690 = vmatpush3.bf16.msra.mxu1 %v9542_v39  ;;  %v3415_v31 = vrot.slane %v11464_v6, 7 }
 0x18f   :  { %15338 = vst [vmem:[#allocation240_spill] sm:$0xff] %v11698_v1  ;;  %v11706_v18 = vsel %vm1173_vm0, %v15340_v51, %v15339_v62  ;;  %v11721_v33 = vsel %vm623_vm1, %v15344_v22, %v3411_v16  ;;  %v3481_v51 = vpack.c.bf16 %v3469_v21, %v3468_v37  ;;  %v11728_v63 = vmul.f32 %v11715_v3, %v15258_v36  ;;  %v11736_v22 = vpop.permute.xlu1 %2874  ;;  %v15348_v62 = vld [vmem:[#allocation49_spill] sm:$0xff] }
 0x190   :  { %15341 = vst [vmem:[#allocation241_spill] sm:$0xff] %v11706_v18  ;;  %15345 = vst [vmem:[#allocation242_spill] sm:$0xff] %v11736_v22  ;;  %v11738_v16 = vpop.permute.xlu0 %2869  ;;  %8550 = vmatpush3.bf16.msra.mxu0 %v9544_v61  ;;  %8707 = vmatprep.subr.bf16.mxu1 %v11690_v43  ;;  %v11743_v39 = vmul.f32 %v11721_v33, %v15265_v46  ;;  %v11747_v21 = vsel %vm623_vm1, %v3413_v8, %v3414_v26 }
 0x191   :  { %15346 = vst [vmem:[#allocation243_spill] sm:$0xff] %v11738_v16  ;;  %v11751_v37 = vsel %vm623_vm1, %v3412_v27, %v3413_v8  ;;  %v1300_v36 = vmul.f32 %v15348_v62, %v11669_v42  ;;  %v11757_v61 = vmul.f32 %v11706_v18, %v11736_v22  ;;  %v11761_v1 = vmul.f32 %v11162_v20, %v11738_v16  ;;  %v15367_v22 = vld [vmem:[#allocation219_spill] sm:$0xff] }
 0x192   :  { %15347 = vst [vmem:[#allocation244_spill] sm:$0xff] %v11743_v39  ;;  %v15351_v46 = vpack.c.bf16 %v11386_v12, %v11365_v49  ;;  %v3482_v24 = vpack.c.bf16 %v3471_v47, %v3470_v57  ;;  %8676 = vmatmul.mubr.msk.bf16.gmra.mrb[68].mxu1 %vm902_vm2, %v3481_v51  ;;  %v11773_v8 = vmul.f32 %v11751_v37, %v15266_v53  ;;  %v1171_v12 = vrot.slane %v10997_v13, 1  ;;  %v15378_v13 = vld [vmem:[#allocation61_spill] sm:$0xff]  ;;  %v15385_v20 = vld [vmem:[#allocation199_spill] sm:$0xff] }
 0x193   :  { %15349 = vst [vmem:[#allocation245_spill] sm:$0xff] %v11757_v61  ;;  %15350 = vst [vmem:[#allocation246_spill] sm:$0xff] %v11761_v1  ;;  %v11777_v16 = vmul.f32 %v11747_v21, %v15260_v34  ;;  %v11785_v49 = vsel %vm1173_vm0, %v3763_v56, %v3764_v25  ;;  %8567 = vmatprep.subr.bf16.mxu0 %v11733_v5  ;;  %v15356_v51 = vrot.slane %v11573_v60, 1  ;;  %v15357_v47 = vrot.slane %v11514_v40, 7  ;;  %v15358_v1 = vld [vmem:[#allocation50_spill] sm:$0xff] }
 0x194   :  { %8536 = vmatmul.mubr.msk.bf16.gmra.mrb[36].mxu0 %vm902_vm2, %v15351_v46  ;;  %15352 = vst [vmem:[#allocation247_spill] sm:$0xff] %v11773_v8  ;;  %8679 = vmatprep.mubr.msk.bf16.mxu1 %vm902_vm2, %v3482_v24  ;;  %v3765_v46 = vrot.slane %v11610_v38, 1  ;;  %v11791_v57 = vpop.permute.xlu0 %2879  ;;  %v11809_v53 = vsel %vm623_vm1, %v3414_v26, %v3415_v31  ;;  %v1299_v61 = vmul.f32 %v15358_v1, %v11661_v54 }
 0x195   :  { %8539 = vmatprep.mubr.msk.bf16.mxu0 %vm902_vm2, %v1307_v28  ;;  %15353 = vst [vmem:[#allocation248_spill] sm:$0xff] %v11777_v16  ;;  %v11789_v28 = vpop.permute.xlu1 %2884  ;;  %15355 = vst [vmem:[#allocation250_spill] sm:$0xff] %v11791_v57  ;;  %v11797_v27 = vsel %vm1173_vm0, %v15356_v51, %v3763_v56  ;;  %v11805_v34 = vsel %vm623_vm1, %v3415_v31, %v15357_v47  ;;  %v1308_v24 = vpack.c.bf16 %v11632_v50, %v11462_v44  ;;  %v15372_v44 = vld [vmem:[#allocation48_spill] sm:$0xff] }
 0x196   :  { %15354 = vst [vmem:[#allocation249_spill] sm:$0xff] %v11789_v28  ;;  %v11815_v56 = vmul.f32 %v11785_v49, %v11789_v28  ;;  %v11819_v51 = vmul.f32 %v11797_v27, %v11791_v57  ;;  %v15361_v47 = vrot.slane %v15259_v15, 1  ;;  %v11831_v26 = vmul.f32 %v11443_v29, %v15322_v45  ;;  %v15384_v15 = vld [vmem:[#allocation200_spill] sm:$0xff] }
 0x197   :  { %v11835_v28 = vmul.f32 %v11809_v53, %v15291_v19  ;;  %v11839_v57 = vmul.f32 %v11805_v34, %v15286_v30  ;;  %v11845_v50 = vsel %vm1173_vm0, %v3764_v25, %v3765_v46  ;;  %v11849_v45 = vmul.f32 %v15367_v22, %v15348_v62  ;;  %v15375_v25 = vld [vmem:[#allocation51_spill] sm:$0xff]  ;;  %v15377_v62 = vld [vmem:[#allocation128_spill] sm:$0xff] }
 0x198   :  { %15359 = vst [vmem:[#allocation251_spill] sm:$0xff] %v11815_v56  ;;  %15360 = vst [vmem:[#allocation252_spill] sm:$0xff] %v11819_v51  ;;  %v11827_v31 = vsel %vm1173_vm0, %v1171_v12, %v15361_v47  ;;  %v1309_v47 = vpack.c.bf16 %v1300_v36, %v1299_v61  ;;  %v15370_v19 = vrot.slane %v11341_v10, 1  ;;  %v11859_v54 = vpop.permute.xlu0 %2889  ;;  %v15373_v51 = vld [vmem:[#allocation205_spill] sm:$0xff]  ;;  %v11867_v36 = vmul.f32 %v11624_v7, %v15375_v25 }
 0x199   :  { %15362 = vst [vmem:[#allocation253_spill] sm:$0xff] %v11827_v31  ;;  %15363 = vst [vmem:[#allocation254_spill] sm:$0xff] %v11831_v26  ;;  %v11851_v42 = vpop.permute.xlu1 %2894  ;;  %v11863_v56 = vmul.f32 %v15373_v51, %v15372_v44  ;;  %v11873_v10 = vmul.f32 %v15378_v13, %v15377_v62  ;;  %v11886_v44 = vmul.f32 %v11512_v48, %v15358_v1  ;;  %v15382_v61 = vrot.slane %v11005_v9, 1  ;;  %v15394_v1 = vld [vmem:[#allocation121_spill] sm:$0xff] }
 0x19a   :  { %15364 = vst [vmem:[#allocation255_spill] sm:$0xff] %v11835_v28  ;;  %15365 = vst [vmem:[#allocation256_spill] sm:$0xff] %v11839_v57  ;;  %v11857_v30 = vsel %vm1173_vm0, %v3765_v46, %v15370_v19  ;;  %v11881_v46 = vmul.f32 %v11845_v50, %v11859_v54  ;;  %v1302_v9 = vmul.f32 %v15375_v25, %v11827_v31  ;;  %v15392_v28 = vld [vmem:[#allocation116_spill] sm:$0xff] }
 0x19b   :  { %15366 = vst [vmem:[#allocation257_spill] sm:$0xff] %v11845_v50  ;;  %15368 = vst [vmem:[#allocation219_spill] sm:$0xff] %v11849_v45  ;;  %v11877_v19 = vmul.f32 %v11857_v30, %v11851_v42  ;;  %v11892_v62 = vsel %vm1173_vm0, %v15382_v61, %v1171_v12  ;;  %v15393_v57 = vld [vmem:[#allocation60_spill] sm:$0xff]  ;;  %v15398_v61 = vld [vmem:[#allocation150_spill] sm:$0xff] }
 0x19c   :  { %15369 = vst [vmem:[#allocation258_spill] sm:$0xff] %v11851_v42  ;;  %15371 = vst [vmem:[#allocation259_spill] sm:$0xff] %v11859_v54  ;;  %8540 = vmatmul.mubr.msk.bf16.gmra.mrb[40].mxu0 %vm902_vm2, %v1308_v24  ;;  %v15386_v42 = vpack.c.bf16 %v15384_v15, %v15385_v20  ;;  %v15387_v54 = vld [vmem:[#allocation52_spill] sm:$0xff]  ;;  %v15389_v15 = vld [vmem:[#allocation213_spill] sm:$0xff]  ;;  %v11918_v8 = vmul.f32 %v15393_v57, %v15392_v28  ;;  %v11926_v31 = vpop.permute.xlu0 %2899 }
 0x19d   :  { %15374 = vst [vmem:[#allocation205_spill] sm:$0xff] %v11863_v56  ;;  %15376 = vst [vmem:[#allocation260_spill] sm:$0xff] %v11867_v36  ;;  %8543 = vmatprep.mubr.msk.bf16.mxu0 %vm902_vm2, %v1309_v47  ;;  %v11901_v24 = vmul.f32 %v11628_v23, %v15387_v54  ;;  %v15390_v20 = vld [vmem:[#allocation212_spill] sm:$0xff]  ;;  %v15395_v56 = vld [vmem:[#allocation62_spill] sm:$0xff]  ;;  %v11924_v12 = vpop.permute.xlu1 %2904  ;;  %v15402_v47 = vrot.slane %v11610_v38, 7  ;;  %v3407_v38 = vrot.slane %v11573_v60, 7 }
 0x19e   :  { %15379 = vst [vmem:[#allocation128_spill] sm:$0xff] %v11877_v19  ;;  %15380 = vst [vmem:[#allocation261_spill] sm:$0xff] %v11881_v46  ;;  %8680 = vmatmul.mubr.msk.bf16.gmra.mrb[72].mxu1 %vm902_vm2, %v15386_v42  ;;  %v15391_v42 = vpack.c.bf16 %v15389_v15, %v15390_v20  ;;  %v11922_v25 = vmul.f32 %v15395_v56, %v15394_v1  ;;  %v15399_v46 = vld [vmem:[#allocation54_spill] sm:$0xff]  ;;  %v11936_v28 = vmul.f32 %v11443_v29, %v11924_v12  ;;  %v15404_v57 = vld [vmem:[#allocation160_spill] sm:$0xff] }
 0x19f   :  { %15381 = vst [vmem:[#allocation262_spill] sm:$0xff] %v11886_v44  ;;  %15383 = vst [vmem:[#allocation263_spill] sm:$0xff] %v11892_v62  ;;  %v1562_v15 = vmul.f32 %v15399_v46, %v15398_v61  ;;  %v11940_v1 = vmul.f32 %v15373_v51, %v11926_v31  ;;  %v15403_v19 = vrot.slane %v11644_v55, 7  ;;  %v3408_v20 = vrot.slane %v11598_v14, 7  ;;  %v15407_v36 = vld [vmem:[#allocation175_spill] sm:$0xff]  ;;  %v15408_v46 = vld [vmem:[#allocation65_spill] sm:$0xff] }
 0x1a0   :  { %15388 = vst [vmem:[#allocation200_spill] sm:$0xff] %v11901_v24  ;;  %8683 = vmatprep.mubr.msk.bf16.mxu1 %vm902_vm2, %v15391_v42  ;;  %15396 = vst [vmem:[#allocation199_spill] sm:$0xff] %v11924_v12  ;;  %v1301_v42 = vmul.f32 %v15387_v54, %v11892_v62  ;;  %v15405_v54 = vld [vmem:[#allocation63_spill] sm:$0xff]  ;;  %v11962_v44 = vmul.f32 %v15408_v46, %v15407_v36  ;;  %v15409_v14 = vld [vmem:[#allocation24_spill] sm:$0xff]  ;;  %v11970_v16 = vpop.permute.xlu0 %2909  ;;  %v11979_v36 = vmul.f32 %v11721_v33, %v15378_v13 }
 0x1a1   :  { %15397 = vst [vmem:[#allocation213_spill] sm:$0xff] %v11926_v31  ;;  %15400 = vst [vmem:[#allocation212_spill] sm:$0xff] %v11936_v28  ;;  %v11948_v61 = vsel %vm623_vm1, %v15403_v19, %v15402_v47  ;;  %v11953_v62 = vmul.f32 %v15405_v54, %v15404_v57  ;;  %v15406_v12 = vld [vmem:[#allocation211_spill] sm:$0xff]  ;;  %v15410_v45 = vld [vmem:[#allocation129_spill] sm:$0xff]  ;;  %v11968_v26 = vpop.permute.xlu1 %2914  ;;  %v12008_v28 = vsel %vm623_vm1, %v3407_v38, %v3408_v20 }
 0x1a2   :  { %15401 = vst [vmem:[#allocation116_spill] sm:$0xff] %v11940_v1  ;;  %v1310_v47 = vpack.c.bf16 %v1302_v9, %v1301_v42  ;;  %v3436_v57 = vmul.f32 %v15410_v45, %v15409_v14  ;;  %15411 = vst [vmem:[#allocation121_spill] sm:$0xff] %v11968_v26  ;;  %v15413_v24 = vld [vmem:[#allocation186_spill] sm:$0xff]  ;;  %v11975_v31 = vmul.f32 %v11948_v61, %v15395_v56  ;;  %v15416_v60 = vld [vmem:[#allocation72_spill] sm:$0xff] }
 0x1a3   :  { %15412 = vst [vmem:[#allocation160_spill] sm:$0xff] %v11970_v16  ;;  %v1578_v39 = vpack.c.bf16 %v15413_v24, %v1562_v15  ;;  %15415 = vst [vmem:[#allocation175_spill] sm:$0xff] %v11979_v36  ;;  %v11983_v9 = vmul.f32 %v10951_v41, %v15416_v60  ;;  %v15418_v42 = vld [vmem:[#allocation23_spill] sm:$0xff]  ;;  %v11989_v1 = vmul.f32 %v15367_v22, %v11968_v26  ;;  %v15445_v60 = vld [vmem:[#allocation28_spill] sm:$0xff] }
 0x1a4   :  { %15414 = vst [vmem:[#allocation211_spill] sm:$0xff] %v11975_v31  ;;  %v15419_v19 = vld [vmem:[#allocation135_spill] sm:$0xff]  ;;  %v11993_v24 = vmul.f32 %v11512_v48, %v11970_v16  ;;  %8544 = vmatmul.mubr.msk.bf16.gmra.mrb[44].mxu0 %vm902_vm2, %v1310_v47  ;;  %v15424_v56 = vpack.c.bf16 %v11554_v11, %v11550_v52  ;;  %v15426_v41 = vpack.c.bf16 %v11608_v0, %v11604_v35  ;;  %v15427_v52 = vrot.slane %v11083_v32, 7  ;;  %v15433_v35 = vld [vmem:[#allocation66_spill] sm:$0xff]  ;;  %v15436_v0 = vld [vmem:[#allocation68_spill] sm:$0xff] }
 0x1a5   :  { %15417 = vst [vmem:[#allocation186_spill] sm:$0xff] %v11983_v9  ;;  %v3437_v14 = vmul.f32 %v15419_v19, %v15418_v42  ;;  %15420 = vst [vmem:[#allocation135_spill] sm:$0xff] %v11989_v1  ;;  %v15422_v15 = vld [vmem:[#allocation71_spill] sm:$0xff]  ;;  %8551 = vmatprep.mubr.msk.bf16.mxu0 %vm902_vm2, %v1578_v39  ;;  %v15425_v19 = vld [vmem:[#allocation117_spill] sm:$0xff]  ;;  %v12030_v47 = vmul.f32 %v11751_v37, %v15405_v54  ;;  %v12034_v42 = vpop.permute.xlu0 %2919 }
 0x1a6   :  { %15421 = vst [vmem:[#allocation264_spill] sm:$0xff] %v11993_v24  ;;  %v11998_v13 = vmul.f32 %v10983_v58, %v15422_v15  ;;  %8684 = vmatmul.mubr.msk.bf16.gmra.mrb[76].mxu1 %vm902_vm2, %v15424_v56  ;;  %v12022_v11 = vsel %vm623_vm1, %v15427_v52, %v3407_v38  ;;  %v15428_v39 = vld [vmem:[#allocation64_spill] sm:$0xff]  ;;  %v12032_v58 = vpop.permute.xlu1 %2924  ;;  %15432 = vst [vmem:[#allocation268_spill] sm:$0xff] %v12034_v42  ;;  %v12042_v38 = vmul.f32 %v11809_v53, %v15408_v46  ;;  %v15438_v24 = vld [vmem:[#allocation67_spill] sm:$0xff] }
 0x1a7   :  { %8691 = vmatprep.mubr.msk.bf16.mxu1 %vm902_vm2, %v15426_v41  ;;  %v12026_v56 = vmul.f32 %v11715_v3, %v15428_v39  ;;  %15430 = vst [vmem:[#allocation266_spill] sm:$0xff] %v12030_v47  ;;  %15431 = vst [vmem:[#allocation267_spill] sm:$0xff] %v12032_v58  ;;  %v12038_v41 = vmul.f32 %v11747_v21, %v15433_v35  ;;  %v12046_v52 = vmul.f32 %v11805_v34, %v15436_v0  ;;  %v15442_v32 = vld [vmem:[#allocation27_spill] sm:$0xff]  ;;  %v15443_v31 = vld [vmem:[#allocation90_spill] sm:$0xff] }
 0x1a8   :  { %15423 = vst [vmem:[#allocation265_spill] sm:$0xff] %v11998_v13  ;;  %15435 = vst [vmem:[#allocation270_spill] sm:$0xff] %v12042_v38  ;;  %v12050_v54 = vmul.f32 %v11589_v17, %v15438_v24  ;;  %v3451_v1 = vpack.c.bf16 %v3437_v14, %v3436_v57  ;;  %v12054_v16 = vmul.f32 %v11624_v7, %v12032_v58  ;;  %v15444_v58 = vld [vmem:[#allocation94_spill] sm:$0xff]  ;;  %v15446_v45 = vld [vmem:[#allocation89_spill] sm:$0xff] }
 0x1a9   :  { %15429 = vst [vmem:[#allocation117_spill] sm:$0xff] %v12026_v56  ;;  %15434 = vst [vmem:[#allocation269_spill] sm:$0xff] %v12038_v41  ;;  %v12058_v26 = vmul.f32 %v11628_v23, %v12034_v42  ;;  %v3441_v46 = vmul.f32 %v12008_v28, %v15442_v32  ;;  %v12064_v36 = vmul.f32 %v11706_v18, %v15443_v31  ;;  %v15447_v14 = vld [vmem:[#allocation98_spill] sm:$0xff]  ;;  %v15450_v32 = vrot.slane %v11644_v55, 7  ;;  %v15453_v9 = vld [vmem:[#allocation97_spill] sm:$0xff] }
 0x1aa   :  { %15437 = vst [vmem:[#allocation271_spill] sm:$0xff] %v12046_v52  ;;  %15439 = vst [vmem:[#allocation272_spill] sm:$0xff] %v12050_v54  ;;  %v12074_v42 = vmul.f32 %v11785_v49, %v15444_v58  ;;  %v3440_v31 = vmul.f32 %v12022_v11, %v15445_v60  ;;  %v12084_v56 = vmul.f32 %v11797_v27, %v15446_v45  ;;  %v15449_v52 = vld [vmem:[#allocation93_spill] sm:$0xff]  ;;  %v9546_v18 = vld [vmem:[%s14482_s10 + $0x28] sm:$0xff]   ;;  %v15455_v41 = vrot.slane %v15425_v19, 1 }
 0x1ab   :  { %15440 = vst [vmem:[#allocation273_spill] sm:$0xff] %v12054_v16  ;;  %15441 = vst [vmem:[#allocation274_spill] sm:$0xff] %v12058_v26  ;;  %v12088_v57 = vmul.f32 %v11857_v30, %v15447_v14  ;;  %v12092_v54 = vmul.f32 %v11845_v50, %v15449_v52  ;;  %v12098_v60 = vsel %vm623_vm1, %v3408_v20, %v15450_v32  ;;  %v15451_v26 = vld [vmem:[#allocation102_spill] sm:$0xff]  ;;  %v15456_v55 = vrot.slane %v11541_v2, 1  ;;  %v15458_v20 = vld [vmem:[#allocation180_spill] sm:$0xff] }
 0x1ac   :  { %v12105_v16 = vmul.f32 %v11443_v29, %v15451_v26  ;;  %v12109_v13 = vmul.f32 %v15373_v51, %v15453_v9  ;;  %v15459_v38 = vld [vmem:[#allocation185_spill] sm:$0xff]  ;;  %v3453_v14 = vpack.c.bf16 %v3441_v46, %v3440_v31  ;;  %v9548_v29 = vld [vmem:[%s14478_s6 + $0x48] sm:$0xff]   ;;  %v15499_v50 = vld [vmem:[#allocation155_spill] sm:$0xff] }
 0x1ad   :  { %15448 = vst [vmem:[#allocation275_spill] sm:$0xff] %v12088_v57  ;;  %v12117_v32 = vsel %vm1173_vm0, %v15456_v55, %v15455_v41  ;;  %v15460_v47 = vpack.c.bf16 %v15458_v20, %v15459_v38  ;;  %v15461_v51 = vld [vmem:[#allocation110_spill] sm:$0xff]  ;;  %v15463_v9 = vld [vmem:[#allocation101_spill] sm:$0xff]  ;;  %v15465_v55 = vld [vmem:[#allocation191_spill] sm:$0xff] }
 0x1ae   :  { %15452 = vst [vmem:[#allocation276_spill] sm:$0xff] %v12105_v16  ;;  %15454 = vst [vmem:[#allocation277_spill] sm:$0xff] %v12109_v13  ;;  %v12128_v26 = vmul.f32 %v15367_v22, %v15461_v51  ;;  %v12132_v58 = vmul.f32 %v11512_v48, %v15463_v9  ;;  %8692 = vmatmul.mubr.msk.bf16.vlgmr.msra.gmra.mrb[64].mxu1 %vm902_vm2, %v3451_v1  ;;  %v15466_v41 = vld [vmem:[#allocation194_spill] sm:$0xff]  ;;  %v15468_v31 = vld [vmem:[#allocation29_spill] sm:$0xff] }
 0x1af   :  { %15457 = vst [vmem:[#allocation278_spill] sm:$0xff] %v12117_v32  ;;  %8552 = vmatmul.mubr.msk.bf16.vlgmr.msra.gmra.mrb[32].mxu0 %vm902_vm2, %v15460_v47  ;;  %v15467_v38 = vpack.c.bf16 %v15465_v55, %v15466_v41  ;;  %v3443_v46 = vmul.f32 %v11948_v61, %v15468_v31  ;;  %v15469_v47 = vld [vmem:[#allocation114_spill] sm:$0xff]  ;;  %v15471_v22 = vld [vmem:[#allocation109_spill] sm:$0xff]  ;;  %v15473_v48 = vld [vmem:[#allocation179_spill] sm:$0xff]  ;;  %8708 = vmatpush3.bf16.msra.mxu1 %v11690_v43 }
 0x1b0   :  { %15462 = vst [vmem:[#allocation180_spill] sm:$0xff] %v12128_v26  ;;  %15464 = vst [vmem:[#allocation185_spill] sm:$0xff] %v12132_v58  ;;  %v12143_v20 = vmul.f32 %v11624_v7, %v15469_v47  ;;  %v12147_v51 = vmul.f32 %v11628_v23, %v15471_v22  ;;  %v15474_v9 = vld [vmem:[#allocation178_spill] sm:$0xff]  ;;  %v15477_v41 = vld [vmem:[#allocation113_spill] sm:$0xff]  ;;  %8709 = vmatprep.subr.bf16.mxu1 %v9546_v18  ;;  %8568 = vmatpush3.bf16.msra.mxu0 %v11733_v5 }
 0x1b1   :  { %8555 = vmatprep.mubr.msk.bf16.mxu0 %vm902_vm2, %v15467_v38  ;;  %v15475_v52 = vpack.c.bf16 %v15473_v48, %v15474_v9  ;;  %v15476_v1 = vld [vmem:[#allocation30_spill] sm:$0xff]  ;;  %v12158_v38 = vmul.f32 %v12117_v32, %v15477_v41  ;;  %v12164_v7 = vld [vmem:[%s14482_s10 + $0x30] sm:$0xff]   ;;  %v15479_v23 = vld [vmem:[#allocation80_spill] sm:$0xff]  ;;  %8569 = vmatprep.subr.bf16.mxu0 %v9548_v29 }
 0x1b2   :  { %15470 = vst [vmem:[#allocation191_spill] sm:$0xff] %v12143_v20  ;;  %15472 = vst [vmem:[#allocation194_spill] sm:$0xff] %v12147_v51  ;;  %v3442_v55 = vmul.f32 %v12098_v60, %v15476_v1  ;;  %v12168_v9 = vmul.f32 %v11347_v59, %v15479_v23  ;;  %v15480_v43 = vld [vmem:[#allocation79_spill] sm:$0xff]  ;;  %v15482_v5 = vld [vmem:[#allocation82_spill] sm:$0xff] }
 0x1b3   :  { %8695 = vmatprep.mubr.msk.bf16.mxu1 %vm902_vm2, %v15475_v52  ;;  %15478 = vst [vmem:[#allocation179_spill] sm:$0xff] %v12158_v38  ;;  %v15481_v52 = vld [vmem:[#allocation198_spill] sm:$0xff]  ;;  %v12177_v1 = vld [vmem:[%s14478_s6 + $0x50] sm:$0xff]   ;;  %v15484_v41 = vld [vmem:[#allocation81_spill] sm:$0xff]  ;;  %8710 = vmatpush3.bf16.msra.mxu1 %v9546_v18 }
 0x1b4   :  { %v12172_v48 = vmul.f32 %v15481_v52, %v15480_v43  ;;  %v15483_v31 = vld [vmem:[#allocation207_spill] sm:$0xff]  ;;  %v12185_v22 = vmul.f32 %v11464_v6, %v15484_v41  ;;  %v15485_v59 = vld [vmem:[#allocation84_spill] sm:$0xff]  ;;  %v3454_v43 = vpack.c.bf16 %v3443_v46, %v3442_v55  ;;  %8570 = vmatpush3.bf16.msra.mxu0 %v9548_v29  ;;  %8727 = vmatprep.subr.bf16.mxu1 %v12164_v7  ;;  %v15494_v18 = vld [vmem:[#allocation145_spill] sm:$0xff] }
 0x1b5   :  { %v12181_v47 = vmul.f32 %v15483_v31, %v15482_v5  ;;  %v12189_v45 = vmul.f32 %v11514_v40, %v15485_v59  ;;  %v15486_v52 = vld [vmem:[#allocation83_spill] sm:$0xff]  ;;  %v15487_v5 = vld [vmem:[#allocation140_spill] sm:$0xff]  ;;  %v15489_v40 = vpack.c.bf16 %v15406_v12, %v11918_v8  ;;  %8587 = vmatprep.subr.bf16.mxu0 %v12177_v1  ;;  %v12233_v6 = vmul.f32 %v11948_v61, %v15494_v18  ;;  %v15560_v20 = vld [vmem:[#allocation46_spill] sm:$0xff] }
 0x1b6   :  { %v12193_v23 = vmul.f32 %v11541_v2, %v15486_v52  ;;  %v12216_v31 = vmul.f32 %v12022_v11, %v15487_v5  ;;  %v15490_v29 = vld [vmem:[#allocation139_spill] sm:$0xff]  ;;  %v15492_v2 = vld [vmem:[#allocation146_spill] sm:$0xff]  ;;  %8696 = vmatmul.mubr.msk.bf16.gmra.mrb[68].mxu1 %vm902_vm2, %v3453_v14  ;;  %v15496_v8 = vpack.c.bf16 %v11873_v10, %v11922_v25  ;;  %v15497_v12 = vld [vmem:[#allocation156_spill] sm:$0xff] }
 0x1b7   :  { %8556 = vmatmul.mubr.msk.bf16.gmra.mrb[36].mxu0 %vm902_vm2, %v15489_v40  ;;  %v12225_v46 = vmul.f32 %v12008_v28, %v15490_v29  ;;  %v12229_v55 = vmul.f32 %v12098_v60, %v15492_v2  ;;  %15495 = vst [vmem:[#allocation279_spill] sm:$0xff] %v12233_v6  ;;  %v12242_v40 = vmul.f32 %v11721_v33, %v15497_v12  ;;  %v15501_v2 = vld [vmem:[#allocation163_spill] sm:$0xff]  ;;  %v15503_v25 = vld [vmem:[#allocation161_spill] sm:$0xff]  ;;  %v15505_v14 = vld [vmem:[#allocation174_spill] sm:$0xff] }
 0x1b8   :  { %15488 = vst [vmem:[#allocation178_spill] sm:$0xff] %v12216_v31  ;;  %8559 = vmatprep.mubr.msk.bf16.mxu0 %vm902_vm2, %v15496_v8  ;;  %v12246_v29 = vmul.f32 %v11715_v3, %v15499_v50  ;;  %v12250_v5 = vmul.f32 %v11751_v37, %v15501_v2  ;;  %8699 = vmatprep.mubr.msk.bf16.mxu1 %vm902_vm2, %v3454_v43  ;;  %v15507_v8 = vld [vmem:[#allocation172_spill] sm:$0xff]  ;;  %v15509_v2 = vld [vmem:[#allocation183_spill] sm:$0xff]  ;;  %v15511_v10 = vld [vmem:[#allocation182_spill] sm:$0xff] }
 0x1b9   :  { %15491 = vst [vmem:[#allocation198_spill] sm:$0xff] %v12225_v46  ;;  %15493 = vst [vmem:[#allocation207_spill] sm:$0xff] %v12229_v55  ;;  %v12259_v33 = vmul.f32 %v11747_v21, %v15503_v25  ;;  %v12263_v3 = vmul.f32 %v11809_v53, %v15505_v14  ;;  %v12269_v43 = vmul.f32 %v11805_v34, %v15507_v8  ;;  %v15512_v50 = vld [vmem:[#allocation229_spill] sm:$0xff]  ;;  %v15515_v14 = vld [vmem:[#allocation162_spill] sm:$0xff] }
 0x1ba   :  { %15498 = vst [vmem:[#allocation280_spill] sm:$0xff] %v12242_v40  ;;  %15500 = vst [vmem:[#allocation281_spill] sm:$0xff] %v12246_v29  ;;  %v12273_v61 = vmul.f32 %v11589_v17, %v15509_v2  ;;  %v12277_v12 = vmul.f32 %v15512_v50, %v15511_v10  ;;  %v15514_v21 = vld [vmem:[#allocation133_spill] sm:$0xff]  ;;  %v1574_v37 = vmul.f32 %v15433_v35, %v15515_v14  ;;  %v15518_v14 = vld [vmem:[#allocation248_spill] sm:$0xff] }
 0x1bb   :  { %15502 = vst [vmem:[#allocation282_spill] sm:$0xff] %v12250_v5  ;;  %15504 = vst [vmem:[#allocation283_spill] sm:$0xff] %v12259_v33  ;;  %v1572_v25 = vmul.f32 %v15428_v39, %v15514_v21  ;;  %v15516_v21 = vld [vmem:[#allocation244_spill] sm:$0xff]  ;;  %v15519_v53 = vld [vmem:[#allocation247_spill] sm:$0xff] }
 0x1bc   :  { %15506 = vst [vmem:[#allocation284_spill] sm:$0xff] %v12263_v3  ;;  %15508 = vst [vmem:[#allocation285_spill] sm:$0xff] %v12269_v43  ;;  %v1584_v18 = vpack.c.bf16 %v11962_v44, %v1574_v37  ;;  %v15517_v39 = vpack.c.bf16 %v11728_v63, %v15516_v21  ;;  %v15520_v35 = vpack.c.bf16 %v15518_v14, %v15519_v53  ;;  %v15521_v34 = vld [vmem:[#allocation149_spill] sm:$0xff]  ;;  %v15524_v37 = vld [vmem:[#allocation91_spill] sm:$0xff] }
 0x1bd   :  { %15510 = vst [vmem:[#allocation286_spill] sm:$0xff] %v12273_v61  ;;  %15513 = vst [vmem:[#allocation229_spill] sm:$0xff] %v12277_v12  ;;  %v1583_v8 = vpack.c.bf16 %v11953_v62, %v1572_v25  ;;  %v1577_v17 = vmul.f32 %v15438_v24, %v15521_v34  ;;  %v15522_v62 = vld [vmem:[#allocation95_spill] sm:$0xff]  ;;  %v15523_v25 = vld [vmem:[#allocation69_spill] sm:$0xff] }
 0x1be   :  { %8700 = vmatmul.mubr.msk.bf16.gmra.mrb[72].mxu1 %vm902_vm2, %v15517_v39  ;;  %v1838_v44 = vmul.f32 %v15523_v25, %v15522_v62  ;;  %v15526_v12 = vld [vmem:[#allocation115_spill] sm:$0xff]  ;;  %v15528_v39 = vrot.slane %v15425_v19, 1  ;;  %v15529_v53 = vld [vmem:[#allocation173_spill] sm:$0xff]  ;;  %v15530_v21 = vld [vmem:[#allocation38_spill] sm:$0xff] }
 0x1bf   :  { %8560 = vmatmul.mubr.msk.bf16.gmra.mrb[40].mxu0 %vm902_vm2, %v1583_v8  ;;  %8703 = vmatprep.mubr.msk.bf16.mxu1 %vm902_vm2, %v15520_v35  ;;  %v15525_v8 = vld [vmem:[#allocation70_spill] sm:$0xff]  ;;  %v15527_v63 = vrot.slane %v15526_v12, 1  ;;  %v1576_v35 = vmul.f32 %v15436_v0, %v15529_v53  ;;  %v3789_v14 = vmul.f32 %v12117_v32, %v15530_v21  ;;  %v15531_v24 = vld [vmem:[#allocation37_spill] sm:$0xff]  ;;  %v15532_v40 = vld [vmem:[#allocation256_spill] sm:$0xff] }
 0x1c0   :  { %8563 = vmatprep.mubr.msk.bf16.mxu0 %vm902_vm2, %v1584_v18  ;;  %v1837_v61 = vmul.f32 %v15525_v8, %v15524_v37  ;;  %v15533_v29 = vld [vmem:[#allocation255_spill] sm:$0xff]  ;;  %v15536_v53 = vld [vmem:[#allocation96_spill] sm:$0xff]  ;;  %v15561_v38 = vld [vmem:[#allocation257_spill] sm:$0xff] }
 0x1c1   :  { %v12313_v18 = vsel %vm1173_vm0, %v15528_v39, %v15527_v63  ;;  %v1585_v43 = vpack.c.bf16 %v1577_v17, %v1576_v35  ;;  %v15534_v55 = vpack.c.bf16 %v15532_v40, %v15533_v29  ;;  %v15535_v63 = vld [vmem:[#allocation100_spill] sm:$0xff]  ;;  %v15538_v17 = vld [vmem:[#allocation103_spill] sm:$0xff]  ;;  %v15543_v29 = vld [vmem:[#allocation74_spill] sm:$0xff]  ;;  %v3797_v26 = vmul.f32 %v15561_v38, %v15560_v20 }
 0x1c2   :  { %v3790_v3 = vmul.f32 %v12313_v18, %v15531_v24  ;;  %v1853_v5 = vpack.c.bf16 %v1838_v44, %v1837_v61  ;;  %v1840_v39 = vmul.f32 %v15422_v15, %v15535_v63  ;;  %v15537_v0 = vld [vmem:[#allocation72_spill] sm:$0xff]  ;;  %v15539_v61 = vld [vmem:[#allocation73_spill] sm:$0xff]  ;;  %v15544_v24 = vld [vmem:[#allocation42_spill] sm:$0xff] }
 0x1c3   :  { %v1839_v21 = vmul.f32 %v15537_v0, %v15536_v53  ;;  %v1842_v44 = vmul.f32 %v15539_v61, %v15538_v17  ;;  %v9550_v15 = vld [vmem:[%s14482_s10 + $0x38] sm:$0xff]   ;;  %v15580_v20 = vld [vmem:[#allocation134_spill] sm:$0xff]  ;;  %v15583_v58 = vld [vmem:[#allocation129_spill] sm:$0xff] }
 0x1c4   :  { %v3805_v33 = vpack.c.bf16 %v3790_v3, %v3789_v14  ;;  %v15541_v3 = vld [vmem:[#allocation241_spill] sm:$0xff]  ;;  %v15542_v14 = vld [vmem:[#allocation99_spill] sm:$0xff]  ;;  %v9552_v0 = vld [vmem:[%s14478_s6 + $0x58] sm:$0xff]  }
 0x1c5   :  { %v1841_v40 = vmul.f32 %v15543_v29, %v15542_v14  ;;  %v15558_v31 = vld [vmem:[#allocation108_spill] sm:$0xff] }
 0x1c6   :  { %8704 = vmatmul.mubr.msk.bf16.gmra.mrb[76].mxu1 %vm902_vm2, %v15534_v55  ;;  %v1854_v55 = vpack.c.bf16 %v1840_v39, %v1839_v21  ;;  %v15549_v21 = vld [vmem:[#allocation107_spill] sm:$0xff]  ;;  %v15564_v38 = vld [vmem:[#allocation136_spill] sm:$0xff] }
 0x1c7   :  { %8564 = vmatmul.mubr.msk.bf16.gmra.mrb[44].mxu0 %vm902_vm2, %v1585_v43  ;;  %8711 = vmatprep.mubr.msk.bf16.mxu1 %vm902_vm2, %v3805_v33  ;;  %v15540_v43 = vld [vmem:[#allocation41_spill] sm:$0xff]  ;;  %v1855_v32 = vpack.c.bf16 %v1842_v44, %v1841_v40  ;;  %v15550_v39 = vld [vmem:[#allocation75_spill] sm:$0xff]  ;;  %v15585_v57 = vld [vmem:[#allocation200_spill] sm:$0xff] }
 0x1c8   :  { %8571 = vmatprep.mubr.msk.bf16.mxu0 %vm902_vm2, %v1853_v5  ;;  %v3794_v35 = vmul.f32 %v15541_v3, %v15540_v43  ;;  %v15545_v5 = vld [vmem:[#allocation164_spill] sm:$0xff]  ;;  %v15546_v3 = vld [vmem:[#allocation154_spill] sm:$0xff]  ;;  %v15547_v43 = vld [vmem:[#allocation157_spill] sm:$0xff]  ;;  %v1844_v44 = vmul.f32 %v15550_v39, %v15549_v21 }
 0x1c9   :  { %v3793_v4 = vmul.f32 %v15545_v5, %v15544_v24  ;;  %v15548_v6 = vpack.c.bf16 %v15546_v3, %v15547_v43  ;;  %v15551_v40 = vld [vmem:[#allocation43_spill] sm:$0xff] }
 0x1cb   :  { %v3807_v33 = vpack.c.bf16 %v3794_v35, %v3793_v4  ;;  %v3796_v4 = vmul.f32 %v11785_v49, %v15551_v40  ;;  %v15552_v35 = vld [vmem:[#allocation111_spill] sm:$0xff]  ;;  %v9555_v49 = vld [vmem:[%s14478_s6 + $0x60] sm:$0xff]   ;;  %v15557_v40 = vld [vmem:[#allocation44_spill] sm:$0xff] }
 0x1cc   :  { %v3795_v24 = vmul.f32 %v11797_v27, %v15557_v40  ;;  %v15562_v27 = vld [vmem:[#allocation118_spill] sm:$0xff]  ;;  %v15563_v40 = vld [vmem:[#allocation79_spill] sm:$0xff] }
 0x1cd   :  { %v1848_v16 = vmul.f32 %v15563_v40, %v15562_v27  ;;  %v15575_v40 = vld [vmem:[#allocation106_spill] sm:$0xff] }
 0x1ce   :  { %8712 = vmatmul.mubr.msk.bf16.vlgmr.msra.gmra.mrb[64].mxu1 %vm902_vm2, %v15548_v6  ;;  %v15554_v6 = vld [vmem:[#allocation45_spill] sm:$0xff] }
 0x1cf   :  { %8572 = vmatmul.mubr.msk.bf16.vlgmr.msra.gmra.mrb[32].mxu0 %vm902_vm2, %v1854_v55  ;;  %8715 = vmatprep.mubr.msk.bf16.mxu1 %vm902_vm2, %v3807_v33  ;;  %v15553_v55 = vld [vmem:[#allocation77_spill] sm:$0xff]  ;;  %v3798_v43 = vmul.f32 %v11857_v30, %v15554_v6  ;;  %v15556_v33 = vld [vmem:[#allocation76_spill] sm:$0xff]  ;;  %v3808_v30 = vpack.c.bf16 %v3796_v4, %v3795_v24  ;;  %v15568_v4 = vld [vmem:[#allocation82_spill] sm:$0xff] }
 0x1d0   :  { %8575 = vmatprep.mubr.msk.bf16.mxu0 %vm902_vm2, %v1855_v32  ;;  %8728 = vmatpush3.bf16.msra.mxu1 %v12164_v7  ;;  %v1846_v5 = vmul.f32 %v15553_v55, %v15552_v35  ;;  %v9553_v32 = vld [vmem:[%s14482_s10 + $0x40] sm:$0xff]   ;;  %v15565_v24 = vld [vmem:[#allocation112_spill] sm:$0xff] }
 0x1d1   :  { %8729 = vmatprep.subr.bf16.mxu1 %v9550_v15  ;;  %8588 = vmatpush3.bf16.msra.mxu0 %v12177_v1  ;;  %v15555_v7 = vld [vmem:[#allocation105_spill] sm:$0xff]  ;;  %v15559_v1 = vld [vmem:[#allocation78_spill] sm:$0xff]  ;;  %v3809_v37 = vpack.c.bf16 %v3798_v43, %v3797_v26 }
 0x1d2   :  { %v1843_v3 = vmul.f32 %v15556_v33, %v15555_v7  ;;  %8589 = vmatprep.subr.bf16.mxu0 %v9552_v0  ;;  %v1845_v46 = vmul.f32 %v15559_v1, %v15558_v31  ;;  %v15569_v43 = vld [vmem:[#allocation254_spill] sm:$0xff] }
 0x1d4   :  { %v1856_v51 = vpack.c.bf16 %v1844_v44, %v1843_v3  ;;  %8730 = vmatpush3.bf16.msra.mxu1 %v9550_v15  ;;  %v1857_v6 = vpack.c.bf16 %v1846_v5, %v1845_v46  ;;  %v1850_v15 = vmul.f32 %v15484_v41, %v15564_v38  ;;  %v15566_v46 = vld [vmem:[#allocation80_spill] sm:$0xff] }
 0x1d5   :  { %8590 = vmatpush3.bf16.msra.mxu0 %v9552_v0  ;;  %8747 = vmatprep.subr.bf16.mxu1 %v9553_v32  ;;  %v1847_v0 = vmul.f32 %v15566_v46, %v15565_v24  ;;  %v15567_v44 = vld [vmem:[#allocation124_spill] sm:$0xff]  ;;  %v1852_v46 = vmul.f32 %v15486_v52, %v15575_v40 }
 0x1d6   :  { %8607 = vmatprep.subr.bf16.mxu0 %v9555_v49  ;;  %8716 = vmatmul.mubr.msk.bf16.gmra.mrb[68].mxu1 %vm902_vm2, %v3808_v30  ;;  %v15573_v30 = vld [vmem:[#allocation262_spill] sm:$0xff]  ;;  %v15584_v40 = vld [vmem:[#allocation260_spill] sm:$0xff] }
 0x1d7   :  { %8576 = vmatmul.mubr.msk.bf16.gmra.mrb[36].mxu0 %vm902_vm2, %v1856_v51  ;;  %8719 = vmatprep.mubr.msk.bf16.mxu1 %vm902_vm2, %v3809_v37  ;;  %v1849_v51 = vmul.f32 %v15568_v4, %v15567_v44  ;;  %v1858_v26 = vpack.c.bf16 %v1848_v16, %v1847_v0  ;;  %v15572_v37 = vld [vmem:[#allocation219_spill] sm:$0xff]  ;;  %v15576_v4 = vld [vmem:[#allocation165_spill] sm:$0xff]  ;;  %v15578_v0 = vld [vmem:[#allocation104_spill] sm:$0xff] }
 0x1d8   :  { %8579 = vmatprep.mubr.msk.bf16.mxu0 %vm902_vm2, %v1857_v6  ;;  %v15570_v6 = vld [vmem:[#allocation205_spill] sm:$0xff]  ;;  %v15574_v41 = vpack.c.bf16 %v15572_v37, %v15573_v30  ;;  %v15589_v38 = vld [vmem:[#allocation168_spill] sm:$0xff] }
 0x1d9   :  { %v1859_v5 = vpack.c.bf16 %v1850_v15, %v1849_v51  ;;  %v15571_v3 = vpack.c.bf16 %v15569_v43, %v15570_v6  ;;  %v15577_v16 = vld [vmem:[#allocation85_spill] sm:$0xff]  ;;  %v15579_v51 = vld [vmem:[#allocation86_spill] sm:$0xff]  ;;  %v1851_v43 = vmul.f32 %v15485_v59, %v15580_v20  ;;  %v15588_v59 = vld [vmem:[#allocation87_spill] sm:$0xff] }
 0x1da   :  { %v2113_v15 = vmul.f32 %v15577_v16, %v15576_v4  ;;  %v15581_v6 = vld [vmem:[#allocation54_spill] sm:$0xff]  ;;  %v15586_v4 = vpack.c.bf16 %v15584_v40, %v15585_v57 }
 0x1db   :  { %v1860_v30 = vpack.c.bf16 %v1852_v46, %v1851_v43  ;;  %v15592_v46 = vld [vmem:[#allocation89_spill] sm:$0xff]  ;;  %v15594_v43 = vld [vmem:[#allocation90_spill] sm:$0xff] }
 0x1de   :  { %8720 = vmatmul.mubr.msk.bf16.gmra.mrb[72].mxu1 %vm902_vm2, %v15571_v3  ;;  %v15582_v3 = vld [vmem:[#allocation53_spill] sm:$0xff] }
 0x1df   :  { %8580 = vmatmul.mubr.msk.bf16.gmra.mrb[40].mxu0 %vm902_vm2, %v1858_v26  ;;  %8723 = vmatprep.mubr.msk.bf16.mxu1 %vm902_vm2, %v15574_v41  ;;  %v2112_v26 = vmul.f32 %v15579_v51, %v15578_v0  ;;  %v3968_v37 = vmul.f32 %v15583_v58, %v15582_v3  ;;  %v15587_v0 = vld [vmem:[#allocation184_spill] sm:$0xff]  ;;  %v15591_v58 = vld [vmem:[#allocation190_spill] sm:$0xff] }
 0x1e0   :  { %8583 = vmatprep.mubr.msk.bf16.mxu0 %vm902_vm2, %v1859_v5  ;;  %v3967_v5 = vmul.f32 %v15512_v50, %v15581_v6  ;;  %v2115_v13 = vmul.f32 %v15588_v59, %v15587_v0  ;;  %v15590_v50 = vld [vmem:[#allocation88_spill] sm:$0xff]  ;;  %v9554_v59 = vld [vmem:[%s14482_s10 + $0x48] sm:$0xff]  }
 0x1e1   :  { %v2128_v41 = vpack.c.bf16 %v2113_v15, %v2112_v26  ;;  %v2114_v6 = vmul.f32 %v15590_v50, %v15589_v38  ;;  %v2117_v15 = vmul.f32 %v15592_v46, %v15591_v58  ;;  %v15593_v26 = vld [vmem:[#allocation181_spill] sm:$0xff]  ;;  %v9556_v46 = vld [vmem:[%s14478_s6 + $0x68] sm:$0xff]   ;;  %v15599_v50 = vld [vmem:[#allocation143_spill] sm:$0xff] }
 0x1e2   :  { %v3983_v52 = vpack.c.bf16 %v3968_v37, %v3967_v5  ;;  %v2116_v5 = vmul.f32 %v15594_v43, %v15593_v26  ;;  %v15595_v37 = vld [vmem:[#allocation57_spill] sm:$0xff]  ;;  %v15598_v43 = vld [vmem:[#allocation144_spill] sm:$0xff] }
 0x1e3   :  { %v3972_v57 = vmul.f32 %v12022_v11, %v15595_v37  ;;  %v2129_v40 = vpack.c.bf16 %v2115_v13, %v2114_v6  ;;  %v15600_v58 = vpack.c.bf16 %v15598_v43, %v15599_v50  ;;  %v15601_v13 = vld [vmem:[#allocation203_spill] sm:$0xff]  ;;  %v15602_v11 = vld [vmem:[#allocation93_spill] sm:$0xff]  ;;  %v15607_v37 = vld [vmem:[#allocation204_spill] sm:$0xff] }
 0x1e4   :  { %v2130_v3 = vpack.c.bf16 %v2117_v15, %v2116_v5  ;;  %v2119_v6 = vmul.f32 %v15602_v11, %v15601_v13  ;;  %v15603_v15 = vld [vmem:[#allocation195_spill] sm:$0xff]  ;;  %v15604_v5 = vld [vmem:[#allocation94_spill] sm:$0xff]  ;;  %v15610_v43 = vld [vmem:[#allocation60_spill] sm:$0xff] }
 0x1e5   :  { %v15609_v50 = vld [vmem:[#allocation59_spill] sm:$0xff] }
 0x1e6   :  { %8724 = vmatmul.mubr.msk.bf16.gmra.mrb[76].mxu1 %vm902_vm2, %v15586_v4  ;;  %v15596_v4 = vld [vmem:[#allocation58_spill] sm:$0xff] }
 0x1e7   :  { %8584 = vmatmul.mubr.msk.bf16.gmra.mrb[44].mxu0 %vm902_vm2, %v1860_v30  ;;  %8731 = vmatprep.mubr.msk.bf16.mxu1 %vm902_vm2, %v3983_v52  ;;  %v15597_v30 = vld [vmem:[#allocation171_spill] sm:$0xff] }
 0x1e8   :  { %8591 = vmatprep.mubr.msk.bf16.mxu0 %vm902_vm2, %v2128_v41  ;;  %v3971_v41 = vmul.f32 %v15597_v30, %v15596_v4  ;;  %v2118_v30 = vmul.f32 %v15604_v5, %v15603_v15  ;;  %v15608_v4 = vld [vmem:[#allocation98_spill] sm:$0xff] }
 0x1e9   :  { %v2120_v0 = vmul.f32 %v15608_v4, %v15607_v37 }
 0x1ea   :  { %v3985_v52 = vpack.c.bf16 %v3972_v57, %v3971_v41  ;;  %v15605_v57 = vld [vmem:[#allocation206_spill] sm:$0xff] }
 0x1ee   :  { %8732 = vmatmul.mubr.msk.bf16.vlgmr.msra.gmra.mrb[64].mxu1 %vm902_vm2, %v15600_v58  ;;  %v3974_v58 = vmul.f32 %v12098_v60, %v15609_v50  ;;  %v15611_v60 = vld [vmem:[#allocation235_spill] sm:$0xff]  ;;  %v15613_v50 = vld [vmem:[#allocation214_spill] sm:$0xff] }
 0x1ef   :  { %8592 = vmatmul.mubr.msk.bf16.vlgmr.msra.gmra.mrb[32].mxu0 %vm902_vm2, %v2129_v40  ;;  %8735 = vmatprep.mubr.msk.bf16.mxu1 %vm902_vm2, %v3985_v52  ;;  %v15606_v40 = vld [vmem:[#allocation97_spill] sm:$0xff]  ;;  %v3973_v52 = vmul.f32 %v12008_v28, %v15610_v43  ;;  %v15615_v28 = vld [vmem:[#allocation175_spill] sm:$0xff] }
 0x1f0   :  { %8595 = vmatprep.mubr.msk.bf16.mxu0 %vm902_vm2, %v2130_v3  ;;  %8748 = vmatpush3.bf16.msra.mxu1 %v9553_v32  ;;  %v2121_v41 = vmul.f32 %v15606_v40, %v15605_v57  ;;  %v9557_v3 = vld [vmem:[%s14482_s10 + $0x50] sm:$0xff]   ;;  %v2131_v40 = vpack.c.bf16 %v2119_v6, %v2118_v30  ;;  %v15614_v57 = vld [vmem:[#allocation102_spill] sm:$0xff] }
 0x1f1   :  { %8749 = vmatprep.subr.bf16.mxu1 %v9554_v59  ;;  %8608 = vmatpush3.bf16.msra.mxu0 %v9555_v49  ;;  %v9559_v32 = vld [vmem:[%s14478_s6 + $0x70] sm:$0xff]   ;;  %v3986_v11 = vpack.c.bf16 %v3974_v58, %v3973_v52  ;;  %v15612_v49 = vld [vmem:[#allocation101_spill] sm:$0xff]  ;;  %v2122_v13 = vmul.f32 %v15614_v57, %v15613_v50 }
 0x1f2   :  { %8609 = vmatprep.subr.bf16.mxu0 %v9556_v46  ;;  %v2132_v4 = vpack.c.bf16 %v2121_v41, %v2120_v0  ;;  %v2123_v5 = vmul.f32 %v15612_v49, %v15611_v60  ;;  %v15616_v6 = vld [vmem:[#allocation211_spill] sm:$0xff]  ;;  %v15621_v41 = vld [vmem:[#allocation110_spill] sm:$0xff]  ;;  %v15623_v49 = vld [vmem:[#allocation117_spill] sm:$0xff] }
 0x1f3   :  { %v15618_v0 = vld [vmem:[#allocation263_spill] sm:$0xff]  ;;  %v15627_v57 = vld [vmem:[#allocation253_spill] sm:$0xff]  ;;  %v15628_v60 = vld [vmem:[#allocation114_spill] sm:$0xff] }
 0x1f4   :  { %8750 = vmatpush3.bf16.msra.mxu1 %v9554_v59  ;;  %v15617_v59 = vpack.c.bf16 %v15615_v28, %v15616_v6  ;;  %v15625_v28 = vld [vmem:[#allocation208_spill] sm:$0xff]  ;;  %v15626_v6 = vld [vmem:[#allocation113_spill] sm:$0xff] }
 0x1f5   :  { %8610 = vmatpush3.bf16.msra.mxu0 %v9556_v46  ;;  %8767 = vmatprep.subr.bf16.mxu1 %v9557_v3  ;;  %v15619_v46 = vld [vmem:[#allocation109_spill] sm:$0xff] }
 0x1f6   :  { %8627 = vmatprep.subr.bf16.mxu0 %v9559_v32  ;;  %8736 = vmatmul.mubr.msk.bf16.gmra.mrb[68].mxu1 %vm902_vm2, %v3986_v11  ;;  %v2125_v30 = vmul.f32 %v15619_v46, %v15618_v0  ;;  %v2133_v11 = vpack.c.bf16 %v2123_v5, %v2122_v13  ;;  %v2126_v46 = vmul.f32 %v15628_v60, %v15627_v57  ;;  %v15629_v0 = vld [vmem:[#allocation270_spill] sm:$0xff]  ;;  %v15630_v50 = vld [vmem:[#allocation269_spill] sm:$0xff] }
 0x1f7   :  { %8596 = vmatmul.mubr.msk.bf16.gmra.mrb[36].mxu0 %vm902_vm2, %v2131_v40  ;;  %8739 = vmatprep.mubr.msk.bf16.mxu1 %vm902_vm2, %v15617_v59  ;;  %v15620_v40 = vld [vmem:[#allocation236_spill] sm:$0xff]  ;;  %v2127_v59 = vmul.f32 %v15626_v6, %v15625_v28  ;;  %v4146_v13 = vmul.f32 %v15526_v12, %v15523_v25  ;;  %v15647_v6 = vld [vmem:[#allocation142_spill] sm:$0xff] }
 0x1f8   :  { %8599 = vmatprep.mubr.msk.bf16.mxu0 %vm902_vm2, %v2132_v4  ;;  %v2124_v58 = vmul.f32 %v15621_v41, %v15620_v40  ;;  %v15622_v4 = vld [vmem:[#allocation266_spill] sm:$0xff]  ;;  %v15631_v41 = vpack.c.bf16 %v15629_v0, %v15630_v50 }
 0x1f9   :  { %v15624_v43 = vpack.c.bf16 %v15622_v4, %v15623_v49  ;;  %v2135_v5 = vpack.c.bf16 %v2127_v59, %v2126_v46  ;;  %v15636_v4 = vld [vmem:[#allocation123_spill] sm:$0xff]  ;;  %v15638_v0 = vld [vmem:[#allocation226_spill] sm:$0xff] }
 0x1fa   :  { %v2134_v52 = vpack.c.bf16 %v2125_v30, %v2124_v58  ;;  %v15632_v30 = vld [vmem:[#allocation272_spill] sm:$0xff]  ;;  %v15633_v58 = vld [vmem:[#allocation271_spill] sm:$0xff]  ;;  %v4150_v46 = vmul.f32 %v15638_v0, %v15539_v61 }
 0x1fb   :  { %v15895_v61 = vld [vmem:[#allocation39_spill] sm:$0xff] }
 0x1fe   :  { %8740 = vmatmul.mubr.msk.bf16.gmra.mrb[72].mxu1 %vm902_vm2, %v15624_v43  ;;  %v4145_v43 = vmul.f32 %v15425_v19, %v15525_v8 }
 0x1ff   :  { %8600 = vmatmul.mubr.msk.bf16.gmra.mrb[40].mxu0 %vm902_vm2, %v2133_v11  ;;  %8743 = vmatprep.mubr.msk.bf16.mxu1 %vm902_vm2, %v15631_v41  ;;  %v15634_v11 = vpack.c.bf16 %v15632_v30, %v15633_v58  ;;  %v15639_v41 = vld [vmem:[#allocation151_spill] sm:$0xff] }
 0x200   :  { %8603 = vmatprep.mubr.msk.bf16.mxu0 %vm902_vm2, %v2134_v52  ;;  %v4161_v49 = vpack.c.bf16 %v4146_v13, %v4145_v43  ;;  %v15635_v52 = vld [vmem:[#allocation122_spill] sm:$0xff]  ;;  %v4149_v59 = vmul.f32 %v15639_v41, %v15543_v29  ;;  %v9558_v13 = vld [vmem:[%s14482_s10 + $0x58] sm:$0xff]  }
 0x201   :  { %v15637_v50 = vpack.c.bf16 %v15635_v52, %v15636_v4  ;;  %v15641_v43 = vld [vmem:[#allocation132_spill] sm:$0xff]  ;;  %v15644_v52 = vld [vmem:[#allocation186_spill] sm:$0xff] }
 0x202   :  { %v4163_v58 = vpack.c.bf16 %v4150_v46, %v4149_v59  ;;  %v12532_v59 = vld [vmem:[%s14482_s10 + $0x60] sm:$0xff]  }
 0x206   :  { %8744 = vmatmul.mubr.msk.bf16.gmra.mrb[76].mxu1 %vm902_vm2, %v15634_v11  ;;  %v15643_v11 = vld [vmem:[#allocation265_spill] sm:$0xff] }
 0x207   :  { %8604 = vmatmul.mubr.msk.bf16.gmra.mrb[44].mxu0 %vm902_vm2, %v2135_v5  ;;  %8751 = vmatprep.mubr.msk.bf16.mxu1 %vm902_vm2, %v4161_v49  ;;  %v15640_v5 = vld [vmem:[#allocation130_spill] sm:$0xff]  ;;  %v9560_v49 = vld [vmem:[%s14478_s6 + $0x78] sm:$0xff]   ;;  %v15645_v4 = vpack.c.bf16 %v15643_v11, %v15644_v52  ;;  %v15653_v52 = vld [vmem:[#allocation147_spill] sm:$0xff] }
 0x208   :  { %8611 = vmatprep.mubr.msk.bf16.mxu0 %vm902_vm2, %v15637_v50  ;;  %v15642_v30 = vpack.c.bf16 %v15640_v5, %v15641_v43  ;;  %v15646_v50 = vld [vmem:[#allocation141_spill] sm:$0xff]  ;;  %v15649_v5 = vld [vmem:[#allocation234_spill] sm:$0xff] }
 0x209   :  { %v15648_v60 = vpack.c.bf16 %v15646_v50, %v15647_v6  ;;  %v4152_v46 = vmul.f32 %v15649_v5, %v15550_v39  ;;  %v15650_v43 = vld [vmem:[#allocation193_spill] sm:$0xff]  ;;  %v15657_v39 = vld [vmem:[#allocation159_spill] sm:$0xff] }
 0x20e   :  { %8752 = vmatmul.mubr.msk.bf16.vlgmr.msra.gmra.mrb[64].mxu1 %vm902_vm2, %v15645_v4  ;;  %v15654_v4 = vld [vmem:[#allocation148_spill] sm:$0xff] }
 0x20f   :  { %8612 = vmatmul.mubr.msk.bf16.vlgmr.msra.gmra.mrb[32].mxu0 %vm902_vm2, %v15642_v30  ;;  %8755 = vmatprep.mubr.msk.bf16.mxu1 %vm902_vm2, %v4163_v58  ;;  %v4154_v30 = vmul.f32 %v15650_v43, %v15553_v55  ;;  %v15652_v58 = vld [vmem:[#allocation231_spill] sm:$0xff]  ;;  %v15655_v50 = vpack.c.bf16 %v15653_v52, %v15654_v4  ;;  %v15656_v55 = vld [vmem:[#allocation158_spill] sm:$0xff]  ;;  %v15667_v52 = vpack.c.bf16 %v12185_v22, %v12181_v47  ;;  %v15669_v4 = vld [vmem:[#allocation188_spill] sm:$0xff]  ;;  %v8041_v22 = vpop.f32.mrb[0].mxu0 }
 0x210   :  { %8615 = vmatprep.mubr.msk.bf16.mxu0 %vm902_vm2, %v15648_v60  ;;  %8768 = vmatpush3.bf16.msra.mxu1 %v9557_v3  ;;  %v12539_v60 = vld [vmem:[%s14478_s6 + $0x80] sm:$0xff]   ;;  %v15651_v3 = vld [vmem:[#allocation230_spill] sm:$0xff]  ;;  %v15671_v47 = vpack.c.bf16 %v12193_v23, %v12189_v45 }
 0x211   :  { %8769 = vmatprep.subr.bf16.mxu1 %v9558_v13  ;;  %8628 = vmatpush3.bf16.msra.mxu0 %v9559_v32  ;;  %v4151_v6 = vmul.f32 %v15651_v3, %v15556_v33  ;;  %v4153_v32 = vmul.f32 %v15652_v58, %v15559_v1  ;;  %v15658_v33 = vpack.c.bf16 %v15656_v55, %v15657_v39  ;;  %v15666_v39 = vld [vmem:[#allocation150_spill] sm:$0xff]  ;;  %v15674_v45 = vld [vmem:[#allocation201_spill] sm:$0xff]  ;;  %v15869_v1 = vld [vmem:[#allocation31_spill] sm:$0xff] }
 0x212   :  { %8629 = vmatprep.subr.bf16.mxu0 %v9560_v49  ;;  %v2402_v55 = vmul.f32 %v15511_v10, %v15666_v39  ;;  %v8042_v39 = vpop.f32.mrb[1].mxu0  ;;  %v2667_v23 = vmul.f32 %v15674_v45, %v15555_v7 }
 0x213   :  { %v4164_v11 = vpack.c.bf16 %v4152_v46, %v4151_v6  ;;  %v4165_v43 = vpack.c.bf16 %v4154_v30, %v4153_v32  ;;  %v15662_v6 = vpack.c.bf16 %v12172_v48, %v12168_v9  ;;  %v15663_v30 = vld [vmem:[#allocation176_spill] sm:$0xff]  ;;  %v15664_v32 = vld [vmem:[#allocation177_spill] sm:$0xff]  ;;  %v15668_v9 = vld [vmem:[#allocation187_spill] sm:$0xff] }
 0x214   :  { %8770 = vmatpush3.bf16.msra.mxu1 %v9558_v13  ;;  %v15659_v13 = vld [vmem:[#allocation166_spill] sm:$0xff]  ;;  %v2663_v48 = vmul.f32 %v15668_v9, %v15536_v53 }
 0x215   :  { %8630 = vmatpush3.bf16.msra.mxu0 %v9560_v49  ;;  %8787 = vmatprep.subr.bf16.mxu1 %v12532_v59  ;;  %v15660_v49 = vld [vmem:[#allocation167_spill] sm:$0xff] }
 0x216   :  { %8647 = vmatprep.subr.bf16.mxu0 %v12539_v60  ;;  %8756 = vmatmul.mubr.msk.bf16.gmra.mrb[68].mxu1 %vm902_vm2, %v4164_v11  ;;  %v15661_v46 = vpack.c.bf16 %v15659_v13, %v15660_v49  ;;  %v15665_v11 = vpack.c.bf16 %v15663_v30, %v15664_v32  ;;  %v15673_v30 = vld [vmem:[#allocation197_spill] sm:$0xff] }
 0x217   :  { %8616 = vmatmul.mubr.msk.bf16.gmra.mrb[36].mxu0 %vm902_vm2, %v15655_v50  ;;  %8759 = vmatprep.mubr.msk.bf16.mxu1 %vm902_vm2, %v4165_v43  ;;  %v2662_v50 = vmul.f32 %v15669_v4, %v15522_v62  ;;  %v15670_v43 = vld [vmem:[#allocation152_spill] sm:$0xff]  ;;  %v2664_v32 = vmul.f32 %v15673_v30, %v15535_v63 }
 0x218   :  { %8619 = vmatprep.mubr.msk.bf16.mxu0 %vm902_vm2, %v15658_v33  ;;  %v2401_v33 = vmul.f32 %v15509_v2, %v15521_v34  ;;  %v4324_v13 = vmul.f32 %v15670_v43, %v15577_v16  ;;  %v15672_v62 = vld [vmem:[#allocation196_spill] sm:$0xff] }
 0x219   :  { %v2665_v53 = vmul.f32 %v15672_v62, %v15542_v14 }
 0x21a   :  { %v2410_v49 = vpack.c.bf16 %v2402_v55, %v2401_v33  ;;  %v15675_v55 = vld [vmem:[#allocation202_spill] sm:$0xff] }
 0x21b   :  { %v2666_v33 = vmul.f32 %v15675_v55, %v15538_v17  ;;  %v9564_v17 = vld [vmem:[%s14478_s6 + $0x88] sm:$0xff]  }
 0x21e   :  { %8760 = vmatmul.mubr.msk.bf16.gmra.mrb[72].mxu1 %vm902_vm2, %v15662_v6  ;;  %v2678_v6 = vpack.c.bf16 %v2663_v48, %v2662_v50  ;;  %v8044_v48 = vpop.f32.mrb[2].mxu0 }
 0x21f   :  { %8620 = vmatmul.mubr.msk.bf16.gmra.mrb[40].mxu0 %vm902_vm2, %v15661_v46  ;;  %8763 = vmatprep.mubr.msk.bf16.mxu1 %vm902_vm2, %v15667_v52  ;;  %v4323_v46 = vmul.f32 %v12313_v18, %v15579_v51  ;;  %v8043_v52 = vadd.f32 %v8042_v39, %v8041_v22  ;;  %v8045_v14 = vpop.f32.mrb[3].mxu0  ;;  %v15677_v39 = vld [vmem:[#allocation170_spill] sm:$0xff] }
 0x220   :  { %8623 = vmatprep.mubr.msk.bf16.mxu0 %vm902_vm2, %v15665_v11  ;;  %v12599_v11 = vld [vmem:[%s14475_s3] ss:$0 sm:$0xff]  ;;  %v8046_v63 = vadd.f32 %v8045_v14, %v8044_v48  ;;  %v8047_v43 = vpop.f32.mrb[4].mxu0 }
 0x221   :  { %v4339_v34 = vpack.c.bf16 %v4324_v13, %v4323_v46  ;;  %v279_v50 = vadd.f32 %v8043_v52, %v12599_v11  ;;  %v2679_v13 = vpack.c.bf16 %v2665_v53, %v2664_v32  ;;  %v2680_v46 = vpack.c.bf16 %v2667_v23, %v2666_v33  ;;  %v15676_v53 = vld [vmem:[#allocation209_spill] sm:$0xff] }
 0x222   :  { %v282_v7 = vadd.f32 %v8046_v63, %v12599_v11  ;;  %v2669_v32 = vmul.f32 %v15676_v53, %v15558_v31  ;;  %v15678_v23 = vld [vmem:[#allocation169_spill] sm:$0xff]  ;;  %v15680_v63 = vld [vmem:[#allocation210_spill] sm:$0xff]  ;;  %v15682_v31 = vld [vmem:[#allocation216_spill] sm:$0xff] }
 0x223   :  { %v15679_v33 = vpack.c.bf16 %v15677_v39, %v15678_v23  ;;  %v2670_v2 = vmul.f32 %v15682_v31, %v15552_v35  ;;  %v15683_v39 = vpack.c.bf16 %v12084_v56, %v12064_v36 }
 0x224   :  { %v342_v52 = vmax.f32 %v282_v7, 0.0 }
 0x226   :  { %8764 = vmatmul.mubr.msk.bf16.gmra.mrb[76].mxu1 %vm902_vm2, %v15671_v47 }
 0x227   :  { %8624 = vmatmul.mubr.msk.bf16.gmra.mrb[44].mxu0 %vm902_vm2, %v2410_v49  ;;  %8771 = vmatprep.mubr.msk.bf16.mxu1 %vm902_vm2, %v4339_v34  ;;  %v8048_v49 = vpop.f32.mrb[5].mxu0  ;;  %v341_v34 = vmax.f32 %v279_v50, 0.0 }
 0x228   :  { %8631 = vmatprep.mubr.msk.bf16.mxu0 %vm902_vm2, %v2678_v6  ;;  %v9562_v6 = vld [vmem:[%s14482_s10 + $0x68] sm:$0xff]   ;;  %v8049_v47 = vadd.f32 %v8048_v49, %v8047_v43  ;;  %v8050_v10 = vpop.f32.mrb[6].mxu0  ;;  %v2668_v43 = vmul.f32 %v15680_v63, %v15549_v21 }
 0x229   :  { %v8051_v22 = vpop.f32.mrb[7].mxu0  ;;  %v12639_v21 = vpack.c.bf16 %v342_v52, %v341_v34 }
 0x22a   :  { %v287_v48 = vadd.f32 %v8049_v47, %v12599_v11  ;;  %v8052_v14 = vadd.f32 %v8051_v22, %v8050_v10  ;;  %v8053_v50 = vpop.f32.mrb[8].mxu0  ;;  %v12637_v10 = vld [vmem:[%s14482_s10 + $0x70] sm:$0xff]  }
 0x22b   :  { %15684 = vst [vmem:[#allocation133_spill] sm:$0xff] %v12639_v21 }
 0x22c   :  { %v290_v35 = vadd.f32 %v8052_v14, %v12599_v11 }
 0x22e   :  { %8772 = vmatmul.mubr.msk.bf16.vlgmr.msra.gmra.mrb[64].mxu1 %vm902_vm2, %v15679_v33  ;;  %v344_v47 = vmax.f32 %v290_v35, 0.0  ;;  %v15686_v35 = vpack.c.bf16 %v12092_v54, %v12074_v42  ;;  %v15691_v54 = vld [vmem:[#allocation225_spill] sm:$0xff] }
 0x22f   :  { %8632 = vmatmul.mubr.msk.bf16.vlgmr.msra.gmra.mrb[32].mxu0 %vm902_vm2, %v2679_v13  ;;  %v15681_v13 = vld [vmem:[#allocation215_spill] sm:$0xff]  ;;  %8775 = vmatprep.mubr.msk.bf16.mxu1 %vm902_vm2, %v15683_v39 }
 0x230   :  { %8635 = vmatprep.mubr.msk.bf16.mxu0 %vm902_vm2, %v2680_v46  ;;  %v2671_v49 = vmul.f32 %v15681_v13, %v15565_v24  ;;  %8788 = vmatpush3.bf16.msra.mxu1 %v12532_v59  ;;  %v8054_v46 = vpop.f32.mrb[9].mxu0  ;;  %v343_v24 = vmax.f32 %v287_v48, 0.0 }
 0x231   :  { %8789 = vmatprep.subr.bf16.mxu1 %v9562_v6  ;;  %8648 = vmatpush3.bf16.msra.mxu0 %v12539_v60  ;;  %v8055_v7 = vadd.f32 %v8054_v46, %v8053_v50  ;;  %v8056_v36 = vpop.f32.mrb[10].mxu0  ;;  %v2681_v60 = vpack.c.bf16 %v2669_v32, %v2668_v43  ;;  %v15687_v43 = vld [vmem:[#allocation220_spill] sm:$0xff] }
 0x232   :  { %8649 = vmatprep.subr.bf16.mxu0 %v9564_v17  ;;  %v8057_v56 = vpop.f32.mrb[11].mxu0  ;;  %v2682_v33 = vpack.c.bf16 %v2671_v49, %v2670_v2  ;;  %v12644_v34 = vpack.c.bf16 %v344_v47, %v343_v24  ;;  %v2673_v49 = vmul.f32 %v15687_v43, %v15567_v44  ;;  %v15688_v24 = vld [vmem:[#allocation221_spill] sm:$0xff]  ;;  %v15690_v47 = vld [vmem:[#allocation136_spill] sm:$0xff]  ;;  %v15835_v43 = vld [vmem:[#allocation14_spill] sm:$0xff] }
 0x233   :  { %v295_v59 = vadd.f32 %v8055_v7, %v12599_v11  ;;  %v8058_v22 = vadd.f32 %v8057_v56, %v8056_v36  ;;  %v8059_v23 = vpop.f32.mrb[12].mxu0  ;;  %v2672_v7 = vmul.f32 %v15688_v24, %v15562_v27  ;;  %v15689_v36 = vld [vmem:[#allocation153_spill] sm:$0xff]  ;;  %v2674_v42 = vmul.f32 %v15691_v54, %v15690_v47  ;;  %v15836_v24 = vld [vmem:[#allocation127_spill] sm:$0xff] }
 0x234   :  { %8790 = vmatpush3.bf16.msra.mxu1 %v9562_v6  ;;  %v8060_v39 = vpop.f32.mrb[13].mxu0  ;;  %15685 = vst [vmem:[#allocation162_spill] sm:$0xff] %v12644_v34  ;;  %v2675_v56 = vmul.f32 %v15689_v36, %v15580_v20 }
 0x235   :  { %8650 = vmatpush3.bf16.msra.mxu0 %v9564_v17  ;;  %8807 = vmatprep.subr.bf16.mxu1 %v12637_v10  ;;  %v345_v52 = vmax.f32 %v295_v59, 0.0  ;;  %v298_v48 = vadd.f32 %v8058_v22, %v12599_v11  ;;  %v8061_v14 = vadd.f32 %v8060_v39, %v8059_v23  ;;  %v8062_v50 = vpop.f32.mrb[14].mxu0  ;;  %v15692_v59 = vld [vmem:[#allocation277_spill] sm:$0xff]  ;;  %v15693_v22 = vld [vmem:[#allocation275_spill] sm:$0xff]  ;;  %v2683_v47 = vpack.c.bf16 %v2673_v49, %v2672_v7 }
 0x236   :  { %v8063_v46 = vpop.f32.mrb[15].mxu0  ;;  %8776 = vmatmul.mubr.msk.bf16.gmra.mrb[68].mxu1 %vm902_vm2, %v15686_v35  ;;  %v15694_v23 = vpack.c.bf16 %v15692_v59, %v15693_v22  ;;  %v2684_v34 = vpack.c.bf16 %v2675_v56, %v2674_v42 }
 0x237   :  { %8636 = vmatmul.mubr.msk.bf16.gmra.mrb[36].mxu0 %vm902_vm2, %v2681_v60  ;;  %v346_v2 = vmax.f32 %v298_v48, 0.0  ;;  %v303_v6 = vadd.f32 %v8061_v14, %v12599_v11  ;;  %v8064_v17 = vadd.f32 %v8063_v46, %v8062_v50  ;;  %v8065_v32 = vpop.f32.mrb[16].mxu0 }
 0x238   :  { %8639 = vmatprep.mubr.msk.bf16.mxu0 %vm902_vm2, %v2682_v33  ;;  %8779 = vmatprep.mubr.msk.bf16.mxu1 %vm902_vm2, %v15694_v23  ;;  %v8066_v60 = vpop.f32.mrb[17].mxu0  ;;  %v15698_v23 = vld [vmem:[#allocation276_spill] sm:$0xff] }
 0x239   :  { %v12666_v33 = vpack.c.bf16 %v346_v2, %v345_v52  ;;  %v347_v39 = vmax.f32 %v303_v6, 0.0  ;;  %v306_v44 = vadd.f32 %v8064_v17, %v12599_v11  ;;  %v8067_v48 = vadd.f32 %v8066_v60, %v8065_v32  ;;  %v8068_v14 = vpop.f32.mrb[18].mxu0  ;;  %v15697_v32 = vld [vmem:[#allocation185_spill] sm:$0xff] }
 0x23a   :  { %v8069_v27 = vpop.f32.mrb[19].mxu0  ;;  %v15699_v60 = vpack.c.bf16 %v15697_v32, %v15698_v23  ;;  %v15707_v32 = vld [vmem:[#allocation194_spill] sm:$0xff]  ;;  %v15708_v23 = vld [vmem:[#allocation180_spill] sm:$0xff] }
 0x23b   :  { %15695 = vst [vmem:[#allocation244_spill] sm:$0xff] %v12666_v33  ;;  %v348_v50 = vmax.f32 %v306_v44, 0.0  ;;  %v311_v20 = vadd.f32 %v8067_v48, %v12599_v11  ;;  %v8070_v46 = vadd.f32 %v8069_v27, %v8068_v14  ;;  %v8071_v35 = vpop.f32.mrb[20].mxu0  ;;  %v15701_v44 = vld [vmem:[#allocation232_spill] sm:$0xff]  ;;  %v15703_v14 = vld [vmem:[#allocation233_spill] sm:$0xff] }
 0x23c   :  { %v8072_v21 = vpop.f32.mrb[21].mxu0 }
 0x23d   :  { %v12670_v59 = vpack.c.bf16 %v348_v50, %v347_v39  ;;  %v349_v22 = vmax.f32 %v311_v20, 0.0  ;;  %v314_v52 = vadd.f32 %v8070_v46, %v12599_v11  ;;  %v8073_v2 = vadd.f32 %v8072_v21, %v8071_v35  ;;  %v8074_v6 = vpop.f32.mrb[22].mxu0  ;;  %v15700_v39 = vld [vmem:[#allocation91_spill] sm:$0xff]  ;;  %v15702_v21 = vld [vmem:[#allocation106_spill] sm:$0xff]  ;;  %v15704_v50 = vld [vmem:[#allocation237_spill] sm:$0xff] }
 0x23e   :  { %v8075_v17 = vpop.f32.mrb[23].mxu0  ;;  %8780 = vmatmul.mubr.msk.bf16.gmra.mrb[72].mxu1 %vm902_vm2, %v15699_v60  ;;  %v2677_v48 = vmul.f32 %v15701_v44, %v15700_v39  ;;  %v2676_v27 = vmul.f32 %v15703_v14, %v15702_v21  ;;  %v2938_v20 = vmul.f32 %v15704_v50, %v15589_v38  ;;  %v15705_v46 = vld [vmem:[#allocation165_spill] sm:$0xff]  ;;  %v15706_v35 = vld [vmem:[#allocation238_spill] sm:$0xff] }
 0x23f   :  { %15696 = vst [vmem:[#allocation248_spill] sm:$0xff] %v12670_v59  ;;  %8640 = vmatmul.mubr.msk.bf16.gmra.mrb[40].mxu0 %vm902_vm2, %v2683_v47  ;;  %v350_v49 = vmax.f32 %v314_v52, 0.0  ;;  %v319_v7 = vadd.f32 %v8073_v2, %v12599_v11  ;;  %v8076_v56 = vadd.f32 %v8075_v17, %v8074_v6  ;;  %v8077_v42 = vpop.f32.mrb[24].mxu0  ;;  %v2937_v47 = vmul.f32 %v15706_v35, %v15705_v46 }
 0x240   :  { %8643 = vmatprep.mubr.msk.bf16.mxu0 %vm902_vm2, %v2684_v34  ;;  %v15709_v34 = vpack.c.bf16 %v15707_v32, %v15708_v23  ;;  %v8078_v52 = vpop.f32.mrb[25].mxu0  ;;  %v2685_v46 = vpack.c.bf16 %v2677_v48, %v2676_v27 }
 0x241   :  { %v12692_v2 = vpack.c.bf16 %v350_v49, %v349_v22  ;;  %v351_v6 = vmax.f32 %v319_v7, 0.0  ;;  %v322_v17 = vadd.f32 %v8076_v56, %v12599_v11  ;;  %v8079_v60 = vadd.f32 %v8078_v52, %v8077_v42  ;;  %v8080_v39 = vpop.f32.mrb[26].mxu0  ;;  %v15712_v42 = vld [vmem:[#allocation179_spill] sm:$0xff] }
 0x242   :  { %8783 = vmatprep.mubr.msk.bf16.mxu1 %vm902_vm2, %v15709_v34  ;;  %v8081_v21 = vpop.f32.mrb[27].mxu0  ;;  %v2953_v35 = vpack.c.bf16 %v2938_v20, %v2937_v47  ;;  %v15713_v34 = vld [vmem:[#allocation191_spill] sm:$0xff]  ;;  %v15715_v20 = vld [vmem:[#allocation242_spill] sm:$0xff] }
 0x243   :  { %15710 = vst [vmem:[#allocation247_spill] sm:$0xff] %v12692_v2  ;;  %v352_v59 = vmax.f32 %v322_v17, 0.0  ;;  %v327_v38 = vadd.f32 %v8079_v60, %v12599_v11  ;;  %v8082_v33 = vadd.f32 %v8081_v21, %v8080_v39  ;;  %v8083_v50 = vpop.f32.mrb[28].mxu0  ;;  %v15714_v52 = vpack.c.bf16 %v15712_v42, %v15713_v34  ;;  %v15719_v60 = vld [vmem:[#allocation137_spill] sm:$0xff]  ;;  %v15720_v39 = vld [vmem:[#allocation138_spill] sm:$0xff] }
 0x244   :  { %v8084_v36 = vpop.f32.mrb[29].mxu0  ;;  %v2940_v47 = vmul.f32 %v15715_v20, %v15593_v26  ;;  %v15721_v21 = vpack.c.bf16 %v15719_v60, %v15720_v39  ;;  %v15735_v39 = vld [vmem:[#allocation214_spill] sm:$0xff] }
 0x245   :  { %v12696_v32 = vpack.c.bf16 %v352_v59, %v351_v6  ;;  %v353_v23 = vmax.f32 %v327_v38, 0.0  ;;  %v330_v22 = vadd.f32 %v8082_v33, %v12599_v11  ;;  %v8085_v49 = vadd.f32 %v8084_v36, %v8083_v50  ;;  %v8086_v7 = vpop.f32.mrb[30].mxu0  ;;  %v15716_v33 = vld [vmem:[#allocation184_spill] sm:$0xff]  ;;  %v15717_v36 = vld [vmem:[#allocation243_spill] sm:$0xff]  ;;  %v15718_v6 = vld [vmem:[#allocation249_spill] sm:$0xff] }
 0x246   :  { %v8087_v56 = vpop.f32.mrb[31].mxu0  ;;  %8784 = vmatmul.mubr.msk.bf16.gmra.mrb[76].mxu1 %vm902_vm2, %v15714_v52  ;;  %v2939_v50 = vmul.f32 %v15717_v36, %v15716_v33  ;;  %v2942_v17 = vmul.f32 %v15718_v6, %v15603_v15  ;;  %v15722_v38 = vld [vmem:[#allocation190_spill] sm:$0xff]  ;;  %v9566_v15 = vld [vmem:[%s14482_s10 + $0x78] sm:$0xff]   ;;  %v15726_v52 = vld [vmem:[#allocation189_spill] sm:$0xff] }
 0x247   :  { %15711 = vst [vmem:[#allocation149_spill] sm:$0xff] %v12696_v32  ;;  %8644 = vmatmul.mubr.msk.bf16.gmra.mrb[44].mxu0 %vm902_vm2, %v2685_v46  ;;  %v354_v48 = vmax.f32 %v330_v22, 0.0  ;;  %v335_v27 = vadd.f32 %v8085_v49, %v12599_v11  ;;  %v8088_v59 = vadd.f32 %v8087_v56, %v8086_v7  ;;  %8791 = vmatprep.mubr.msk.bf16.mxu1 %vm902_vm2, %v15721_v21  ;;  %v15727_v33 = vld [vmem:[#allocation192_spill] sm:$0xff]  ;;  %v15736_v21 = vld [vmem:[#allocation199_spill] sm:$0xff] }
 0x248   :  { %8651 = vmatprep.mubr.msk.bf16.mxu0 %vm902_vm2, %v2953_v35  ;;  %v15723_v35 = vld [vmem:[#allocation250_spill] sm:$0xff]  ;;  %v2954_v56 = vpack.c.bf16 %v2940_v47, %v2939_v50  ;;  %v15728_v60 = vpack.c.bf16 %v15726_v52, %v15727_v33  ;;  %v15740_v52 = vld [vmem:[#allocation207_spill] sm:$0xff]  ;;  %v15742_v33 = vld [vmem:[#allocation121_spill] sm:$0xff] }
 0x249   :  { %v2941_v46 = vmul.f32 %v15723_v35, %v15722_v38  ;;  %v12718_v22 = vpack.c.bf16 %v354_v48, %v353_v23  ;;  %v355_v49 = vmax.f32 %v335_v27, 0.0  ;;  %v338_v7 = vadd.f32 %v8088_v59, %v12599_v11  ;;  %v15729_v11 = vld [vmem:[#allocation258_spill] sm:$0xff]  ;;  %v15730_v48 = vld [vmem:[#allocation203_spill] sm:$0xff] }
 0x24a   :  { %v2944_v23 = vmul.f32 %v15729_v11, %v15607_v37  ;;  %v15731_v27 = vld [vmem:[#allocation259_spill] sm:$0xff]  ;;  %v15732_v47 = vld [vmem:[#allocation198_spill] sm:$0xff]  ;;  %v2946_v38 = vmul.f32 %v15736_v21, %v15735_v39  ;;  %v9567_v37 = vld [vmem:[%s14482_s10 + $0x80] sm:$0xff]  }
 0x24b   :  { %15724 = vst [vmem:[#allocation95_spill] sm:$0xff] %v12718_v22  ;;  %v356_v26 = vmax.f32 %v338_v7, 0.0  ;;  %v2955_v42 = vpack.c.bf16 %v2942_v17, %v2941_v46  ;;  %v2943_v59 = vmul.f32 %v15731_v27, %v15730_v48  ;;  %v15733_v50 = vld [vmem:[#allocation178_spill] sm:$0xff]  ;;  %v15743_v48 = vld [vmem:[#allocation235_spill] sm:$0xff] }
 0x24c   :  { %v15734_v17 = vpack.c.bf16 %v15732_v47, %v15733_v50  ;;  %v15737_v46 = vld [vmem:[#allocation206_spill] sm:$0xff]  ;;  %v15744_v47 = vld [vmem:[#allocation160_spill] sm:$0xff]  ;;  %v15829_v6 = vld [vmem:[#allocation11_spill] sm:$0xff] }
 0x24d   :  { %v12724_v34 = vpack.c.bf16 %v356_v26, %v355_v49  ;;  %v15738_v49 = vld [vmem:[#allocation213_spill] sm:$0xff]  ;;  %v2956_v26 = vpack.c.bf16 %v2944_v23, %v2943_v59  ;;  %v2947_v50 = vmul.f32 %v15744_v47, %v15743_v48  ;;  %v15746_v23 = vld [vmem:[#allocation280_spill] sm:$0xff]  ;;  %v15748_v59 = vld [vmem:[#allocation267_spill] sm:$0xff] }
 0x24e   :  { %8792 = vmatmul.mubr.msk.bf16.vlgmr.msra.gmra.mrb[64].mxu1 %vm902_vm2, %v15728_v60  ;;  %v2945_v7 = vmul.f32 %v15738_v49, %v15737_v46  ;;  %v2948_v60 = vmul.f32 %v15742_v33, %v15620_v40  ;;  %v2950_v39 = vmul.f32 %v15748_v59, %v15627_v57  ;;  %v15750_v46 = vld [vmem:[#allocation268_spill] sm:$0xff]  ;;  %v15753_v40 = vld [vmem:[#allocation283_spill] sm:$0xff]  ;;  %v15830_v35 = vld [vmem:[#allocation26_spill] sm:$0xff] }
 0x24f   :  { %15725 = vst [vmem:[#allocation69_spill] sm:$0xff] %v12724_v34  ;;  %8652 = vmatmul.mubr.msk.bf16.vlgmr.msra.gmra.mrb[32].mxu0 %vm902_vm2, %v2954_v56  ;;  %8795 = vmatprep.mubr.msk.bf16.mxu1 %vm902_vm2, %v15734_v17  ;;  %v15745_v17 = vld [vmem:[#allocation281_spill] sm:$0xff] }
 0x250   :  { %8655 = vmatprep.mubr.msk.bf16.mxu0 %vm902_vm2, %v2955_v42  ;;  %8808 = vmatpush3.bf16.msra.mxu1 %v12637_v10  ;;  %v2957_v56 = vpack.c.bf16 %v2946_v38, %v2945_v7  ;;  %v15739_v42 = vld [vmem:[#allocation279_spill] sm:$0xff] }
 0x251   :  { %8809 = vmatprep.subr.bf16.mxu1 %v9566_v15  ;;  %v15741_v10 = vpack.c.bf16 %v15739_v42, %v15740_v52  ;;  %v15749_v38 = vld [vmem:[#allocation263_spill] sm:$0xff]  ;;  %v12768_v52 = vpop.permute.xlu0 %2929 }
 0x252   :  { %v2949_v7 = vmul.f32 %v15750_v46, %v15749_v38  ;;  %15752 = vst [vmem:[#allocation115_spill] sm:$0xff] %v12768_v52 }
 0x254   :  { %8810 = vmatpush3.bf16.msra.mxu1 %v9566_v15  ;;  %v15747_v15 = vpack.c.bf16 %v15745_v17, %v15746_v23  ;;  %v2959_v42 = vpack.c.bf16 %v2950_v39, %v2949_v7  ;;  %v15756_v17 = vld [vmem:[#allocation104_spill] sm:$0xff]  ;;  %v15760_v39 = vld [vmem:[#allocation125_spill] sm:$0xff]  ;;  %v4679_v7 = vmul.f32 %v15526_v12, %v15669_v4  ;;  %v4684_v12 = vmul.f32 %v15651_v3, %v15674_v45 }
 0x255   :  { %8827 = vmatprep.subr.bf16.mxu1 %v9567_v37  ;;  %v15758_v23 = vld [vmem:[#allocation284_spill] sm:$0xff]  ;;  %v4680_v38 = vmul.f32 %v15760_v39, %v15668_v9  ;;  %v4685_v3 = vmul.f32 %v15649_v5, %v15680_v63  ;;  %v15765_v39 = vld [vmem:[#allocation217_spill] sm:$0xff]  ;;  %v4694_v5 = vmul.f32 %v15425_v19, %v15701_v44 }
 0x256   :  { %8796 = vmatmul.mubr.msk.bf16.gmra.mrb[68].mxu1 %vm902_vm2, %v15741_v10  ;;  %v15754_v10 = vld [vmem:[#allocation282_spill] sm:$0xff]  ;;  %v15784_v19 = vld [vmem:[#allocation128_spill] sm:$0xff]  ;;  %v15839_v63 = vld [vmem:[#allocation13_spill] sm:$0xff] }
 0x257   :  { %8656 = vmatmul.mubr.msk.bf16.gmra.mrb[36].mxu0 %vm902_vm2, %v2956_v26  ;;  %8799 = vmatprep.mubr.msk.bf16.mxu1 %vm902_vm2, %v15747_v15  ;;  %v2958_v26 = vpack.c.bf16 %v2948_v60, %v2947_v50  ;;  %v15755_v48 = vpack.c.bf16 %v15753_v40, %v15754_v10  ;;  %v2951_v60 = vmul.f32 %v12768_v52, %v15625_v28  ;;  %v15757_v50 = vld [vmem:[#allocation285_spill] sm:$0xff]  ;;  %v15762_v10 = vld [vmem:[#allocation286_spill] sm:$0xff] }
 0x258   :  { %8659 = vmatprep.mubr.msk.bf16.mxu0 %vm902_vm2, %v2957_v56  ;;  %v12766_v56 = vpop.permute.xlu1 %2934  ;;  %v15759_v15 = vpack.c.bf16 %v15757_v50, %v15758_v23  ;;  %v4695_v40 = vpack.c.bf16 %v4680_v38, %v4679_v7  ;;  %v4682_v28 = vmul.f32 %v15639_v41, %v15672_v62  ;;  %v9568_v23 = vld [vmem:[%s14482_s10 + $0x88] sm:$0xff]   ;;  %v4686_v41 = vmul.f32 %v15652_v58, %v15676_v53  ;;  %v15772_v58 = vld [vmem:[#allocation228_spill] sm:$0xff] }
 0x259   :  { %15751 = vst [vmem:[#allocation70_spill] sm:$0xff] %v12766_v56  ;;  %v2952_v57 = vmul.f32 %v12766_v56, %v15756_v17  ;;  %v15764_v17 = vld [vmem:[#allocation131_spill] sm:$0xff]  ;;  %v15766_v38 = vld [vmem:[#allocation218_spill] sm:$0xff] }
 0x25a   :  { %v4681_v50 = vmul.f32 %v15764_v17, %v15673_v30  ;;  %v15767_v7 = vpack.c.bf16 %v15765_v39, %v15766_v38  ;;  %v15785_v39 = vld [vmem:[#allocation261_spill] sm:$0xff] }
 0x25b   :  { %v15786_v38 = vpack.c.bf16 %v15784_v19, %v15785_v39 }
 0x25e   :  { %8800 = vmatmul.mubr.msk.bf16.gmra.mrb[72].mxu1 %vm902_vm2, %v15755_v48 }
 0x25f   :  { %8660 = vmatmul.mubr.msk.bf16.gmra.mrb[40].mxu0 %vm902_vm2, %v2958_v26  ;;  %8803 = vmatprep.mubr.msk.bf16.mxu1 %vm902_vm2, %v15759_v15  ;;  %v2960_v26 = vpack.c.bf16 %v2952_v57, %v2951_v60  ;;  %v4683_v57 = vmul.f32 %v15638_v0, %v15675_v55  ;;  %v4696_v60 = vpack.c.bf16 %v4682_v28, %v4681_v50  ;;  %v15775_v50 = vld [vmem:[#allocation239_spill] sm:$0xff] }
 0x260   :  { %8663 = vmatprep.mubr.msk.bf16.mxu0 %vm902_vm2, %v2959_v42  ;;  %v15761_v42 = vld [vmem:[#allocation229_spill] sm:$0xff]  ;;  %v4698_v0 = vpack.c.bf16 %v4686_v41, %v4685_v3  ;;  %v15781_v41 = vld [vmem:[#allocation251_spill] sm:$0xff]  ;;  %v15782_v3 = vld [vmem:[#allocation252_spill] sm:$0xff] }
 0x261   :  { %v15763_v48 = vpack.c.bf16 %v15761_v42, %v15762_v10  ;;  %v4697_v15 = vpack.c.bf16 %v4684_v12, %v4683_v57  ;;  %v15776_v12 = vld [vmem:[#allocation240_spill] sm:$0xff] }
 0x262   :  { %v15777_v57 = vpack.c.bf16 %v15775_v50, %v15776_v12 }
 0x266   :  { %8804 = vmatmul.mubr.msk.bf16.gmra.mrb[76].mxu1 %vm902_vm2, %v15763_v48  ;;  %v15774_v48 = vld [vmem:[#allocation223_spill] sm:$0xff] }
 0x267   :  { %8664 = vmatmul.mubr.msk.bf16.gmra.mrb[44].mxu0 %vm902_vm2, %v2960_v26  ;;  %8811 = vmatprep.mubr.msk.bf16.mxu1 %vm902_vm2, %v4695_v40  ;;  %v15768_v26 = vld [vmem:[#allocation222_spill] sm:$0xff]  ;;  %v15769_v40 = vld [vmem:[#allocation224_spill] sm:$0xff]  ;;  %v4693_v28 = vmul.f32 %v15774_v48, %v15703_v14 }
 0x268   :  { %v15770_v42 = vpack.c.bf16 %v15768_v26, %v15769_v40  ;;  %v15788_v26 = vld [vmem:[#allocation116_spill] sm:$0xff] }
 0x269   :  { %v4702_v17 = vpack.c.bf16 %v4694_v5, %v4693_v28  ;;  %v15794_v5 = vld [vmem:[#allocation274_spill] sm:$0xff]  ;;  %v4872_v28 = vmul.f32 %v12313_v18, %v12766_v56  ;;  %v12871_v18 = vld [vmem:[%s14484_s12] sm:$0xff]  }
 0x26e   :  { %8812 = vmatmul.mubr.msk.bf16.vlgmr.msra.gmra.mrb[64].mxu1 %vm902_vm2, %v4696_v60  ;;  %v15778_v60 = vld [vmem:[#allocation245_spill] sm:$0xff] }
 0x26f   :  { %8815 = vmatprep.mubr.msk.bf16.mxu1 %vm902_vm2, %v4697_v15  ;;  %8828 = vmatpush3.bf16.msra.mxu1 %v9567_v37  ;;  %v15771_v37 = vld [vmem:[#allocation227_spill] sm:$0xff] }
 0x270   :  { %8829 = vmatprep.subr.bf16.mxu1 %v9568_v23  ;;  %v15773_v10 = vpack.c.bf16 %v15771_v37, %v15772_v58  ;;  %v15791_v37 = vld [vmem:[#allocation264_spill] sm:$0xff] }
 0x273   :  { %8830 = vmatpush3.bf16.msra.mxu1 %v9568_v23  ;;  %v15779_v23 = vld [vmem:[#allocation246_spill] sm:$0xff] }
 0x274   :  { %v15780_v15 = vpack.c.bf16 %v15778_v60, %v15779_v23  ;;  %v9570_v60 = vld [vmem:[%s14484_s12 + $0x18] sm:$0xff]   ;;  %v9574_v23 = vld [vmem:[%s14487_s15 + $0x4] ss:$8 sps:$4 sm:$0xff]  }
 0x276   :  { %8816 = vmatmul.mubr.msk.bf16.gmra.mrb[68].mxu1 %vm902_vm2, %v4698_v0  ;;  %v15783_v0 = vpack.c.bf16 %v15781_v41, %v15782_v3 }
 0x277   :  { %8819 = vmatprep.mubr.msk.bf16.mxu1 %vm902_vm2, %v15767_v7  ;;  %v15787_v7 = vld [vmem:[#allocation212_spill] sm:$0xff] }
 0x278   :  { %v15789_v40 = vpack.c.bf16 %v15787_v7, %v15788_v26 }
 0x27e   :  { %8820 = vmatmul.mubr.msk.bf16.gmra.mrb[72].mxu1 %vm902_vm2, %v15770_v42  ;;  %v15790_v42 = vld [vmem:[#allocation135_spill] sm:$0xff] }
 0x27f   :  { %8823 = vmatprep.mubr.msk.bf16.mxu1 %vm902_vm2, %v15773_v10  ;;  %v15792_v58 = vpack.c.bf16 %v15790_v42, %v15791_v37  ;;  %v15793_v10 = vld [vmem:[#allocation273_spill] sm:$0xff] }
 0x280   :  { %v15795_v48 = vpack.c.bf16 %v15793_v10, %v15794_v5 }
 0x286   :  { %8824 = vmatmul.mubr.msk.bf16.gmra.mrb[76].mxu1 %vm902_vm2, %v4702_v17  ;;  %v15796_v17 = vld [vmem:[#allocation278_spill] sm:$0xff] }
 0x287   :  { %8831 = vmatprep.mubr.msk.bf16.mxu1 %vm902_vm2, %v15777_v57  ;;  %v4871_v50 = vmul.f32 %v15796_v17, %v12768_v52  ;;  %v9569_v57 = vld [vmem:[%s14484_s12 + $0x10] sm:$0xff]  }
 0x288   :  { %8847 = vmatprep.subr.bf16.mxu0 %v9569_v57  ;;  %9027 = vmatprep.subr.bf16.mxu1 %v9569_v57 }
 0x289   :  { %v4880_v12 = vpack.c.bf16 %v4872_v28, %v4871_v50  ;;  %8848 = vmatpush3.bf16.msra.mxu0 %v9569_v57 }
 0x28a   :  { %8849 = vmatprep.subr.bf16.mxu0 %v9570_v60 }
 0x28d   :  { %8850 = vmatpush3.bf16.msra.mxu0 %v9570_v60 }
 0x28e   :  { %8832 = vmatmul.mubr.msk.bf16.vlgmr.msra.gmra.mrb[64].mxu1 %vm902_vm2, %v15780_v15  ;;  %8867 = vmatprep.subr.bf16.mxu0 %v12871_v18  ;;  %v7725_v15 = vld [vmem:[%s14479_s7] ss:$0 sm:$0xff] }
 0x28f   :  { %8835 = vmatprep.mubr.msk.bf16.mxu1 %vm902_vm2, %v15783_v0  ;;  %9029 = vmatpush3.bf16.msra.mxu1 %v9569_v57 }
 0x290   :  { %9028 = vmatprep.subr.bf16.mxu1 %v9570_v60 }
 0x293   :  { %9030 = vmatpush3.bf16.msra.mxu1 %v9570_v60 }
 0x294   :  { %6814 = vmatprep.subr.bf16.mxu1 %v9574_v23 }
 0x296   :  { %8836 = vmatmul.mubr.msk.bf16.gmra.mrb[68].mxu1 %vm902_vm2, %v15786_v38 }
 0x297   :  { %8839 = vmatprep.mubr.msk.bf16.mxu1 %vm902_vm2, %v15789_v40 }
 0x29e   :  { %8840 = vmatmul.mubr.msk.bf16.gmra.mrb[72].mxu1 %vm902_vm2, %v15792_v58 }
 0x29f   :  { %8843 = vmatprep.mubr.msk.bf16.mxu1 %vm902_vm2, %v15795_v48 }
 0x2a6   :  { %8844 = vmatmul.mubr.msk.bf16.gmra.mrb[76].mxu1 %vm902_vm2, %v4880_v12 }
 0x322   :  { %v8653_v41 = vpop.f32.mrb[32].mxu0 }
 0x323   :  { %v3124_v3 = vadd.f32 %v8653_v41, %v7725_v15  ;;  %v3036_v0 = vpop.f32.mrb[33].mxu0 }
 0x324   :  { %v3122_v19 = vadd.f32 %v7725_v15, %v3036_v0  ;;  %v8654_v39 = vpop.f32.mrb[34].mxu0 }
 0x325   :  { %v3125_v38 = vadd.f32 %v8654_v39, %v7725_v15  ;;  %v3039_v7 = vpop.f32.mrb[35].mxu0  ;;  %v3140_v40 = vmax.f32 %v3124_v3, 0.0 }
 0x326   :  { %v3123_v26 = vadd.f32 %v7725_v15, %v3039_v7  ;;  %v3138_v37 = vmax.f32 %v3122_v19, 0.0 }
 0x327   :  { %v3141_v42 = vmax.f32 %v3125_v38, 0.0 }
 0x328   :  { %v3139_v58 = vmax.f32 %v3123_v26, 0.0 }
 0x329   :  { %v12880_v10 = vpack.c.bf16 %v3141_v42, %v3140_v40 }
 0x32a   :  { %v12882_v5 = vpack.c.bf16 %v3139_v58, %v3138_v37  ;;  %v8657_v48 = vpop.f32.mrb[36].mxu0 }
 0x32b   :  { %v3128_v28 = vadd.f32 %v8657_v48, %v7725_v15  ;;  %v3052_v17 = vpop.f32.mrb[37].mxu0 }
 0x32c   :  { %v3126_v50 = vadd.f32 %v7725_v15, %v3052_v17  ;;  %v8658_v12 = vpop.f32.mrb[38].mxu0 }
 0x32d   :  { %v3129_v57 = vadd.f32 %v8658_v12, %v7725_v15  ;;  %v3055_v60 = vpop.f32.mrb[39].mxu0  ;;  %v3144_v41 = vmax.f32 %v3128_v28, 0.0 }
 0x32e   :  { %v3127_v23 = vadd.f32 %v7725_v15, %v3055_v60  ;;  %v3142_v39 = vmax.f32 %v3126_v50, 0.0 }
 0x32f   :  { %v3145_v0 = vmax.f32 %v3129_v57, 0.0 }
 0x330   :  { %v3143_v7 = vmax.f32 %v3127_v23, 0.0 }
 0x331   :  { %v12884_v3 = vpack.c.bf16 %v3145_v0, %v3144_v41 }
 0x332   :  { %v12886_v19 = vpack.c.bf16 %v3143_v7, %v3142_v39  ;;  %v8661_v38 = vpop.f32.mrb[40].mxu0 }
 0x333   :  { %15797 = vst [vmem:[#allocation173_spill] sm:$0xff] %v12884_v3  ;;  %v3132_v26 = vadd.f32 %v8661_v38, %v7725_v15  ;;  %v3068_v40 = vpop.f32.mrb[41].mxu0 }
 0x334   :  { %15798 = vst [vmem:[#allocation256_spill] sm:$0xff] %v12886_v19  ;;  %v3130_v42 = vadd.f32 %v7725_v15, %v3068_v40  ;;  %v8662_v37 = vpop.f32.mrb[42].mxu0 }
 0x335   :  { %v3133_v58 = vadd.f32 %v8662_v37, %v7725_v15  ;;  %v3071_v48 = vpop.f32.mrb[43].mxu0  ;;  %v3148_v34 = vmax.f32 %v3132_v26, 0.0 }
 0x336   :  { %v3131_v17 = vadd.f32 %v7725_v15, %v3071_v48  ;;  %v3146_v22 = vmax.f32 %v3130_v42, 0.0 }
 0x337   :  { %v3149_v12 = vmax.f32 %v3133_v58, 0.0 }
 0x338   :  { %v3147_v60 = vmax.f32 %v3131_v17, 0.0 }
 0x339   :  { %v12888_v28 = vpack.c.bf16 %v3149_v12, %v3148_v34 }
 0x33a   :  { %v12890_v50 = vpack.c.bf16 %v3147_v60, %v3146_v22  ;;  %v8665_v57 = vpop.f32.mrb[44].mxu0  ;;  %v12899_v22 = vld [vmem:[%s14483_s11] ss:$0 sm:$0xff] }
 0x33b   :  { %15799 = vst [vmem:[#allocation255_spill] sm:$0xff] %v12888_v28  ;;  %v3136_v23 = vadd.f32 %v8665_v57, %v7725_v15  ;;  %v3084_v41 = vpop.f32.mrb[45].mxu0 }
 0x33c   :  { %15800 = vst [vmem:[#allocation100_spill] sm:$0xff] %v12890_v50  ;;  %v3134_v0 = vadd.f32 %v7725_v15, %v3084_v41  ;;  %v8666_v39 = vpop.f32.mrb[46].mxu0  ;;  %v15833_v50 = vld [vmem:[#allocation55_spill] sm:$0xff] }
 0x33d   :  { %v3137_v7 = vadd.f32 %v8666_v39, %v7725_v15  ;;  %v3087_v38 = vpop.f32.mrb[47].mxu0  ;;  %v3152_v32 = vmax.f32 %v3136_v23, 0.0 }
 0x33e   :  { %v3135_v40 = vadd.f32 %v7725_v15, %v3087_v38  ;;  %v3150_v2 = vmax.f32 %v3134_v0, 0.0  ;;  %v15803_v0 = vld [vmem:[#allocation7_spill] sm:$0xff] }
 0x33f   :  { %v3153_v37 = vmax.f32 %v3137_v7, 0.0 }
 0x340   :  { %v3151_v48 = vmax.f32 %v3135_v40, 0.0 }
 0x341   :  { %v12892_v26 = vpack.c.bf16 %v3153_v37, %v3152_v32  ;;  %v15804_v37 = vld [vmem:[#allocation72_spill] sm:$0xff] }
 0x342   :  { %v12894_v42 = vpack.c.bf16 %v3151_v48, %v3150_v2 }
 0x343   :  { %15801 = vst [vmem:[#allocation96_spill] sm:$0xff] %v12892_v26  ;;  %v15809_v26 = vld [vmem:[#allocation5_spill] sm:$0xff] }
 0x344   :  { %15802 = vst [vmem:[#allocation103_spill] sm:$0xff] %v12894_v42 }
 0x361   :  { %v8833_v34 = vpop.f32.mrb[64].mxu1 }
 0x362   :  { %v5044_v58 = vadd.f32 %v8833_v34, %v12899_v22  ;;  %v4956_v17 = vpop.f32.mrb[65].mxu1 }
 0x363   :  { %v5042_v12 = vadd.f32 %v12899_v22, %v4956_v17  ;;  %v8834_v15 = vpop.f32.mrb[66].mxu1 }
 0x364   :  { %v5060_v60 = vmax.f32 %v5044_v58, 0.0  ;;  %v5045_v57 = vadd.f32 %v8834_v15, %v12899_v22  ;;  %v4959_v23 = vpop.f32.mrb[67].mxu1  ;;  %v15806_v15 = vld [vmem:[#allocation71_spill] sm:$0xff] }
 0x365   :  { %v12904_v32 = vmax.f32 %v5042_v12, 0.0  ;;  %v5043_v2 = vadd.f32 %v12899_v22, %v4959_v23 }
 0x366   :  { %v5076_v41 = vrot.slane %v5060_v60, 7  ;;  %v12908_v39 = vmul.f32 %v5060_v60, %v15803_v0  ;;  %v12910_v7 = vmax.f32 %v5045_v57, 0.0  ;;  %v5431_v40 = vrot.slane %v5060_v60, 1  ;;  %v15808_v0 = vld [vmem:[#allocation8_spill] sm:$0xff] }
 0x367   :  { %v12912_v38 = vmax.f32 %v5043_v2, 0.0  ;;  %v12915_v48 = vmul.f32 %v5060_v60, %v15804_v37  ;;  %v12927_v2 = vmul.f32 %v12904_v32, %v15808_v0  ;;  %v15815_v58 = vrot.slane %v12904_v32, 7  ;;  %v15819_v0 = vld [vmem:[#allocation23_spill] sm:$0xff] }
 0x368   :  { %v5077_v17 = vrot.slane %v12910_v7, 7  ;;  %v12923_v23 = vmul.f32 %v12910_v7, %v15806_v15  ;;  %v15810_v28 = vrot.slane %v12910_v7, 1  ;;  %v15947_v15 = vld [vmem:[#allocation53_spill] sm:$0xff] }
 0x369   :  { %15805 = vst [vmem:[#allocation241_spill] sm:$0xff] %v12915_v48  ;;  %v8837_v57 = vpop.f32.mrb[68].mxu1  ;;  %v5075_v37 = vrot.slane %v12912_v38, 7  ;;  %v12932_v34 = vmul.f32 %v12912_v38, %v15809_v26  ;;  %v12947_v26 = vmul.f32 %v12904_v32, %v15525_v8 }
 0x36a   :  { %15807 = vst [vmem:[#allocation99_spill] sm:$0xff] %v12923_v23  ;;  %v5048_v42 = vadd.f32 %v8837_v57, %v12899_v22  ;;  %v4972_v12 = vpop.f32.mrb[69].mxu1  ;;  %v12940_v56 = vsel %vm1173_vm0, %v5431_v40, %v15810_v28 }
 0x36b   :  { %15812 = vst [vmem:[#allocation74_spill] sm:$0xff] %v12940_v56  ;;  %v5046_v52 = vadd.f32 %v12899_v22, %v4972_v12  ;;  %v8838_v59 = vpop.f32.mrb[70].mxu1  ;;  %15813 = vst [vmem:[#allocation164_spill] sm:$0xff] %v12947_v26  ;;  %v12951_v57 = vsel %vm623_vm1, %v5075_v37, %v5076_v41  ;;  %v12957_v28 = vsel %vm623_vm1, %v15815_v58, %v5075_v37  ;;  %v15816_v12 = vrot.slane %v12912_v38, 1  ;;  %v15818_v58 = vld [vmem:[#allocation24_spill] sm:$0xff] }
 0x36c   :  { %15814 = vst [vmem:[#allocation154_spill] sm:$0xff] %v12951_v57  ;;  %v4975_v8 = vpop.f32.mrb[71].mxu1  ;;  %v12967_v23 = vmax.f32 %v5048_v42, 0.0  ;;  %v5049_v33 = vadd.f32 %v8838_v59, %v12899_v22  ;;  %v12975_v37 = vmul.f32 %v12957_v28, %v15818_v58  ;;  %v12979_v21 = vmul.f32 %v12951_v57, %v15819_v0 }
 0x36d   :  { %v12965_v48 = vsel %vm1173_vm0, %v15816_v12, %v5431_v40  ;;  %v12969_v46 = vmax.f32 %v5046_v52, 0.0  ;;  %v5047_v47 = vadd.f32 %v12899_v22, %v4975_v8  ;;  %v5102_v40 = vsel %vm623_vm1, %v5076_v41, %v5077_v17  ;;  %v15822_v12 = vld [vmem:[#allocation10_spill] sm:$0xff] }
 0x36e   :  { %15817 = vst [vmem:[#allocation157_spill] sm:$0xff] %v12965_v48  ;;  %v12984_v42 = vmul.f32 %v5060_v60, %v15668_v9  ;;  %v12988_v52 = vmul.f32 %v12910_v7, %v15673_v30  ;;  %v12993_v8 = vmul.f32 %v12910_v7, %v15822_v12  ;;  %v12997_v0 = vmul.f32 %v12904_v32, %v15701_v44  ;;  %v15825_v30 = vld [vmem:[#allocation9_spill] sm:$0xff] }
 0x36f   :  { %v13001_v41 = vmul.f32 %v12969_v46, %v15672_v62  ;;  %v13003_v9 = vmax.f32 %v5049_v33, 0.0  ;;  %v13005_v60 = vmax.f32 %v5047_v47, 0.0  ;;  %v13009_v58 = vmul.f32 %v12969_v46, %v15825_v30  ;;  %v15827_v33 = vld [vmem:[#allocation56_spill] sm:$0xff] }
 0x370   :  { %15820 = vst [vmem:[#allocation107_spill] sm:$0xff] %v12984_v42  ;;  %15821 = vst [vmem:[#allocation111_spill] sm:$0xff] %v12988_v52  ;;  %v15826_v44 = vrot.slane %v12969_v46, 7  ;;  %v13022_v47 = vmul.f32 %v12951_v57, %v15827_v33  ;;  %v13030_v49 = vmul.f32 %v12967_v23, %v15829_v6  ;;  %v13036_v14 = vmul.f32 %v5102_v40, %v15830_v35  ;;  %v15831_v52 = vld [vmem:[#allocation12_spill] sm:$0xff] }
 0x371   :  { %15823 = vst [vmem:[#allocation105_spill] sm:$0xff] %v12997_v0  ;;  %15824 = vst [vmem:[#allocation108_spill] sm:$0xff] %v13001_v41  ;;  %v8841_v12 = vpop.f32.mrb[72].mxu1  ;;  %v13043_v6 = vmul.f32 %v13005_v60, %v15831_v52  ;;  %v15832_v41 = vld [vmem:[#allocation25_spill] sm:$0xff]  ;;  %v15842_v52 = vld [vmem:[#allocation16_spill] sm:$0xff]  ;;  %v15843_v54 = vrot.slane %v12967_v23, 7 }
 0x372   :  { %v13018_v62 = vsel %vm623_vm1, %v5077_v17, %v15826_v44  ;;  %15828 = vst [vmem:[#allocation257_spill] sm:$0xff] %v13022_v47  ;;  %v4988_v27 = vpop.f32.mrb[73].mxu1  ;;  %v5052_v17 = vadd.f32 %v8841_v12, %v12899_v22  ;;  %v15853_v57 = vld [vmem:[#allocation20_spill] sm:$0xff]  ;;  %v15856_v19 = vrot.slane %v13003_v9, 7 }
 0x373   :  { %v5050_v44 = vadd.f32 %v12899_v22, %v4988_v27  ;;  %v8842_v33 = vpop.f32.mrb[74].mxu1  ;;  %v13047_v0 = vmul.f32 %v13018_v62, %v15832_v41 }
 0x374   :  { %v5053_v11 = vadd.f32 %v8842_v33, %v12899_v22  ;;  %v4991_v30 = vpop.f32.mrb[75].mxu1  ;;  %v13049_v12 = vmax.f32 %v5052_v17, 0.0  ;;  %v13055_v33 = vmul.f32 %v5102_v40, %v15833_v50  ;;  %v5079_v17 = vrot.slane %v13005_v60, 7 }
 0x375   :  { %v13051_v27 = vmax.f32 %v5050_v44, 0.0  ;;  %v5051_v35 = vadd.f32 %v12899_v22, %v4991_v30  ;;  %v5142_v30 = vmul.f32 %v13003_v9, %v15835_v43  ;;  %v13069_v50 = vmul.f32 %v5102_v40, %v15836_v24  ;;  %v15840_v24 = vld [vmem:[#allocation126_spill] sm:$0xff] }
 0x376   :  { %15834 = vst [vmem:[#allocation118_spill] sm:$0xff] %v13055_v33  ;;  %v13058_v59 = vmax.f32 %v5053_v11, 0.0  ;;  %v15838_v11 = vld [vmem:[#allocation15_spill] sm:$0xff]  ;;  %v13084_v40 = vmul.f32 %v13018_v62, %v15840_v24  ;;  %v9572_v43 = vld [vmem:[%s14487_s15] ss:$8 sps:$4 sm:$0xff]  }
 0x377   :  { %15837 = vst [vmem:[#allocation112_spill] sm:$0xff] %v13069_v50  ;;  %v5145_v13 = vmul.f32 %v13049_v12, %v15838_v11  ;;  %v13075_v31 = vmax.f32 %v5051_v35, 0.0  ;;  %v5143_v44 = vmul.f32 %v13051_v27, %v15839_v63  ;;  %v13101_v11 = vsel %vm623_vm1, %v5079_v17, %v15843_v54  ;;  %v15845_v54 = vld [vmem:[#allocation28_spill] sm:$0xff] }
 0x378   :  { %15841 = vst [vmem:[#allocation124_spill] sm:$0xff] %v13084_v40 }
 0x379   :  { %v8845_v53 = vpop.f32.mrb[76].mxu1  ;;  %v5144_v35 = vmul.f32 %v13075_v31, %v15842_v52  ;;  %v5154_v55 = vpack.c.bf16 %v5143_v44, %v5142_v30  ;;  %v9577_v44 = vld [vmem:[%s14487_s15 + $0x14] ss:$8 sps:$4 sm:$0xff]   ;;  %v15844_v30 = vrot.slane %v12969_v46, 7  ;;  %v5083_v33 = vrot.slane %v13075_v31, 7 }
 0x37a   :  { %v5056_v41 = vadd.f32 %v8845_v53, %v12899_v22  ;;  %v5004_v42 = vpop.f32.mrb[77].mxu1 }
 0x37b   :  { %v5054_v45 = vadd.f32 %v12899_v22, %v5004_v42  ;;  %v8846_v63 = vpop.f32.mrb[78].mxu1  ;;  %v5155_v52 = vpack.c.bf16 %v5145_v13, %v5144_v35  ;;  %v13113_v24 = vsel %vm623_vm1, %v15844_v30, %v5079_v17  ;;  %8859 = vmatprep.mubr.msk.bf16.mxu1 %vm902_vm2, %v5154_v55  ;;  %v15847_v35 = vld [vmem:[#allocation27_spill] sm:$0xff] }
 0x37c   :  { %v13103_v53 = vmax.f32 %v5056_v41, 0.0  ;;  %v5057_v42 = vadd.f32 %v8846_v63, %v12899_v22  ;;  %v5007_v47 = vpop.f32.mrb[79].mxu1  ;;  %v13121_v41 = vmul.f32 %v13113_v24, %v15845_v54  ;;  %v13125_v63 = vmul.f32 %v13101_v11, %v15847_v35  ;;  %v15850_v54 = vld [vmem:[#allocation17_spill] sm:$0xff] }
 0x37d   :  { %v13115_v50 = vmax.f32 %v5054_v45, 0.0  ;;  %v5055_v13 = vadd.f32 %v12899_v22, %v5007_v47  ;;  %8860 = vmatmul.mubr.msk.bf16.vlgmr.msra.gmra.mrb[80].mxu1 %vm902_vm2, %v5155_v52  ;;  %v15849_v45 = vld [vmem:[#allocation18_spill] sm:$0xff] }
 0x37e   :  { %15846 = vst [vmem:[#allocation254_spill] sm:$0xff] %v13121_v41  ;;  %15848 = vst [vmem:[#allocation205_spill] sm:$0xff] %v13125_v63  ;;  %v13129_v17 = vmax.f32 %v5057_v42, 0.0  ;;  %v5146_v55 = vmul.f32 %v13058_v59, %v15849_v45  ;;  %v5088_v47 = vrot.slane %v13103_v53, 7  ;;  %6815 = vmatpush1.bf16.msra.mxu1 %v9572_v43  ;;  %v9575_v42 = vld [vmem:[%s14487_s15 + $0x10] ss:$8 sps:$4 sm:$0xff]  }
 0x37f   :  { %v13136_v30 = vmax.f32 %v5055_v13, 0.0  ;;  %v5147_v35 = vmul.f32 %v13115_v50, %v15850_v54  ;;  %v15851_v52 = vld [vmem:[#allocation6_spill] sm:$0xff]  ;;  %v15852_v45 = vld [vmem:[#allocation19_spill] sm:$0xff]  ;;  %6816 = vmatprep.subr.bf16.mxu1 %v9577_v44  ;;  %v5086_v3 = vrot.slane %v13115_v50, 7  ;;  %v15855_v13 = vrot.slane %v13051_v27, 7  ;;  %v15858_v41 = vld [vmem:[#allocation21_spill] sm:$0xff] }
 0x380   :  { %v5089_v40 = vrot.slane %v13129_v17, 7  ;;  %v5134_v4 = vmul.f32 %v13129_v17, %v15851_v52  ;;  %v5149_v22 = vmul.f32 %v13103_v53, %v15852_v45  ;;  %v15854_v45 = vrot.slane %v12904_v32, 7  ;;  %v15867_v63 = vld [vmem:[#allocation32_spill] sm:$0xff]  ;;  %s9663_s15 = smov [#allocation2]  }
 0x381   :  { %v5087_v43 = vrot.slane %v13136_v30, 7  ;;  %v5156_v54 = vpack.c.bf16 %v5147_v35, %v5146_v55  ;;  %v5148_v16 = vmul.f32 %v13136_v30, %v15853_v57  ;;  %v13171_v55 = vsel %vm623_vm1, %v15856_v19, %v15855_v13  ;;  %v15857_v57 = vld [vmem:[#allocation22_spill] sm:$0xff]  ;;  %s7430_s0 = sshll.u32 %s9663_s15, 4  ;;  %s7431_s0 = int_to_ptr.vmem [resolvable:$true] %s7430_s0 }
 0x382   :  { %v5150_v51 = vpack.c.bf16 %v12927_v2, %v5134_v4  ;;  %v13157_v52 = vsel %vm623_vm1, %v5088_v47, %v5089_v40  ;;  %v13163_v44 = vsel %vm623_vm1, %v5089_v40, %v15854_v45  ;;  %6817 = vmatpush1.bf16.msra.mxu1 %v9575_v42  ;;  %v9578_v45 = vld [vmem:[%s14484_s12 + $0x8] sm:$0xff]   ;;  %v15859_v13 = vrot.slane %v12967_v23, 7  ;;  %s9638_s20 = scalar_lea.vmem %s7431_s0, 4096  ;;  %p9643_p1 = scmp.lt.s32.totalorder %s7431_s0, %s7431_s0 }
 0x383   :  { %8863 = vmatprep.mubr.msk.bf16.mxu1 %vm902_vm2, %v5156_v54  ;;  %v5157_v2 = vpack.c.bf16 %v5149_v22, %v5148_v16  ;;  %v5106_v35 = vmul.f32 %v13157_v52, %v15857_v57  ;;  %v5107_v40 = vmul.f32 %v13163_v44, %v15858_v41  ;;  %v15860_v22 = vld [vmem:[#allocation29_spill] sm:$0xff]  ;;  %v15862_v41 = vrot.slane %v13049_v12, 7  ;;  %p9639_p0 = scmp.ne.s32.totalorder %s7431_s0, %s9638_s20  ;;  %p9644_p2 = scmp.lt.s32.totalorder %s9638_s20, %s9638_s20 }
 0x384   :  { %8851 = vmatprep.mubr.msk.bf16.mxu0 %vm902_vm2, %v5150_v51  ;;  %v13189_v16 = vsel %vm623_vm1, %v15859_v13, %v15856_v19  ;;  %v13193_v42 = vmul.f32 %v13171_v55, %v15860_v22  ;;  %v15863_v54 = vrot.slane %v13051_v27, 7  ;;  %v15864_v19 = vpack.c.bf16 %v12908_v39, %v12932_v34  ;;  %v15865_v22 = vld [vmem:[#allocation30_spill] sm:$0xff] }
 0x385   :  { %v13199_v51 = vsel %vm623_vm1, %v5083_v33, %v15862_v41  ;;  %v5122_v13 = vpack.c.bf16 %v5107_v40, %v5106_v35  ;;  %v13213_v4 = vmul.f32 %v13189_v16, %v15865_v22  ;;  %8864 = vmatmul.mubr.msk.bf16.gmra.mrb[84].mxu1 %vm902_vm2, %v5157_v2  ;;  %v15871_v34 = vpack.c.bf16 %v13009_v58, %v12993_v8  ;;  %p9645_p3 = por %p9644_p2, %p9643_p1 }
 0x386   :  { %15861 = vst [vmem:[#allocation219_spill] sm:$0xff] %v13193_v42  ;;  %v13205_v57 = vsel %vm623_vm1, %v15863_v54, %v5083_v33  ;;  %8852 = vmatmul.mubr.msk.bf16.vlgmr.msra.gmra.mrb[48].mxu0 %vm902_vm2, %v15864_v19  ;;  %v13221_v26 = vmul.f32 %v13199_v51, %v15869_v1  ;;  %v9585_v33 = vld [vmem:[%s14486_s14 + $0x4] ss:$8 sps:$4 sm:$0xff]   ;;  %v15874_v40 = vrot.slane %v13049_v12, 7  ;;  %v13248_v2 = vsel %vm623_vm1, %v5087_v43, %v5088_v47  ;;  %v15880_v19 = vld [vmem:[#allocation35_spill] sm:$0xff]  ;;  %v15891_v42 = vld [vmem:[#allocation40_spill] sm:$0xff] }
 0x387   :  { %15866 = vst [vmem:[#allocation262_spill] sm:$0xff] %v13213_v4  ;;  %v13217_v41 = vmul.f32 %v13205_v57, %v15867_v63  ;;  %8855 = vmatprep.mubr.msk.bf16.mxu0 %vm902_vm2, %v15871_v34  ;;  %v15872_v63 = vrot.slane %v13058_v59, 7  ;;  %8868 = vmatpush3.bf16.msra.mxu0 %v12871_v18  ;;  %v15875_v58 = vmov 0   ;;  %v15876_v34 = vld [vmem:[#allocation34_spill] sm:$0xff]  ;;  %v13264_v47 = vld [vmem:[%s14484_s12 + $0x20] sm:$0xff]   ;;  %v13276_v22 = vmul.f32 %v13248_v2, %v15880_v19  ;;  %p9646_p4 = pnand %p9645_p3, %p9639_p0 }
 0x388   :  { %15870 = vst [vmem:[#allocation129_spill] sm:$0xff] %v13221_v26  ;;  %6846 = vmatprep.mubr.bf16.mxu1 %v15875_v58  ;;  %8869 = vmatprep.subr.bf16.mxu0 %v9578_v45  ;;  %v15883_v39 = vrot.slane %v12904_v32, 1  ;;  %v15889_v19 = vld [vmem:[#allocation37_spill] sm:$0xff] }
 0x389   :  { %15868 = vst [vmem:[#allocation134_spill] sm:$0xff] %v13217_v41  ;;  %v13236_v35 = vsel %vm623_vm1, %v15872_v63, %v5086_v3  ;;  %v15873_v1 = vmov %v15872_v63  ;;  %15881 = vst [vmem:[#allocation168_spill] sm:$0xff] %v13276_v22  ;;  %v15884_v41 = vld [vmem:[#allocation36_spill] sm:$0xff]  ;;  %6971 = vmatprep.subr.bf16.mxu1 %v9585_v33  ;;  %v15955_v22 = vld [vmem:[#allocation59_spill] sm:$0xff] }
 0x38a   :  { %v13244_v54 = vsel %vm623_vm1, %v15874_v40, %v15873_v1  ;;  %v15878_v1 = vld [vmem:[#allocation33_spill] sm:$0xff]  ;;  %v13272_v40 = vsel %vm623_vm1, %v5086_v3, %v5087_v43  ;;  %v15886_v26 = vmov %v15883_v39  ;;  %v15887_v3 = vrot.slane %v13129_v17, 1 }
 0x38b   :  { %v13259_v63 = vmul.f32 %v13244_v54, %v15876_v34  ;;  %v13268_v18 = vmul.f32 %v13236_v35, %v15878_v1  ;;  %v15882_v34 = vrot.slane %v12912_v38, 1  ;;  %v13288_v1 = vmul.f32 %v13272_v40, %v15884_v41  ;;  %8870 = vmatpush3.bf16.msra.mxu0 %v9578_v45 }
 0x38c   :  { %v13296_v43 = vsel %vm1173_vm0, %v15887_v3, %v15886_v26  ;;  %v13314_v26 = vmul.f32 %v12940_v56, %v15895_v61  ;;  %v15897_v3 = vrot.slane %v13005_v60, 1  ;;  %8887 = vmatprep.subr.bf16.mxu0 %v13264_v47 }
 0x38d   :  { %15877 = vst [vmem:[#allocation260_spill] sm:$0xff] %v13259_v63  ;;  %15879 = vst [vmem:[#allocation200_spill] sm:$0xff] %v13268_v18  ;;  %v13284_v8 = vsel %vm1173_vm0, %v15883_v39, %v15882_v34  ;;  %v13304_v39 = vmul.f32 %v12965_v48, %v15891_v42  ;;  %v15893_v34 = vld [vmem:[#allocation38_spill] sm:$0xff]  ;;  %v15901_v63 = vld [vmem:[#allocation41_spill] sm:$0xff]  ;;  %7993 = vmatmul.mubr.msk.bf16.vlgmr.msra.gmra.mrb[88].mxu1 %vm902_vm2, %v12882_v5 }
 0x38e   :  { %15885 = vst [vmem:[#allocation181_spill] sm:$0xff] %v13288_v1  ;;  %15888 = vst [vmem:[#allocation171_spill] sm:$0xff] %v13296_v43  ;;  %v13300_v4 = vmul.f32 %v13284_v8, %v15889_v19  ;;  %v13310_v32 = vmul.f32 %v13296_v43, %v15893_v34  ;;  %v15898_v19 = vrot.slane %v12969_v46, 1  ;;  %v15900_v34 = vrot.slane %v12910_v7, 1  ;;  %v15903_v43 = vld [vmem:[#allocation88_spill] sm:$0xff]  ;;  %v15905_v7 = vld [vmem:[#allocation42_spill] sm:$0xff]  ;;  %6856 = vmatprep.mubr.bf16.mxu1 %v15875_v58 }
 0x38f   :  { %15892 = vst [vmem:[#allocation143_spill] sm:$0xff] %v13304_v39  ;;  %15896 = vst [vmem:[#allocation204_spill] sm:$0xff] %v13314_v26  ;;  %v13338_v48 = vmul.f32 %v12940_v56, %v15903_v43  ;;  %v15909_v43 = vpack.c.bf16 %v13030_v49, %v13043_v6  ;;  %v15915_v49 = vrot.slane %v13005_v60, 1  ;;  %v5441_v6 = vrot.slane %v13115_v50, 1  ;;  %v15932_v26 = vld [vmem:[#allocation48_spill] sm:$0xff] }
 0x390   :  { %15890 = vst [vmem:[#allocation144_spill] sm:$0xff] %v13300_v4  ;;  %15894 = vst [vmem:[#allocation195_spill] sm:$0xff] %v13310_v32  ;;  %v13322_v42 = vsel %vm1173_vm0, %v15898_v19, %v15897_v3  ;;  %v15899_v41 = vmov %v15898_v19  ;;  %v15936_v32 = vrot.slane %v13136_v30, 1  ;;  %v15953_v1 = vld [vmem:[#allocation60_spill] sm:$0xff] }
 0x391   :  { %v5456_v61 = vsel %vm1173_vm0, %v15900_v34, %v15899_v41  ;;  %v13334_v18 = vmul.f32 %v13322_v42, %v15901_v63  ;;  %15904 = vst [vmem:[#allocation211_spill] sm:$0xff] %v13338_v48  ;;  %v15907_v41 = vld [vmem:[#allocation87_spill] sm:$0xff]  ;;  %v9583_v63 = vld [vmem:[%s14486_s14] ss:$8 sps:$4 sm:$0xff]   ;;  %8856 = vmatmul.mubr.msk.bf16.gmra.mrb[52].mxu0 %vm902_vm2, %v15909_v43  ;;  %v13363_v3 = vmul.f32 %v13322_v42, %v15715_v20  ;;  %v15923_v48 = vrot.slane %v13003_v9, 1 }
 0x392   :  { %v13346_v19 = vmul.f32 %v5456_v61, %v15905_v7  ;;  %v13349_v34 = vmul.f32 %v5456_v61, %v15907_v41  ;;  %v13359_v45 = vmul.f32 %v5456_v61, %v15717_v36  ;;  %v15912_v7 = vrot.slane %v13003_v9, 1  ;;  %v9588_v20 = vld [vmem:[%s14486_s14 + $0x14] ss:$8 sps:$4 sm:$0xff]   ;;  %8871 = vmatprep.mubr.msk.bf16.mxu0 %vm902_vm2, %v5122_v13  ;;  %6972 = vmatpush1.bf16.msra.mxu1 %v9583_v63  ;;  %v15941_v63 = vld [vmem:[#allocation50_spill] sm:$0xff] }
 0x393   :  { %15902 = vst [vmem:[#allocation175_spill] sm:$0xff] %v13334_v18  ;;  %15911 = vst [vmem:[#allocation208_spill] sm:$0xff] %v13363_v3  ;;  %v15913_v41 = vrot.slane %v12967_v23, 1  ;;  %v15920_v13 = vrot.slane %v13075_v31, 1  ;;  %v15921_v61 = vrot.slane %v13051_v27, 1  ;;  %6973 = vmatprep.subr.bf16.mxu1 %v9588_v20  ;;  %v15946_v20 = vld [vmem:[#allocation54_spill] sm:$0xff] }
 0x394   :  { %15906 = vst [vmem:[#allocation236_spill] sm:$0xff] %v13346_v19  ;;  %15908 = vst [vmem:[#allocation266_spill] sm:$0xff] %v13349_v34  ;;  %v15928_v19 = vrot.slane %v13058_v59, 1 }
 0x395   :  { %15910 = vst [vmem:[#allocation117_spill] sm:$0xff] %v13359_v45  ;;  %v13371_v33 = vsel %vm1173_vm0, %v15913_v41, %v15912_v7  ;;  %v15914_v39 = vmov %v15913_v41  ;;  %v15916_v7 = vld [vmem:[#allocation44_spill] sm:$0xff]  ;;  %v13409_v43 = vsel %vm1173_vm0, %v15921_v61, %v15920_v13  ;;  %v15924_v41 = vld [vmem:[#allocation46_spill] sm:$0xff]  ;;  %v15926_v45 = vld [vmem:[#allocation45_spill] sm:$0xff]  ;;  %7994 = vmatmul.mubr.msk.bf16.gmra.mrb[92].mxu1 %vm902_vm2, %v12880_v10 }
 0x396   :  { %v13379_v36 = vsel %vm1173_vm0, %v15915_v49, %v15914_v39  ;;  %v15918_v49 = vld [vmem:[#allocation43_spill] sm:$0xff]  ;;  %v13425_v3 = vmul.f32 %v13409_v43, %v15926_v45  ;;  %6866 = vmatprep.mubr.bf16.mxu1 %v15875_v58 }
 0x397   :  { %v13394_v39 = vmul.f32 %v13379_v36, %v15916_v7  ;;  %v13401_v5 = vmul.f32 %v13371_v33, %v15918_v49  ;;  %v15922_v7 = vmov %v15921_v61  ;;  %v15929_v61 = vrot.slane %v13049_v12, 1  ;;  %v9586_v45 = vld [vmem:[%s14486_s14 + $0x10] ss:$8 sps:$4 sm:$0xff]  }
 0x398   :  { %v13417_v34 = vsel %vm1173_vm0, %v15923_v48, %v15922_v7  ;;  %15927 = vst [vmem:[#allocation272_spill] sm:$0xff] %v13425_v3  ;;  %v15931_v48 = vrot.slane %v13075_v31, 1  ;;  %v15938_v7 = vld [vmem:[#allocation49_spill] sm:$0xff]  ;;  %v15944_v3 = vld [vmem:[#allocation51_spill] sm:$0xff]  ;;  %6974 = vmatpush1.bf16.msra.mxu1 %v9586_v45  ;;  %v13602_v45 = vmul.f32 %v12969_v46, %v15543_v29  ;;  %v15982_v46 = vld [vmem:[#allocation78_spill] sm:$0xff] }
 0x399   :  { %15917 = vst [vmem:[#allocation253_spill] sm:$0xff] %v13394_v39  ;;  %15919 = vst [vmem:[#allocation270_spill] sm:$0xff] %v13401_v5  ;;  %v13421_v49 = vmul.f32 %v13417_v34, %v15924_v41  ;;  %v13433_v13 = vsel %vm1173_vm0, %v15929_v61, %v15928_v19  ;;  %v15930_v18 = vmov %v15929_v61  ;;  %v15934_v61 = vld [vmem:[#allocation47_spill] sm:$0xff]  ;;  %v15939_v39 = vrot.slane %v13129_v17, 1  ;;  %v16001_v29 = vld [vmem:[#allocation84_spill] sm:$0xff] }
 0x39a   :  { %v13441_v41 = vsel %vm1173_vm0, %v15931_v48, %v15930_v18  ;;  %v13454_v56 = vmul.f32 %v13433_v13, %v15934_v61  ;;  %v13460_v18 = vsel %vm1173_vm0, %v5441_v6, %v15936_v32  ;;  %v15937_v48 = vrot.slane %v13058_v59, 1  ;;  %15974 = vst [vmem:[#allocation231_spill] sm:$0xff] %v13602_v45  ;;  %v15991_v45 = vld [vmem:[#allocation79_spill] sm:$0xff] }
 0x39b   :  { %15925 = vst [vmem:[#allocation269_spill] sm:$0xff] %v13421_v49  ;;  %v13450_v19 = vmul.f32 %v13441_v41, %v15932_v26  ;;  %v13472_v61 = vmul.f32 %v13460_v18, %v15938_v7  ;;  %v15940_v5 = vrot.slane %v13103_v53, 1  ;;  %v15943_v7 = vrot.slane %v13136_v30, 1 }
 0x39c   :  { %15935 = vst [vmem:[#allocation122_spill] sm:$0xff] %v13454_v56  ;;  %v13468_v26 = vsel %vm1173_vm0, %v15937_v48, %v5441_v6  ;;  %v15950_v56 = vpack.c.bf16 %v12979_v21, %v12975_v37  ;;  %v15957_v21 = vpack.c.bf16 %v13047_v0, %v13036_v14  ;;  %v15960_v0 = vld [vmem:[#allocation61_spill] sm:$0xff]  ;;  %v15965_v37 = vld [vmem:[#allocation66_spill] sm:$0xff] }
 0x39d   :  { %15933 = vst [vmem:[#allocation271_spill] sm:$0xff] %v13450_v19  ;;  %v13480_v32 = vsel %vm1173_vm0, %v15940_v5, %v15939_v39  ;;  %v13486_v49 = vmul.f32 %v13468_v26, %v15941_v63  ;;  %v15942_v6 = vmov %v15940_v5  ;;  %v9580_v39 = vld [vmem:[%s14484_s12 + $0x28] sm:$0xff]   ;;  %v15945_v5 = vld [vmem:[#allocation52_spill] sm:$0xff]  ;;  %v13509_v19 = vmul.f32 %v13163_v44, %v15946_v20 }
 0x39e   :  { %v13494_v48 = vsel %vm1173_vm0, %v15943_v7, %v15942_v6  ;;  %v13498_v4 = vmul.f32 %v13480_v32, %v15944_v3  ;;  %v13513_v6 = vmul.f32 %v12957_v28, %v15947_v15  ;;  %v15948_v7 = vld [vmem:[#allocation58_spill] sm:$0xff]  ;;  %8872 = vmatmul.mubr.msk.bf16.vlgmr.msra.gmra.mrb[48].mxu0 %vm902_vm2, %v15950_v56  ;;  %v13531_v15 = vmul.f32 %v13101_v11, %v15953_v1 }
 0x39f   :  { %v13505_v63 = vmul.f32 %v13494_v48, %v15945_v5  ;;  %v13517_v3 = vmul.f32 %v13018_v62, %v15948_v7  ;;  %v15951_v5 = vld [vmem:[#allocation57_spill] sm:$0xff]  ;;  %v13535_v62 = vmul.f32 %v13189_v16, %v15955_v22  ;;  %8875 = vmatprep.mubr.msk.bf16.mxu0 %vm902_vm2, %v15957_v21  ;;  %v15958_v1 = vld [vmem:[#allocation62_spill] sm:$0xff]  ;;  %8888 = vmatpush3.bf16.msra.mxu0 %v13264_v47  ;;  %v15962_v21 = vld [vmem:[#allocation64_spill] sm:$0xff] }
 0x3a0   :  { %v13527_v20 = vmul.f32 %v13113_v24, %v15951_v5  ;;  %15954 = vst [vmem:[#allocation151_spill] sm:$0xff] %v13531_v15  ;;  %v13549_v7 = vmul.f32 %v13171_v55, %v15958_v1  ;;  %v13559_v22 = vmul.f32 %v13205_v57, %v15960_v0  ;;  %8889 = vmatprep.subr.bf16.mxu0 %v9580_v39  ;;  %v13564_v5 = vld [vmem:[%s14484_s12 + $0x30] sm:$0xff]   ;;  %v15967_v0 = vld [vmem:[#allocation65_spill] sm:$0xff]  ;;  %v15969_v15 = vld [vmem:[#allocation68_spill] sm:$0xff] }
 0x3a1   :  { %15949 = vst [vmem:[#allocation123_spill] sm:$0xff] %v13517_v3  ;;  %15956 = vst [vmem:[#allocation130_spill] sm:$0xff] %v13535_v62  ;;  %v13568_v47 = vmul.f32 %v13199_v51, %v15962_v21  ;;  %v15964_v1 = vld [vmem:[#allocation63_spill] sm:$0xff]  ;;  %v13576_v14 = vmul.f32 %v13236_v35, %v15965_v37  ;;  %v13580_v56 = vmul.f32 %v13272_v40, %v15967_v0 }
 0x3a2   :  { %15952 = vst [vmem:[#allocation226_spill] sm:$0xff] %v13527_v20  ;;  %15959 = vst [vmem:[#allocation132_spill] sm:$0xff] %v13549_v7  ;;  %v13572_v10 = vmul.f32 %v13244_v54, %v15964_v1  ;;  %v13586_v62 = vmul.f32 %v13248_v2, %v15969_v15  ;;  %v15971_v21 = vld [vmem:[#allocation67_spill] sm:$0xff]  ;;  %v13594_v1 = vmul.f32 %v12912_v38, %v15523_v25  ;;  %v15975_v15 = vld [vmem:[#allocation73_spill] sm:$0xff] }
 0x3a3   :  { %15961 = vst [vmem:[#allocation265_spill] sm:$0xff] %v13559_v22  ;;  %15963 = vst [vmem:[#allocation186_spill] sm:$0xff] %v13568_v47  ;;  %v13590_v3 = vmul.f32 %v13157_v52, %v15971_v21  ;;  %v13606_v7 = vmul.f32 %v13005_v60, %v15975_v15  ;;  %8890 = vmatpush3.bf16.msra.mxu0 %v9580_v39  ;;  %v15978_v20 = vld [vmem:[#allocation76_spill] sm:$0xff]  ;;  %v15980_v0 = vld [vmem:[#allocation75_spill] sm:$0xff]  ;;  %v13625_v39 = vmul.f32 %v13051_v27, %v15982_v46 }
 0x3a4   :  { %15966 = vst [vmem:[#allocation141_spill] sm:$0xff] %v13576_v14  ;;  %15968 = vst [vmem:[#allocation142_spill] sm:$0xff] %v13580_v56  ;;  %v13614_v37 = vmul.f32 %v12967_v23, %v15978_v20  ;;  %v13618_v14 = vmul.f32 %v13003_v9, %v15980_v0  ;;  %8907 = vmatprep.subr.bf16.mxu0 %v13564_v5  ;;  %v15984_v15 = vld [vmem:[#allocation77_spill] sm:$0xff]  ;;  %v15986_v21 = vld [vmem:[#allocation80_spill] sm:$0xff]  ;;  %v13643_v46 = vmul.f32 %v13058_v59, %v15991_v45 }
 0x3a5   :  { %15970 = vst [vmem:[#allocation234_spill] sm:$0xff] %v13586_v62  ;;  %15972 = vst [vmem:[#allocation193_spill] sm:$0xff] %v13590_v3  ;;  %v13629_v22 = vmul.f32 %v13075_v31, %v15984_v15  ;;  %v13633_v20 = vmul.f32 %v13049_v12, %v15986_v21  ;;  %v15988_v25 = vld [vmem:[#allocation205_spill] sm:$0xff]  ;;  %v15989_v0 = vld [vmem:[#allocation254_spill] sm:$0xff] }
 0x3a6   :  { %15973 = vst [vmem:[#allocation230_spill] sm:$0xff] %v13594_v1  ;;  %15976 = vst [vmem:[#allocation147_spill] sm:$0xff] %v13606_v7  ;;  %v15990_v1 = vpack.c.bf16 %v15988_v25, %v15989_v0  ;;  %v15993_v7 = vld [vmem:[#allocation82_spill] sm:$0xff]  ;;  %v15995_v62 = vld [vmem:[#allocation81_spill] sm:$0xff] }
 0x3a7   :  { %15979 = vst [vmem:[#allocation148_spill] sm:$0xff] %v13614_v37  ;;  %15981 = vst [vmem:[#allocation158_spill] sm:$0xff] %v13618_v14  ;;  %v13647_v15 = vmul.f32 %v13115_v50, %v15993_v7  ;;  %v13651_v21 = vmul.f32 %v13136_v30, %v15995_v62  ;;  %v15997_v3 = vld [vmem:[#allocation256_spill] sm:$0xff]  ;;  %v15998_v25 = vld [vmem:[#allocation219_spill] sm:$0xff]  ;;  %v13663_v37 = vmul.f32 %v13103_v53, %v16001_v29 }
 0x3a8   :  { %15983 = vst [vmem:[#allocation159_spill] sm:$0xff] %v13625_v39  ;;  %15985 = vst [vmem:[#allocation166_spill] sm:$0xff] %v13629_v22  ;;  %8876 = vmatmul.mubr.msk.bf16.gmra.mrb[52].mxu0 %vm902_vm2, %v15990_v1  ;;  %7995 = vmatmul.mubr.msk.bf16.gmra.mrb[96].mxu1 %vm902_vm2, %v15997_v3  ;;  %v15999_v1 = vld [vmem:[#allocation262_spill] sm:$0xff]  ;;  %v16003_v7 = vld [vmem:[#allocation83_spill] sm:$0xff] }
 0x3a9   :  { %15987 = vst [vmem:[#allocation167_spill] sm:$0xff] %v13633_v20  ;;  %15992 = vst [vmem:[#allocation176_spill] sm:$0xff] %v13643_v46  ;;  %v16000_v0 = vpack.c.bf16 %v15998_v25, %v15999_v1  ;;  %v13667_v14 = vmul.f32 %v13129_v17, %v16003_v7  ;;  %6876 = vmatprep.mubr.bf16.mxu1 %v15875_v58  ;;  %v16005_v25 = vld [vmem:[#allocation86_spill] sm:$0xff]  ;;  %v16008_v45 = vld [vmem:[#allocation157_spill] sm:$0xff] }
 0x3aa   :  { %15994 = vst [vmem:[#allocation177_spill] sm:$0xff] %v13647_v15  ;;  %15996 = vst [vmem:[#allocation150_spill] sm:$0xff] %v13651_v21  ;;  %v13676_v1 = vmul.f32 %v13284_v8, %v16005_v25  ;;  %v16010_v39 = vld [vmem:[#allocation90_spill] sm:$0xff]  ;;  %v16012_v56 = vld [vmem:[#allocation89_spill] sm:$0xff] }
 0x3ab   :  { %8879 = vmatprep.mubr.msk.bf16.mxu0 %vm902_vm2, %v16000_v0  ;;  %16002 = vst [vmem:[#allocation187_spill] sm:$0xff] %v13663_v37  ;;  %16004 = vst [vmem:[#allocation152_spill] sm:$0xff] %v13667_v14  ;;  %v16007_v0 = vld [vmem:[#allocation85_spill] sm:$0xff]  ;;  %v13686_v22 = vmul.f32 %v13322_v42, %v16010_v39  ;;  %v13690_v3 = vmul.f32 %v13379_v36, %v16012_v56  ;;  %v16014_v62 = vld [vmem:[#allocation94_spill] sm:$0xff] }
 0x3ac   :  { %16006 = vst [vmem:[#allocation196_spill] sm:$0xff] %v13676_v1  ;;  %v13680_v29 = vmul.f32 %v16008_v45, %v16007_v0  ;;  %v13694_v15 = vmul.f32 %v13371_v33, %v16014_v62  ;;  %v16016_v0 = vld [vmem:[#allocation93_spill] sm:$0xff]  ;;  %v16018_v7 = vld [vmem:[#allocation98_spill] sm:$0xff]  ;;  %v16030_v47 = vld [vmem:[#allocation120_spill] sm:$0xff] }
 0x3ad   :  { %16011 = vst [vmem:[#allocation170_spill] sm:$0xff] %v13686_v22  ;;  %16013 = vst [vmem:[#allocation169_spill] sm:$0xff] %v13690_v3  ;;  %v13700_v21 = vmul.f32 %v13417_v34, %v16016_v0  ;;  %v13704_v37 = vmul.f32 %v13409_v43, %v16018_v7  ;;  %v16020_v42 = vld [vmem:[#allocation97_spill] sm:$0xff]  ;;  %v16022_v62 = vld [vmem:[#allocation102_spill] sm:$0xff]  ;;  %v13744_v7 = vmul.f32 %v12957_v28, %v16030_v47 }
 0x3ae   :  { %16009 = vst [vmem:[#allocation197_spill] sm:$0xff] %v13680_v29  ;;  %16015 = vst [vmem:[#allocation136_spill] sm:$0xff] %v13694_v15  ;;  %v13708_v39 = vmul.f32 %v13441_v41, %v16020_v42  ;;  %v13714_v14 = vmul.f32 %v13433_v13, %v16022_v62  ;;  %v16024_v25 = vld [vmem:[#allocation101_spill] sm:$0xff]  ;;  %v16025_v0 = vld [vmem:[#allocation110_spill] sm:$0xff] }
 0x3af   :  { %16017 = vst [vmem:[#allocation277_spill] sm:$0xff] %v13700_v21  ;;  %16019 = vst [vmem:[#allocation275_spill] sm:$0xff] %v13704_v37  ;;  %v13718_v1 = vmul.f32 %v13468_v26, %v16024_v25  ;;  %v13722_v29 = vmul.f32 %v13460_v18, %v16025_v0  ;;  %v16026_v20 = vld [vmem:[#allocation109_spill] sm:$0xff]  ;;  %v16027_v62 = vld [vmem:[#allocation114_spill] sm:$0xff] }
 0x3b0   :  { %16021 = vst [vmem:[#allocation185_spill] sm:$0xff] %v13708_v39  ;;  %16023 = vst [vmem:[#allocation276_spill] sm:$0xff] %v13714_v14  ;;  %v13730_v56 = vmul.f32 %v13494_v48, %v16026_v20  ;;  %v13734_v22 = vmul.f32 %v13480_v32, %v16027_v62  ;;  %v16028_v3 = vld [vmem:[#allocation113_spill] sm:$0xff]  ;;  %v16029_v0 = vld [vmem:[#allocation171_spill] sm:$0xff] }
 0x3b1   :  { %v13740_v46 = vmul.f32 %v16029_v0, %v16028_v3  ;;  %v16031_v42 = vld [vmem:[#allocation119_spill] sm:$0xff]  ;;  %v16032_v37 = vld [vmem:[#allocation154_spill] sm:$0xff]  ;;  %v16033_v20 = vld [vmem:[#allocation129_spill] sm:$0xff] }
 0x3b2   :  { %v13748_v39 = vmul.f32 %v16032_v37, %v16031_v42  ;;  %v16034_v15 = vld [vmem:[#allocation134_spill] sm:$0xff]  ;;  %v16036_v25 = vld [vmem:[#allocation140_spill] sm:$0xff]  ;;  %v16037_v14 = vld [vmem:[#allocation139_spill] sm:$0xff] }
 0x3b3   :  { %v16035_v21 = vpack.c.bf16 %v16033_v20, %v16034_v15  ;;  %v13758_v3 = vmul.f32 %v13113_v24, %v16036_v25  ;;  %v13762_v28 = vmul.f32 %v13101_v11, %v16037_v14  ;;  %v16038_v47 = vld [vmem:[#allocation146_spill] sm:$0xff]  ;;  %v16039_v42 = vld [vmem:[#allocation173_spill] sm:$0xff]  ;;  %v16040_v15 = vld [vmem:[#allocation200_spill] sm:$0xff] }
 0x3b4   :  { %v13766_v37 = vmul.f32 %v13189_v16, %v16038_v47  ;;  %7996 = vmatmul.mubr.msk.bf16.gmra.mrb[100].mxu1 %vm902_vm2, %v16039_v42  ;;  %v16043_v11 = vld [vmem:[#allocation145_spill] sm:$0xff]  ;;  %v16044_v47 = vld [vmem:[#allocation156_spill] sm:$0xff]  ;;  %v16048_v16 = vld [vmem:[#allocation174_spill] sm:$0xff] }
 0x3b5   :  { %8880 = vmatmul.mubr.msk.bf16.gmra.mrb[56].mxu0 %vm902_vm2, %v16035_v21  ;;  %v16041_v21 = vld [vmem:[#allocation260_spill] sm:$0xff]  ;;  %v13780_v14 = vmul.f32 %v13171_v55, %v16043_v11  ;;  %6886 = vmatprep.mubr.bf16.mxu1 %v15875_v58  ;;  %v13787_v42 = vmul.f32 %v13205_v57, %v16044_v47  ;;  %v16047_v11 = vld [vmem:[#allocation161_spill] sm:$0xff]  ;;  %v13805_v62 = vmul.f32 %v13272_v40, %v16048_v16  ;;  %v16054_v16 = vld [vmem:[#allocation202_spill] sm:$0xff] }
 0x3b6   :  { %v16042_v20 = vpack.c.bf16 %v16040_v15, %v16041_v21  ;;  %v16045_v15 = vld [vmem:[#allocation155_spill] sm:$0xff]  ;;  %v13801_v24 = vmul.f32 %v13236_v35, %v16047_v11  ;;  %v16049_v57 = vld [vmem:[#allocation172_spill] sm:$0xff] }
 0x3b7   :  { %v13791_v21 = vmul.f32 %v13199_v51, %v16045_v15  ;;  %v13809_v47 = vmul.f32 %v13248_v2, %v16049_v57  ;;  %v16052_v35 = vld [vmem:[#allocation188_spill] sm:$0xff]  ;;  %v13831_v57 = vmul.f32 %v13005_v60, %v16054_v16  ;;  %v16058_v51 = vld [vmem:[#allocation209_spill] sm:$0xff]  ;;  %v16080_v60 = vld [vmem:[#allocation259_spill] sm:$0xff] }
 0x3b8   :  { %8883 = vmatprep.mubr.msk.bf16.mxu0 %vm902_vm2, %v16042_v20  ;;  %v16046_v20 = vld [vmem:[#allocation163_spill] sm:$0xff]  ;;  %v13823_v11 = vmul.f32 %v12912_v38, %v16052_v35  ;;  %v16057_v35 = vld [vmem:[#allocation210_spill] sm:$0xff]  ;;  %v13847_v2 = vmul.f32 %v13051_v27, %v16058_v51  ;;  %v16059_v16 = vld [vmem:[#allocation216_spill] sm:$0xff] }
 0x3b9   :  { %v13795_v25 = vmul.f32 %v13244_v54, %v16046_v20  ;;  %v16050_v54 = vld [vmem:[#allocation183_spill] sm:$0xff]  ;;  %v16051_v20 = vld [vmem:[#allocation182_spill] sm:$0xff]  ;;  %v13843_v40 = vmul.f32 %v13003_v9, %v16057_v35  ;;  %v16062_v9 = vld [vmem:[#allocation168_spill] sm:$0xff] }
 0x3ba   :  { %v13815_v15 = vmul.f32 %v13157_v52, %v16050_v54  ;;  %v13819_v55 = vmul.f32 %v13163_v44, %v16051_v20  ;;  %16053 = vst [vmem:[#allocation91_spill] sm:$0xff] %v13823_v11  ;;  %v16055_v52 = vld [vmem:[#allocation201_spill] sm:$0xff]  ;;  %v16065_v51 = vld [vmem:[#allocation220_spill] sm:$0xff] }
 0x3bb   :  { %v13835_v54 = vmul.f32 %v12967_v23, %v16055_v52  ;;  %v13853_v23 = vmul.f32 %v13075_v31, %v16059_v16  ;;  %v16060_v52 = vld [vmem:[#allocation215_spill] sm:$0xff]  ;;  %v16061_v20 = vld [vmem:[#allocation221_spill] sm:$0xff]  ;;  %v13871_v31 = vmul.f32 %v13115_v50, %v16065_v51 }
 0x3bc   :  { %v13857_v44 = vmul.f32 %v13049_v12, %v16060_v52  ;;  %v13861_v11 = vmul.f32 %v13058_v59, %v16061_v20  ;;  %v16063_v35 = vld [vmem:[#allocation181_spill] sm:$0xff]  ;;  %v16069_v20 = vld [vmem:[#allocation100_spill] sm:$0xff] }
 0x3bd   :  { %v16064_v38 = vpack.c.bf16 %v16062_v9, %v16063_v35  ;;  %v16066_v16 = vld [vmem:[#allocation225_spill] sm:$0xff]  ;;  %7997 = vmatmul.mubr.msk.bf16.gmra.mrb[104].mxu1 %vm902_vm2, %v16069_v20  ;;  %v16070_v9 = vld [vmem:[#allocation144_spill] sm:$0xff] }
 0x3be   :  { %v13875_v12 = vmul.f32 %v13136_v30, %v16066_v16  ;;  %v16068_v52 = vld [vmem:[#allocation153_spill] sm:$0xff]  ;;  %v16074_v30 = vld [vmem:[#allocation238_spill] sm:$0xff]  ;;  %6896 = vmatprep.mubr.bf16.mxu1 %v15875_v58 }
 0x3bf   :  { %8884 = vmatmul.mubr.msk.bf16.gmra.mrb[60].mxu0 %vm902_vm2, %v16064_v38  ;;  %v13879_v59 = vmul.f32 %v13103_v53, %v16068_v52  ;;  %v16071_v38 = vld [vmem:[#allocation195_spill] sm:$0xff]  ;;  %v16073_v51 = vld [vmem:[#allocation233_spill] sm:$0xff]  ;;  %v13895_v16 = vmul.f32 %v16008_v45, %v16074_v30  ;;  %v13918_v53 = vmul.f32 %v13417_v34, %v16080_v60  ;;  %v16081_v52 = vld [vmem:[#allocation258_spill] sm:$0xff] }
 0x3c0   :  { %16067 = vst [vmem:[#allocation232_spill] sm:$0xff] %v13875_v12  ;;  %v16072_v35 = vpack.c.bf16 %v16070_v9, %v16071_v38  ;;  %v13891_v27 = vmul.f32 %v13129_v17, %v16073_v51  ;;  %v16075_v20 = vld [vmem:[#allocation237_spill] sm:$0xff]  ;;  %v16076_v9 = vld [vmem:[#allocation74_spill] sm:$0xff]  ;;  %v13922_v12 = vmul.f32 %v13409_v43, %v16081_v52 }
 0x3c1   :  { %v13904_v38 = vmul.f32 %v16076_v9, %v16075_v20  ;;  %v16078_v51 = vld [vmem:[#allocation105_spill] sm:$0xff]  ;;  %v16089_v43 = vld [vmem:[#allocation70_spill] sm:$0xff] }
 0x3c2   :  { %8891 = vmatprep.mubr.msk.bf16.mxu0 %vm902_vm2, %v16072_v35  ;;  %v16077_v35 = vld [vmem:[#allocation250_spill] sm:$0xff]  ;;  %v16079_v30 = vld [vmem:[#allocation249_spill] sm:$0xff]  ;;  %v13962_v20 = vmul.f32 %v13284_v8, %v16089_v43  ;;  %v16093_v8 = vld [vmem:[#allocation255_spill] sm:$0xff] }
 0x3c3   :  { %v13908_v17 = vmul.f32 %v13379_v36, %v16077_v35  ;;  %v13914_v50 = vmul.f32 %v13371_v33, %v16079_v30  ;;  %v16082_v36 = vld [vmem:[#allocation213_spill] sm:$0xff]  ;;  %v16083_v35 = vld [vmem:[#allocation199_spill] sm:$0xff]  ;;  %v16084_v33 = vld [vmem:[#allocation160_spill] sm:$0xff] }
 0x3c4   :  { %v13928_v9 = vmul.f32 %v13441_v41, %v16082_v36  ;;  %v13932_v45 = vmul.f32 %v13433_v13, %v16083_v35  ;;  %v13936_v30 = vmul.f32 %v13468_v26, %v16084_v33  ;;  %v16085_v60 = vld [vmem:[#allocation121_spill] sm:$0xff]  ;;  %v16086_v41 = vld [vmem:[#allocation268_spill] sm:$0xff]  ;;  %v16087_v35 = vld [vmem:[#allocation267_spill] sm:$0xff] }
 0x3c5   :  { %v13944_v52 = vmul.f32 %v13460_v18, %v16085_v60  ;;  %v13948_v36 = vmul.f32 %v13494_v48, %v16086_v41  ;;  %v13954_v26 = vmul.f32 %v13480_v32, %v16087_v35  ;;  %v16088_v33 = vld [vmem:[#allocation115_spill] sm:$0xff]  ;;  %v9582_v18 = vld [vmem:[%s14484_s12 + $0x38] sm:$0xff]   ;;  %7998 = vmatmul.mubr.msk.bf16.gmra.mrb[108].mxu1 %vm902_vm2, %v16093_v8 }
 0x3c6   :  { %v13958_v34 = vmul.f32 %v16029_v0, %v16088_v33  ;;  %v16090_v60 = vld [vmem:[#allocation204_spill] sm:$0xff]  ;;  %v16091_v41 = vld [vmem:[#allocation143_spill] sm:$0xff]  ;;  %6906 = vmatprep.mubr.bf16.mxu1 %v15875_v58 }
 0x3c7   :  { %v16092_v13 = vpack.c.bf16 %v16090_v60, %v16091_v41  ;;  %v16094_v43 = vld [vmem:[#allocation175_spill] sm:$0xff]  ;;  %v16095_v35 = vld [vmem:[#allocation236_spill] sm:$0xff]  ;;  %v16097_v60 = vld [vmem:[#allocation270_spill] sm:$0xff] }
 0x3c8   :  { %v16096_v33 = vpack.c.bf16 %v16094_v43, %v16095_v35  ;;  %v16098_v41 = vld [vmem:[#allocation253_spill] sm:$0xff]  ;;  %v16100_v8 = vld [vmem:[#allocation103_spill] sm:$0xff]  ;;  %v16101_v43 = vld [vmem:[#allocation272_spill] sm:$0xff] }
 0x3c9   :  { %8892 = vmatmul.mubr.msk.bf16.vlgmr.msra.gmra.mrb[48].mxu0 %vm902_vm2, %v16092_v13  ;;  %v9589_v13 = vld [vmem:[%s14484_s12 + $0x40] sm:$0xff]   ;;  %v16099_v0 = vpack.c.bf16 %v16097_v60, %v16098_v41  ;;  %v16105_v32 = vld [vmem:[#allocation271_spill] sm:$0xff]  ;;  %v16109_v60 = vpack.c.bf16 %v13498_v4, %v13505_v63  ;;  %v16115_v4 = vld [vmem:[#allocation162_spill] sm:$0xff] }
 0x3ca   :  { %8895 = vmatprep.mubr.msk.bf16.mxu0 %vm902_vm2, %v16096_v33  ;;  %8908 = vmatpush3.bf16.msra.mxu0 %v13564_v5  ;;  %v16102_v35 = vld [vmem:[#allocation269_spill] sm:$0xff]  ;;  %v16104_v33 = vld [vmem:[#allocation122_spill] sm:$0xff] }
 0x3cb   :  { %8909 = vmatprep.subr.bf16.mxu0 %v9582_v18  ;;  %v16103_v5 = vpack.c.bf16 %v16101_v43, %v16102_v35  ;;  %v16106_v48 = vpack.c.bf16 %v16104_v33, %v16105_v32  ;;  %v16110_v41 = vld [vmem:[#allocation133_spill] sm:$0xff]  ;;  %v16116_v63 = vld [vmem:[#allocation226_spill] sm:$0xff]  ;;  %v16117_v43 = vld [vmem:[#allocation123_spill] sm:$0xff] }
 0x3cc   :  { %v16113_v32 = vld [vmem:[#allocation257_spill] sm:$0xff]  ;;  %v16118_v35 = vpack.c.bf16 %v16116_v63, %v16117_v43  ;;  %v16133_v63 = vld [vmem:[#allocation234_spill] sm:$0xff] }
 0x3cd   :  { %7999 = vmatmul.mubr.msk.bf16.gmra.mrb[112].mxu1 %vm902_vm2, %v16100_v8 }
 0x3ce   :  { %8910 = vmatpush3.bf16.msra.mxu0 %v9582_v18  ;;  %6916 = vmatprep.mubr.bf16.mxu1 %v15875_v58  ;;  %v16107_v18 = vld [vmem:[#allocation96_spill] sm:$0xff] }
 0x3cf   :  { %8927 = vmatprep.subr.bf16.mxu0 %v9589_v13 }
 0x3d1   :  { %8896 = vmatmul.mubr.msk.bf16.gmra.mrb[52].mxu0 %vm902_vm2, %v16099_v0  ;;  %v16108_v0 = vpack.c.bf16 %v13472_v61, %v13486_v49  ;;  %v9590_v49 = vld [vmem:[%s14484_s12 + $0x48] sm:$0xff]  }
 0x3d2   :  { %8899 = vmatprep.mubr.msk.bf16.mxu0 %vm902_vm2, %v16103_v5  ;;  %v16112_v61 = vld [vmem:[#allocation118_spill] sm:$0xff]  ;;  %v16120_v5 = vld [vmem:[#allocation151_spill] sm:$0xff] }
 0x3d3   :  { %v16114_v8 = vpack.c.bf16 %v16112_v61, %v16113_v32  ;;  %v16129_v61 = vld [vmem:[#allocation142_spill] sm:$0xff]  ;;  %v16130_v32 = vld [vmem:[#allocation141_spill] sm:$0xff] }
 0x3d5   :  { %8000 = vmatmul.mubr.msk.bf16.gmra.mrb[116].mxu1 %vm902_vm2, %v16107_v18  ;;  %v16122_v18 = vld [vmem:[#allocation244_spill] sm:$0xff] }
 0x3d6   :  { %7003 = vmatprep.mubr.bf16.mxu1 %v15875_v58 }
 0x3d9   :  { %8900 = vmatmul.mubr.msk.bf16.gmra.mrb[56].mxu0 %vm902_vm2, %v16106_v48  ;;  %v16111_v48 = vpack.c.bf16 %v13513_v6, %v13509_v19  ;;  %v9591_v19 = vld [vmem:[%s14484_s12 + $0x50] sm:$0xff]   ;;  %v16119_v6 = vld [vmem:[#allocation130_spill] sm:$0xff] }
 0x3da   :  { %8903 = vmatprep.mubr.msk.bf16.mxu0 %vm902_vm2, %v16108_v0  ;;  %v16121_v33 = vpack.c.bf16 %v16119_v6, %v16120_v5  ;;  %v16123_v0 = vld [vmem:[#allocation265_spill] sm:$0xff]  ;;  %v16137_v6 = vld [vmem:[#allocation164_spill] sm:$0xff] }
 0x3dd   :  { %8005 = vmatmul.mubr.msk.bf16.vlgmr.msra.gmra.mrb[88].mxu1 %vm902_vm2, %v16110_v41  ;;  %v16126_v41 = vld [vmem:[#allocation186_spill] sm:$0xff] }
 0x3de   :  { %7013 = vmatprep.mubr.bf16.mxu1 %v15875_v58 }
 0x3e1   :  { %8904 = vmatmul.mubr.msk.bf16.gmra.mrb[60].mxu0 %vm902_vm2, %v16109_v60  ;;  %v16124_v60 = vld [vmem:[#allocation132_spill] sm:$0xff] }
 0x3e2   :  { %8911 = vmatprep.mubr.msk.bf16.mxu0 %vm902_vm2, %v16111_v48  ;;  %v16127_v48 = vpack.c.bf16 %v13572_v10, %v16126_v41  ;;  %v16136_v10 = vld [vmem:[#allocation230_spill] sm:$0xff]  ;;  %v16143_v41 = vld [vmem:[#allocation147_spill] sm:$0xff] }
 0x3e3   :  { %v16138_v5 = vpack.c.bf16 %v16136_v10, %v16137_v6  ;;  %v16153_v10 = vld [vmem:[#allocation176_spill] sm:$0xff]  ;;  %v16154_v6 = vld [vmem:[#allocation167_spill] sm:$0xff] }
 0x3e5   :  { %8006 = vmatmul.mubr.msk.bf16.gmra.mrb[92].mxu1 %vm902_vm2, %v16115_v4  ;;  %v16132_v4 = vld [vmem:[#allocation193_spill] sm:$0xff] }
 0x3e6   :  { %7023 = vmatprep.mubr.bf16.mxu1 %v15875_v58  ;;  %v16134_v43 = vpack.c.bf16 %v16132_v4, %v16133_v63  ;;  %v16149_v63 = vld [vmem:[#allocation95_spill] sm:$0xff] }
 0x3e9   :  { %8912 = vmatmul.mubr.msk.bf16.vlgmr.msra.gmra.mrb[48].mxu0 %vm902_vm2, %v16114_v8  ;;  %v16131_v8 = vpack.c.bf16 %v16129_v61, %v16130_v32  ;;  %v9593_v61 = vld [vmem:[%s14484_s12 + $0x60] sm:$0xff]   ;;  %v16146_v32 = vld [vmem:[#allocation158_spill] sm:$0xff] }
 0x3ea   :  { %8915 = vmatprep.mubr.msk.bf16.mxu0 %vm902_vm2, %v16118_v35  ;;  %8928 = vmatpush3.bf16.msra.mxu0 %v9589_v13  ;;  %v16125_v13 = vpack.c.bf16 %v16123_v0, %v16124_v60  ;;  %v16135_v35 = vld [vmem:[#allocation247_spill] sm:$0xff]  ;;  %v16140_v0 = vld [vmem:[#allocation241_spill] sm:$0xff] }
 0x3eb   :  { %8929 = vmatprep.subr.bf16.mxu0 %v9590_v49 }
 0x3ed   :  { %8007 = vmatmul.mubr.msk.bf16.gmra.mrb[96].mxu1 %vm902_vm2, %v16122_v18  ;;  %v16139_v18 = vld [vmem:[#allocation99_spill] sm:$0xff] }
 0x3ee   :  { %8930 = vmatpush3.bf16.msra.mxu0 %v9590_v49  ;;  %7033 = vmatprep.mubr.bf16.mxu1 %v15875_v58  ;;  %v16128_v49 = vld [vmem:[#allocation248_spill] sm:$0xff]  ;;  %v16141_v60 = vpack.c.bf16 %v16139_v18, %v16140_v0  ;;  %v16157_v18 = vld [vmem:[#allocation150_spill] sm:$0xff]  ;;  %v16158_v0 = vld [vmem:[#allocation177_spill] sm:$0xff] }
 0x3ef   :  { %8947 = vmatprep.subr.bf16.mxu0 %v9591_v19 }
 0x3f1   :  { %8916 = vmatmul.mubr.msk.bf16.gmra.mrb[52].mxu0 %vm902_vm2, %v16121_v33  ;;  %v9592_v33 = vld [vmem:[%s14484_s12 + $0x58] sm:$0xff]  }
 0x3f2   :  { %8919 = vmatprep.mubr.msk.bf16.mxu0 %vm902_vm2, %v16125_v13  ;;  %v16142_v13 = vld [vmem:[#allocation149_spill] sm:$0xff] }
 0x3f5   :  { %8008 = vmatmul.mubr.msk.bf16.gmra.mrb[100].mxu1 %vm902_vm2, %v16128_v49 }
 0x3f6   :  { %7043 = vmatprep.mubr.bf16.mxu1 %v15875_v58 }
 0x3f9   :  { %8920 = vmatmul.mubr.msk.bf16.gmra.mrb[56].mxu0 %vm902_vm2, %v16127_v48  ;;  %v16144_v48 = vld [vmem:[#allocation231_spill] sm:$0xff] }
 0x3fa   :  { %8923 = vmatprep.mubr.msk.bf16.mxu0 %vm902_vm2, %v16131_v8  ;;  %v16145_v49 = vpack.c.bf16 %v16143_v41, %v16144_v48  ;;  %v16147_v8 = vld [vmem:[#allocation148_spill] sm:$0xff]  ;;  %v16161_v41 = vld [vmem:[#allocation187_spill] sm:$0xff] }
 0x3fb   :  { %v16148_v4 = vpack.c.bf16 %v16146_v32, %v16147_v8  ;;  %v9601_v32 = vld [vmem:[%s14488_s16 + $0x4] ss:$8 sps:$4 sm:$0xff]  }
 0x3fc   :  { %v16163_v8 = vld [vmem:[#allocation197_spill] sm:$0xff]  ;;  %7140 = vmatprep.subr.bf16.mxu1 %v9601_v32  ;;  %v16176_v32 = vld [vmem:[#allocation275_spill] sm:$0xff] }
 0x3fd   :  { %8009 = vmatmul.mubr.msk.bf16.gmra.mrb[104].mxu1 %vm902_vm2, %v16135_v35  ;;  %v16151_v35 = vld [vmem:[#allocation159_spill] sm:$0xff] }
 0x3fe   :  { %7053 = vmatprep.mubr.bf16.mxu1 %v15875_v58 }
 0x401   :  { %8924 = vmatmul.mubr.msk.bf16.gmra.mrb[60].mxu0 %vm902_vm2, %v16134_v43  ;;  %v16150_v43 = vld [vmem:[#allocation166_spill] sm:$0xff] }
 0x402   :  { %8931 = vmatprep.mubr.msk.bf16.mxu0 %vm902_vm2, %v16138_v5  ;;  %v16155_v5 = vpack.c.bf16 %v16153_v10, %v16154_v6  ;;  %v16166_v10 = vld [vmem:[#allocation266_spill] sm:$0xff]  ;;  %v16167_v6 = vld [vmem:[#allocation211_spill] sm:$0xff] }
 0x405   :  { %8010 = vmatmul.mubr.msk.bf16.gmra.mrb[108].mxu1 %vm902_vm2, %v16142_v13  ;;  %v16160_v13 = vld [vmem:[#allocation152_spill] sm:$0xff] }
 0x406   :  { %7063 = vmatprep.mubr.bf16.mxu1 %v15875_v58  ;;  %v16162_v48 = vpack.c.bf16 %v16160_v13, %v16161_v41  ;;  %v16172_v13 = vld [vmem:[#allocation277_spill] sm:$0xff]  ;;  %v16173_v41 = vld [vmem:[#allocation136_spill] sm:$0xff] }
 0x409   :  { %8932 = vmatmul.mubr.msk.bf16.vlgmr.msra.gmra.mrb[48].mxu0 %vm902_vm2, %v16141_v60  ;;  %v16159_v60 = vpack.c.bf16 %v16157_v18, %v16158_v0  ;;  %v16170_v18 = vld [vmem:[#allocation170_spill] sm:$0xff] }
 0x40a   :  { %8935 = vmatprep.mubr.msk.bf16.mxu0 %vm902_vm2, %v16145_v49  ;;  %8948 = vmatpush3.bf16.msra.mxu0 %v9591_v19  ;;  %v16152_v19 = vpack.c.bf16 %v16150_v43, %v16151_v35  ;;  %v9599_v49 = vld [vmem:[%s14488_s16] ss:$8 sps:$4 sm:$0xff]   ;;  %v9604_v43 = vld [vmem:[%s14488_s16 + $0x14] ss:$8 sps:$4 sm:$0xff]   ;;  %v9602_v35 = vld [vmem:[%s14488_s16 + $0x10] ss:$8 sps:$4 sm:$0xff]  }
 0x40b   :  { %8949 = vmatprep.subr.bf16.mxu0 %v9592_v33  ;;  %7141 = vmatpush1.bf16.msra.mxu1 %v9599_v49  ;;  %v16175_v49 = vld [vmem:[#allocation185_spill] sm:$0xff] }
 0x40c   :  { %7142 = vmatprep.subr.bf16.mxu1 %v9604_v43  ;;  %v16181_v43 = vpack.c.bf16 %v13740_v46, %v13734_v22  ;;  %v9597_v22 = vld [vmem:[%s14484_s12 + $0x80] sm:$0xff]   ;;  %v16187_v46 = vpack.c.bf16 %v13780_v14, %v13766_v37  ;;  %v16193_v37 = vld [vmem:[#allocation91_spill] sm:$0xff] }
 0x40d   :  { %8011 = vmatmul.mubr.msk.bf16.gmra.mrb[112].mxu1 %vm902_vm2, %v16149_v63 }
 0x40e   :  { %8950 = vmatpush3.bf16.msra.mxu0 %v9592_v33  ;;  %7073 = vmatprep.mubr.bf16.mxu1 %v15875_v58  ;;  %v16156_v33 = vld [vmem:[#allocation69_spill] sm:$0xff] }
 0x40f   :  { %8967 = vmatprep.subr.bf16.mxu0 %v9593_v61  ;;  %7143 = vmatpush1.bf16.msra.mxu1 %v9602_v35  ;;  %v16182_v35 = vpack.c.bf16 %v13748_v39, %v13744_v7  ;;  %v16188_v39 = vpack.c.bf16 %v13791_v21, %v13787_v42  ;;  %v16190_v7 = vpack.c.bf16 %v13809_v47, %v13805_v62  ;;  %v9598_v62 = vld [vmem:[%s14484_s12 + $0x88] sm:$0xff]   ;;  %v16195_v47 = vld [vmem:[#allocation108_spill] sm:$0xff] }
 0x411   :  { %8936 = vmatmul.mubr.msk.bf16.gmra.mrb[52].mxu0 %vm902_vm2, %v16148_v4  ;;  %v16164_v4 = vld [vmem:[#allocation196_spill] sm:$0xff] }
 0x412   :  { %8939 = vmatprep.mubr.msk.bf16.mxu0 %vm902_vm2, %v16152_v19  ;;  %v16165_v63 = vpack.c.bf16 %v16163_v8, %v16164_v4  ;;  %v9594_v19 = vld [vmem:[%s14484_s12 + $0x68] sm:$0xff]   ;;  %v16177_v8 = vpack.c.bf16 %v16175_v49, %v16176_v32  ;;  %v16178_v4 = vld [vmem:[#allocation276_spill] sm:$0xff] }
 0x415   :  { %8012 = vmatmul.mubr.msk.bf16.gmra.mrb[116].mxu1 %vm902_vm2, %v16156_v33  ;;  %v16169_v33 = vld [vmem:[#allocation169_spill] sm:$0xff] }
 0x416   :  { %7172 = vmatprep.mubr.bf16.mxu1 %v15875_v58  ;;  %v16171_v0 = vpack.c.bf16 %v16169_v33, %v16170_v18 }
 0x419   :  { %8940 = vmatmul.mubr.msk.bf16.gmra.mrb[56].mxu0 %vm902_vm2, %v16155_v5  ;;  %v16168_v5 = vpack.c.bf16 %v16166_v10, %v16167_v6  ;;  %v16184_v10 = vld [vmem:[#allocation112_spill] sm:$0xff] }
 0x41a   :  { %8943 = vmatprep.mubr.msk.bf16.mxu0 %vm902_vm2, %v16159_v60  ;;  %v9595_v60 = vld [vmem:[%s14484_s12 + $0x70] sm:$0xff]  }
 0x421   :  { %8944 = vmatmul.mubr.msk.bf16.gmra.mrb[60].mxu0 %vm902_vm2, %v16162_v48  ;;  %v16174_v48 = vpack.c.bf16 %v16172_v13, %v16173_v41  ;;  %v16199_v13 = vpack.c.bf16 %v13847_v2, %v13843_v40  ;;  %v16202_v41 = vld [vmem:[#allocation232_spill] sm:$0xff]  ;;  %v16204_v40 = vpack.c.bf16 %v16078_v51, %v13891_v27  ;;  %v16205_v2 = vpack.c.bf16 %v13904_v38, %v13895_v16 }
 0x422   :  { %8951 = vmatprep.mubr.msk.bf16.mxu0 %vm902_vm2, %v16165_v63  ;;  %v16180_v63 = vpack.c.bf16 %v13730_v56, %v13722_v29  ;;  %v16186_v29 = vpack.c.bf16 %v13762_v28, %v13758_v3  ;;  %v16189_v56 = vpack.c.bf16 %v13801_v24, %v13795_v25  ;;  %v16191_v3 = vpack.c.bf16 %v13819_v55, %v13815_v15  ;;  %v16192_v28 = vld [vmem:[#allocation107_spill] sm:$0xff] }
 0x423   :  { %v16194_v14 = vpack.c.bf16 %v16192_v28, %v16193_v37  ;;  %v16198_v15 = vpack.c.bf16 %v13835_v54, %v13831_v57  ;;  %v16200_v57 = vpack.c.bf16 %v13857_v44, %v13853_v23  ;;  %v16201_v54 = vpack.c.bf16 %v13871_v31, %v13861_v11  ;;  %v16206_v44 = vld [vmem:[#allocation208_spill] sm:$0xff]  ;;  %v16207_v23 = vld [vmem:[#allocation117_spill] sm:$0xff] }
 0x424   :  { %v16208_v11 = vpack.c.bf16 %v16206_v44, %v16207_v23  ;;  %v16209_v31 = vpack.c.bf16 %v13914_v50, %v13908_v17  ;;  %v16210_v27 = vpack.c.bf16 %v13922_v12, %v13918_v53  ;;  %v16212_v16 = vpack.c.bf16 %v13944_v52, %v13936_v30  ;;  %v14284_v53 = vld [vmem:[%s14485_s13] ss:$0 sm:$0xff] }
 0x425   :  { %v16213_v50 = vpack.c.bf16 %v13954_v26, %v13948_v36  ;;  %v16214_v12 = vpack.c.bf16 %v13962_v20, %v13958_v34 }
 0x429   :  { %8952 = vmatmul.mubr.msk.bf16.vlgmr.msra.gmra.mrb[48].mxu0 %vm902_vm2, %v16168_v5  ;;  %v16196_v5 = vld [vmem:[#allocation111_spill] sm:$0xff] }
 0x42a   :  { %8955 = vmatprep.mubr.msk.bf16.mxu0 %vm902_vm2, %v16171_v0  ;;  %8968 = vmatpush3.bf16.msra.mxu0 %v9593_v61  ;;  %v16179_v61 = vpack.c.bf16 %v13718_v1, %v16178_v4  ;;  %v9596_v1 = vld [vmem:[%s14484_s12 + $0x78] sm:$0xff]   ;;  %v16197_v55 = vpack.c.bf16 %v16195_v47, %v16196_v5 }
 0x42b   :  { %8969 = vmatprep.subr.bf16.mxu0 %v9594_v19 }
 0x42e   :  { %8970 = vmatpush3.bf16.msra.mxu0 %v9594_v19  ;;  %v16183_v19 = vld [vmem:[#allocation124_spill] sm:$0xff] }
 0x42f   :  { %8987 = vmatprep.subr.bf16.mxu0 %v9595_v60  ;;  %v16185_v6 = vpack.c.bf16 %v16183_v19, %v16184_v10 }
 0x431   :  { %8956 = vmatmul.mubr.msk.bf16.gmra.mrb[52].mxu0 %vm902_vm2, %v16174_v48  ;;  %v16203_v48 = vpack.c.bf16 %v13879_v59, %v16202_v41  ;;  %v16211_v59 = vpack.c.bf16 %v13932_v45, %v13928_v9 }
 0x432   :  { %8959 = vmatprep.mubr.msk.bf16.mxu0 %vm902_vm2, %v16177_v8 }
 0x439   :  { %8960 = vmatmul.mubr.msk.bf16.gmra.mrb[56].mxu0 %vm902_vm2, %v16179_v61 }
 0x43a   :  { %8963 = vmatprep.mubr.msk.bf16.mxu0 %vm902_vm2, %v16180_v63 }
 0x441   :  { %8964 = vmatmul.mubr.msk.bf16.gmra.mrb[60].mxu0 %vm902_vm2, %v16181_v43 }
 0x442   :  { %8971 = vmatprep.mubr.msk.bf16.mxu0 %vm902_vm2, %v16182_v35 }
 0x449   :  { %8972 = vmatmul.mubr.msk.bf16.vlgmr.msra.gmra.mrb[48].mxu0 %vm902_vm2, %v16185_v6 }
 0x44a   :  { %8975 = vmatprep.mubr.msk.bf16.mxu0 %vm902_vm2, %v16186_v29  ;;  %8988 = vmatpush3.bf16.msra.mxu0 %v9595_v60 }
 0x44b   :  { %8989 = vmatprep.subr.bf16.mxu0 %v9596_v1 }
 0x44e   :  { %8990 = vmatpush3.bf16.msra.mxu0 %v9596_v1 }
 0x44f   :  { %9007 = vmatprep.subr.bf16.mxu0 %v9597_v22 }
 0x450   :  { %v8861_v42 = vpop.f32.mrb[80].mxu1 }
 0x451   :  { %8976 = vmatmul.mubr.msk.bf16.gmra.mrb[52].mxu0 %vm902_vm2, %v16187_v46  ;;  %v5265_v21 = vpop.f32.mrb[81].mxu1 }
 0x452   :  { %8979 = vmatprep.mubr.msk.bf16.mxu0 %vm902_vm2, %v16188_v39  ;;  %v14206_v24 = vpop.f32.mrb[82].mxu1 }
 0x453   :  { %v14211_v25 = vpop.f32.mrb[83].mxu1 }
 0x458   :  { %v14221_v33 = vpop.f32.mrb[84].mxu1 }
 0x459   :  { %8980 = vmatmul.mubr.msk.bf16.gmra.mrb[56].mxu0 %vm902_vm2, %v16189_v56  ;;  %v14223_v18 = vpop.f32.mrb[85].mxu1 }
 0x45a   :  { %8983 = vmatprep.mubr.msk.bf16.mxu0 %vm902_vm2, %v16190_v7  ;;  %v14225_v0 = vpop.f32.mrb[86].mxu1 }
 0x45b   :  { %v14227_v60 = vpop.f32.mrb[87].mxu1 }
 0x461   :  { %8984 = vmatmul.mubr.msk.bf16.gmra.mrb[60].mxu0 %vm902_vm2, %v16191_v3 }
 0x462   :  { %8991 = vmatprep.mubr.msk.bf16.mxu0 %vm902_vm2, %v16194_v14 }
 0x469   :  { %8992 = vmatmul.mubr.msk.bf16.vlgmr.msra.gmra.mrb[48].mxu0 %vm902_vm2, %v16197_v55 }
 0x46a   :  { %8995 = vmatprep.mubr.msk.bf16.mxu0 %vm902_vm2, %v16198_v15  ;;  %9008 = vmatpush3.bf16.msra.mxu0 %v9597_v22 }
 0x46b   :  { %9009 = vmatprep.subr.bf16.mxu0 %v9598_v62 }
 0x46e   :  { %9010 = vmatpush3.bf16.msra.mxu0 %v9598_v62 }
 0x471   :  { %8996 = vmatmul.mubr.msk.bf16.gmra.mrb[52].mxu0 %vm902_vm2, %v16199_v13 }
 0x472   :  { %8999 = vmatprep.mubr.msk.bf16.mxu0 %vm902_vm2, %v16200_v57 }
 0x479   :  { %9000 = vmatmul.mubr.msk.bf16.gmra.mrb[56].mxu0 %vm902_vm2, %v16201_v54 }
 0x47a   :  { %9003 = vmatprep.mubr.msk.bf16.mxu0 %vm902_vm2, %v16203_v48 }
 0x481   :  { %9004 = vmatmul.mubr.msk.bf16.gmra.mrb[60].mxu0 %vm902_vm2, %v16204_v40 }
 0x482   :  { %9011 = vmatprep.mubr.msk.bf16.mxu0 %vm902_vm2, %v16205_v2 }
 0x489   :  { %9012 = vmatmul.mubr.msk.bf16.vlgmr.msra.gmra.mrb[48].mxu0 %vm902_vm2, %v16208_v11 }
 0x48a   :  { %9015 = vmatprep.mubr.msk.bf16.mxu0 %vm902_vm2, %v16209_v31 }
 0x491   :  { %9016 = vmatmul.mubr.msk.bf16.gmra.mrb[52].mxu0 %vm902_vm2, %v16210_v27 }
 0x492   :  { %9019 = vmatprep.mubr.msk.bf16.mxu0 %vm902_vm2, %v16211_v59 }
 0x499   :  { %9020 = vmatmul.mubr.msk.bf16.gmra.mrb[56].mxu0 %vm902_vm2, %v16212_v16 }
 0x49a   :  { %9023 = vmatprep.mubr.msk.bf16.mxu0 %vm902_vm2, %v16213_v50 }
 0x4a1   :  { %9024 = vmatmul.mubr.msk.bf16.gmra.mrb[60].mxu0 %vm902_vm2, %v16214_v12 }
 0x55c   :  { %v9013_v38 = vpop.f32.mrb[48].mxu0 }
 0x55d   :  { %v6716_v17 = vadd.f32 %v9013_v38, %v14284_v53  ;;  %v6628_v51 = vpop.f32.mrb[49].mxu0 }
 0x55e   :  { %v6714_v45 = vadd.f32 %v14284_v53, %v6628_v51  ;;  %v9014_v9 = vpop.f32.mrb[50].mxu0 }
 0x55f   :  { %v6717_v30 = vadd.f32 %v9014_v9, %v14284_v53  ;;  %v6631_v52 = vpop.f32.mrb[51].mxu0  ;;  %v6732_v20 = vmax.f32 %v6716_v17, 0.0 }
 0x560   :  { %v6715_v36 = vadd.f32 %v14284_v53, %v6631_v52  ;;  %v6730_v26 = vmax.f32 %v6714_v45, 0.0 }
 0x561   :  { %v6733_v34 = vmax.f32 %v6717_v30, 0.0 }
 0x562   :  { %v6731_v49 = vmax.f32 %v6715_v36, 0.0 }
 0x563   :  { %v7085_v32 = vpack.c.bf16 %v6733_v34, %v6732_v20 }
 0x564   :  { %v7084_v8 = vpack.c.bf16 %v6731_v49, %v6730_v26  ;;  %v9017_v4 = vpop.f32.mrb[52].mxu0  ;;  %v9606_v49 = vld [vmem:[%s15024_s25] sm:$0xff] }
 0x565   :  { %v6720_v61 = vadd.f32 %v9017_v4, %v14284_v53  ;;  %v6644_v63 = vpop.f32.mrb[53].mxu0 }
 0x566   :  { %v6718_v43 = vadd.f32 %v14284_v53, %v6644_v63  ;;  %v9018_v35 = vpop.f32.mrb[54].mxu0  ;;  %8017 = vmatmul.mubr.msk.bf16.vlgmr.msra.gmra.mrb[88].mxu1 %vm902_vm2, %v7084_v8 }
 0x567   :  { %v6721_v1 = vadd.f32 %v9018_v35, %v14284_v53  ;;  %v6647_v19 = vpop.f32.mrb[55].mxu0  ;;  %7182 = vmatprep.mubr.bf16.mxu1 %v15875_v58  ;;  %v6736_v6 = vmax.f32 %v6720_v61, 0.0  ;;  %v9607_v61 = vld [vmem:[%s15024_s25 + $0x8] sm:$0xff] }
 0x568   :  { %v6719_v10 = vadd.f32 %v14284_v53, %v6647_v19  ;;  %v6734_v22 = vmax.f32 %v6718_v43, 0.0 }
 0x569   :  { %v6737_v29 = vmax.f32 %v6721_v1, 0.0  ;;  %v9608_v1 = vld [vmem:[%s15024_s25 + $0x10] sm:$0xff] }
 0x56a   :  { %v6735_v46 = vmax.f32 %v6719_v10, 0.0 }
 0x56b   :  { %v7087_v39 = vpack.c.bf16 %v6737_v29, %v6736_v6  ;;  %v9609_v6 = vld [vmem:[%s15024_s25 + $0x18] sm:$0xff] }
 0x56c   :  { %v7086_v56 = vpack.c.bf16 %v6735_v46, %v6734_v22  ;;  %v9021_v7 = vpop.f32.mrb[56].mxu0 }
 0x56d   :  { %v9031_v3 = vadd.f32 %v9021_v7, %v8861_v42  ;;  %v6660_v28 = vpop.f32.mrb[57].mxu0 }
 0x56e   :  { %v9032_v37 = vadd.f32 %v6660_v28, %v5265_v21  ;;  %v9022_v14 = vpop.f32.mrb[58].mxu0  ;;  %8018 = vmatmul.mubr.msk.bf16.gmra.mrb[92].mxu1 %vm902_vm2, %v7085_v32 }
 0x56f   :  { %v6724_v62 = vadd.f32 %v9031_v3, %v14284_v53  ;;  %v9033_v47 = vadd.f32 %v9022_v14, %v14206_v24  ;;  %v6663_v5 = vpop.f32.mrb[59].mxu0  ;;  %7192 = vmatprep.mubr.bf16.mxu1 %v15875_v58 }
 0x570   :  { %v6722_v55 = vadd.f32 %v9032_v37, %v14284_v53  ;;  %v9034_v15 = vadd.f32 %v6663_v5, %v14211_v25  ;;  %v9610_v37 = vld [vmem:[%s15024_s25 + $0x20] sm:$0xff]  ;;  %v9611_v5 = vld [vmem:[%s15024_s25 + $0x28] sm:$0xff] }
 0x571   :  { %v6725_v13 = vadd.f32 %v9033_v47, %v14284_v53  ;;  %v6740_v57 = vmax.f32 %v6724_v62, 0.0 }
 0x572   :  { %v6723_v42 = vadd.f32 %v9034_v15, %v14284_v53  ;;  %v6738_v54 = vmax.f32 %v6722_v55, 0.0 }
 0x573   :  { %v6741_v21 = vmax.f32 %v6725_v13, 0.0 }
 0x574   :  { %v6739_v41 = vmax.f32 %v6723_v42, 0.0  ;;  %v9025_v48 = vpop.f32.mrb[60].mxu0  ;;  %v9612_v42 = vld [vmem:[%s15024_s25 + $0x30] sm:$0xff] }
 0x575   :  { %v7089_v40 = vpack.c.bf16 %v6741_v21, %v6740_v57  ;;  %v9035_v2 = vadd.f32 %v9025_v48, %v14221_v33  ;;  %v6676_v24 = vpop.f32.mrb[61].mxu0 }
 0x576   :  { %v7088_v44 = vpack.c.bf16 %v6739_v41, %v6738_v54  ;;  %v9036_v23 = vadd.f32 %v6676_v24, %v14223_v18  ;;  %v9026_v11 = vpop.f32.mrb[62].mxu0  ;;  %8019 = vmatmul.mubr.msk.bf16.gmra.mrb[96].mxu1 %vm902_vm2, %v7086_v56  ;;  %v9613_v54 = vld [vmem:[%s15024_s25 + $0x38] sm:$0xff] }
 0x577   :  { %v6728_v25 = vadd.f32 %v9035_v2, %v14284_v53  ;;  %v9037_v31 = vadd.f32 %v9026_v11, %v14225_v0  ;;  %v6679_v27 = vpop.f32.mrb[63].mxu0  ;;  %7202 = vmatprep.mubr.bf16.mxu1 %v15875_v58  ;;  %v16215_v0 = vld [vmem:[#allocation92_spill] sm:$0xff] }
 0x578   :  { %v6726_v59 = vadd.f32 %v9036_v23, %v14284_v53  ;;  %v9038_v16 = vadd.f32 %v6679_v27, %v14227_v60  ;;  %v7289_v60 = vsub.s32 0, %v16215_v0  ;;  %v7293_v9 = vsub.s32 1, %v16215_v0 }
 0x579   :  { %v6729_v33 = vadd.f32 %v9037_v31, %v14284_v53  ;;  %v6744_v12 = vmax.f32 %v6728_v25, 0.0  ;;  %v9614_v25 = vld [vmem:[%s15024_s25 + $0x40] sm:$0xff] }
 0x57a   :  { %v6727_v50 = vadd.f32 %v9038_v16, %v14284_v53  ;;  %v6742_v38 = vmax.f32 %v6726_v59, 0.0  ;;  %v7285_v53 = vld [vmem:[%s14489_s17] sm:$0x3]  ;;  %v9615_v16 = vld [vmem:[%s15024_s25 + $0x48] sm:$0xff] }
 0x57b   :  { %v6745_v18 = vmax.f32 %v6729_v33, 0.0  ;;  %v14328_v30 = vrot.slane %v7285_v53, %v7289_v60  ;;  %v14330_v52 = vrot.slane %v7285_v53, %v7293_v9 }
 0x57c   :  { %v6743_v17 = vmax.f32 %v6727_v50, 0.0 }
 0x57d   :  { %v7091_v51 = vpack.c.bf16 %v6745_v18, %v6744_v12  ;;  %v9616_v18 = vld [vmem:[%s15024_s25 + $0x50] sm:$0xff] }
 0x57e   :  { %v7090_v45 = vpack.c.bf16 %v6743_v17, %v6742_v38  ;;  %8020 = vmatmul.mubr.msk.bf16.gmra.mrb[100].mxu1 %vm902_vm2, %v7087_v39 }
 0x57f   :  { %7212 = vmatprep.mubr.bf16.mxu1 %v15875_v58 }
 0x586   :  { %8021 = vmatmul.mubr.msk.bf16.gmra.mrb[104].mxu1 %vm902_vm2, %v7088_v44 }
 0x587   :  { %7222 = vmatprep.mubr.bf16.mxu1 %v15875_v58 }
 0x58e   :  { %8022 = vmatmul.mubr.msk.bf16.gmra.mrb[108].mxu1 %vm902_vm2, %v7089_v40 }
 0x58f   :  { %7232 = vmatprep.mubr.bf16.mxu1 %v15875_v58 }
 0x596   :  { %8023 = vmatmul.mubr.msk.bf16.gmra.mrb[112].mxu1 %vm902_vm2, %v7090_v45 }
 0x597   :  { %7242 = vmatprep.mubr.bf16.mxu1 %v15875_v58 }
 0x59e   :  { %8024 = vmatmul.mubr.msk.bf16.gmra.mrb[116].mxu1 %vm902_vm2, %v7091_v51  ;;  %v9617_v51 = vld [vmem:[%s15024_s25 + $0x58] sm:$0xff] }
 0x639   :  { %v7174_v36 = vpop.f32.mrb[88].mxu1 }
 0x63a   :  { %v7297_v20 = vadd.f32 %v14328_v30, %v7174_v36  ;;  %v7176_v34 = vpop.f32.mrb[89].mxu1 }
 0x63b   :  { %v7298_v58 = vadd.f32 %v14330_v52, %v7176_v34  ;;  %v7178_v26 = vpop.f32.mrb[90].mxu1 }
 0x63c   :  { %v7329_v32 = vadd.f32 %v9606_v49, %v7297_v20  ;;  %v7299_v8 = vadd.f32 %v14328_v30, %v7178_v26  ;;  %v7180_v4 = vpop.f32.mrb[91].mxu1 }
 0x63d   :  { %v7330_v63 = vadd.f32 %v9607_v61, %v7298_v58  ;;  %v7300_v43 = vadd.f32 %v14330_v52, %v7180_v4  ;;  %v9618_v58 = vld [vmem:[%s15024_s25 + $0x60] sm:$0xff] }
 0x63e   :  { %v7361_v35 = vmax.f32 %v7329_v32, 0.0  ;;  %v7331_v19 = vadd.f32 %v9608_v1, %v7299_v8  ;;  %v9619_v8 = vld [vmem:[%s15024_s25 + $0x68] sm:$0xff] }
 0x63f   :  { %v7362_v10 = vmax.f32 %v7330_v63, 0.0  ;;  %v7332_v29 = vadd.f32 %v9609_v6, %v7300_v43  ;;  %v9620_v43 = vld [vmem:[%s15024_s25 + $0x70] sm:$0xff] }
 0x640   :  { %7393 = vst [vmem:[#allocation2] sm:$0xff] %v7361_v35  ;;  %v7363_v22 = vmax.f32 %v7331_v19, 0.0  ;;  %v9621_v19 = vld [vmem:[%s15024_s25 + $0x78] sm:$0xff] }
 0x641   :  { %7394 = vst [vmem:[#allocation2 + $0x8] sm:$0xff] %v7362_v10  ;;  %v7364_v46 = vmax.f32 %v7332_v29, 0.0  ;;  %v7184_v39 = vpop.f32.mrb[92].mxu1 }
 0x642   :  { %7395 = vst [vmem:[#allocation2 + $0x10] sm:$0xff] %v7363_v22  ;;  %v7301_v56 = vadd.f32 %v14328_v30, %v7184_v39  ;;  %v7186_v7 = vpop.f32.mrb[93].mxu1 }
 0x643   :  { %7396 = vst [vmem:[#allocation2 + $0x18] sm:$0xff] %v7364_v46  ;;  %v7302_v3 = vadd.f32 %v14330_v52, %v7186_v7  ;;  %v7188_v28 = vpop.f32.mrb[94].mxu1 }
 0x644   :  { %v7333_v14 = vadd.f32 %v9610_v37, %v7301_v56  ;;  %v7303_v62 = vadd.f32 %v14328_v30, %v7188_v28  ;;  %v7190_v47 = vpop.f32.mrb[95].mxu1 }
 0x645   :  { %v7334_v55 = vadd.f32 %v9611_v5, %v7302_v3  ;;  %v7304_v15 = vadd.f32 %v14330_v52, %v7190_v47  ;;  %v9622_v3 = vld [vmem:[%s15024_s25 + $0x80] sm:$0xff] }
 0x646   :  { %v7365_v13 = vmax.f32 %v7333_v14, 0.0  ;;  %v7335_v57 = vadd.f32 %v9612_v42, %v7303_v62  ;;  %v9623_v62 = vld [vmem:[%s15024_s25 + $0x88] sm:$0xff] }
 0x647   :  { %v7366_v21 = vmax.f32 %v7334_v55, 0.0  ;;  %v7336_v41 = vadd.f32 %v9613_v54, %v7304_v15  ;;  %v9624_v15 = vld [vmem:[%s15024_s25 + $0x90] sm:$0xff] }
 0x648   :  { %7397 = vst [vmem:[#allocation2 + $0x20] sm:$0xff] %v7365_v13  ;;  %v7367_v48 = vmax.f32 %v7335_v57, 0.0  ;;  %v9625_v57 = vld [vmem:[%s15024_s25 + $0x98] sm:$0xff] }
 0x649   :  { %7398 = vst [vmem:[#allocation2 + $0x28] sm:$0xff] %v7366_v21  ;;  %v7368_v40 = vmax.f32 %v7336_v41, 0.0  ;;  %v7194_v2 = vpop.f32.mrb[96].mxu1 }
 0x64a   :  { %7399 = vst [vmem:[#allocation2 + $0x30] sm:$0xff] %v7367_v48  ;;  %v7305_v24 = vadd.f32 %v14328_v30, %v7194_v2  ;;  %v7196_v44 = vpop.f32.mrb[97].mxu1 }
 0x64b   :  { %7400 = vst [vmem:[#allocation2 + $0x38] sm:$0xff] %v7368_v40  ;;  %v7306_v23 = vadd.f32 %v14330_v52, %v7196_v44  ;;  %v7198_v11 = vpop.f32.mrb[98].mxu1 }
 0x64c   :  { %v7337_v31 = vadd.f32 %v9614_v25, %v7305_v24  ;;  %v7307_v27 = vadd.f32 %v14328_v30, %v7198_v11  ;;  %v7200_v59 = vpop.f32.mrb[99].mxu1 }
 0x64d   :  { %v7338_v33 = vadd.f32 %v9615_v16, %v7306_v23  ;;  %v7308_v50 = vadd.f32 %v14330_v52, %v7200_v59  ;;  %v9626_v23 = vld [vmem:[%s15024_s25 + $0xa0] sm:$0xff] }
 0x64e   :  { %v7369_v12 = vmax.f32 %v7337_v31, 0.0  ;;  %v7339_v38 = vadd.f32 %v9616_v18, %v7307_v27  ;;  %v9627_v27 = vld [vmem:[%s15024_s25 + $0xa8] sm:$0xff] }
 0x64f   :  { %v7370_v17 = vmax.f32 %v7338_v33, 0.0  ;;  %v7340_v45 = vadd.f32 %v9617_v51, %v7308_v50  ;;  %v9628_v50 = vld [vmem:[%s15024_s25 + $0xb0] sm:$0xff] }
 0x650   :  { %7401 = vst [vmem:[#allocation2 + $0x40] sm:$0xff] %v7369_v12  ;;  %v7371_v0 = vmax.f32 %v7339_v38, 0.0  ;;  %v9629_v38 = vld [vmem:[%s15024_s25 + $0xb8] sm:$0xff] }
 0x651   :  { %7402 = vst [vmem:[#allocation2 + $0x48] sm:$0xff] %v7370_v17  ;;  %v7372_v60 = vmax.f32 %v7340_v45, 0.0  ;;  %v7204_v53 = vpop.f32.mrb[100].mxu1 }
 0x652   :  { %7403 = vst [vmem:[#allocation2 + $0x50] sm:$0xff] %v7371_v0  ;;  %v7309_v9 = vadd.f32 %v14328_v30, %v7204_v53  ;;  %v7206_v36 = vpop.f32.mrb[101].mxu1 }
 0x653   :  { %7404 = vst [vmem:[#allocation2 + $0x58] sm:$0xff] %v7372_v60  ;;  %v7310_v20 = vadd.f32 %v14330_v52, %v7206_v36  ;;  %v7208_v34 = vpop.f32.mrb[102].mxu1 }
 0x654   :  { %v7341_v26 = vadd.f32 %v9618_v58, %v7309_v9  ;;  %v7311_v49 = vadd.f32 %v14328_v30, %v7208_v34  ;;  %v7210_v32 = vpop.f32.mrb[103].mxu1 }
 0x655   :  { %v7342_v4 = vadd.f32 %v9619_v8, %v7310_v20  ;;  %v7312_v61 = vadd.f32 %v14330_v52, %v7210_v32  ;;  %v9630_v20 = vld [vmem:[%s15024_s25 + $0xc0] sm:$0xff] }
 0x656   :  { %v7373_v63 = vmax.f32 %v7341_v26, 0.0  ;;  %v7343_v35 = vadd.f32 %v9620_v43, %v7311_v49  ;;  %v9631_v49 = vld [vmem:[%s15024_s25 + $0xc8] sm:$0xff] }
 0x657   :  { %v7374_v1 = vmax.f32 %v7342_v4, 0.0  ;;  %v7344_v10 = vadd.f32 %v9621_v19, %v7312_v61  ;;  %v9632_v61 = vld [vmem:[%s15024_s25 + $0xd0] sm:$0xff] }
 0x658   :  { %7405 = vst [vmem:[#allocation2 + $0x60] sm:$0xff] %v7373_v63  ;;  %v7375_v6 = vmax.f32 %v7343_v35, 0.0  ;;  %v9633_v35 = vld [vmem:[%s15024_s25 + $0xd8] sm:$0xff] }
 0x659   :  { %7406 = vst [vmem:[#allocation2 + $0x68] sm:$0xff] %v7374_v1  ;;  %v7376_v29 = vmax.f32 %v7344_v10, 0.0  ;;  %v7214_v22 = vpop.f32.mrb[104].mxu1 }
 0x65a   :  { %7407 = vst [vmem:[#allocation2 + $0x70] sm:$0xff] %v7375_v6  ;;  %v7313_v46 = vadd.f32 %v14328_v30, %v7214_v22  ;;  %v7216_v39 = vpop.f32.mrb[105].mxu1 }
 0x65b   :  { %7408 = vst [vmem:[#allocation2 + $0x78] sm:$0xff] %v7376_v29  ;;  %v7314_v56 = vadd.f32 %v14330_v52, %v7216_v39  ;;  %v7218_v7 = vpop.f32.mrb[106].mxu1 }
 0x65c   :  { %v7345_v28 = vadd.f32 %v9622_v3, %v7313_v46  ;;  %v7315_v37 = vadd.f32 %v14328_v30, %v7218_v7  ;;  %v7220_v14 = vpop.f32.mrb[107].mxu1 }
 0x65d   :  { %v7346_v47 = vadd.f32 %v9623_v62, %v7314_v56  ;;  %v7316_v5 = vadd.f32 %v14330_v52, %v7220_v14  ;;  %v9634_v56 = vld [vmem:[%s15024_s25 + $0xe0] sm:$0xff] }
 0x65e   :  { %v7377_v55 = vmax.f32 %v7345_v28, 0.0  ;;  %v7347_v13 = vadd.f32 %v9624_v15, %v7315_v37  ;;  %v9635_v37 = vld [vmem:[%s15024_s25 + $0xe8] sm:$0xff] }
 0x65f   :  { %v7378_v42 = vmax.f32 %v7346_v47, 0.0  ;;  %v7348_v21 = vadd.f32 %v9625_v57, %v7316_v5  ;;  %v9636_v5 = vld [vmem:[%s15024_s25 + $0xf0] sm:$0xff] }
 0x660   :  { %7409 = vst [vmem:[#allocation2 + $0x80] sm:$0xff] %v7377_v55  ;;  %v7379_v54 = vmax.f32 %v7347_v13, 0.0 }
 0x661   :  { %7410 = vst [vmem:[#allocation2 + $0x88] sm:$0xff] %v7378_v42  ;;  %v7380_v41 = vmax.f32 %v7348_v21, 0.0  ;;  %v7224_v48 = vpop.f32.mrb[108].mxu1 }
 0x662   :  { %7411 = vst [vmem:[#allocation2 + $0x90] sm:$0xff] %v7379_v54  ;;  %v7317_v40 = vadd.f32 %v14328_v30, %v7224_v48  ;;  %v7226_v2 = vpop.f32.mrb[109].mxu1 }
 0x663   :  { %7412 = vst [vmem:[#allocation2 + $0x98] sm:$0xff] %v7380_v41  ;;  %v7318_v24 = vadd.f32 %v14330_v52, %v7226_v2  ;;  %v7228_v44 = vpop.f32.mrb[110].mxu1 }
 0x664   :  { %v7349_v11 = vadd.f32 %v9626_v23, %v7317_v40  ;;  %v7319_v25 = vadd.f32 %v14328_v30, %v7228_v44  ;;  %v7230_v31 = vpop.f32.mrb[111].mxu1 }
 0x665   :  { %v7350_v59 = vadd.f32 %v9627_v27, %v7318_v24  ;;  %v7320_v16 = vadd.f32 %v14330_v52, %v7230_v31 }
 0x666   :  { %v7381_v33 = vmax.f32 %v7349_v11, 0.0  ;;  %v7351_v12 = vadd.f32 %v9628_v50, %v7319_v25 }
 0x667   :  { %v7382_v18 = vmax.f32 %v7350_v59, 0.0  ;;  %v7352_v17 = vadd.f32 %v9629_v38, %v7320_v16 }
 0x668   :  { %7413 = vst [vmem:[#allocation2 + $0xa0] sm:$0xff] %v7381_v33  ;;  %v7383_v51 = vmax.f32 %v7351_v12, 0.0 }
 0x669   :  { %7414 = vst [vmem:[#allocation2 + $0xa8] sm:$0xff] %v7382_v18  ;;  %v7384_v45 = vmax.f32 %v7352_v17, 0.0  ;;  %v7234_v0 = vpop.f32.mrb[112].mxu1 }
 0x66a   :  { %7415 = vst [vmem:[#allocation2 + $0xb0] sm:$0xff] %v7383_v51  ;;  %v7321_v60 = vadd.f32 %v14328_v30, %v7234_v0  ;;  %v7236_v53 = vpop.f32.mrb[113].mxu1 }
 0x66b   :  { %7416 = vst [vmem:[#allocation2 + $0xb8] sm:$0xff] %v7384_v45  ;;  %v7322_v9 = vadd.f32 %v14330_v52, %v7236_v53  ;;  %v7238_v36 = vpop.f32.mrb[114].mxu1 }
 0x66c   :  { %v7353_v34 = vadd.f32 %v9630_v20, %v7321_v60  ;;  %v7323_v58 = vadd.f32 %v14328_v30, %v7238_v36  ;;  %v7240_v26 = vpop.f32.mrb[115].mxu1 }
 0x66d   :  { %v7354_v32 = vadd.f32 %v9631_v49, %v7322_v9  ;;  %v7324_v8 = vadd.f32 %v14330_v52, %v7240_v26 }
 0x66e   :  { %v7385_v4 = vmax.f32 %v7353_v34, 0.0  ;;  %v7355_v63 = vadd.f32 %v9632_v61, %v7323_v58 }
 0x66f   :  { %v7386_v43 = vmax.f32 %v7354_v32, 0.0  ;;  %v7356_v1 = vadd.f32 %v9633_v35, %v7324_v8 }
 0x670   :  { %7417 = vst [vmem:[#allocation2 + $0xc0] sm:$0xff] %v7385_v4  ;;  %v7387_v19 = vmax.f32 %v7355_v63, 0.0 }
 0x671   :  { %7418 = vst [vmem:[#allocation2 + $0xc8] sm:$0xff] %v7386_v43  ;;  %v7388_v10 = vmax.f32 %v7356_v1, 0.0  ;;  %v7244_v6 = vpop.f32.mrb[116].mxu1 }
 0x672   :  { %7419 = vst [vmem:[#allocation2 + $0xd0] sm:$0xff] %v7387_v19  ;;  %v7325_v29 = vadd.f32 %v14328_v30, %v7244_v6  ;;  %v7246_v22 = vpop.f32.mrb[117].mxu1 }
 0x673   :  { %7420 = vst [vmem:[#allocation2 + $0xd8] sm:$0xff] %v7388_v10  ;;  %v7326_v46 = vadd.f32 %v14330_v52, %v7246_v22  ;;  %v7248_v39 = vpop.f32.mrb[118].mxu1 }
 0x674   :  { %v7357_v7 = vadd.f32 %v9634_v56, %v7325_v29  ;;  %v7327_v3 = vadd.f32 %v14328_v30, %v7248_v39  ;;  %v7250_v28 = vpop.f32.mrb[119].mxu1  ;;  %v9637_v30 = vld [vmem:[%s15024_s25 + $0xf8] sm:$0xff] }
 0x675   :  { %v7358_v14 = vadd.f32 %v9635_v37, %v7326_v46  ;;  %v7328_v62 = vadd.f32 %v14330_v52, %v7250_v28 }
 0x676   :  { %v7389_v47 = vmax.f32 %v7357_v7, 0.0  ;;  %v7359_v55 = vadd.f32 %v9636_v5, %v7327_v3 }
 0x677   :  { %v7390_v15 = vmax.f32 %v7358_v14, 0.0  ;;  %v7360_v13 = vadd.f32 %v9637_v30, %v7328_v62 }
 0x678   :  { %7421 = vst [vmem:[#allocation2 + $0xe0] sm:$0xff] %v7389_v47  ;;  %v7391_v42 = vmax.f32 %v7359_v55, 0.0 }
 0x679   :  { %7422 = vst [vmem:[#allocation2 + $0xe8] sm:$0xff] %v7390_v15  ;;  %v7392_v57 = vmax.f32 %v7360_v13, 0.0 }
 0x67a   :  { %7423 = vst [vmem:[#allocation2 + $0xf0] sm:$0xff] %v7391_v42 }
 0x67b   :  { %7424 = vst [vmem:[#allocation2 + $0xf8] sm:$0xff] %v7392_v57 }
 0x67c   :  { %9649 = shalt.err (!%p9646_p4)
}
 0x67d   :  { %s9650_s4 = scalar_lea.hbm %s14490_s18, 4096 }
 0x67e   :  { %p9651_p5 = scmp.ne.s32.totalorder %s14490_s18, %s9650_s4  ;;  %p9654_p6 = scmp.lt.u32.totalorder %s9650_s4, %s14490_s18 }
 0x680   :  { %p9656_p7 = pnand %p9654_p6, %p9651_p5 }
 0x682   :  { %9659 = shalt.err (!%p9656_p7)
}
 0x683   :  { %s9664_s2 = smov 256   ;;  %s9665_s14 = smov 16  }
 0x684   :  { %7436 = dma.vmem_to_hbm [thread:$0]  %s7431_s0, 4096, %s14490_s18, [#allocation3], %s9664_s2, %s9664_s2, %s9665_s14  }
 0x685   :  { %9660 = dma.done.wait [#allocation3], 4096  }
 0x686   :  { %9661 = vsyncadd [#allocation3], 4294963200 }
 0x687   :  { %7440 = vsyncpa [#allocation3], 1 }

</bundles_post_ra>
